<compile_context>
chip_gen: v6e
topology: v6e:2x2x1
jax: 0.10.0
libtpu: 0.0.40
codegen_flags: <defaults>
</compile_context>

<pallas_src>
import math
import functools

import jax
import jax.numpy as jnp
from jax.experimental import pallas as pl
from jax.experimental.pallas import tpu as pltpu

_SQRT1_2 = 0.7071067811865476
_BN_EPS = 1e-5


# ----------------------------------------------------------------------------
# In-kernel math helpers (all in f32)
# ----------------------------------------------------------------------------
def _erf_approx(x):
    # Abramowitz & Stegun 7.1.26 (max abs err ~1.5e-7) — exp/mul/add/where only.
    ax = jnp.abs(x)
    t = 1.0 / (1.0 + 0.3275911 * ax)
    poly = ((((1.061405429 * t - 1.453152027) * t + 1.421413741) * t
             - 0.284496736) * t + 0.254829592) * t
    y = 1.0 - poly * jnp.exp(-ax * ax)
    return jnp.where(x < 0, -y, y)


def _gelu_exact(x):
    return 0.5 * x * (1.0 + _erf_approx(x * _SQRT1_2))


def _apply_act(y, act):
    if act is None:
        return y
    if act == "gelu":
        return _gelu_exact(y)
    raise ValueError(act)


# ----------------------------------------------------------------------------
# Row tiling: big tiles, >=2 grid steps when possible (v7x megacore)
# ----------------------------------------------------------------------------
_TM_TARGET = 512
_ROW_ALIGN = 16          # bf16-friendly sublane packing


def _row_tiling(M):
    Mpad = -(-M // _ROW_ALIGN) * _ROW_ALIGN
    if Mpad >= 2 * _TM_TARGET:
        Mpad = -(-Mpad // _TM_TARGET) * _TM_TARGET
        return Mpad, _TM_TARGET
    if Mpad >= 2 * _ROW_ALIGN and (Mpad // 2) % _ROW_ALIGN == 0:
        return Mpad, Mpad // 2
    return Mpad, Mpad


def _pad_rows(a, Mpad, axis):
    M = a.shape[axis]
    if M == Mpad:
        return a
    widths = [(0, 0)] * a.ndim
    widths[axis] = (0, Mpad - M)
    return jnp.pad(a, widths)


# ----------------------------------------------------------------------------
# Pallas kernels
# ----------------------------------------------------------------------------
def _dense_kernel(*refs, act1, has_c2, has_res):
    """y = act1(x @ W1 + s1) [; y = y @ W2 + s2] [; y += res]  (f32 epilogue)."""
    it = iter(refs)
    x_ref, w1_ref, s1_ref = next(it), next(it), next(it)
    w2_ref = s2_ref = res_ref = None
    if has_c2:
        w2_ref, s2_ref = next(it), next(it)
    if has_res:
        res_ref = next(it)
    out_ref = next(it)

    y = jnp.dot(x_ref[...], w1_ref[...], preferred_element_type=jnp.float32)
    y = y + s1_ref[...]
    y = _apply_act(y, act1)
    if has_c2:
        y = jnp.dot(y.astype(jnp.bfloat16), w2_ref[...],
                    preferred_element_type=jnp.float32) + s2_ref[...]
    if has_res:
        y = y + res_ref[...].astype(jnp.float32)
    out_ref[...] = y.astype(out_ref.dtype)


def _dw_kernel(*refs, act1, has_point, has_res, kk):
    """Depthwise: unrolled sum_k p[k]*w[k]; optional fused 1x1 point conv + res."""
    it = iter(refs)
    p_ref, w_ref, s1_ref = next(it), next(it), next(it)
    w2_ref = s2_ref = res_ref = None
    if has_point:
        w2_ref, s2_ref = next(it), next(it)
    if has_res:
        res_ref = next(it)
    out_ref = next(it)

    acc = p_ref[0].astype(jnp.float32) * w_ref[0].astype(jnp.float32)
    for k in range(1, kk):
        acc = acc + p_ref[k].astype(jnp.float32) * w_ref[k].astype(jnp.float32)
    y = acc + s1_ref[...]
    y = _apply_act(y, act1)
    if has_point:
        y = jnp.dot(y.astype(jnp.bfloat16), w2_ref[...],
                    preferred_element_type=jnp.float32) + s2_ref[...]
    if has_res:
        y = y + res_ref[...].astype(jnp.float32)
    out_ref[...] = y.astype(out_ref.dtype)


_COMPILER_PARAMS = pltpu.CompilerParams(dimension_semantics=("parallel",))


def _dense_call(x2d, w1, s1, act1, w2=None, s2=None, residual=None):
    """Row-tiled fused (conv [+ conv] [+ res]) matmul kernel."""
    M, K = x2d.shape
    C1 = w1.shape[1]
    Cout = w2.shape[1] if w2 is not None else C1
    Mpad, TM = _row_tiling(M)

    x2d = _pad_rows(x2d, Mpad, 0)
    args = [x2d, w1, s1]
    in_specs = [
        pl.BlockSpec((TM, K), lambda i: (i, 0)),
        pl.BlockSpec((K, C1), lambda i: (0, 0)),
        pl.BlockSpec((1, C1), lambda i: (0, 0)),
    ]
    has_c2 = w2 is not None
    if has_c2:
        args += [w2, s2]
        in_specs += [pl.BlockSpec((C1, Cout), lambda i: (0, 0)),
                     pl.BlockSpec((1, Cout), lambda i: (0, 0))]
    has_res = residual is not None
    if has_res:
        args.append(_pad_rows(residual, Mpad, 0))
        in_specs.append(pl.BlockSpec((TM, Cout), lambda i: (i, 0)))

    kernel = functools.partial(_dense_kernel, act1=act1, has_c2=has_c2,
                               has_res=has_res)
    out = pl.pallas_call(
        kernel,
        out_shape=jax.ShapeDtypeStruct((Mpad, Cout), jnp.bfloat16),
        grid=(Mpad // TM,),
        in_specs=in_specs,
        out_specs=pl.BlockSpec((TM, Cout), lambda i: (i, 0)),
        compiler_params=_COMPILER_PARAMS,
    )(*args)
    return out if Mpad == M else out[:M]


def _dw_call(pdw, wdw, s1, act1, w2=None, s2=None, residual=None):
    """Row-tiled fused (depthwise conv [+ point conv] [+ res]) kernel.

    pdw: (KK, M, C) bf16 patches; wdw: (KK, 1, C) bf16 scale-folded weights.
    """
    KK, M, C = pdw.shape
    Cout = w2.shape[1] if w2 is not None else C
    Mpad, TM = _row_tiling(M)

    pdw = _pad_rows(pdw, Mpad, 1)
    args = [pdw, wdw, s1]
    in_specs = [
        pl.BlockSpec((KK, TM, C), lambda i: (0, i, 0)),
        pl.BlockSpec((KK, 1, C), lambda i: (0, 0, 0)),
        pl.BlockSpec((1, C), lambda i: (0, 0)),
    ]
    has_point = w2 is not None
    if has_point:
        args += [w2, s2]
        in_specs += [pl.BlockSpec((C, Cout), lambda i: (0, 0)),
                     pl.BlockSpec((1, Cout), lambda i: (0, 0))]
    has_res = residual is not None
    if has_res:
        args.append(_pad_rows(residual, Mpad, 0))
        in_specs.append(pl.BlockSpec((TM, Cout), lambda i: (i, 0)))

    kernel = functools.partial(_dw_kernel, act1=act1, has_point=has_point,
                               has_res=has_res, kk=KK)
    out = pl.pallas_call(
        kernel,
        out_shape=jax.ShapeDtypeStruct((Mpad, Cout), jnp.bfloat16),
        grid=(Mpad // TM,),
        in_specs=in_specs,
        out_specs=pl.BlockSpec((TM, Cout), lambda i: (i, 0)),
        compiler_params=_COMPILER_PARAMS,
    )(*args)
    return out if Mpad == M else out[:M]


# ----------------------------------------------------------------------------
# JAX glue: im2col taps + conv dispatch
# ----------------------------------------------------------------------------
def _im2col_taps(x, k, stride):
    """x: (N,H,W,C) -> list of k*k shifted views, 'same' padding (pad = k//2)."""
    pad = k // 2
    xp = jnp.pad(x, ((0, 0), (pad, pad), (pad, pad), (0, 0)))
    H, W = x.shape[1], x.shape[2]
    Ho = (H + 2 * pad - k) // stride + 1
    Wo = (W + 2 * pad - k) // stride + 1
    taps = [xp[:, di:di + stride * (Ho - 1) + 1:stride,
               dj:dj + stride * (Wo - 1) + 1:stride, :]
            for di in range(k) for dj in range(k)]
    return taps, Ho, Wo


def _dense_conv(x, w2d, shift, *, k, stride, act, residual=None):
    """Single ConvLayer: Conv2d(pad=k//2) -> folded BN -> act [+ residual]."""
    N, H, W, Cin = x.shape
    if k == 1 and stride == 1:
        x2d = x.reshape(N * H * W, Cin)
        Ho, Wo = H, W
    else:
        taps, Ho, Wo = _im2col_taps(x, k, stride)
        x2d = jnp.stack(taps, axis=3).reshape(N * Ho * Wo, k * k * Cin)
    Cout = w2d.shape[1]
    res2d = None if residual is None else residual.reshape(N * Ho * Wo, Cout)
    y2d = _dense_call(x2d, w2d, shift, act, residual=res2d)
    return y2d.reshape(N, Ho, Wo, Cout)


# ----------------------------------------------------------------------------
# Deterministic parameter init + host-side BN/scale folding into weights
# ----------------------------------------------------------------------------
class _KeyGen:
    def __init__(self, key):
        self._key = key
        self._i = 0

    def __call__(self):
        self._i += 1
        return jax.random.fold_in(self._key, self._i)


def init_conv(key, cin_per_group, cout, k, use_bias, use_norm):
    kw, kb, kg, kbt, km, kv = jax.random.split(key, 6)
    fan_in = cin_per_group * k * k
    w = jax.random.normal(kw, (cout, cin_per_group, k, k), jnp.float32) / math.sqrt(fan_in)
    bias = (0.1 * jax.random.normal(kb, (cout,), jnp.float32)) if use_bias \
        else jnp.zeros((cout,), jnp.float32)
    if use_norm:
        gamma = 1.0 + 0.1 * jax.random.normal(kg, (cout,), jnp.float32)
        beta = 0.1 * jax.random.normal(kbt, (cout,), jnp.float32)
        mean = 0.1 * jax.random.normal(km, (cout,), jnp.float32)
        var = 1.0 + 0.1 * jnp.abs(jax.random.normal(kv, (cout,), jnp.float32))
        scale = gamma / jnp.sqrt(var + _BN_EPS)
        shift = scale * (bias - mean) + beta
    else:
        scale = jnp.ones((cout,), jnp.float32)
        shift = bias
    return {"w": w, "scale": scale, "shift": shift}


def _prep_dense(p, k):
    """OIHW conv weight -> (k*k*Cin, Cout) bf16 with BN scale folded; shift f32."""
    cout, cin = p["w"].shape[0], p["w"].shape[1]
    w2d = jnp.transpose(p["w"], (2, 3, 1, 0)).reshape(k * k * cin, cout)
    w2d = (w2d * p["scale"][None, :]).astype(jnp.bfloat16)
    shift = p["shift"].reshape(1, cout).astype(jnp.float32)
    return w2d, shift


def _prep_dw(p, k):
    """Depthwise (C,1,k,k) -> (k*k, 1, C) bf16 with BN scale folded; shift f32."""
    c = p["w"].shape[0]
    wdw = jnp.transpose(p["w"][:, 0, :, :], (1, 2, 0)).reshape(k * k, 1, c)
    wdw = (wdw * p["scale"][None, None, :]).astype(jnp.bfloat16)
    shift = p["shift"].reshape(1, c).astype(jnp.float32)
    return wdw, shift


# ----------------------------------------------------------------------------
# Backbone construction — mirrors ETPCascadedBackbone.__init__ / build_local_block
# ----------------------------------------------------------------------------
def _make_local_block(kg, name, cin, cout, stride, expand, fewer_norm, residual):
    if name == "res":
        mid = round(cin * expand)
        b = (True, False) if fewer_norm else (False, False)
        n = (False, True) if fewer_norm else (True, True)
        w1, s1 = _prep_dense(init_conv(kg(), cin, mid, 3, b[0], n[0]), 3)
        w2, s2 = _prep_dense(init_conv(kg(), mid, cout, 3, b[1], n[1]), 3)
        return {"type": "res", "stride": stride, "residual": residual,
                "w1": w1, "s1": s1, "w2": w2, "s2": s2}
    if name == "fmb":
        mid = round(cin * expand)
        b = (True, False) if fewer_norm else (False, False)
        n = (False, True) if fewer_norm else (True, True)
        ws, ss = _prep_dense(init_conv(kg(), cin, mid, 3, b[0], n[0]), 3)
        wp, sp = _prep_dense(init_conv(kg(), mid, cout, 1, b[1], n[1]), 1)
        return {"type": "fmb", "stride": stride, "residual": residual,
                "ws": ws, "ss": ss, "wp": wp, "sp": sp}
    if name == "mb":
        mid = round(cin * expand)
        b = (True, True, False) if fewer_norm else (False, False, False)
        n = (False, False, True) if fewer_norm else (True, True, True)
        wi, si = _prep_dense(init_conv(kg(), cin, mid, 1, b[0], n[0]), 1)
        wd, sd = _prep_dw(init_conv(kg(), 1, mid, 3, b[1], n[1]), 3)
        wp, sp = _prep_dense(init_conv(kg(), mid, cout, 1, b[2], n[2]), 1)
        return {"type": "mb", "stride": stride, "residual": residual,
                "wi": wi, "si": si, "wd": wd, "sd": sd, "wp": wp, "sp": sp}
    raise ValueError(name)


def build_backbone(key, width_list, depth_list, block_list=None, expand_list=None,
                   fewer_norm_list=None, param_discount=False, input_resolution=3000):
    kg = _KeyGen(key)
    block_list = block_list or ["res", "fmb", "fmb", "mb", "att"]
    if input_resolution <= 1500:
        expand_list = expand_list or [1, 4, 4, 4, 6]
    else:
        expand_list = expand_list or [1, 2, 2, 4, 4]
    if param_discount:
        expand_list = [1, 2, 4, 4, 6]
    fewer_norm_list = fewer_norm_list or [False, False, False, True, True]

    stages = []
    # stage 0: input stem conv + depth_list[0] residual 'res' blocks
    w_stem, s_stem = _prep_dense(init_conv(kg(), 3, width_list[0], 3, False, True), 3)
    stage0 = [{"type": "conv", "k": 3, "stride": 2, "w": w_stem, "s": s_stem}]
    for _ in range(depth_list[0]):
        stage0.append(_make_local_block(kg, block_list[0], width_list[0], width_list[0],
                                        1, expand_list[0], fewer_norm_list[0], residual=True))
    stages.append(stage0)
    in_ch = width_list[0]

    for stage_id, (w, d) in enumerate(zip(width_list[1:], depth_list[1:]), start=1):
        stage = []
        if input_resolution <= 1500:
            er = expand_list[stage_id] * 4
        else:
            er = expand_list[stage_id] * 2
        if param_discount:
            er = expand_list[stage_id]
        ds_name = "mb" if block_list[stage_id] not in ["mb", "fmb"] else block_list[stage_id]
        stage.append(_make_local_block(kg, ds_name, in_ch, w, 2, er,
                                       fewer_norm_list[stage_id], residual=False))
        in_ch = w
        for _ in range(d):
            if block_list[stage_id].startswith("att"):
                # TODO(synk): ETPCascadedBlock source not provided; 'att' stage unsupported.
                raise NotImplementedError("ETPCascadedBlock ('att') is not provided")
            stage.append(_make_local_block(kg, block_list[stage_id], in_ch, in_ch, 1,
                                           expand_list[stage_id], fewer_norm_list[stage_id],
                                           residual=True))
        stages.append(stage)
    return stages


# ----------------------------------------------------------------------------
# Forward pass (bf16 activations between kernels; fused per-block kernels)
# ----------------------------------------------------------------------------
def _run_block(x, blk):
    t = blk["type"]
    if t == "conv":
        return _dense_conv(x, blk["w"], blk["s"], k=blk["k"], stride=blk["stride"],
                           act="gelu")
    if t == "res":
        h = _dense_conv(x, blk["w1"], blk["s1"], k=3, stride=blk["stride"], act="gelu")
        res = x if blk["residual"] else None
        return _dense_conv(h, blk["w2"], blk["s2"], k=3, stride=1, act=None, residual=res)
    if t == "fmb":
        # Fused: 3x3 spatial conv -> GELU -> 1x1 point conv (+residual) in ONE kernel.
        N, H, W, Cin = x.shape
        taps, Ho, Wo = _im2col_taps(x, 3, blk["stride"])
        x2d = jnp.stack(taps, axis=3).reshape(N * Ho * Wo, 9 * Cin)
        Cout = blk["wp"].shape[1]
        res2d = x.reshape(-1, Cout) if blk["residual"] else None
        y2d = _dense_call(x2d, blk["ws"], blk["ss"], "gelu",
                          w2=blk["wp"], s2=blk["sp"], residual=res2d)
        return y2d.reshape(N, Ho, Wo, Cout)
    if t == "mb":
        # 1x1 inverted conv kernel, then fused [dw3x3 -> GELU -> 1x1 point (+res)] kernel.
        N, H, W, Cin = x.shape
        h = _dense_conv(x, blk["wi"], blk["si"], k=1, stride=1, act="gelu")
        mid = h.shape[-1]
        taps, Ho, Wo = _im2col_taps(h, 3, blk["stride"])
        pdw = jnp.stack(taps, axis=0).reshape(9, N * Ho * Wo, mid)
        Cout = blk["wp"].shape[1]
        res2d = x.reshape(-1, Cout) if blk["residual"] else None
        y2d = _dw_call(pdw, blk["wd"], blk["sd"], "gelu",
                       w2=blk["wp"], s2=blk["sp"], residual=res2d)
        return y2d.reshape(N, Ho, Wo, Cout)
    raise ValueError(t)


def backbone_forward(stages, x_nchw):
    out = {"input": x_nchw}
    x = jnp.transpose(x_nchw, (0, 2, 3, 1)).astype(jnp.bfloat16)   # NCHW -> NHWC bf16
    for sid, stage in enumerate(stages):
        for blk in stage:
            x = _run_block(x, blk)
        out["stage%d" % sid] = jnp.transpose(x, (0, 3, 1, 2)).astype(jnp.float32)
    out["stage_final"] = out["stage%d" % (len(stages) - 1)]
    return out


# ----------------------------------------------------------------------------
# Main
# ----------------------------------------------------------------------------
if __name__ == "__main__":
    key = jax.random.PRNGKey(0)
    k_params, k_input = jax.random.split(key)

    # Small config: stages ['res', 'fmb', 'fmb', 'mb'] (attention stage omitted — see TODO).
    width_list = [8, 16, 24, 32]
    depth_list = [1, 1, 1, 1]
    stages = build_backbone(k_params, width_list, depth_list, input_resolution=3000)

    x = jax.random.normal(k_input, (2, 3, 32, 32), jnp.float32)    # NCHW, like PyTorch

    # The entire forward (Pallas kernels + im2col/transpose glue) under one jit.
    forward = jax.jit(functools.partial(backbone_forward, stages))
    outputs = forward(x)
    jax.block_until_ready(outputs)

    # Sanity: expected pyramid shapes
    assert outputs["stage0"].shape == (2, 8, 16, 16)
    assert outputs["stage1"].shape == (2, 16, 8, 8)
    assert outputs["stage2"].shape == (2, 24, 4, 4)
    assert outputs["stage3"].shape == (2, 32, 2, 2)
    assert outputs["stage_final"].shape == (2, 32, 2, 2)

    print("KERNEL_OK")
</pallas_src>

<mosaic_0001>
module attributes {stable_mosaic.version = 11 : i64} {
  func.func @_dense_kernel(%arg0: i32, %arg1: memref<256x27xbf16, #tpu.memory_space<vmem>>, %arg2: memref<27x8xbf16, #tpu.memory_space<vmem>>, %arg3: memref<1x8xf32, #tpu.memory_space<vmem>>, %arg4: memref<256x8xbf16, #tpu.memory_space<vmem>>) attributes {dimension_semantics = [#tpu.dimension_semantics<parallel>], iteration_bounds = array<i64: 2>, scalar_prefetch = 0 : i64, scratch_operands = 0 : i64, tpu.core_type = #tpu.core_type<tc>, window_params = [{transform_indices = @transform_0, window_bounds = array<i64: 256, 27>}, {pipeline_mode = #tpu.pipeline_mode<synchronous>, transform_indices = @transform_1, window_bounds = array<i64: 27, 8>}, {pipeline_mode = #tpu.pipeline_mode<synchronous>, transform_indices = @transform_2, window_bounds = array<i64: 1, 8>}, {transform_indices = @transform_3, window_bounds = array<i64: 256, 8>}]} {
    %c0 = arith.constant 0 : index
    %c0_0 = arith.constant 0 : index
    %0 = vector.load %arg1[%c0, %c0_0] : memref<256x27xbf16, #tpu.memory_space<vmem>>, vector<256x27xbf16>
    %c0_1 = arith.constant 0 : index
    %c0_2 = arith.constant 0 : index
    %1 = vector.load %arg2[%c0_1, %c0_2] : memref<27x8xbf16, #tpu.memory_space<vmem>>, vector<27x8xbf16>
    %cst = arith.constant dense<0.000000e+00> : vector<256x8xf32>
    %2 = tpu.matmul %0, %1, %cst {dimension_numbers = #tpu.dot_dimension_numbers<[1], [0], [0], [1], [0, 0, 1, 1], [], []>} : vector<256x27xbf16>, vector<27x8xbf16>, vector<256x8xf32> -> vector<256x8xf32>
    %c0_3 = arith.constant 0 : index
    %c0_4 = arith.constant 0 : index
    %3 = vector.load %arg3[%c0_3, %c0_4] : memref<1x8xf32, #tpu.memory_space<vmem>>, vector<1x8xf32>
    %4 = vector.broadcast %3 : vector<1x8xf32> to vector<256x8xf32>
    %5 = arith.addf %2, %4 : vector<256x8xf32>
    %cst_5 = arith.constant 5.000000e-01 : f32
    %6 = vector.broadcast %cst_5 : f32 to vector<256x8xf32>
    %7 = arith.mulf %6, %5 : vector<256x8xf32>
    %cst_6 = arith.constant 0.707106769 : f32
    %8 = vector.broadcast %cst_6 : f32 to vector<256x8xf32>
    %9 = arith.mulf %5, %8 : vector<256x8xf32>
    %10 = math.absf %9 : vector<256x8xf32>
    %cst_7 = arith.constant 0.327591091 : f32
    %11 = vector.broadcast %cst_7 : f32 to vector<256x8xf32>
    %12 = arith.mulf %11, %10 : vector<256x8xf32>
    %cst_8 = arith.constant 1.000000e+00 : f32
    %13 = vector.broadcast %cst_8 : f32 to vector<256x8xf32>
    %14 = arith.addf %13, %12 : vector<256x8xf32>
    %cst_9 = arith.constant 1.000000e+00 : f32
    %15 = vector.broadcast %cst_9 : f32 to vector<256x8xf32>
    %16 = arith.divf %15, %14 : vector<256x8xf32>
    %cst_10 = arith.constant 1.06140542 : f32
    %17 = vector.broadcast %cst_10 : f32 to vector<256x8xf32>
    %18 = arith.mulf %17, %16 : vector<256x8xf32>
    %cst_11 = arith.constant 1.45315206 : f32
    %19 = vector.broadcast %cst_11 : f32 to vector<256x8xf32>
    %20 = arith.subf %18, %19 : vector<256x8xf32>
    %21 = arith.mulf %20, %16 : vector<256x8xf32>
    %cst_12 = arith.constant 1.42141378 : f32
    %22 = vector.broadcast %cst_12 : f32 to vector<256x8xf32>
    %23 = arith.addf %21, %22 : vector<256x8xf32>
    %24 = arith.mulf %23, %16 : vector<256x8xf32>
    %cst_13 = arith.constant 0.284496725 : f32
    %25 = vector.broadcast %cst_13 : f32 to vector<256x8xf32>
    %26 = arith.subf %24, %25 : vector<256x8xf32>
    %27 = arith.mulf %26, %16 : vector<256x8xf32>
    %cst_14 = arith.constant 0.254829586 : f32
    %28 = vector.broadcast %cst_14 : f32 to vector<256x8xf32>
    %29 = arith.addf %27, %28 : vector<256x8xf32>
    %30 = arith.mulf %29, %16 : vector<256x8xf32>
    %cst_15 = arith.constant 0.000000e+00 : f32
    %31 = vector.broadcast %cst_15 : f32 to vector<256x8xf32>
    %32 = arith.subf %31, %10 : vector<256x8xf32>
    %33 = arith.mulf %32, %10 : vector<256x8xf32>
    %34 = math.exp %33 : vector<256x8xf32>
    %35 = arith.mulf %30, %34 : vector<256x8xf32>
    %cst_16 = arith.constant 1.000000e+00 : f32
    %36 = vector.broadcast %cst_16 : f32 to vector<256x8xf32>
    %37 = arith.subf %36, %35 : vector<256x8xf32>
    %cst_17 = arith.constant 0.000000e+00 : f32
    %38 = vector.broadcast %cst_17 : f32 to vector<256x8xf32>
    %39 = arith.cmpf olt, %9, %38 : vector<256x8xf32>
    %cst_18 = arith.constant 0.000000e+00 : f32
    %40 = vector.broadcast %cst_18 : f32 to vector<256x8xf32>
    %41 = arith.subf %40, %37 : vector<256x8xf32>
    %42 = arith.select %39, %41, %37 : vector<256x8xi1>, vector<256x8xf32>
    %cst_19 = arith.constant 1.000000e+00 : f32
    %43 = vector.broadcast %cst_19 : f32 to vector<256x8xf32>
    %44 = arith.addf %43, %42 : vector<256x8xf32>
    %45 = arith.mulf %7, %44 : vector<256x8xf32>
    %46 = arith.truncf %45 : vector<256x8xf32> to vector<256x8xbf16>
    %c0_20 = arith.constant 0 : index
    %c0_21 = arith.constant 0 : index
    %47 = vector.load %arg4[%c0_20, %c0_21] : memref<256x8xbf16, #tpu.memory_space<vmem>>, vector<256x8xbf16>
    tpu.vector_store %arg4[%c0_20, %c0_21], %46 {strides = array<i32>} : memref<256x8xbf16, #tpu.memory_space<vmem>>, vector<256x8xbf16>,
    return
  }
  func.func @transform_0(%arg0: i32) -> (i32, i32) {
    %c0_i32 = arith.constant 0 : i32
    %c0_i32_0 = arith.constant 0 : i32
    return %arg0, %c0_i32 : i32, i32
  }
  func.func @transform_1(%arg0: i32) -> (i32, i32) {
    %c0_i32 = arith.constant 0 : i32
    %c0_i32_0 = arith.constant 0 : i32
    %c0_i32_1 = arith.constant 0 : i32
    return %c0_i32, %c0_i32_0 : i32, i32
  }
  func.func @transform_2(%arg0: i32) -> (i32, i32) {
    %c0_i32 = arith.constant 0 : i32
    %c0_i32_0 = arith.constant 0 : i32
    %c0_i32_1 = arith.constant 0 : i32
    return %c0_i32, %c0_i32_0 : i32, i32
  }
  func.func @transform_3(%arg0: i32) -> (i32, i32) {
    %c0_i32 = arith.constant 0 : i32
    %c0_i32_0 = arith.constant 0 : i32
    return %arg0, %c0_i32 : i32, i32
  }
}

module attributes {stable_mosaic.version = 11 : i64} {
  func.func @_dense_kernel(%arg0: i32, %arg1: memref<256x72xbf16, #tpu.memory_space<vmem>>, %arg2: memref<72x8xbf16, #tpu.memory_space<vmem>>, %arg3: memref<1x8xf32, #tpu.memory_space<vmem>>, %arg4: memref<256x8xbf16, #tpu.memory_space<vmem>>) attributes {dimension_semantics = [#tpu.dimension_semantics<parallel>], iteration_bounds = array<i64: 2>, scalar_prefetch = 0 : i64, scratch_operands = 0 : i64, tpu.core_type = #tpu.core_type<tc>, window_params = [{transform_indices = @transform_0, window_bounds = array<i64: 256, 72>}, {pipeline_mode = #tpu.pipeline_mode<synchronous>, transform_indices = @transform_1, window_bounds = array<i64: 72, 8>}, {pipeline_mode = #tpu.pipeline_mode<synchronous>, transform_indices = @transform_2, window_bounds = array<i64: 1, 8>}, {transform_indices = @transform_3, window_bounds = array<i64: 256, 8>}]} {
    %c0 = arith.constant 0 : index
    %c0_0 = arith.constant 0 : index
    %0 = vector.load %arg1[%c0, %c0_0] : memref<256x72xbf16, #tpu.memory_space<vmem>>, vector<256x72xbf16>
    %c0_1 = arith.constant 0 : index
    %c0_2 = arith.constant 0 : index
    %1 = vector.load %arg2[%c0_1, %c0_2] : memref<72x8xbf16, #tpu.memory_space<vmem>>, vector<72x8xbf16>
    %cst = arith.constant dense<0.000000e+00> : vector<256x8xf32>
    %2 = tpu.matmul %0, %1, %cst {dimension_numbers = #tpu.dot_dimension_numbers<[1], [0], [0], [1], [0, 0, 1, 1], [], []>} : vector<256x72xbf16>, vector<72x8xbf16>, vector<256x8xf32> -> vector<256x8xf32>
    %c0_3 = arith.constant 0 : index
    %c0_4 = arith.constant 0 : index
    %3 = vector.load %arg3[%c0_3, %c0_4] : memref<1x8xf32, #tpu.memory_space<vmem>>, vector<1x8xf32>
    %4 = vector.broadcast %3 : vector<1x8xf32> to vector<256x8xf32>
    %5 = arith.addf %2, %4 : vector<256x8xf32>
    %cst_5 = arith.constant 5.000000e-01 : f32
    %6 = vector.broadcast %cst_5 : f32 to vector<256x8xf32>
    %7 = arith.mulf %6, %5 : vector<256x8xf32>
    %cst_6 = arith.constant 0.707106769 : f32
    %8 = vector.broadcast %cst_6 : f32 to vector<256x8xf32>
    %9 = arith.mulf %5, %8 : vector<256x8xf32>
    %10 = math.absf %9 : vector<256x8xf32>
    %cst_7 = arith.constant 0.327591091 : f32
    %11 = vector.broadcast %cst_7 : f32 to vector<256x8xf32>
    %12 = arith.mulf %11, %10 : vector<256x8xf32>
    %cst_8 = arith.constant 1.000000e+00 : f32
    %13 = vector.broadcast %cst_8 : f32 to vector<256x8xf32>
    %14 = arith.addf %13, %12 : vector<256x8xf32>
    %cst_9 = arith.constant 1.000000e+00 : f32
    %15 = vector.broadcast %cst_9 : f32 to vector<256x8xf32>
    %16 = arith.divf %15, %14 : vector<256x8xf32>
    %cst_10 = arith.constant 1.06140542 : f32
    %17 = vector.broadcast %cst_10 : f32 to vector<256x8xf32>
    %18 = arith.mulf %17, %16 : vector<256x8xf32>
    %cst_11 = arith.constant 1.45315206 : f32
    %19 = vector.broadcast %cst_11 : f32 to vector<256x8xf32>
    %20 = arith.subf %18, %19 : vector<256x8xf32>
    %21 = arith.mulf %20, %16 : vector<256x8xf32>
    %cst_12 = arith.constant 1.42141378 : f32
    %22 = vector.broadcast %cst_12 : f32 to vector<256x8xf32>
    %23 = arith.addf %21, %22 : vector<256x8xf32>
    %24 = arith.mulf %23, %16 : vector<256x8xf32>
    %cst_13 = arith.constant 0.284496725 : f32
    %25 = vector.broadcast %cst_13 : f32 to vector<256x8xf32>
    %26 = arith.subf %24, %25 : vector<256x8xf32>
    %27 = arith.mulf %26, %16 : vector<256x8xf32>
    %cst_14 = arith.constant 0.254829586 : f32
    %28 = vector.broadcast %cst_14 : f32 to vector<256x8xf32>
    %29 = arith.addf %27, %28 : vector<256x8xf32>
    %30 = arith.mulf %29, %16 : vector<256x8xf32>
    %cst_15 = arith.constant 0.000000e+00 : f32
    %31 = vector.broadcast %cst_15 : f32 to vector<256x8xf32>
    %32 = arith.subf %31, %10 : vector<256x8xf32>
    %33 = arith.mulf %32, %10 : vector<256x8xf32>
    %34 = math.exp %33 : vector<256x8xf32>
    %35 = arith.mulf %30, %34 : vector<256x8xf32>
    %cst_16 = arith.constant 1.000000e+00 : f32
    %36 = vector.broadcast %cst_16 : f32 to vector<256x8xf32>
    %37 = arith.subf %36, %35 : vector<256x8xf32>
    %cst_17 = arith.constant 0.000000e+00 : f32
    %38 = vector.broadcast %cst_17 : f32 to vector<256x8xf32>
    %39 = arith.cmpf olt, %9, %38 : vector<256x8xf32>
    %cst_18 = arith.constant 0.000000e+00 : f32
    %40 = vector.broadcast %cst_18 : f32 to vector<256x8xf32>
    %41 = arith.subf %40, %37 : vector<256x8xf32>
    %42 = arith.select %39, %41, %37 : vector<256x8xi1>, vector<256x8xf32>
    %cst_19 = arith.constant 1.000000e+00 : f32
    %43 = vector.broadcast %cst_19 : f32 to vector<256x8xf32>
    %44 = arith.addf %43, %42 : vector<256x8xf32>
    %45 = arith.mulf %7, %44 : vector<256x8xf32>
    %46 = arith.truncf %45 : vector<256x8xf32> to vector<256x8xbf16>
    %c0_20 = arith.constant 0 : index
    %c0_21 = arith.constant 0 : index
    %47 = vector.load %arg4[%c0_20, %c0_21] : memref<256x8xbf16, #tpu.memory_space<vmem>>, vector<256x8xbf16>
    tpu.vector_store %arg4[%c0_20, %c0_21], %46 {strides = array<i32>} : memref<256x8xbf16, #tpu.memory_space<vmem>>, vector<256x8xbf16>,
    return
  }
  func.func @transform_0(%arg0: i32) -> (i32, i32) {
    %c0_i32 = arith.constant 0 : i32
    %c0_i32_0 = arith.constant 0 : i32
    return %arg0, %c0_i32 : i32, i32
  }
  func.func @transform_1(%arg0: i32) -> (i32, i32) {
    %c0_i32 = arith.constant 0 : i32
    %c0_i32_0 = arith.constant 0 : i32
    %c0_i32_1 = arith.constant 0 : i32
    return %c0_i32, %c0_i32_0 : i32, i32
  }
  func.func @transform_2(%arg0: i32) -> (i32, i32) {
    %c0_i32 = arith.constant 0 : i32
    %c0_i32_0 = arith.constant 0 : i32
    %c0_i32_1 = arith.constant 0 : i32
    return %c0_i32, %c0_i32_0 : i32, i32
  }
  func.func @transform_3(%arg0: i32) -> (i32, i32) {
    %c0_i32 = arith.constant 0 : i32
    %c0_i32_0 = arith.constant 0 : i32
    return %arg0, %c0_i32 : i32, i32
  }
}

module attributes {stable_mosaic.version = 11 : i64} {
  func.func @_dense_kernel(%arg0: i32, %arg1: memref<256x72xbf16, #tpu.memory_space<vmem>>, %arg2: memref<72x8xbf16, #tpu.memory_space<vmem>>, %arg3: memref<1x8xf32, #tpu.memory_space<vmem>>, %arg4: memref<256x8xbf16, #tpu.memory_space<vmem>>, %arg5: memref<256x8xbf16, #tpu.memory_space<vmem>>) attributes {dimension_semantics = [#tpu.dimension_semantics<parallel>], iteration_bounds = array<i64: 2>, scalar_prefetch = 0 : i64, scratch_operands = 0 : i64, tpu.core_type = #tpu.core_type<tc>, window_params = [{transform_indices = @transform_0, window_bounds = array<i64: 256, 72>}, {pipeline_mode = #tpu.pipeline_mode<synchronous>, transform_indices = @transform_1, window_bounds = array<i64: 72, 8>}, {pipeline_mode = #tpu.pipeline_mode<synchronous>, transform_indices = @transform_2, window_bounds = array<i64: 1, 8>}, {transform_indices = @transform_3, window_bounds = array<i64: 256, 8>}, {transform_indices = @transform_4, window_bounds = array<i64: 256, 8>}]} {
    %c0 = arith.constant 0 : index
    %c0_0 = arith.constant 0 : index
    %0 = vector.load %arg1[%c0, %c0_0] : memref<256x72xbf16, #tpu.memory_space<vmem>>, vector<256x72xbf16>
    %c0_1 = arith.constant 0 : index
    %c0_2 = arith.constant 0 : index
    %1 = vector.load %arg2[%c0_1, %c0_2] : memref<72x8xbf16, #tpu.memory_space<vmem>>, vector<72x8xbf16>
    %cst = arith.constant dense<0.000000e+00> : vector<256x8xf32>
    %2 = tpu.matmul %0, %1, %cst {dimension_numbers = #tpu.dot_dimension_numbers<[1], [0], [0], [1], [0, 0, 1, 1], [], []>} : vector<256x72xbf16>, vector<72x8xbf16>, vector<256x8xf32> -> vector<256x8xf32>
    %c0_3 = arith.constant 0 : index
    %c0_4 = arith.constant 0 : index
    %3 = vector.load %arg3[%c0_3, %c0_4] : memref<1x8xf32, #tpu.memory_space<vmem>>, vector<1x8xf32>
    %4 = vector.broadcast %3 : vector<1x8xf32> to vector<256x8xf32>
    %5 = arith.addf %2, %4 : vector<256x8xf32>
    %c0_5 = arith.constant 0 : index
    %c0_6 = arith.constant 0 : index
    %6 = vector.load %arg4[%c0_5, %c0_6] : memref<256x8xbf16, #tpu.memory_space<vmem>>, vector<256x8xbf16>
    %7 = arith.extf %6 : vector<256x8xbf16> to vector<256x8xf32>
    %8 = arith.addf %5, %7 : vector<256x8xf32>
    %9 = arith.truncf %8 : vector<256x8xf32> to vector<256x8xbf16>
    %c0_7 = arith.constant 0 : index
    %c0_8 = arith.constant 0 : index
    %10 = vector.load %arg5[%c0_7, %c0_8] : memref<256x8xbf16, #tpu.memory_space<vmem>>, vector<256x8xbf16>
    tpu.vector_store %arg5[%c0_7, %c0_8], %9 {strides = array<i32>} : memref<256x8xbf16, #tpu.memory_space<vmem>>, vector<256x8xbf16>,
    return
  }
  func.func @transform_0(%arg0: i32) -> (i32, i32) {
    %c0_i32 = arith.constant 0 : i32
    %c0_i32_0 = arith.constant 0 : i32
    return %arg0, %c0_i32 : i32, i32
  }
  func.func @transform_1(%arg0: i32) -> (i32, i32) {
    %c0_i32 = arith.constant 0 : i32
    %c0_i32_0 = arith.constant 0 : i32
    %c0_i32_1 = arith.constant 0 : i32
    return %c0_i32, %c0_i32_0 : i32, i32
  }
  func.func @transform_2(%arg0: i32) -> (i32, i32) {
    %c0_i32 = arith.constant 0 : i32
    %c0_i32_0 = arith.constant 0 : i32
    %c0_i32_1 = arith.constant 0 : i32
    return %c0_i32, %c0_i32_0 : i32, i32
  }
  func.func @transform_3(%arg0: i32) -> (i32, i32) {
    %c0_i32 = arith.constant 0 : i32
    %c0_i32_0 = arith.constant 0 : i32
    return %arg0, %c0_i32 : i32, i32
  }
  func.func @transform_4(%arg0: i32) -> (i32, i32) {
    %c0_i32 = arith.constant 0 : i32
    %c0_i32_0 = arith.constant 0 : i32
    return %arg0, %c0_i32 : i32, i32
  }
}

module attributes {stable_mosaic.version = 11 : i64} {
  func.func @_dense_kernel(%arg0: i32, %arg1: memref<64x72xbf16, #tpu.memory_space<vmem>>, %arg2: memref<72x32xbf16, #tpu.memory_space<vmem>>, %arg3: memref<1x32xf32, #tpu.memory_space<vmem>>, %arg4: memref<32x16xbf16, #tpu.memory_space<vmem>>, %arg5: memref<1x16xf32, #tpu.memory_space<vmem>>, %arg6: memref<64x16xbf16, #tpu.memory_space<vmem>>) attributes {dimension_semantics = [#tpu.dimension_semantics<parallel>], iteration_bounds = array<i64: 2>, scalar_prefetch = 0 : i64, scratch_operands = 0 : i64, tpu.core_type = #tpu.core_type<tc>, window_params = [{transform_indices = @transform_0, window_bounds = array<i64: 64, 72>}, {pipeline_mode = #tpu.pipeline_mode<synchronous>, transform_indices = @transform_1, window_bounds = array<i64: 72, 32>}, {pipeline_mode = #tpu.pipeline_mode<synchronous>, transform_indices = @transform_2, window_bounds = array<i64: 1, 32>}, {pipeline_mode = #tpu.pipeline_mode<synchronous>, transform_indices = @transform_3, window_bounds = array<i64: 32, 16>}, {pipeline_mode = #tpu.pipeline_mode<synchronous>, transform_indices = @transform_4, window_bounds = array<i64: 1, 16>}, {transform_indices = @transform_5, window_bounds = array<i64: 64, 16>}]} {
    %c0 = arith.constant 0 : index
    %c0_0 = arith.constant 0 : index
    %0 = vector.load %arg1[%c0, %c0_0] : memref<64x72xbf16, #tpu.memory_space<vmem>>, vector<64x72xbf16>
    %c0_1 = arith.constant 0 : index
    %c0_2 = arith.constant 0 : index
    %1 = vector.load %arg2[%c0_1, %c0_2] : memref<72x32xbf16, #tpu.memory_space<vmem>>, vector<72x32xbf16>
    %cst = arith.constant dense<0.000000e+00> : vector<64x32xf32>
    %2 = tpu.matmul %0, %1, %cst {dimension_numbers = #tpu.dot_dimension_numbers<[1], [0], [0], [1], [0, 0, 1, 1], [], []>} : vector<64x72xbf16>, vector<72x32xbf16>, vector<64x32xf32> -> vector<64x32xf32>
    %c0_3 = arith.constant 0 : index
    %c0_4 = arith.constant 0 : index
    %3 = vector.load %arg3[%c0_3, %c0_4] : memref<1x32xf32, #tpu.memory_space<vmem>>, vector<1x32xf32>
    %4 = vector.broadcast %3 : vector<1x32xf32> to vector<64x32xf32>
    %5 = arith.addf %2, %4 : vector<64x32xf32>
    %cst_5 = arith.constant 5.000000e-01 : f32
    %6 = vector.broadcast %cst_5 : f32 to vector<64x32xf32>
    %7 = arith.mulf %6, %5 : vector<64x32xf32>
    %cst_6 = arith.constant 0.707106769 : f32
    %8 = vector.broadcast %cst_6 : f32 to vector<64x32xf32>
    %9 = arith.mulf %5, %8 : vector<64x32xf32>
    %10 = math.absf %9 : vector<64x32xf32>
    %cst_7 = arith.constant 0.327591091 : f32
    %11 = vector.broadcast %cst_7 : f32 to vector<64x32xf32>
    %12 = arith.mulf %11, %10 : vector<64x32xf32>
    %cst_8 = arith.constant 1.000000e+00 : f32
    %13 = vector.broadcast %cst_8 : f32 to vector<64x32xf32>
    %14 = arith.addf %13, %12 : vector<64x32xf32>
    %cst_9 = arith.constant 1.000000e+00 : f32
    %15 = vector.broadcast %cst_9 : f32 to vector<64x32xf32>
    %16 = arith.divf %15, %14 : vector<64x32xf32>
    %cst_10 = arith.constant 1.06140542 : f32
    %17 = vector.broadcast %cst_10 : f32 to vector<64x32xf32>
    %18 = arith.mulf %17, %16 : vector<64x32xf32>
    %cst_11 = arith.constant 1.45315206 : f32
    %19 = vector.broadcast %cst_11 : f32 to vector<64x32xf32>
    %20 = arith.subf %18, %19 : vector<64x32xf32>
    %21 = arith.mulf %20, %16 : vector<64x32xf32>
    %cst_12 = arith.constant 1.42141378 : f32
    %22 = vector.broadcast %cst_12 : f32 to vector<64x32xf32>
    %23 = arith.addf %21, %22 : vector<64x32xf32>
    %24 = arith.mulf %23, %16 : vector<64x32xf32>
    %cst_13 = arith.constant 0.284496725 : f32
    %25 = vector.broadcast %cst_13 : f32 to vector<64x32xf32>
    %26 = arith.subf %24, %25 : vector<64x32xf32>
    %27 = arith.mulf %26, %16 : vector<64x32xf32>
    %cst_14 = arith.constant 0.254829586 : f32
    %28 = vector.broadcast %cst_14 : f32 to vector<64x32xf32>
    %29 = arith.addf %27, %28 : vector<64x32xf32>
    %30 = arith.mulf %29, %16 : vector<64x32xf32>
    %cst_15 = arith.constant 0.000000e+00 : f32
    %31 = vector.broadcast %cst_15 : f32 to vector<64x32xf32>
    %32 = arith.subf %31, %10 : vector<64x32xf32>
    %33 = arith.mulf %32, %10 : vector<64x32xf32>
    %34 = math.exp %33 : vector<64x32xf32>
    %35 = arith.mulf %30, %34 : vector<64x32xf32>
    %cst_16 = arith.constant 1.000000e+00 : f32
    %36 = vector.broadcast %cst_16 : f32 to vector<64x32xf32>
    %37 = arith.subf %36, %35 : vector<64x32xf32>
    %cst_17 = arith.constant 0.000000e+00 : f32
    %38 = vector.broadcast %cst_17 : f32 to vector<64x32xf32>
    %39 = arith.cmpf olt, %9, %38 : vector<64x32xf32>
    %cst_18 = arith.constant 0.000000e+00 : f32
    %40 = vector.broadcast %cst_18 : f32 to vector<64x32xf32>
    %41 = arith.subf %40, %37 : vector<64x32xf32>
    %42 = arith.select %39, %41, %37 : vector<64x32xi1>, vector<64x32xf32>
    %cst_19 = arith.constant 1.000000e+00 : f32
    %43 = vector.broadcast %cst_19 : f32 to vector<64x32xf32>
    %44 = arith.addf %43, %42 : vector<64x32xf32>
    %45 = arith.mulf %7, %44 : vector<64x32xf32>
    %46 = arith.truncf %45 : vector<64x32xf32> to vector<64x32xbf16>
    %c0_20 = arith.constant 0 : index
    %c0_21 = arith.constant 0 : index
    %47 = vector.load %arg4[%c0_20, %c0_21] : memref<32x16xbf16, #tpu.memory_space<vmem>>, vector<32x16xbf16>
    %cst_22 = arith.constant dense<0.000000e+00> : vector<64x16xf32>
    %48 = tpu.matmul %46, %47, %cst_22 {dimension_numbers = #tpu.dot_dimension_numbers<[1], [0], [0], [1], [0, 0, 1, 1], [], []>} : vector<64x32xbf16>, vector<32x16xbf16>, vector<64x16xf32> -> vector<64x16xf32>
    %c0_23 = arith.constant 0 : index
    %c0_24 = arith.constant 0 : index
    %49 = vector.load %arg5[%c0_23, %c0_24] : memref<1x16xf32, #tpu.memory_space<vmem>>, vector<1x16xf32>
    %50 = vector.broadcast %49 : vector<1x16xf32> to vector<64x16xf32>
    %51 = arith.addf %48, %50 : vector<64x16xf32>
    %52 = arith.truncf %51 : vector<64x16xf32> to vector<64x16xbf16>
    %c0_25 = arith.constant 0 : index
    %c0_26 = arith.constant 0 : index
    %53 = vector.load %arg6[%c0_25, %c0_26] : memref<64x16xbf16, #tpu.memory_space<vmem>>, vector<64x16xbf16>
    tpu.vector_store %arg6[%c0_25, %c0_26], %52 {strides = array<i32>} : memref<64x16xbf16, #tpu.memory_space<vmem>>, vector<64x16xbf16>,
    return
  }
  func.func @transform_0(%arg0: i32) -> (i32, i32) {
    %c0_i32 = arith.constant 0 : i32
    %c0_i32_0 = arith.constant 0 : i32
    return %arg0, %c0_i32 : i32, i32
  }
  func.func @transform_1(%arg0: i32) -> (i32, i32) {
    %c0_i32 = arith.constant 0 : i32
    %c0_i32_0 = arith.constant 0 : i32
    %c0_i32_1 = arith.constant 0 : i32
    return %c0_i32, %c0_i32_0 : i32, i32
  }
  func.func @transform_2(%arg0: i32) -> (i32, i32) {
    %c0_i32 = arith.constant 0 : i32
    %c0_i32_0 = arith.constant 0 : i32
    %c0_i32_1 = arith.constant 0 : i32
    return %c0_i32, %c0_i32_0 : i32, i32
  }
  func.func @transform_3(%arg0: i32) -> (i32, i32) {
    %c0_i32 = arith.constant 0 : i32
    %c0_i32_0 = arith.constant 0 : i32
    %c0_i32_1 = arith.constant 0 : i32
    return %c0_i32, %c0_i32_0 : i32, i32
  }
  func.func @transform_4(%arg0: i32) -> (i32, i32) {
    %c0_i32 = arith.constant 0 : i32
    %c0_i32_0 = arith.constant 0 : i32
    %c0_i32_1 = arith.constant 0 : i32
    return %c0_i32, %c0_i32_0 : i32, i32
  }
  func.func @transform_5(%arg0: i32) -> (i32, i32) {
    %c0_i32 = arith.constant 0 : i32
    %c0_i32_0 = arith.constant 0 : i32
    return %arg0, %c0_i32 : i32, i32
  }
}

module attributes {stable_mosaic.version = 11 : i64} {
  func.func @_dense_kernel(%arg0: i32, %arg1: memref<64x144xbf16, #tpu.memory_space<vmem>>, %arg2: memref<144x32xbf16, #tpu.memory_space<vmem>>, %arg3: memref<1x32xf32, #tpu.memory_space<vmem>>, %arg4: memref<32x16xbf16, #tpu.memory_space<vmem>>, %arg5: memref<1x16xf32, #tpu.memory_space<vmem>>, %arg6: memref<64x16xbf16, #tpu.memory_space<vmem>>, %arg7: memref<64x16xbf16, #tpu.memory_space<vmem>>) attributes {dimension_semantics = [#tpu.dimension_semantics<parallel>], iteration_bounds = array<i64: 2>, scalar_prefetch = 0 : i64, scratch_operands = 0 : i64, tpu.core_type = #tpu.core_type<tc>, window_params = [{transform_indices = @transform_0, window_bounds = array<i64: 64, 144>}, {pipeline_mode = #tpu.pipeline_mode<synchronous>, transform_indices = @transform_1, window_bounds = array<i64: 144, 32>}, {pipeline_mode = #tpu.pipeline_mode<synchronous>, transform_indices = @transform_2, window_bounds = array<i64: 1, 32>}, {pipeline_mode = #tpu.pipeline_mode<synchronous>, transform_indices = @transform_3, window_bounds = array<i64: 32, 16>}, {pipeline_mode = #tpu.pipeline_mode<synchronous>, transform_indices = @transform_4, window_bounds = array<i64: 1, 16>}, {transform_indices = @transform_5, window_bounds = array<i64: 64, 16>}, {transform_indices = @transform_6, window_bounds = array<i64: 64, 16>}]} {
    %c0 = arith.constant 0 : index
    %c0_0 = arith.constant 0 : index
    %0 = vector.load %arg1[%c0, %c0_0] : memref<64x144xbf16, #tpu.memory_space<vmem>>, vector<64x144xbf16>
    %c0_1 = arith.constant 0 : index
    %c0_2 = arith.constant 0 : index
    %1 = vector.load %arg2[%c0_1, %c0_2] : memref<144x32xbf16, #tpu.memory_space<vmem>>, vector<144x32xbf16>
    %cst = arith.constant dense<0.000000e+00> : vector<64x32xf32>
    %2 = tpu.matmul %0, %1, %cst {dimension_numbers = #tpu.dot_dimension_numbers<[1], [0], [0], [1], [0, 0, 1, 1], [], []>} : vector<64x144xbf16>, vector<144x32xbf16>, vector<64x32xf32> -> vector<64x32xf32>
    %c0_3 = arith.constant 0 : index
    %c0_4 = arith.constant 0 : index
    %3 = vector.load %arg3[%c0_3, %c0_4] : memref<1x32xf32, #tpu.memory_space<vmem>>, vector<1x32xf32>
    %4 = vector.broadcast %3 : vector<1x32xf32> to vector<64x32xf32>
    %5 = arith.addf %2, %4 : vector<64x32xf32>
    %cst_5 = arith.constant 5.000000e-01 : f32
    %6 = vector.broadcast %cst_5 : f32 to vector<64x32xf32>
    %7 = arith.mulf %6, %5 : vector<64x32xf32>
    %cst_6 = arith.constant 0.707106769 : f32
    %8 = vector.broadcast %cst_6 : f32 to vector<64x32xf32>
    %9 = arith.mulf %5, %8 : vector<64x32xf32>
    %10 = math.absf %9 : vector<64x32xf32>
    %cst_7 = arith.constant 0.327591091 : f32
    %11 = vector.broadcast %cst_7 : f32 to vector<64x32xf32>
    %12 = arith.mulf %11, %10 : vector<64x32xf32>
    %cst_8 = arith.constant 1.000000e+00 : f32
    %13 = vector.broadcast %cst_8 : f32 to vector<64x32xf32>
    %14 = arith.addf %13, %12 : vector<64x32xf32>
    %cst_9 = arith.constant 1.000000e+00 : f32
    %15 = vector.broadcast %cst_9 : f32 to vector<64x32xf32>
    %16 = arith.divf %15, %14 : vector<64x32xf32>
    %cst_10 = arith.constant 1.06140542 : f32
    %17 = vector.broadcast %cst_10 : f32 to vector<64x32xf32>
    %18 = arith.mulf %17, %16 : vector<64x32xf32>
    %cst_11 = arith.constant 1.45315206 : f32
    %19 = vector.broadcast %cst_11 : f32 to vector<64x32xf32>
    %20 = arith.subf %18, %19 : vector<64x32xf32>
    %21 = arith.mulf %20, %16 : vector<64x32xf32>
    %cst_12 = arith.constant 1.42141378 : f32
    %22 = vector.broadcast %cst_12 : f32 to vector<64x32xf32>
    %23 = arith.addf %21, %22 : vector<64x32xf32>
    %24 = arith.mulf %23, %16 : vector<64x32xf32>
    %cst_13 = arith.constant 0.284496725 : f32
    %25 = vector.broadcast %cst_13 : f32 to vector<64x32xf32>
    %26 = arith.subf %24, %25 : vector<64x32xf32>
    %27 = arith.mulf %26, %16 : vector<64x32xf32>
    %cst_14 = arith.constant 0.254829586 : f32
    %28 = vector.broadcast %cst_14 : f32 to vector<64x32xf32>
    %29 = arith.addf %27, %28 : vector<64x32xf32>
    %30 = arith.mulf %29, %16 : vector<64x32xf32>
    %cst_15 = arith.constant 0.000000e+00 : f32
    %31 = vector.broadcast %cst_15 : f32 to vector<64x32xf32>
    %32 = arith.subf %31, %10 : vector<64x32xf32>
    %33 = arith.mulf %32, %10 : vector<64x32xf32>
    %34 = math.exp %33 : vector<64x32xf32>
    %35 = arith.mulf %30, %34 : vector<64x32xf32>
    %cst_16 = arith.constant 1.000000e+00 : f32
    %36 = vector.broadcast %cst_16 : f32 to vector<64x32xf32>
    %37 = arith.subf %36, %35 : vector<64x32xf32>
    %cst_17 = arith.constant 0.000000e+00 : f32
    %38 = vector.broadcast %cst_17 : f32 to vector<64x32xf32>
    %39 = arith.cmpf olt, %9, %38 : vector<64x32xf32>
    %cst_18 = arith.constant 0.000000e+00 : f32
    %40 = vector.broadcast %cst_18 : f32 to vector<64x32xf32>
    %41 = arith.subf %40, %37 : vector<64x32xf32>
    %42 = arith.select %39, %41, %37 : vector<64x32xi1>, vector<64x32xf32>
    %cst_19 = arith.constant 1.000000e+00 : f32
    %43 = vector.broadcast %cst_19 : f32 to vector<64x32xf32>
    %44 = arith.addf %43, %42 : vector<64x32xf32>
    %45 = arith.mulf %7, %44 : vector<64x32xf32>
    %46 = arith.truncf %45 : vector<64x32xf32> to vector<64x32xbf16>
    %c0_20 = arith.constant 0 : index
    %c0_21 = arith.constant 0 : index
    %47 = vector.load %arg4[%c0_20, %c0_21] : memref<32x16xbf16, #tpu.memory_space<vmem>>, vector<32x16xbf16>
    %cst_22 = arith.constant dense<0.000000e+00> : vector<64x16xf32>
    %48 = tpu.matmul %46, %47, %cst_22 {dimension_numbers = #tpu.dot_dimension_numbers<[1], [0], [0], [1], [0, 0, 1, 1], [], []>} : vector<64x32xbf16>, vector<32x16xbf16>, vector<64x16xf32> -> vector<64x16xf32>
    %c0_23 = arith.constant 0 : index
    %c0_24 = arith.constant 0 : index
    %49 = vector.load %arg5[%c0_23, %c0_24] : memref<1x16xf32, #tpu.memory_space<vmem>>, vector<1x16xf32>
    %50 = vector.broadcast %49 : vector<1x16xf32> to vector<64x16xf32>
    %51 = arith.addf %48, %50 : vector<64x16xf32>
    %c0_25 = arith.constant 0 : index
    %c0_26 = arith.constant 0 : index
    %52 = vector.load %arg6[%c0_25, %c0_26] : memref<64x16xbf16, #tpu.memory_space<vmem>>, vector<64x16xbf16>
    %53 = arith.extf %52 : vector<64x16xbf16> to vector<64x16xf32>
    %54 = arith.addf %51, %53 : vector<64x16xf32>
    %55 = arith.truncf %54 : vector<64x16xf32> to vector<64x16xbf16>
    %c0_27 = arith.constant 0 : index
    %c0_28 = arith.constant 0 : index
    %56 = vector.load %arg7[%c0_27, %c0_28] : memref<64x16xbf16, #tpu.memory_space<vmem>>, vector<64x16xbf16>
    tpu.vector_store %arg7[%c0_27, %c0_28], %55 {strides = array<i32>} : memref<64x16xbf16, #tpu.memory_space<vmem>>, vector<64x16xbf16>,
    return
  }
  func.func @transform_0(%arg0: i32) -> (i32, i32) {
    %c0_i32 = arith.constant 0 : i32
    %c0_i32_0 = arith.constant 0 : i32
    return %arg0, %c0_i32 : i32, i32
  }
  func.func @transform_1(%arg0: i32) -> (i32, i32) {
    %c0_i32 = arith.constant 0 : i32
    %c0_i32_0 = arith.constant 0 : i32
    %c0_i32_1 = arith.constant 0 : i32
    return %c0_i32, %c0_i32_0 : i32, i32
  }
  func.func @transform_2(%arg0: i32) -> (i32, i32) {
    %c0_i32 = arith.constant 0 : i32
    %c0_i32_0 = arith.constant 0 : i32
    %c0_i32_1 = arith.constant 0 : i32
    return %c0_i32, %c0_i32_0 : i32, i32
  }
  func.func @transform_3(%arg0: i32) -> (i32, i32) {
    %c0_i32 = arith.constant 0 : i32
    %c0_i32_0 = arith.constant 0 : i32
    %c0_i32_1 = arith.constant 0 : i32
    return %c0_i32, %c0_i32_0 : i32, i32
  }
  func.func @transform_4(%arg0: i32) -> (i32, i32) {
    %c0_i32 = arith.constant 0 : i32
    %c0_i32_0 = arith.constant 0 : i32
    %c0_i32_1 = arith.constant 0 : i32
    return %c0_i32, %c0_i32_0 : i32, i32
  }
  func.func @transform_5(%arg0: i32) -> (i32, i32) {
    %c0_i32 = arith.constant 0 : i32
    %c0_i32_0 = arith.constant 0 : i32
    return %arg0, %c0_i32 : i32, i32
  }
  func.func @transform_6(%arg0: i32) -> (i32, i32) {
    %c0_i32 = arith.constant 0 : i32
    %c0_i32_0 = arith.constant 0 : i32
    return %arg0, %c0_i32 : i32, i32
  }
}

module attributes {stable_mosaic.version = 11 : i64} {
  func.func @_dense_kernel(%arg0: i32, %arg1: memref<16x144xbf16, #tpu.memory_space<vmem>>, %arg2: memref<144x64xbf16, #tpu.memory_space<vmem>>, %arg3: memref<1x64xf32, #tpu.memory_space<vmem>>, %arg4: memref<64x24xbf16, #tpu.memory_space<vmem>>, %arg5: memref<1x24xf32, #tpu.memory_space<vmem>>, %arg6: memref<16x24xbf16, #tpu.memory_space<vmem>>) attributes {dimension_semantics = [#tpu.dimension_semantics<parallel>], iteration_bounds = array<i64: 2>, scalar_prefetch = 0 : i64, scratch_operands = 0 : i64, tpu.core_type = #tpu.core_type<tc>, window_params = [{transform_indices = @transform_0, window_bounds = array<i64: 16, 144>}, {pipeline_mode = #tpu.pipeline_mode<synchronous>, transform_indices = @transform_1, window_bounds = array<i64: 144, 64>}, {pipeline_mode = #tpu.pipeline_mode<synchronous>, transform_indices = @transform_2, window_bounds = array<i64: 1, 64>}, {pipeline_mode = #tpu.pipeline_mode<synchronous>, transform_indices = @transform_3, window_bounds = array<i64: 64, 24>}, {pipeline_mode = #tpu.pipeline_mode<synchronous>, transform_indices = @transform_4, window_bounds = array<i64: 1, 24>}, {transform_indices = @transform_5, window_bounds = array<i64: 16, 24>}]} {
    %c0 = arith.constant 0 : index
    %c0_0 = arith.constant 0 : index
    %0 = vector.load %arg1[%c0, %c0_0] : memref<16x144xbf16, #tpu.memory_space<vmem>>, vector<16x144xbf16>
    %c0_1 = arith.constant 0 : index
    %c0_2 = arith.constant 0 : index
    %1 = vector.load %arg2[%c0_1, %c0_2] : memref<144x64xbf16, #tpu.memory_space<vmem>>, vector<144x64xbf16>
    %cst = arith.constant dense<0.000000e+00> : vector<16x64xf32>
    %2 = tpu.matmul %0, %1, %cst {dimension_numbers = #tpu.dot_dimension_numbers<[1], [0], [0], [1], [0, 0, 1, 1], [], []>} : vector<16x144xbf16>, vector<144x64xbf16>, vector<16x64xf32> -> vector<16x64xf32>
    %c0_3 = arith.constant 0 : index
    %c0_4 = arith.constant 0 : index
    %3 = vector.load %arg3[%c0_3, %c0_4] : memref<1x64xf32, #tpu.memory_space<vmem>>, vector<1x64xf32>
    %4 = vector.broadcast %3 : vector<1x64xf32> to vector<16x64xf32>
    %5 = arith.addf %2, %4 : vector<16x64xf32>
    %cst_5 = arith.constant 5.000000e-01 : f32
    %6 = vector.broadcast %cst_5 : f32 to vector<16x64xf32>
    %7 = arith.mulf %6, %5 : vector<16x64xf32>
    %cst_6 = arith.constant 0.707106769 : f32
    %8 = vector.broadcast %cst_6 : f32 to vector<16x64xf32>
    %9 = arith.mulf %5, %8 : vector<16x64xf32>
    %10 = math.absf %9 : vector<16x64xf32>
    %cst_7 = arith.constant 0.327591091 : f32
    %11 = vector.broadcast %cst_7 : f32 to vector<16x64xf32>
    %12 = arith.mulf %11, %10 : vector<16x64xf32>
    %cst_8 = arith.constant 1.000000e+00 : f32
    %13 = vector.broadcast %cst_8 : f32 to vector<16x64xf32>
    %14 = arith.addf %13, %12 : vector<16x64xf32>
    %cst_9 = arith.constant 1.000000e+00 : f32
    %15 = vector.broadcast %cst_9 : f32 to vector<16x64xf32>
    %16 = arith.divf %15, %14 : vector<16x64xf32>
    %cst_10 = arith.constant 1.06140542 : f32
    %17 = vector.broadcast %cst_10 : f32 to vector<16x64xf32>
    %18 = arith.mulf %17, %16 : vector<16x64xf32>
    %cst_11 = arith.constant 1.45315206 : f32
    %19 = vector.broadcast %cst_11 : f32 to vector<16x64xf32>
    %20 = arith.subf %18, %19 : vector<16x64xf32>
    %21 = arith.mulf %20, %16 : vector<16x64xf32>
    %cst_12 = arith.constant 1.42141378 : f32
    %22 = vector.broadcast %cst_12 : f32 to vector<16x64xf32>
    %23 = arith.addf %21, %22 : vector<16x64xf32>
    %24 = arith.mulf %23, %16 : vector<16x64xf32>
    %cst_13 = arith.constant 0.284496725 : f32
    %25 = vector.broadcast %cst_13 : f32 to vector<16x64xf32>
    %26 = arith.subf %24, %25 : vector<16x64xf32>
    %27 = arith.mulf %26, %16 : vector<16x64xf32>
    %cst_14 = arith.constant 0.254829586 : f32
    %28 = vector.broadcast %cst_14 : f32 to vector<16x64xf32>
    %29 = arith.addf %27, %28 : vector<16x64xf32>
    %30 = arith.mulf %29, %16 : vector<16x64xf32>
    %cst_15 = arith.constant 0.000000e+00 : f32
    %31 = vector.broadcast %cst_15 : f32 to vector<16x64xf32>
    %32 = arith.subf %31, %10 : vector<16x64xf32>
    %33 = arith.mulf %32, %10 : vector<16x64xf32>
    %34 = math.exp %33 : vector<16x64xf32>
    %35 = arith.mulf %30, %34 : vector<16x64xf32>
    %cst_16 = arith.constant 1.000000e+00 : f32
    %36 = vector.broadcast %cst_16 : f32 to vector<16x64xf32>
    %37 = arith.subf %36, %35 : vector<16x64xf32>
    %cst_17 = arith.constant 0.000000e+00 : f32
    %38 = vector.broadcast %cst_17 : f32 to vector<16x64xf32>
    %39 = arith.cmpf olt, %9, %38 : vector<16x64xf32>
    %cst_18 = arith.constant 0.000000e+00 : f32
    %40 = vector.broadcast %cst_18 : f32 to vector<16x64xf32>
    %41 = arith.subf %40, %37 : vector<16x64xf32>
    %42 = arith.select %39, %41, %37 : vector<16x64xi1>, vector<16x64xf32>
    %cst_19 = arith.constant 1.000000e+00 : f32
    %43 = vector.broadcast %cst_19 : f32 to vector<16x64xf32>
    %44 = arith.addf %43, %42 : vector<16x64xf32>
    %45 = arith.mulf %7, %44 : vector<16x64xf32>
    %46 = arith.truncf %45 : vector<16x64xf32> to vector<16x64xbf16>
    %c0_20 = arith.constant 0 : index
    %c0_21 = arith.constant 0 : index
    %47 = vector.load %arg4[%c0_20, %c0_21] : memref<64x24xbf16, #tpu.memory_space<vmem>>, vector<64x24xbf16>
    %cst_22 = arith.constant dense<0.000000e+00> : vector<16x24xf32>
    %48 = tpu.matmul %46, %47, %cst_22 {dimension_numbers = #tpu.dot_dimension_numbers<[1], [0], [0], [1], [0, 0, 1, 1], [], []>} : vector<16x64xbf16>, vector<64x24xbf16>, vector<16x24xf32> -> vector<16x24xf32>
    %c0_23 = arith.constant 0 : index
    %c0_24 = arith.constant 0 : index
    %49 = vector.load %arg5[%c0_23, %c0_24] : memref<1x24xf32, #tpu.memory_space<vmem>>, vector<1x24xf32>
    %50 = vector.broadcast %49 : vector<1x24xf32> to vector<16x24xf32>
    %51 = arith.addf %48, %50 : vector<16x24xf32>
    %52 = arith.truncf %51 : vector<16x24xf32> to vector<16x24xbf16>
    %c0_25 = arith.constant 0 : index
    %c0_26 = arith.constant 0 : index
    %53 = vector.load %arg6[%c0_25, %c0_26] : memref<16x24xbf16, #tpu.memory_space<vmem>>, vector<16x24xbf16>
    tpu.vector_store %arg6[%c0_25, %c0_26], %52 {strides = array<i32>} : memref<16x24xbf16, #tpu.memory_space<vmem>>, vector<16x24xbf16>,
    return
  }
  func.func @transform_0(%arg0: i32) -> (i32, i32) {
    %c0_i32 = arith.constant 0 : i32
    %c0_i32_0 = arith.constant 0 : i32
    return %arg0, %c0_i32 : i32, i32
  }
  func.func @transform_1(%arg0: i32) -> (i32, i32) {
    %c0_i32 = arith.constant 0 : i32
    %c0_i32_0 = arith.constant 0 : i32
    %c0_i32_1 = arith.constant 0 : i32
    return %c0_i32, %c0_i32_0 : i32, i32
  }
  func.func @transform_2(%arg0: i32) -> (i32, i32) {
    %c0_i32 = arith.constant 0 : i32
    %c0_i32_0 = arith.constant 0 : i32
    %c0_i32_1 = arith.constant 0 : i32
    return %c0_i32, %c0_i32_0 : i32, i32
  }
  func.func @transform_3(%arg0: i32) -> (i32, i32) {
    %c0_i32 = arith.constant 0 : i32
    %c0_i32_0 = arith.constant 0 : i32
    %c0_i32_1 = arith.constant 0 : i32
    return %c0_i32, %c0_i32_0 : i32, i32
  }
  func.func @transform_4(%arg0: i32) -> (i32, i32) {
    %c0_i32 = arith.constant 0 : i32
    %c0_i32_0 = arith.constant 0 : i32
    %c0_i32_1 = arith.constant 0 : i32
    return %c0_i32, %c0_i32_0 : i32, i32
  }
  func.func @transform_5(%arg0: i32) -> (i32, i32) {
    %c0_i32 = arith.constant 0 : i32
    %c0_i32_0 = arith.constant 0 : i32
    return %arg0, %c0_i32 : i32, i32
  }
}

module attributes {stable_mosaic.version = 11 : i64} {
  func.func @_dense_kernel(%arg0: i32, %arg1: memref<16x216xbf16, #tpu.memory_space<vmem>>, %arg2: memref<216x48xbf16, #tpu.memory_space<vmem>>, %arg3: memref<1x48xf32, #tpu.memory_space<vmem>>, %arg4: memref<48x24xbf16, #tpu.memory_space<vmem>>, %arg5: memref<1x24xf32, #tpu.memory_space<vmem>>, %arg6: memref<16x24xbf16, #tpu.memory_space<vmem>>, %arg7: memref<16x24xbf16, #tpu.memory_space<vmem>>) attributes {dimension_semantics = [#tpu.dimension_semantics<parallel>], iteration_bounds = array<i64: 2>, scalar_prefetch = 0 : i64, scratch_operands = 0 : i64, tpu.core_type = #tpu.core_type<tc>, window_params = [{transform_indices = @transform_0, window_bounds = array<i64: 16, 216>}, {pipeline_mode = #tpu.pipeline_mode<synchronous>, transform_indices = @transform_1, window_bounds = array<i64: 216, 48>}, {pipeline_mode = #tpu.pipeline_mode<synchronous>, transform_indices = @transform_2, window_bounds = array<i64: 1, 48>}, {pipeline_mode = #tpu.pipeline_mode<synchronous>, transform_indices = @transform_3, window_bounds = array<i64: 48, 24>}, {pipeline_mode = #tpu.pipeline_mode<synchronous>, transform_indices = @transform_4, window_bounds = array<i64: 1, 24>}, {transform_indices = @transform_5, window_bounds = array<i64: 16, 24>}, {transform_indices = @transform_6, window_bounds = array<i64: 16, 24>}]} {
    %c0 = arith.constant 0 : index
    %c0_0 = arith.constant 0 : index
    %0 = vector.load %arg1[%c0, %c0_0] : memref<16x216xbf16, #tpu.memory_space<vmem>>, vector<16x216xbf16>
    %c0_1 = arith.constant 0 : index
    %c0_2 = arith.constant 0 : index
    %1 = vector.load %arg2[%c0_1, %c0_2] : memref<216x48xbf16, #tpu.memory_space<vmem>>, vector<216x48xbf16>
    %cst = arith.constant dense<0.000000e+00> : vector<16x48xf32>
    %2 = tpu.matmul %0, %1, %cst {dimension_numbers = #tpu.dot_dimension_numbers<[1], [0], [0], [1], [0, 0, 1, 1], [], []>} : vector<16x216xbf16>, vector<216x48xbf16>, vector<16x48xf32> -> vector<16x48xf32>
    %c0_3 = arith.constant 0 : index
    %c0_4 = arith.constant 0 : index
    %3 = vector.load %arg3[%c0_3, %c0_4] : memref<1x48xf32, #tpu.memory_space<vmem>>, vector<1x48xf32>
    %4 = vector.broadcast %3 : vector<1x48xf32> to vector<16x48xf32>
    %5 = arith.addf %2, %4 : vector<16x48xf32>
    %cst_5 = arith.constant 5.000000e-01 : f32
    %6 = vector.broadcast %cst_5 : f32 to vector<16x48xf32>
    %7 = arith.mulf %6, %5 : vector<16x48xf32>
    %cst_6 = arith.constant 0.707106769 : f32
    %8 = vector.broadcast %cst_6 : f32 to vector<16x48xf32>
    %9 = arith.mulf %5, %8 : vector<16x48xf32>
    %10 = math.absf %9 : vector<16x48xf32>
    %cst_7 = arith.constant 0.327591091 : f32
    %11 = vector.broadcast %cst_7 : f32 to vector<16x48xf32>
    %12 = arith.mulf %11, %10 : vector<16x48xf32>
    %cst_8 = arith.constant 1.000000e+00 : f32
    %13 = vector.broadcast %cst_8 : f32 to vector<16x48xf32>
    %14 = arith.addf %13, %12 : vector<16x48xf32>
    %cst_9 = arith.constant 1.000000e+00 : f32
    %15 = vector.broadcast %cst_9 : f32 to vector<16x48xf32>
    %16 = arith.divf %15, %14 : vector<16x48xf32>
    %cst_10 = arith.constant 1.06140542 : f32
    %17 = vector.broadcast %cst_10 : f32 to vector<16x48xf32>
    %18 = arith.mulf %17, %16 : vector<16x48xf32>
    %cst_11 = arith.constant 1.45315206 : f32
    %19 = vector.broadcast %cst_11 : f32 to vector<16x48xf32>
    %20 = arith.subf %18, %19 : vector<16x48xf32>
    %21 = arith.mulf %20, %16 : vector<16x48xf32>
    %cst_12 = arith.constant 1.42141378 : f32
    %22 = vector.broadcast %cst_12 : f32 to vector<16x48xf32>
    %23 = arith.addf %21, %22 : vector<16x48xf32>
    %24 = arith.mulf %23, %16 : vector<16x48xf32>
    %cst_13 = arith.constant 0.284496725 : f32
    %25 = vector.broadcast %cst_13 : f32 to vector<16x48xf32>
    %26 = arith.subf %24, %25 : vector<16x48xf32>
    %27 = arith.mulf %26, %16 : vector<16x48xf32>
    %cst_14 = arith.constant 0.254829586 : f32
    %28 = vector.broadcast %cst_14 : f32 to vector<16x48xf32>
    %29 = arith.addf %27, %28 : vector<16x48xf32>
    %30 = arith.mulf %29, %16 : vector<16x48xf32>
    %cst_15 = arith.constant 0.000000e+00 : f32
    %31 = vector.broadcast %cst_15 : f32 to vector<16x48xf32>
    %32 = arith.subf %31, %10 : vector<16x48xf32>
    %33 = arith.mulf %32, %10 : vector<16x48xf32>
    %34 = math.exp %33 : vector<16x48xf32>
    %35 = arith.mulf %30, %34 : vector<16x48xf32>
    %cst_16 = arith.constant 1.000000e+00 : f32
    %36 = vector.broadcast %cst_16 : f32 to vector<16x48xf32>
    %37 = arith.subf %36, %35 : vector<16x48xf32>
    %cst_17 = arith.constant 0.000000e+00 : f32
    %38 = vector.broadcast %cst_17 : f32 to vector<16x48xf32>
    %39 = arith.cmpf olt, %9, %38 : vector<16x48xf32>
    %cst_18 = arith.constant 0.000000e+00 : f32
    %40 = vector.broadcast %cst_18 : f32 to vector<16x48xf32>
    %41 = arith.subf %40, %37 : vector<16x48xf32>
    %42 = arith.select %39, %41, %37 : vector<16x48xi1>, vector<16x48xf32>
    %cst_19 = arith.constant 1.000000e+00 : f32
    %43 = vector.broadcast %cst_19 : f32 to vector<16x48xf32>
    %44 = arith.addf %43, %42 : vector<16x48xf32>
    %45 = arith.mulf %7, %44 : vector<16x48xf32>
    %46 = arith.truncf %45 : vector<16x48xf32> to vector<16x48xbf16>
    %c0_20 = arith.constant 0 : index
    %c0_21 = arith.constant 0 : index
    %47 = vector.load %arg4[%c0_20, %c0_21] : memref<48x24xbf16, #tpu.memory_space<vmem>>, vector<48x24xbf16>
    %cst_22 = arith.constant dense<0.000000e+00> : vector<16x24xf32>
    %48 = tpu.matmul %46, %47, %cst_22 {dimension_numbers = #tpu.dot_dimension_numbers<[1], [0], [0], [1], [0, 0, 1, 1], [], []>} : vector<16x48xbf16>, vector<48x24xbf16>, vector<16x24xf32> -> vector<16x24xf32>
    %c0_23 = arith.constant 0 : index
    %c0_24 = arith.constant 0 : index
    %49 = vector.load %arg5[%c0_23, %c0_24] : memref<1x24xf32, #tpu.memory_space<vmem>>, vector<1x24xf32>
    %50 = vector.broadcast %49 : vector<1x24xf32> to vector<16x24xf32>
    %51 = arith.addf %48, %50 : vector<16x24xf32>
    %c0_25 = arith.constant 0 : index
    %c0_26 = arith.constant 0 : index
    %52 = vector.load %arg6[%c0_25, %c0_26] : memref<16x24xbf16, #tpu.memory_space<vmem>>, vector<16x24xbf16>
    %53 = arith.extf %52 : vector<16x24xbf16> to vector<16x24xf32>
    %54 = arith.addf %51, %53 : vector<16x24xf32>
    %55 = arith.truncf %54 : vector<16x24xf32> to vector<16x24xbf16>
    %c0_27 = arith.constant 0 : index
    %c0_28 = arith.constant 0 : index
    %56 = vector.load %arg7[%c0_27, %c0_28] : memref<16x24xbf16, #tpu.memory_space<vmem>>, vector<16x24xbf16>
    tpu.vector_store %arg7[%c0_27, %c0_28], %55 {strides = array<i32>} : memref<16x24xbf16, #tpu.memory_space<vmem>>, vector<16x24xbf16>,
    return
  }
  func.func @transform_0(%arg0: i32) -> (i32, i32) {
    %c0_i32 = arith.constant 0 : i32
    %c0_i32_0 = arith.constant 0 : i32
    return %arg0, %c0_i32 : i32, i32
  }
  func.func @transform_1(%arg0: i32) -> (i32, i32) {
    %c0_i32 = arith.constant 0 : i32
    %c0_i32_0 = arith.constant 0 : i32
    %c0_i32_1 = arith.constant 0 : i32
    return %c0_i32, %c0_i32_0 : i32, i32
  }
  func.func @transform_2(%arg0: i32) -> (i32, i32) {
    %c0_i32 = arith.constant 0 : i32
    %c0_i32_0 = arith.constant 0 : i32
    %c0_i32_1 = arith.constant 0 : i32
    return %c0_i32, %c0_i32_0 : i32, i32
  }
  func.func @transform_3(%arg0: i32) -> (i32, i32) {
    %c0_i32 = arith.constant 0 : i32
    %c0_i32_0 = arith.constant 0 : i32
    %c0_i32_1 = arith.constant 0 : i32
    return %c0_i32, %c0_i32_0 : i32, i32
  }
  func.func @transform_4(%arg0: i32) -> (i32, i32) {
    %c0_i32 = arith.constant 0 : i32
    %c0_i32_0 = arith.constant 0 : i32
    %c0_i32_1 = arith.constant 0 : i32
    return %c0_i32, %c0_i32_0 : i32, i32
  }
  func.func @transform_5(%arg0: i32) -> (i32, i32) {
    %c0_i32 = arith.constant 0 : i32
    %c0_i32_0 = arith.constant 0 : i32
    return %arg0, %c0_i32 : i32, i32
  }
  func.func @transform_6(%arg0: i32) -> (i32, i32) {
    %c0_i32 = arith.constant 0 : i32
    %c0_i32_0 = arith.constant 0 : i32
    return %arg0, %c0_i32 : i32, i32
  }
}

module attributes {stable_mosaic.version = 11 : i64} {
  func.func @_dense_kernel(%arg0: i32, %arg1: memref<16x24xbf16, #tpu.memory_space<vmem>>, %arg2: memref<24x192xbf16, #tpu.memory_space<vmem>>, %arg3: memref<1x192xf32, #tpu.memory_space<vmem>>, %arg4: memref<16x192xbf16, #tpu.memory_space<vmem>>) attributes {dimension_semantics = [#tpu.dimension_semantics<parallel>], iteration_bounds = array<i64: 2>, scalar_prefetch = 0 : i64, scratch_operands = 0 : i64, tpu.core_type = #tpu.core_type<tc>, window_params = [{transform_indices = @transform_0, window_bounds = array<i64: 16, 24>}, {pipeline_mode = #tpu.pipeline_mode<synchronous>, transform_indices = @transform_1, window_bounds = array<i64: 24, 192>}, {pipeline_mode = #tpu.pipeline_mode<synchronous>, transform_indices = @transform_2, window_bounds = array<i64: 1, 192>}, {transform_indices = @transform_3, window_bounds = array<i64: 16, 192>}]} {
    %c0 = arith.constant 0 : index
    %c0_0 = arith.constant 0 : index
    %0 = vector.load %arg1[%c0, %c0_0] : memref<16x24xbf16, #tpu.memory_space<vmem>>, vector<16x24xbf16>
    %c0_1 = arith.constant 0 : index
    %c0_2 = arith.constant 0 : index
    %1 = vector.load %arg2[%c0_1, %c0_2] : memref<24x192xbf16, #tpu.memory_space<vmem>>, vector<24x192xbf16>
    %cst = arith.constant dense<0.000000e+00> : vector<16x192xf32>
    %2 = tpu.matmul %0, %1, %cst {dimension_numbers = #tpu.dot_dimension_numbers<[1], [0], [0], [1], [0, 0, 1, 1], [], []>} : vector<16x24xbf16>, vector<24x192xbf16>, vector<16x192xf32> -> vector<16x192xf32>
    %c0_3 = arith.constant 0 : index
    %c0_4 = arith.constant 0 : index
    %3 = vector.load %arg3[%c0_3, %c0_4] : memref<1x192xf32, #tpu.memory_space<vmem>>, vector<1x192xf32>
    %4 = vector.broadcast %3 : vector<1x192xf32> to vector<16x192xf32>
    %5 = arith.addf %2, %4 : vector<16x192xf32>
    %cst_5 = arith.constant 5.000000e-01 : f32
    %6 = vector.broadcast %cst_5 : f32 to vector<16x192xf32>
    %7 = arith.mulf %6, %5 : vector<16x192xf32>
    %cst_6 = arith.constant 0.707106769 : f32
    %8 = vector.broadcast %cst_6 : f32 to vector<16x192xf32>
    %9 = arith.mulf %5, %8 : vector<16x192xf32>
    %10 = math.absf %9 : vector<16x192xf32>
    %cst_7 = arith.constant 0.327591091 : f32
    %11 = vector.broadcast %cst_7 : f32 to vector<16x192xf32>
    %12 = arith.mulf %11, %10 : vector<16x192xf32>
    %cst_8 = arith.constant 1.000000e+00 : f32
    %13 = vector.broadcast %cst_8 : f32 to vector<16x192xf32>
    %14 = arith.addf %13, %12 : vector<16x192xf32>
    %cst_9 = arith.constant 1.000000e+00 : f32
    %15 = vector.broadcast %cst_9 : f32 to vector<16x192xf32>
    %16 = arith.divf %15, %14 : vector<16x192xf32>
    %cst_10 = arith.constant 1.06140542 : f32
    %17 = vector.broadcast %cst_10 : f32 to vector<16x192xf32>
    %18 = arith.mulf %17, %16 : vector<16x192xf32>
    %cst_11 = arith.constant 1.45315206 : f32
    %19 = vector.broadcast %cst_11 : f32 to vector<16x192xf32>
    %20 = arith.subf %18, %19 : vector<16x192xf32>
    %21 = arith.mulf %20, %16 : vector<16x192xf32>
    %cst_12 = arith.constant 1.42141378 : f32
    %22 = vector.broadcast %cst_12 : f32 to vector<16x192xf32>
    %23 = arith.addf %21, %22 : vector<16x192xf32>
    %24 = arith.mulf %23, %16 : vector<16x192xf32>
    %cst_13 = arith.constant 0.284496725 : f32
    %25 = vector.broadcast %cst_13 : f32 to vector<16x192xf32>
    %26 = arith.subf %24, %25 : vector<16x192xf32>
    %27 = arith.mulf %26, %16 : vector<16x192xf32>
    %cst_14 = arith.constant 0.254829586 : f32
    %28 = vector.broadcast %cst_14 : f32 to vector<16x192xf32>
    %29 = arith.addf %27, %28 : vector<16x192xf32>
    %30 = arith.mulf %29, %16 : vector<16x192xf32>
    %cst_15 = arith.constant 0.000000e+00 : f32
    %31 = vector.broadcast %cst_15 : f32 to vector<16x192xf32>
    %32 = arith.subf %31, %10 : vector<16x192xf32>
    %33 = arith.mulf %32, %10 : vector<16x192xf32>
    %34 = math.exp %33 : vector<16x192xf32>
    %35 = arith.mulf %30, %34 : vector<16x192xf32>
    %cst_16 = arith.constant 1.000000e+00 : f32
    %36 = vector.broadcast %cst_16 : f32 to vector<16x192xf32>
    %37 = arith.subf %36, %35 : vector<16x192xf32>
    %cst_17 = arith.constant 0.000000e+00 : f32
    %38 = vector.broadcast %cst_17 : f32 to vector<16x192xf32>
    %39 = arith.cmpf olt, %9, %38 : vector<16x192xf32>
    %cst_18 = arith.constant 0.000000e+00 : f32
    %40 = vector.broadcast %cst_18 : f32 to vector<16x192xf32>
    %41 = arith.subf %40, %37 : vector<16x192xf32>
    %42 = arith.select %39, %41, %37 : vector<16x192xi1>, vector<16x192xf32>
    %cst_19 = arith.constant 1.000000e+00 : f32
    %43 = vector.broadcast %cst_19 : f32 to vector<16x192xf32>
    %44 = arith.addf %43, %42 : vector<16x192xf32>
    %45 = arith.mulf %7, %44 : vector<16x192xf32>
    %46 = arith.truncf %45 : vector<16x192xf32> to vector<16x192xbf16>
    %c0_20 = arith.constant 0 : index
    %c0_21 = arith.constant 0 : index
    %47 = vector.load %arg4[%c0_20, %c0_21] : memref<16x192xbf16, #tpu.memory_space<vmem>>, vector<16x192xbf16>
    tpu.vector_store %arg4[%c0_20, %c0_21], %46 {strides = array<i32>} : memref<16x192xbf16, #tpu.memory_space<vmem>>, vector<16x192xbf16>,
    return
  }
  func.func @transform_0(%arg0: i32) -> (i32, i32) {
    %c0_i32 = arith.constant 0 : i32
    %c0_i32_0 = arith.constant 0 : i32
    return %arg0, %c0_i32 : i32, i32
  }
  func.func @transform_1(%arg0: i32) -> (i32, i32) {
    %c0_i32 = arith.constant 0 : i32
    %c0_i32_0 = arith.constant 0 : i32
    %c0_i32_1 = arith.constant 0 : i32
    return %c0_i32, %c0_i32_0 : i32, i32
  }
  func.func @transform_2(%arg0: i32) -> (i32, i32) {
    %c0_i32 = arith.constant 0 : i32
    %c0_i32_0 = arith.constant 0 : i32
    %c0_i32_1 = arith.constant 0 : i32
    return %c0_i32, %c0_i32_0 : i32, i32
  }
  func.func @transform_3(%arg0: i32) -> (i32, i32) {
    %c0_i32 = arith.constant 0 : i32
    %c0_i32_0 = arith.constant 0 : i32
    return %arg0, %c0_i32 : i32, i32
  }
}

module attributes {stable_mosaic.version = 11 : i64} {
  func.func @_dense_kernel(%arg0: i32, %arg1: memref<16x32xbf16, #tpu.memory_space<vmem>>, %arg2: memref<32x128xbf16, #tpu.memory_space<vmem>>, %arg3: memref<1x128xf32, #tpu.memory_space<vmem>>, %arg4: memref<16x128xbf16, #tpu.memory_space<vmem>>) attributes {dimension_semantics = [#tpu.dimension_semantics<parallel>], iteration_bounds = array<i64: 1>, scalar_prefetch = 0 : i64, scratch_operands = 0 : i64, tpu.core_type = #tpu.core_type<tc>, window_params = [{transform_indices = @transform_0, window_bounds = array<i64: 16, 32>}, {pipeline_mode = #tpu.pipeline_mode<synchronous>, transform_indices = @transform_1, window_bounds = array<i64: 32, 128>}, {pipeline_mode = #tpu.pipeline_mode<synchronous>, transform_indices = @transform_2, window_bounds = array<i64: 1, 128>}, {transform_indices = @transform_3, window_bounds = array<i64: 16, 128>}]} {
    %c0 = arith.constant 0 : index
    %c0_0 = arith.constant 0 : index
    %0 = vector.load %arg1[%c0, %c0_0] : memref<16x32xbf16, #tpu.memory_space<vmem>>, vector<16x32xbf16>
    %c0_1 = arith.constant 0 : index
    %c0_2 = arith.constant 0 : index
    %1 = vector.load %arg2[%c0_1, %c0_2] : memref<32x128xbf16, #tpu.memory_space<vmem>>, vector<32x128xbf16>
    %cst = arith.constant dense<0.000000e+00> : vector<16x128xf32>
    %2 = tpu.matmul %0, %1, %cst {dimension_numbers = #tpu.dot_dimension_numbers<[1], [0], [0], [1], [0, 0, 1, 1], [], []>} : vector<16x32xbf16>, vector<32x128xbf16>, vector<16x128xf32> -> vector<16x128xf32>
    %c0_3 = arith.constant 0 : index
    %c0_4 = arith.constant 0 : index
    %3 = vector.load %arg3[%c0_3, %c0_4] : memref<1x128xf32, #tpu.memory_space<vmem>>, vector<1x128xf32>
    %4 = vector.broadcast %3 : vector<1x128xf32> to vector<16x128xf32>
    %5 = arith.addf %2, %4 : vector<16x128xf32>
    %cst_5 = arith.constant 5.000000e-01 : f32
    %6 = vector.broadcast %cst_5 : f32 to vector<16x128xf32>
    %7 = arith.mulf %6, %5 : vector<16x128xf32>
    %cst_6 = arith.constant 0.707106769 : f32
    %8 = vector.broadcast %cst_6 : f32 to vector<16x128xf32>
    %9 = arith.mulf %5, %8 : vector<16x128xf32>
    %10 = math.absf %9 : vector<16x128xf32>
    %cst_7 = arith.constant 0.327591091 : f32
    %11 = vector.broadcast %cst_7 : f32 to vector<16x128xf32>
    %12 = arith.mulf %11, %10 : vector<16x128xf32>
    %cst_8 = arith.constant 1.000000e+00 : f32
    %13 = vector.broadcast %cst_8 : f32 to vector<16x128xf32>
    %14 = arith.addf %13, %12 : vector<16x128xf32>
    %cst_9 = arith.constant 1.000000e+00 : f32
    %15 = vector.broadcast %cst_9 : f32 to vector<16x128xf32>
    %16 = arith.divf %15, %14 : vector<16x128xf32>
    %cst_10 = arith.constant 1.06140542 : f32
    %17 = vector.broadcast %cst_10 : f32 to vector<16x128xf32>
    %18 = arith.mulf %17, %16 : vector<16x128xf32>
    %cst_11 = arith.constant 1.45315206 : f32
    %19 = vector.broadcast %cst_11 : f32 to vector<16x128xf32>
    %20 = arith.subf %18, %19 : vector<16x128xf32>
    %21 = arith.mulf %20, %16 : vector<16x128xf32>
    %cst_12 = arith.constant 1.42141378 : f32
    %22 = vector.broadcast %cst_12 : f32 to vector<16x128xf32>
    %23 = arith.addf %21, %22 : vector<16x128xf32>
    %24 = arith.mulf %23, %16 : vector<16x128xf32>
    %cst_13 = arith.constant 0.284496725 : f32
    %25 = vector.broadcast %cst_13 : f32 to vector<16x128xf32>
    %26 = arith.subf %24, %25 : vector<16x128xf32>
    %27 = arith.mulf %26, %16 : vector<16x128xf32>
    %cst_14 = arith.constant 0.254829586 : f32
    %28 = vector.broadcast %cst_14 : f32 to vector<16x128xf32>
    %29 = arith.addf %27, %28 : vector<16x128xf32>
    %30 = arith.mulf %29, %16 : vector<16x128xf32>
    %cst_15 = arith.constant 0.000000e+00 : f32
    %31 = vector.broadcast %cst_15 : f32 to vector<16x128xf32>
    %32 = arith.subf %31, %10 : vector<16x128xf32>
    %33 = arith.mulf %32, %10 : vector<16x128xf32>
    %34 = math.exp %33 : vector<16x128xf32>
    %35 = arith.mulf %30, %34 : vector<16x128xf32>
    %cst_16 = arith.constant 1.000000e+00 : f32
    %36 = vector.broadcast %cst_16 : f32 to vector<16x128xf32>
    %37 = arith.subf %36, %35 : vector<16x128xf32>
    %cst_17 = arith.constant 0.000000e+00 : f32
    %38 = vector.broadcast %cst_17 : f32 to vector<16x128xf32>
    %39 = arith.cmpf olt, %9, %38 : vector<16x128xf32>
    %cst_18 = arith.constant 0.000000e+00 : f32
    %40 = vector.broadcast %cst_18 : f32 to vector<16x128xf32>
    %41 = arith.subf %40, %37 : vector<16x128xf32>
    %42 = arith.select %39, %41, %37 : vector<16x128xi1>, vector<16x128xf32>
    %cst_19 = arith.constant 1.000000e+00 : f32
    %43 = vector.broadcast %cst_19 : f32 to vector<16x128xf32>
    %44 = arith.addf %43, %42 : vector<16x128xf32>
    %45 = arith.mulf %7, %44 : vector<16x128xf32>
    %46 = arith.truncf %45 : vector<16x128xf32> to vector<16x128xbf16>
    %c0_20 = arith.constant 0 : index
    %c0_21 = arith.constant 0 : index
    %47 = vector.load %arg4[%c0_20, %c0_21] : memref<16x128xbf16, #tpu.memory_space<vmem>>, vector<16x128xbf16>
    tpu.vector_store %arg4[%c0_20, %c0_21], %46 {strides = array<i32>} : memref<16x128xbf16, #tpu.memory_space<vmem>>, vector<16x128xbf16>,
    return
  }
  func.func @transform_0(%arg0: i32) -> (i32, i32) {
    %c0_i32 = arith.constant 0 : i32
    %c0_i32_0 = arith.constant 0 : i32
    return %arg0, %c0_i32 : i32, i32
  }
  func.func @transform_1(%arg0: i32) -> (i32, i32) {
    %c0_i32 = arith.constant 0 : i32
    %c0_i32_0 = arith.constant 0 : i32
    %c0_i32_1 = arith.constant 0 : i32
    return %c0_i32, %c0_i32_0 : i32, i32
  }
  func.func @transform_2(%arg0: i32) -> (i32, i32) {
    %c0_i32 = arith.constant 0 : i32
    %c0_i32_0 = arith.constant 0 : i32
    %c0_i32_1 = arith.constant 0 : i32
    return %c0_i32, %c0_i32_0 : i32, i32
  }
  func.func @transform_3(%arg0: i32) -> (i32, i32) {
    %c0_i32 = arith.constant 0 : i32
    %c0_i32_0 = arith.constant 0 : i32
    return %arg0, %c0_i32 : i32, i32
  }
}

module attributes {stable_mosaic.version = 11 : i64} {
  func.func @_dw_kernel(%arg0: i32, %arg1: memref<9x16x192xbf16, #tpu.memory_space<vmem>>, %arg2: memref<9x1x192xbf16, #tpu.memory_space<vmem>>, %arg3: memref<1x192xf32, #tpu.memory_space<vmem>>, %arg4: memref<192x32xbf16, #tpu.memory_space<vmem>>, %arg5: memref<1x32xf32, #tpu.memory_space<vmem>>, %arg6: memref<16x32xbf16, #tpu.memory_space<vmem>>) attributes {dimension_semantics = [#tpu.dimension_semantics<parallel>], iteration_bounds = array<i64: 1>, scalar_prefetch = 0 : i64, scratch_operands = 0 : i64, tpu.core_type = #tpu.core_type<tc>, window_params = [{transform_indices = @transform_0, window_bounds = array<i64: 9, 16, 192>}, {pipeline_mode = #tpu.pipeline_mode<synchronous>, transform_indices = @transform_1, window_bounds = array<i64: 9, 1, 192>}, {pipeline_mode = #tpu.pipeline_mode<synchronous>, transform_indices = @transform_2, window_bounds = array<i64: 1, 192>}, {pipeline_mode = #tpu.pipeline_mode<synchronous>, transform_indices = @transform_3, window_bounds = array<i64: 192, 32>}, {pipeline_mode = #tpu.pipeline_mode<synchronous>, transform_indices = @transform_4, window_bounds = array<i64: 1, 32>}, {transform_indices = @transform_5, window_bounds = array<i64: 16, 32>}]} {
    %c0 = arith.constant 0 : index
    %c0_0 = arith.constant 0 : index
    %c0_1 = arith.constant 0 : index
    %0 = vector.load %arg1[%c0, %c0_0, %c0_1] : memref<9x16x192xbf16, #tpu.memory_space<vmem>>, vector<1x16x192xbf16>
    %1 = vector.shape_cast %0 : vector<1x16x192xbf16> to vector<16x192xbf16>
    %2 = arith.extf %1 : vector<16x192xbf16> to vector<16x192xf32>
    %c0_2 = arith.constant 0 : index
    %c0_3 = arith.constant 0 : index
    %c0_4 = arith.constant 0 : index
    %3 = vector.load %arg2[%c0_2, %c0_3, %c0_4] : memref<9x1x192xbf16, #tpu.memory_space<vmem>>, vector<1x1x192xbf16>
    %4 = vector.shape_cast %3 : vector<1x1x192xbf16> to vector<1x192xbf16>
    %5 = arith.extf %4 : vector<1x192xbf16> to vector<1x192xf32>
    %6 = vector.broadcast %5 : vector<1x192xf32> to vector<16x192xf32>
    %7 = arith.mulf %2, %6 : vector<16x192xf32>
    %c1 = arith.constant 1 : index
    %c0_5 = arith.constant 0 : index
    %c0_6 = arith.constant 0 : index
    %8 = vector.load %arg1[%c1, %c0_5, %c0_6] : memref<9x16x192xbf16, #tpu.memory_space<vmem>>, vector<1x16x192xbf16>
    %9 = vector.shape_cast %8 : vector<1x16x192xbf16> to vector<16x192xbf16>
    %10 = arith.extf %9 : vector<16x192xbf16> to vector<16x192xf32>
    %c1_7 = arith.constant 1 : index
    %c0_8 = arith.constant 0 : index
    %c0_9 = arith.constant 0 : index
    %11 = vector.load %arg2[%c1_7, %c0_8, %c0_9] : memref<9x1x192xbf16, #tpu.memory_space<vmem>>, vector<1x1x192xbf16>
    %12 = vector.shape_cast %11 : vector<1x1x192xbf16> to vector<1x192xbf16>
    %13 = arith.extf %12 : vector<1x192xbf16> to vector<1x192xf32>
    %14 = vector.broadcast %13 : vector<1x192xf32> to vector<16x192xf32>
    %15 = arith.mulf %10, %14 : vector<16x192xf32>
    %16 = arith.addf %7, %15 : vector<16x192xf32>
    %c2 = arith.constant 2 : index
    %c0_10 = arith.constant 0 : index
    %c0_11 = arith.constant 0 : index
    %17 = vector.load %arg1[%c2, %c0_10, %c0_11] : memref<9x16x192xbf16, #tpu.memory_space<vmem>>, vector<1x16x192xbf16>
    %18 = vector.shape_cast %17 : vector<1x16x192xbf16> to vector<16x192xbf16>
    %19 = arith.extf %18 : vector<16x192xbf16> to vector<16x192xf32>
    %c2_12 = arith.constant 2 : index
    %c0_13 = arith.constant 0 : index
    %c0_14 = arith.constant 0 : index
    %20 = vector.load %arg2[%c2_12, %c0_13, %c0_14] : memref<9x1x192xbf16, #tpu.memory_space<vmem>>, vector<1x1x192xbf16>
    %21 = vector.shape_cast %20 : vector<1x1x192xbf16> to vector<1x192xbf16>
    %22 = arith.extf %21 : vector<1x192xbf16> to vector<1x192xf32>
    %23 = vector.broadcast %22 : vector<1x192xf32> to vector<16x192xf32>
    %24 = arith.mulf %19, %23 : vector<16x192xf32>
    %25 = arith.addf %16, %24 : vector<16x192xf32>
    %c3 = arith.constant 3 : index
    %c0_15 = arith.constant 0 : index
    %c0_16 = arith.constant 0 : index
    %26 = vector.load %arg1[%c3, %c0_15, %c0_16] : memref<9x16x192xbf16, #tpu.memory_space<vmem>>, vector<1x16x192xbf16>
    %27 = vector.shape_cast %26 : vector<1x16x192xbf16> to vector<16x192xbf16>
    %28 = arith.extf %27 : vector<16x192xbf16> to vector<16x192xf32>
    %c3_17 = arith.constant 3 : index
    %c0_18 = arith.constant 0 : index
    %c0_19 = arith.constant 0 : index
    %29 = vector.load %arg2[%c3_17, %c0_18, %c0_19] : memref<9x1x192xbf16, #tpu.memory_space<vmem>>, vector<1x1x192xbf16>
    %30 = vector.shape_cast %29 : vector<1x1x192xbf16> to vector<1x192xbf16>
    %31 = arith.extf %30 : vector<1x192xbf16> to vector<1x192xf32>
    %32 = vector.broadcast %31 : vector<1x192xf32> to vector<16x192xf32>
    %33 = arith.mulf %28, %32 : vector<16x192xf32>
    %34 = arith.addf %25, %33 : vector<16x192xf32>
    %c4 = arith.constant 4 : index
    %c0_20 = arith.constant 0 : index
    %c0_21 = arith.constant 0 : index
    %35 = vector.load %arg1[%c4, %c0_20, %c0_21] : memref<9x16x192xbf16, #tpu.memory_space<vmem>>, vector<1x16x192xbf16>
    %36 = vector.shape_cast %35 : vector<1x16x192xbf16> to vector<16x192xbf16>
    %37 = arith.extf %36 : vector<16x192xbf16> to vector<16x192xf32>
    %c4_22 = arith.constant 4 : index
    %c0_23 = arith.constant 0 : index
    %c0_24 = arith.constant 0 : index
    %38 = vector.load %arg2[%c4_22, %c0_23, %c0_24] : memref<9x1x192xbf16, #tpu.memory_space<vmem>>, vector<1x1x192xbf16>
    %39 = vector.shape_cast %38 : vector<1x1x192xbf16> to vector<1x192xbf16>
    %40 = arith.extf %39 : vector<1x192xbf16> to vector<1x192xf32>
    %41 = vector.broadcast %40 : vector<1x192xf32> to vector<16x192xf32>
    %42 = arith.mulf %37, %41 : vector<16x192xf32>
    %43 = arith.addf %34, %42 : vector<16x192xf32>
    %c5 = arith.constant 5 : index
    %c0_25 = arith.constant 0 : index
    %c0_26 = arith.constant 0 : index
    %44 = vector.load %arg1[%c5, %c0_25, %c0_26] : memref<9x16x192xbf16, #tpu.memory_space<vmem>>, vector<1x16x192xbf16>
    %45 = vector.shape_cast %44 : vector<1x16x192xbf16> to vector<16x192xbf16>
    %46 = arith.extf %45 : vector<16x192xbf16> to vector<16x192xf32>
    %c5_27 = arith.constant 5 : index
    %c0_28 = arith.constant 0 : index
    %c0_29 = arith.constant 0 : index
    %47 = vector.load %arg2[%c5_27, %c0_28, %c0_29] : memref<9x1x192xbf16, #tpu.memory_space<vmem>>, vector<1x1x192xbf16>
    %48 = vector.shape_cast %47 : vector<1x1x192xbf16> to vector<1x192xbf16>
    %49 = arith.extf %48 : vector<1x192xbf16> to vector<1x192xf32>
    %50 = vector.broadcast %49 : vector<1x192xf32> to vector<16x192xf32>
    %51 = arith.mulf %46, %50 : vector<16x192xf32>
    %52 = arith.addf %43, %51 : vector<16x192xf32>
    %c6 = arith.constant 6 : index
    %c0_30 = arith.constant 0 : index
    %c0_31 = arith.constant 0 : index
    %53 = vector.load %arg1[%c6, %c0_30, %c0_31] : memref<9x16x192xbf16, #tpu.memory_space<vmem>>, vector<1x16x192xbf16>
    %54 = vector.shape_cast %53 : vector<1x16x192xbf16> to vector<16x192xbf16>
    %55 = arith.extf %54 : vector<16x192xbf16> to vector<16x192xf32>
    %c6_32 = arith.constant 6 : index
    %c0_33 = arith.constant 0 : index
    %c0_34 = arith.constant 0 : index
    %56 = vector.load %arg2[%c6_32, %c0_33, %c0_34] : memref<9x1x192xbf16, #tpu.memory_space<vmem>>, vector<1x1x192xbf16>
    %57 = vector.shape_cast %56 : vector<1x1x192xbf16> to vector<1x192xbf16>
    %58 = arith.extf %57 : vector<1x192xbf16> to vector<1x192xf32>
    %59 = vector.broadcast %58 : vector<1x192xf32> to vector<16x192xf32>
    %60 = arith.mulf %55, %59 : vector<16x192xf32>
    %61 = arith.addf %52, %60 : vector<16x192xf32>
    %c7 = arith.constant 7 : index
    %c0_35 = arith.constant 0 : index
    %c0_36 = arith.constant 0 : index
    %62 = vector.load %arg1[%c7, %c0_35, %c0_36] : memref<9x16x192xbf16, #tpu.memory_space<vmem>>, vector<1x16x192xbf16>
    %63 = vector.shape_cast %62 : vector<1x16x192xbf16> to vector<16x192xbf16>
    %64 = arith.extf %63 : vector<16x192xbf16> to vector<16x192xf32>
    %c7_37 = arith.constant 7 : index
    %c0_38 = arith.constant 0 : index
    %c0_39 = arith.constant 0 : index
    %65 = vector.load %arg2[%c7_37, %c0_38, %c0_39] : memref<9x1x192xbf16, #tpu.memory_space<vmem>>, vector<1x1x192xbf16>
    %66 = vector.shape_cast %65 : vector<1x1x192xbf16> to vector<1x192xbf16>
    %67 = arith.extf %66 : vector<1x192xbf16> to vector<1x192xf32>
    %68 = vector.broadcast %67 : vector<1x192xf32> to vector<16x192xf32>
    %69 = arith.mulf %64, %68 : vector<16x192xf32>
    %70 = arith.addf %61, %69 : vector<16x192xf32>
    %c8 = arith.constant 8 : index
    %c0_40 = arith.constant 0 : index
    %c0_41 = arith.constant 0 : index
    %71 = vector.load %arg1[%c8, %c0_40, %c0_41] : memref<9x16x192xbf16, #tpu.memory_space<vmem>>, vector<1x16x192xbf16>
    %72 = vector.shape_cast %71 : vector<1x16x192xbf16> to vector<16x192xbf16>
    %73 = arith.extf %72 : vector<16x192xbf16> to vector<16x192xf32>
    %c8_42 = arith.constant 8 : index
    %c0_43 = arith.constant 0 : index
    %c0_44 = arith.constant 0 : index
    %74 = vector.load %arg2[%c8_42, %c0_43, %c0_44] : memref<9x1x192xbf16, #tpu.memory_space<vmem>>, vector<1x1x192xbf16>
    %75 = vector.shape_cast %74 : vector<1x1x192xbf16> to vector<1x192xbf16>
    %76 = arith.extf %75 : vector<1x192xbf16> to vector<1x192xf32>
    %77 = vector.broadcast %76 : vector<1x192xf32> to vector<16x192xf32>
    %78 = arith.mulf %73, %77 : vector<16x192xf32>
    %79 = arith.addf %70, %78 : vector<16x192xf32>
    %c0_45 = arith.constant 0 : index
    %c0_46 = arith.constant 0 : index
    %80 = vector.load %arg3[%c0_45, %c0_46] : memref<1x192xf32, #tpu.memory_space<vmem>>, vector<1x192xf32>
    %81 = vector.broadcast %80 : vector<1x192xf32> to vector<16x192xf32>
    %82 = arith.addf %79, %81 : vector<16x192xf32>
    %cst = arith.constant 5.000000e-01 : f32
    %83 = vector.broadcast %cst : f32 to vector<16x192xf32>
    %84 = arith.mulf %83, %82 : vector<16x192xf32>
    %cst_47 = arith.constant 0.707106769 : f32
    %85 = vector.broadcast %cst_47 : f32 to vector<16x192xf32>
    %86 = arith.mulf %82, %85 : vector<16x192xf32>
    %87 = math.absf %86 : vector<16x192xf32>
    %cst_48 = arith.constant 0.327591091 : f32
    %88 = vector.broadcast %cst_48 : f32 to vector<16x192xf32>
    %89 = arith.mulf %88, %87 : vector<16x192xf32>
    %cst_49 = arith.constant 1.000000e+00 : f32
    %90 = vector.broadcast %cst_49 : f32 to vector<16x192xf32>
    %91 = arith.addf %90, %89 : vector<16x192xf32>
    %cst_50 = arith.constant 1.000000e+00 : f32
    %92 = vector.broadcast %cst_50 : f32 to vector<16x192xf32>
    %93 = arith.divf %92, %91 : vector<16x192xf32>
    %cst_51 = arith.constant 1.06140542 : f32
    %94 = vector.broadcast %cst_51 : f32 to vector<16x192xf32>
    %95 = arith.mulf %94, %93 : vector<16x192xf32>
    %cst_52 = arith.constant 1.45315206 : f32
    %96 = vector.broadcast %cst_52 : f32 to vector<16x192xf32>
    %97 = arith.subf %95, %96 : vector<16x192xf32>
    %98 = arith.mulf %97, %93 : vector<16x192xf32>
    %cst_53 = arith.constant 1.42141378 : f32
    %99 = vector.broadcast %cst_53 : f32 to vector<16x192xf32>
    %100 = arith.addf %98, %99 : vector<16x192xf32>
    %101 = arith.mulf %100, %93 : vector<16x192xf32>
    %cst_54 = arith.constant 0.284496725 : f32
    %102 = vector.broadcast %cst_54 : f32 to vector<16x192xf32>
    %103 = arith.subf %101, %102 : vector<16x192xf32>
    %104 = arith.mulf %103, %93 : vector<16x192xf32>
    %cst_55 = arith.constant 0.254829586 : f32
    %105 = vector.broadcast %cst_55 : f32 to vector<16x192xf32>
    %106 = arith.addf %104, %105 : vector<16x192xf32>
    %107 = arith.mulf %106, %93 : vector<16x192xf32>
    %cst_56 = arith.constant 0.000000e+00 : f32
    %108 = vector.broadcast %cst_56 : f32 to vector<16x192xf32>
    %109 = arith.subf %108, %87 : vector<16x192xf32>
    %110 = arith.mulf %109, %87 : vector<16x192xf32>
    %111 = math.exp %110 : vector<16x192xf32>
    %112 = arith.mulf %107, %111 : vector<16x192xf32>
    %cst_57 = arith.constant 1.000000e+00 : f32
    %113 = vector.broadcast %cst_57 : f32 to vector<16x192xf32>
    %114 = arith.subf %113, %112 : vector<16x192xf32>
    %cst_58 = arith.constant 0.000000e+00 : f32
    %115 = vector.broadcast %cst_58 : f32 to vector<16x192xf32>
    %116 = arith.cmpf olt, %86, %115 : vector<16x192xf32>
    %cst_59 = arith.constant 0.000000e+00 : f32
    %117 = vector.broadcast %cst_59 : f32 to vector<16x192xf32>
    %118 = arith.subf %117, %114 : vector<16x192xf32>
    %119 = arith.select %116, %118, %114 : vector<16x192xi1>, vector<16x192xf32>
    %cst_60 = arith.constant 1.000000e+00 : f32
    %120 = vector.broadcast %cst_60 : f32 to vector<16x192xf32>
    %121 = arith.addf %120, %119 : vector<16x192xf32>
    %122 = arith.mulf %84, %121 : vector<16x192xf32>
    %123 = arith.truncf %122 : vector<16x192xf32> to vector<16x192xbf16>
    %c0_61 = arith.constant 0 : index
    %c0_62 = arith.constant 0 : index
    %124 = vector.load %arg4[%c0_61, %c0_62] : memref<192x32xbf16, #tpu.memory_space<vmem>>, vector<192x32xbf16>
    %cst_63 = arith.constant dense<0.000000e+00> : vector<16x32xf32>
    %125 = tpu.matmul %123, %124, %cst_63 {dimension_numbers = #tpu.dot_dimension_numbers<[1], [0], [0], [1], [0, 0, 1, 1], [], []>} : vector<16x192xbf16>, vector<192x32xbf16>, vector<16x32xf32> -> vector<16x32xf32>
    %c0_64 = arith.constant 0 : index
    %c0_65 = arith.constant 0 : index
    %126 = vector.load %arg5[%c0_64, %c0_65] : memref<1x32xf32, #tpu.memory_space<vmem>>, vector<1x32xf32>
    %127 = vector.broadcast %126 : vector<1x32xf32> to vector<16x32xf32>
    %128 = arith.addf %125, %127 : vector<16x32xf32>
    %129 = arith.truncf %128 : vector<16x32xf32> to vector<16x32xbf16>
    %c0_66 = arith.constant 0 : index
    %c0_67 = arith.constant 0 : index
    %130 = vector.load %arg6[%c0_66, %c0_67] : memref<16x32xbf16, #tpu.memory_space<vmem>>, vector<16x32xbf16>
    tpu.vector_store %arg6[%c0_66, %c0_67], %129 {strides = array<i32>} : memref<16x32xbf16, #tpu.memory_space<vmem>>, vector<16x32xbf16>,
    return
  }
  func.func @transform_0(%arg0: i32) -> (i32, i32, i32) {
    %c0_i32 = arith.constant 0 : i32
    %c0_i32_0 = arith.constant 0 : i32
    %c0_i32_1 = arith.constant 0 : i32
    return %c0_i32, %arg0, %c0_i32_0 : i32, i32, i32
  }
  func.func @transform_1(%arg0: i32) -> (i32, i32, i32) {
    %c0_i32 = arith.constant 0 : i32
    %c0_i32_0 = arith.constant 0 : i32
    %c0_i32_1 = arith.constant 0 : i32
    %c0_i32_2 = arith.constant 0 : i32
    return %c0_i32, %c0_i32_0, %c0_i32_1 : i32, i32, i32
  }
  func.func @transform_2(%arg0: i32) -> (i32, i32) {
    %c0_i32 = arith.constant 0 : i32
    %c0_i32_0 = arith.constant 0 : i32
    %c0_i32_1 = arith.constant 0 : i32
    return %c0_i32, %c0_i32_0 : i32, i32
  }
  func.func @transform_3(%arg0: i32) -> (i32, i32) {
    %c0_i32 = arith.constant 0 : i32
    %c0_i32_0 = arith.constant 0 : i32
    %c0_i32_1 = arith.constant 0 : i32
    return %c0_i32, %c0_i32_0 : i32, i32
  }
  func.func @transform_4(%arg0: i32) -> (i32, i32) {
    %c0_i32 = arith.constant 0 : i32
    %c0_i32_0 = arith.constant 0 : i32
    %c0_i32_1 = arith.constant 0 : i32
    return %c0_i32, %c0_i32_0 : i32, i32
  }
  func.func @transform_5(%arg0: i32) -> (i32, i32) {
    %c0_i32 = arith.constant 0 : i32
    %c0_i32_0 = arith.constant 0 : i32
    return %arg0, %c0_i32 : i32, i32
  }
}

module attributes {stable_mosaic.version = 11 : i64} {
  func.func @_dw_kernel(%arg0: i32, %arg1: memref<9x16x128xbf16, #tpu.memory_space<vmem>>, %arg2: memref<9x1x128xbf16, #tpu.memory_space<vmem>>, %arg3: memref<1x128xf32, #tpu.memory_space<vmem>>, %arg4: memref<128x32xbf16, #tpu.memory_space<vmem>>, %arg5: memref<1x32xf32, #tpu.memory_space<vmem>>, %arg6: memref<16x32xbf16, #tpu.memory_space<vmem>>, %arg7: memref<16x32xbf16, #tpu.memory_space<vmem>>) attributes {dimension_semantics = [#tpu.dimension_semantics<parallel>], iteration_bounds = array<i64: 1>, scalar_prefetch = 0 : i64, scratch_operands = 0 : i64, tpu.core_type = #tpu.core_type<tc>, window_params = [{transform_indices = @transform_0, window_bounds = array<i64: 9, 16, 128>}, {pipeline_mode = #tpu.pipeline_mode<synchronous>, transform_indices = @transform_1, window_bounds = array<i64: 9, 1, 128>}, {pipeline_mode = #tpu.pipeline_mode<synchronous>, transform_indices = @transform_2, window_bounds = array<i64: 1, 128>}, {pipeline_mode = #tpu.pipeline_mode<synchronous>, transform_indices = @transform_3, window_bounds = array<i64: 128, 32>}, {pipeline_mode = #tpu.pipeline_mode<synchronous>, transform_indices = @transform_4, window_bounds = array<i64: 1, 32>}, {transform_indices = @transform_5, window_bounds = array<i64: 16, 32>}, {transform_indices = @transform_6, window_bounds = array<i64: 16, 32>}]} {
    %c0 = arith.constant 0 : index
    %c0_0 = arith.constant 0 : index
    %c0_1 = arith.constant 0 : index
    %0 = vector.load %arg1[%c0, %c0_0, %c0_1] : memref<9x16x128xbf16, #tpu.memory_space<vmem>>, vector<1x16x128xbf16>
    %1 = vector.shape_cast %0 : vector<1x16x128xbf16> to vector<16x128xbf16>
    %2 = arith.extf %1 : vector<16x128xbf16> to vector<16x128xf32>
    %c0_2 = arith.constant 0 : index
    %c0_3 = arith.constant 0 : index
    %c0_4 = arith.constant 0 : index
    %3 = vector.load %arg2[%c0_2, %c0_3, %c0_4] : memref<9x1x128xbf16, #tpu.memory_space<vmem>>, vector<1x1x128xbf16>
    %4 = vector.shape_cast %3 : vector<1x1x128xbf16> to vector<1x128xbf16>
    %5 = arith.extf %4 : vector<1x128xbf16> to vector<1x128xf32>
    %6 = vector.broadcast %5 : vector<1x128xf32> to vector<16x128xf32>
    %7 = arith.mulf %2, %6 : vector<16x128xf32>
    %c1 = arith.constant 1 : index
    %c0_5 = arith.constant 0 : index
    %c0_6 = arith.constant 0 : index
    %8 = vector.load %arg1[%c1, %c0_5, %c0_6] : memref<9x16x128xbf16, #tpu.memory_space<vmem>>, vector<1x16x128xbf16>
    %9 = vector.shape_cast %8 : vector<1x16x128xbf16> to vector<16x128xbf16>
    %10 = arith.extf %9 : vector<16x128xbf16> to vector<16x128xf32>
    %c1_7 = arith.constant 1 : index
    %c0_8 = arith.constant 0 : index
    %c0_9 = arith.constant 0 : index
    %11 = vector.load %arg2[%c1_7, %c0_8, %c0_9] : memref<9x1x128xbf16, #tpu.memory_space<vmem>>, vector<1x1x128xbf16>
    %12 = vector.shape_cast %11 : vector<1x1x128xbf16> to vector<1x128xbf16>
    %13 = arith.extf %12 : vector<1x128xbf16> to vector<1x128xf32>
    %14 = vector.broadcast %13 : vector<1x128xf32> to vector<16x128xf32>
    %15 = arith.mulf %10, %14 : vector<16x128xf32>
    %16 = arith.addf %7, %15 : vector<16x128xf32>
    %c2 = arith.constant 2 : index
    %c0_10 = arith.constant 0 : index
    %c0_11 = arith.constant 0 : index
    %17 = vector.load %arg1[%c2, %c0_10, %c0_11] : memref<9x16x128xbf16, #tpu.memory_space<vmem>>, vector<1x16x128xbf16>
    %18 = vector.shape_cast %17 : vector<1x16x128xbf16> to vector<16x128xbf16>
    %19 = arith.extf %18 : vector<16x128xbf16> to vector<16x128xf32>
    %c2_12 = arith.constant 2 : index
    %c0_13 = arith.constant 0 : index
    %c0_14 = arith.constant 0 : index
    %20 = vector.load %arg2[%c2_12, %c0_13, %c0_14] : memref<9x1x128xbf16, #tpu.memory_space<vmem>>, vector<1x1x128xbf16>
    %21 = vector.shape_cast %20 : vector<1x1x128xbf16> to vector<1x128xbf16>
    %22 = arith.extf %21 : vector<1x128xbf16> to vector<1x128xf32>
    %23 = vector.broadcast %22 : vector<1x128xf32> to vector<16x128xf32>
    %24 = arith.mulf %19, %23 : vector<16x128xf32>
    %25 = arith.addf %16, %24 : vector<16x128xf32>
    %c3 = arith.constant 3 : index
    %c0_15 = arith.constant 0 : index
    %c0_16 = arith.constant 0 : index
    %26 = vector.load %arg1[%c3, %c0_15, %c0_16] : memref<9x16x128xbf16, #tpu.memory_space<vmem>>, vector<1x16x128xbf16>
    %27 = vector.shape_cast %26 : vector<1x16x128xbf16> to vector<16x128xbf16>
    %28 = arith.extf %27 : vector<16x128xbf16> to vector<16x128xf32>
    %c3_17 = arith.constant 3 : index
    %c0_18 = arith.constant 0 : index
    %c0_19 = arith.constant 0 : index
    %29 = vector.load %arg2[%c3_17, %c0_18, %c0_19] : memref<9x1x128xbf16, #tpu.memory_space<vmem>>, vector<1x1x128xbf16>
    %30 = vector.shape_cast %29 : vector<1x1x128xbf16> to vector<1x128xbf16>
    %31 = arith.extf %30 : vector<1x128xbf16> to vector<1x128xf32>
    %32 = vector.broadcast %31 : vector<1x128xf32> to vector<16x128xf32>
    %33 = arith.mulf %28, %32 : vector<16x128xf32>
    %34 = arith.addf %25, %33 : vector<16x128xf32>
    %c4 = arith.constant 4 : index
    %c0_20 = arith.constant 0 : index
    %c0_21 = arith.constant 0 : index
    %35 = vector.load %arg1[%c4, %c0_20, %c0_21] : memref<9x16x128xbf16, #tpu.memory_space<vmem>>, vector<1x16x128xbf16>
    %36 = vector.shape_cast %35 : vector<1x16x128xbf16> to vector<16x128xbf16>
    %37 = arith.extf %36 : vector<16x128xbf16> to vector<16x128xf32>
    %c4_22 = arith.constant 4 : index
    %c0_23 = arith.constant 0 : index
    %c0_24 = arith.constant 0 : index
    %38 = vector.load %arg2[%c4_22, %c0_23, %c0_24] : memref<9x1x128xbf16, #tpu.memory_space<vmem>>, vector<1x1x128xbf16>
    %39 = vector.shape_cast %38 : vector<1x1x128xbf16> to vector<1x128xbf16>
    %40 = arith.extf %39 : vector<1x128xbf16> to vector<1x128xf32>
    %41 = vector.broadcast %40 : vector<1x128xf32> to vector<16x128xf32>
    %42 = arith.mulf %37, %41 : vector<16x128xf32>
    %43 = arith.addf %34, %42 : vector<16x128xf32>
    %c5 = arith.constant 5 : index
    %c0_25 = arith.constant 0 : index
    %c0_26 = arith.constant 0 : index
    %44 = vector.load %arg1[%c5, %c0_25, %c0_26] : memref<9x16x128xbf16, #tpu.memory_space<vmem>>, vector<1x16x128xbf16>
    %45 = vector.shape_cast %44 : vector<1x16x128xbf16> to vector<16x128xbf16>
    %46 = arith.extf %45 : vector<16x128xbf16> to vector<16x128xf32>
    %c5_27 = arith.constant 5 : index
    %c0_28 = arith.constant 0 : index
    %c0_29 = arith.constant 0 : index
    %47 = vector.load %arg2[%c5_27, %c0_28, %c0_29] : memref<9x1x128xbf16, #tpu.memory_space<vmem>>, vector<1x1x128xbf16>
    %48 = vector.shape_cast %47 : vector<1x1x128xbf16> to vector<1x128xbf16>
    %49 = arith.extf %48 : vector<1x128xbf16> to vector<1x128xf32>
    %50 = vector.broadcast %49 : vector<1x128xf32> to vector<16x128xf32>
    %51 = arith.mulf %46, %50 : vector<16x128xf32>
    %52 = arith.addf %43, %51 : vector<16x128xf32>
    %c6 = arith.constant 6 : index
    %c0_30 = arith.constant 0 : index
    %c0_31 = arith.constant 0 : index
    %53 = vector.load %arg1[%c6, %c0_30, %c0_31] : memref<9x16x128xbf16, #tpu.memory_space<vmem>>, vector<1x16x128xbf16>
    %54 = vector.shape_cast %53 : vector<1x16x128xbf16> to vector<16x128xbf16>
    %55 = arith.extf %54 : vector<16x128xbf16> to vector<16x128xf32>
    %c6_32 = arith.constant 6 : index
    %c0_33 = arith.constant 0 : index
    %c0_34 = arith.constant 0 : index
    %56 = vector.load %arg2[%c6_32, %c0_33, %c0_34] : memref<9x1x128xbf16, #tpu.memory_space<vmem>>, vector<1x1x128xbf16>
    %57 = vector.shape_cast %56 : vector<1x1x128xbf16> to vector<1x128xbf16>
    %58 = arith.extf %57 : vector<1x128xbf16> to vector<1x128xf32>
    %59 = vector.broadcast %58 : vector<1x128xf32> to vector<16x128xf32>
    %60 = arith.mulf %55, %59 : vector<16x128xf32>
    %61 = arith.addf %52, %60 : vector<16x128xf32>
    %c7 = arith.constant 7 : index
    %c0_35 = arith.constant 0 : index
    %c0_36 = arith.constant 0 : index
    %62 = vector.load %arg1[%c7, %c0_35, %c0_36] : memref<9x16x128xbf16, #tpu.memory_space<vmem>>, vector<1x16x128xbf16>
    %63 = vector.shape_cast %62 : vector<1x16x128xbf16> to vector<16x128xbf16>
    %64 = arith.extf %63 : vector<16x128xbf16> to vector<16x128xf32>
    %c7_37 = arith.constant 7 : index
    %c0_38 = arith.constant 0 : index
    %c0_39 = arith.constant 0 : index
    %65 = vector.load %arg2[%c7_37, %c0_38, %c0_39] : memref<9x1x128xbf16, #tpu.memory_space<vmem>>, vector<1x1x128xbf16>
    %66 = vector.shape_cast %65 : vector<1x1x128xbf16> to vector<1x128xbf16>
    %67 = arith.extf %66 : vector<1x128xbf16> to vector<1x128xf32>
    %68 = vector.broadcast %67 : vector<1x128xf32> to vector<16x128xf32>
    %69 = arith.mulf %64, %68 : vector<16x128xf32>
    %70 = arith.addf %61, %69 : vector<16x128xf32>
    %c8 = arith.constant 8 : index
    %c0_40 = arith.constant 0 : index
    %c0_41 = arith.constant 0 : index
    %71 = vector.load %arg1[%c8, %c0_40, %c0_41] : memref<9x16x128xbf16, #tpu.memory_space<vmem>>, vector<1x16x128xbf16>
    %72 = vector.shape_cast %71 : vector<1x16x128xbf16> to vector<16x128xbf16>
    %73 = arith.extf %72 : vector<16x128xbf16> to vector<16x128xf32>
    %c8_42 = arith.constant 8 : index
    %c0_43 = arith.constant 0 : index
    %c0_44 = arith.constant 0 : index
    %74 = vector.load %arg2[%c8_42, %c0_43, %c0_44] : memref<9x1x128xbf16, #tpu.memory_space<vmem>>, vector<1x1x128xbf16>
    %75 = vector.shape_cast %74 : vector<1x1x128xbf16> to vector<1x128xbf16>
    %76 = arith.extf %75 : vector<1x128xbf16> to vector<1x128xf32>
    %77 = vector.broadcast %76 : vector<1x128xf32> to vector<16x128xf32>
    %78 = arith.mulf %73, %77 : vector<16x128xf32>
    %79 = arith.addf %70, %78 : vector<16x128xf32>
    %c0_45 = arith.constant 0 : index
    %c0_46 = arith.constant 0 : index
    %80 = vector.load %arg3[%c0_45, %c0_46] : memref<1x128xf32, #tpu.memory_space<vmem>>, vector<1x128xf32>
    %81 = vector.broadcast %80 : vector<1x128xf32> to vector<16x128xf32>
    %82 = arith.addf %79, %81 : vector<16x128xf32>
    %cst = arith.constant 5.000000e-01 : f32
    %83 = vector.broadcast %cst : f32 to vector<16x128xf32>
    %84 = arith.mulf %83, %82 : vector<16x128xf32>
    %cst_47 = arith.constant 0.707106769 : f32
    %85 = vector.broadcast %cst_47 : f32 to vector<16x128xf32>
    %86 = arith.mulf %82, %85 : vector<16x128xf32>
    %87 = math.absf %86 : vector<16x128xf32>
    %cst_48 = arith.constant 0.327591091 : f32
    %88 = vector.broadcast %cst_48 : f32 to vector<16x128xf32>
    %89 = arith.mulf %88, %87 : vector<16x128xf32>
    %cst_49 = arith.constant 1.000000e+00 : f32
    %90 = vector.broadcast %cst_49 : f32 to vector<16x128xf32>
    %91 = arith.addf %90, %89 : vector<16x128xf32>
    %cst_50 = arith.constant 1.000000e+00 : f32
    %92 = vector.broadcast %cst_50 : f32 to vector<16x128xf32>
    %93 = arith.divf %92, %91 : vector<16x128xf32>
    %cst_51 = arith.constant 1.06140542 : f32
    %94 = vector.broadcast %cst_51 : f32 to vector<16x128xf32>
    %95 = arith.mulf %94, %93 : vector<16x128xf32>
    %cst_52 = arith.constant 1.45315206 : f32
    %96 = vector.broadcast %cst_52 : f32 to vector<16x128xf32>
    %97 = arith.subf %95, %96 : vector<16x128xf32>
    %98 = arith.mulf %97, %93 : vector<16x128xf32>
    %cst_53 = arith.constant 1.42141378 : f32
    %99 = vector.broadcast %cst_53 : f32 to vector<16x128xf32>
    %100 = arith.addf %98, %99 : vector<16x128xf32>
    %101 = arith.mulf %100, %93 : vector<16x128xf32>
    %cst_54 = arith.constant 0.284496725 : f32
    %102 = vector.broadcast %cst_54 : f32 to vector<16x128xf32>
    %103 = arith.subf %101, %102 : vector<16x128xf32>
    %104 = arith.mulf %103, %93 : vector<16x128xf32>
    %cst_55 = arith.constant 0.254829586 : f32
    %105 = vector.broadcast %cst_55 : f32 to vector<16x128xf32>
    %106 = arith.addf %104, %105 : vector<16x128xf32>
    %107 = arith.mulf %106, %93 : vector<16x128xf32>
    %cst_56 = arith.constant 0.000000e+00 : f32
    %108 = vector.broadcast %cst_56 : f32 to vector<16x128xf32>
    %109 = arith.subf %108, %87 : vector<16x128xf32>
    %110 = arith.mulf %109, %87 : vector<16x128xf32>
    %111 = math.exp %110 : vector<16x128xf32>
    %112 = arith.mulf %107, %111 : vector<16x128xf32>
    %cst_57 = arith.constant 1.000000e+00 : f32
    %113 = vector.broadcast %cst_57 : f32 to vector<16x128xf32>
    %114 = arith.subf %113, %112 : vector<16x128xf32>
    %cst_58 = arith.constant 0.000000e+00 : f32
    %115 = vector.broadcast %cst_58 : f32 to vector<16x128xf32>
    %116 = arith.cmpf olt, %86, %115 : vector<16x128xf32>
    %cst_59 = arith.constant 0.000000e+00 : f32
    %117 = vector.broadcast %cst_59 : f32 to vector<16x128xf32>
    %118 = arith.subf %117, %114 : vector<16x128xf32>
    %119 = arith.select %116, %118, %114 : vector<16x128xi1>, vector<16x128xf32>
    %cst_60 = arith.constant 1.000000e+00 : f32
    %120 = vector.broadcast %cst_60 : f32 to vector<16x128xf32>
    %121 = arith.addf %120, %119 : vector<16x128xf32>
    %122 = arith.mulf %84, %121 : vector<16x128xf32>
    %123 = arith.truncf %122 : vector<16x128xf32> to vector<16x128xbf16>
    %c0_61 = arith.constant 0 : index
    %c0_62 = arith.constant 0 : index
    %124 = vector.load %arg4[%c0_61, %c0_62] : memref<128x32xbf16, #tpu.memory_space<vmem>>, vector<128x32xbf16>
    %cst_63 = arith.constant dense<0.000000e+00> : vector<16x32xf32>
    %125 = tpu.matmul %123, %124, %cst_63 {dimension_numbers = #tpu.dot_dimension_numbers<[1], [0], [0], [1], [0, 0, 1, 1], [], []>} : vector<16x128xbf16>, vector<128x32xbf16>, vector<16x32xf32> -> vector<16x32xf32>
    %c0_64 = arith.constant 0 : index
    %c0_65 = arith.constant 0 : index
    %126 = vector.load %arg5[%c0_64, %c0_65] : memref<1x32xf32, #tpu.memory_space<vmem>>, vector<1x32xf32>
    %127 = vector.broadcast %126 : vector<1x32xf32> to vector<16x32xf32>
    %128 = arith.addf %125, %127 : vector<16x32xf32>
    %c0_66 = arith.constant 0 : index
    %c0_67 = arith.constant 0 : index
    %129 = vector.load %arg6[%c0_66, %c0_67] : memref<16x32xbf16, #tpu.memory_space<vmem>>, vector<16x32xbf16>
    %130 = arith.extf %129 : vector<16x32xbf16> to vector<16x32xf32>
    %131 = arith.addf %128, %130 : vector<16x32xf32>
    %132 = arith.truncf %131 : vector<16x32xf32> to vector<16x32xbf16>
    %c0_68 = arith.constant 0 : index
    %c0_69 = arith.constant 0 : index
    %133 = vector.load %arg7[%c0_68, %c0_69] : memref<16x32xbf16, #tpu.memory_space<vmem>>, vector<16x32xbf16>
    tpu.vector_store %arg7[%c0_68, %c0_69], %132 {strides = array<i32>} : memref<16x32xbf16, #tpu.memory_space<vmem>>, vector<16x32xbf16>,
    return
  }
  func.func @transform_0(%arg0: i32) -> (i32, i32, i32) {
    %c0_i32 = arith.constant 0 : i32
    %c0_i32_0 = arith.constant 0 : i32
    %c0_i32_1 = arith.constant 0 : i32
    return %c0_i32, %arg0, %c0_i32_0 : i32, i32, i32
  }
  func.func @transform_1(%arg0: i32) -> (i32, i32, i32) {
    %c0_i32 = arith.constant 0 : i32
    %c0_i32_0 = arith.constant 0 : i32
    %c0_i32_1 = arith.constant 0 : i32
    %c0_i32_2 = arith.constant 0 : i32
    return %c0_i32, %c0_i32_0, %c0_i32_1 : i32, i32, i32
  }
  func.func @transform_2(%arg0: i32) -> (i32, i32) {
    %c0_i32 = arith.constant 0 : i32
    %c0_i32_0 = arith.constant 0 : i32
    %c0_i32_1 = arith.constant 0 : i32
    return %c0_i32, %c0_i32_0 : i32, i32
  }
  func.func @transform_3(%arg0: i32) -> (i32, i32) {
    %c0_i32 = arith.constant 0 : i32
    %c0_i32_0 = arith.constant 0 : i32
    %c0_i32_1 = arith.constant 0 : i32
    return %c0_i32, %c0_i32_0 : i32, i32
  }
  func.func @transform_4(%arg0: i32) -> (i32, i32) {
    %c0_i32 = arith.constant 0 : i32
    %c0_i32_0 = arith.constant 0 : i32
    %c0_i32_1 = arith.constant 0 : i32
    return %c0_i32, %c0_i32_0 : i32, i32
  }
  func.func @transform_5(%arg0: i32) -> (i32, i32) {
    %c0_i32 = arith.constant 0 : i32
    %c0_i32_0 = arith.constant 0 : i32
    return %arg0, %c0_i32 : i32, i32
  }
  func.func @transform_6(%arg0: i32) -> (i32, i32) {
    %c0_i32 = arith.constant 0 : i32
    %c0_i32_0 = arith.constant 0 : i32
    return %arg0, %c0_i32 : i32, i32
  }
}

</mosaic_0001>

<bundles_post_ra>
// kernel: backbone_forward.11
= control target key start
LH: loop header
LB: loop body
LE: loop exit
PB: predicated region body
PF: predicated region fallthrough
CT: control target
= control target key end

     0   :  { %s2024_s12 = smov 0   ;;  %s2740_s0 = inlined_call_operand.vmem [shape: bf16[512,27], index: 0, kind: input, shape index: {}]   ;;  %s2741_s1 = inlined_call_operand.vmem [shape: bf16[27,8], index: 1, kind: input, shape index: {}]   ;;  %s2742_s2 = inlined_call_operand.vmem [shape: f32[1,8], index: 2, kind: input, shape index: {}]   ;;  %s2743_s3 = inlined_call_operand.vmem [shape: bf16[512,8], index: 3, kind: output, shape index: {}]  }
   0x1 LB: > { %s1607_s13 = sadd.s32 4294967295, %s2001_s12   ;;  %p1611_p0 = scmp.ge.s32.totalorder %s2001_s12, 1  ;;  %s2001_s12 = sphi %s2024_s12, %s13_s12  }
   0x2   : > { %p138_p1 = scmp.lt.s32.totalorder %s2001_s12, 3 }
   0x4   : > { %p139_p2 = pnand %p1611_p0, %p138_p1 }
   0x5   : > { %s1612_s16 = sshll.u32 (!%p139_p2), %s1607_s13, 5 }
   0x6   : > { %142 = sbr.rel (%p139_p2) target bundleno = 472 (0x1d8), region = 32  ;;  %p163_p3 = scmp.lt.s32.totalorder (!%p139_p2), %s1612_s16, 63 }
   0xb   : > { %v1848_v0 = vld [vmem:[%s2741_s1 + $0x8] sm:$0x3f]   ;;  %vm358_vm0 = vcmask 1044480   ;;  %vm359_vm1 = vcmask 1045504   ;;  %v2003_v1 = vmov 65535   ;;  %v1849_v5 = vld [vmem:[%s2741_s1] sm:$0xff]  }
   0xc   : > { %v360_v2 = vsel %vm358_vm0, 4294967295, %v2003_v1  ;;  %s2745_s16 = smov (!%p163_p3, %s1612_s16), 63  ;;  %vm309_vm2 = vcmask 220160   ;;  %v2083_v22 = vld [vmem:[%s2742_s2] ss:$0 sm:$0xff]  ;;  %vm1518_vm6 = vcmask 60416  }
   0xd   : > { %v361_v3 = vsel %vm359_vm1, %v360_v2, 0  ;;  %s1613_s19 = sshll.u32 %s2745_s16, 2 }
   0xe   : > { %v363_v4 = vand.u32 %v1848_v0, %v361_v3  ;;  %s2046_s22 = scalar_lea.vmem %s2740_s0, %s1613_s19  ;;  %s2243_s27 = scalar_lea.vmem %s2743_s3, %s1613_s19 }
   0xf   : > { %v1850_v6 = vld [vmem:[%s2046_s22] sm:$0xff]   ;;  %v1852_v8 = vld [vmem:[%s2046_s22 + $0x8] sm:$0xff]   ;;  %v1854_v10 = vld [vmem:[%s2046_s22 + $0x10] sm:$0xff]  }
  0x10   : > { %1799 = vmatprep.subr.bf16.mxu0 %v363_v4  ;;  %1835 = vmatprep.subr.bf16.mxu1 %v363_v4  ;;  %v1851_v7 = vld [vmem:[%s2046_s22 + $0x40] sm:$0xff]   ;;  %v1853_v9 = vld [vmem:[%s2046_s22 + $0x48] sm:$0xff]   ;;  %v1855_v11 = vld [vmem:[%s2046_s22 + $0x50] sm:$0xff]  }
  0x11   : > { %1800 = vmatpush3.bf16.msra.mxu0 %v363_v4  ;;  %1837 = vmatpush3.bf16.msra.mxu1 %v363_v4  ;;  %v1856_v12 = vld [vmem:[%s2046_s22 + $0x18] sm:$0xff]   ;;  %v1858_v14 = vld [vmem:[%s2046_s22 + $0x20] sm:$0xff]   ;;  %v1860_v16 = vld [vmem:[%s2046_s22 + $0x28] sm:$0xff]  }
  0x12   : > { %1801 = vmatprep.subr.bf16.mxu0 %v1849_v5  ;;  %1836 = vmatprep.subr.bf16.mxu1 %v1849_v5  ;;  %v1857_v13 = vld [vmem:[%s2046_s22 + $0x58] sm:$0xff]   ;;  %v1859_v15 = vld [vmem:[%s2046_s22 + $0x60] sm:$0xff]   ;;  %v1861_v17 = vld [vmem:[%s2046_s22 + $0x68] sm:$0xff]  }
  0x13   : > { %1803 = vmatprep.mubr.msk.bf16.mxu0 %vm309_vm2, %v1850_v6  ;;  %1819 = vmatprep.mubr.msk.bf16.mxu1 %vm309_vm2, %v1851_v7  ;;  %v1862_v18 = vld [vmem:[%s2046_s22 + $0x30] sm:$0xff]   ;;  %v1864_v20 = vld [vmem:[%s2046_s22 + $0x38] sm:$0xff]  }
  0x14   : > { %v1863_v19 = vld [vmem:[%s2046_s22 + $0x70] sm:$0xff]   ;;  %v1865_v21 = vld [vmem:[%s2046_s22 + $0x78] sm:$0xff]  }
  0x15   : > { %1802 = vmatpush3.bf16.msra.mxu0 %v1849_v5  ;;  %1838 = vmatpush3.bf16.msra.mxu1 %v1849_v5 }
  0x18   : > { %1804 = vmatmul.mubr.msk.bf16.vlgmr.msra.gmra.mxu0 %vm309_vm2, %v1852_v8  ;;  %1820 = vmatmul.mubr.msk.bf16.vlgmr.msra.gmra.mxu1 %vm309_vm2, %v1853_v9 }
  0x19   : > { %1807 = vmatprep.mubr.msk.bf16.mxu0 %vm309_vm2, %v1854_v10  ;;  %1823 = vmatprep.mubr.msk.bf16.mxu1 %vm309_vm2, %v1855_v11 }
  0x20   : > { %1808 = vmatmul.mubr.msk.bf16.gmra.mxu0 %vm309_vm2, %v1856_v12  ;;  %1824 = vmatmul.mubr.msk.bf16.gmra.mxu1 %vm309_vm2, %v1857_v13 }
  0x21   : > { %1811 = vmatprep.mubr.msk.bf16.mxu0 %vm309_vm2, %v1858_v14  ;;  %1827 = vmatprep.mubr.msk.bf16.mxu1 %vm309_vm2, %v1859_v15 }
  0x28   : > { %1812 = vmatmul.mubr.msk.bf16.gmra.mxu0 %vm309_vm2, %v1860_v16  ;;  %1828 = vmatmul.mubr.msk.bf16.gmra.mxu1 %vm309_vm2, %v1861_v17 }
  0x29   : > { %1815 = vmatprep.mubr.msk.bf16.mxu0 %vm309_vm2, %v1862_v18  ;;  %1831 = vmatprep.mubr.msk.bf16.mxu1 %vm309_vm2, %v1863_v19 }
  0x30   : > { %1816 = vmatmul.mubr.msk.bf16.gmra.mxu0 %vm309_vm2, %v1864_v20  ;;  %1832 = vmatmul.mubr.msk.bf16.gmra.mxu1 %vm309_vm2, %v1865_v21 }
  0xd8   : > { %v1805_v23 = vpop.f32.mrf.mxu0  ;;  %v1821_v24 = vpop.f32.mrf.mxu1 }
  0xd9   : > { %v408_v25 = vadd.f32 %v1805_v23, %v2083_v22  ;;  %v472_v26 = vadd.f32 %v1821_v24, %v2083_v22 }
  0xda   : > { %v399_v27 = vpop.f32.mrf.mxu0  ;;  %v463_v28 = vpop.f32.mrf.mxu1 }
  0xdb   : > { %v2087_v29 = vmul.f32 0.70710677, %v408_v25  ;;  %v2089_v30 = vmul.f32 0.70710677, %v472_v26  ;;  %v400_v31 = vadd.f32 %v2083_v22, %v399_v27  ;;  %v2093_v32 = vadd.f32 %v2083_v22, %v463_v28 }
  0xdc   : > { %v1806_v40 = vpop.f32.mrf.mxu0  ;;  %v1822_v52 = vpop.f32.mrf.mxu1  ;;  %v2110_v1 = vmul.f32 0.5, %v408_v25  ;;  %v2112_v2 = vmul.f32 0.5, %v472_v26 }
  0xdd   : > { %v592_v33 = vand.u32 2147483647, %v2087_v29  ;;  %v608_v34 = vand.u32 2147483647, %v2089_v30  ;;  %v2097_v35 = vmul.f32 0.70710677, %v400_v31  ;;  %v411_v51 = vadd.f32 %v1806_v40, %v2083_v22 }
  0xde   : > { %v2100_v36 = vmul.f32 0.70710677, %v2093_v32  ;;  %v402_v53 = vpop.f32.mrf.mxu0  ;;  %v475_v59 = vadd.f32 %v1822_v52, %v2083_v22  ;;  %v466_v0 = vpop.f32.mrf.mxu1  ;;  %v2118_v8 = vmul.f32 0.5, %v400_v31  ;;  %vm1232_vm3 = vcmp.lt.f32.partialorder %v2087_v29, 0.0 }
  0xdf   : > { %v624_v37 = vmul.f32 0.3275911, %v592_v33  ;;  %v1040_v38 = vsub.f32 0.0, %v592_v33  ;;  %v640_v39 = vmul.f32 0.3275911, %v608_v34  ;;  %v1056_v41 = vsub.f32 0.0, %v608_v34 }
  0xe0   : > { %v590_v42 = vand.u32 2147483647, %v2097_v35  ;;  %v606_v43 = vand.u32 2147483647, %v2100_v36  ;;  %v2105_v57 = vmul.f32 0.70710677, %v411_v51  ;;  %v403_v60 = vadd.f32 %v2083_v22, %v402_v53  ;;  %v1809_v18 = vpop.f32.mrf.mxu0 }
  0xe1   : > { %v656_v44 = vadd.f32 1.0, %v624_v37  ;;  %v672_v45 = vadd.f32 1.0, %v640_v39  ;;  %v1072_v49 = vmul.f32 %v1040_v38, %v592_v33  ;;  %v1088_v54 = vmul.f32 %v1056_v41, %v608_v34  ;;  %v1825_v38 = vpop.f32.mrf.mxu1 }
  0xe2   : > { %v622_v46 = vmul.f32 0.3275911, %v590_v42  ;;  %v1038_v47 = vsub.f32 0.0, %v590_v42  ;;  %v638_v48 = vmul.f32 0.3275911, %v606_v43  ;;  %v1054_v50 = vsub.f32 0.0, %v606_v43 }
  0xe3   : > { %1866 = vrcp.f32 %v656_v44  ;;  %v1106_v61 = vmul.f32 1.442695, %v1072_v49  ;;  %v593_v63 = vand.u32 2147483647, %v2105_v57  ;;  %v1138_v3 = vmul.f32 1.442695, %v1088_v54 }
  0xe4   : > { %1868 = vrcp.f32 %v672_v45  ;;  %v654_v55 = vadd.f32 1.0, %v622_v46  ;;  %v670_v56 = vadd.f32 1.0, %v638_v48  ;;  %v1070_v58 = vmul.f32 %v1038_v47, %v590_v42 }
  0xe5   : > { %v1086_v62 = vmul.f32 %v1054_v50, %v606_v43  ;;  %v2114_v4 = vmul.f32 0.70710677, %v475_v59  ;;  %v625_v5 = vmul.f32 0.3275911, %v593_v63  ;;  %v1041_v6 = vsub.f32 0.0, %v593_v63 }
  0xe6   : > { %1870 = vrcp.f32 %v654_v55  ;;  %v2116_v7 = vmul.f32 0.70710677, %v403_v60  ;;  %v1102_v9 = vmul.f32 1.442695, %v1070_v58  ;;  %v2122_v11 = vadd.f32 %v2083_v22, %v466_v0  ;;  %v415_v58 = vpop.f32.mrf.mxu0 }
  0xe7   : > { %1872 = vrcp.f32 %v670_v56  ;;  %v609_v10 = vand.u32 2147483647, %v2114_v4  ;;  %v1134_v12 = vmul.f32 1.442695, %v1086_v62  ;;  %v657_v13 = vadd.f32 1.0, %v625_v5 }
  0xe8   : > { %1874 = vpow2.f32 %v1106_v61  ;;  %v591_v14 = vand.u32 2147483647, %v2116_v7  ;;  %v2126_v17 = vmul.f32 0.70710677, %v2122_v11  ;;  %v1073_v19 = vmul.f32 %v1041_v6, %v593_v63 }
  0xe9   : > { %1876 = vpow2.f32 %v1138_v3  ;;  %v641_v15 = vmul.f32 0.3275911, %v609_v10  ;;  %v1057_v16 = vsub.f32 0.0, %v609_v10  ;;  %v2130_v28 = vadd.f32 %v1809_v18, %v2083_v22 }
  0xea   : > { %1878 = vrcp.f32 %v657_v13  ;;  %v623_v20 = vmul.f32 0.3275911, %v591_v14  ;;  %v1039_v21 = vsub.f32 0.0, %v591_v14  ;;  %v607_v25 = vand.u32 2147483647, %v2126_v17 }
  0xeb   : > { %1880 = vpow2.f32 %v1102_v9  ;;  %v673_v23 = vadd.f32 1.0, %v641_v15  ;;  %v1089_v24 = vmul.f32 %v1057_v16, %v609_v10  ;;  %v2135_v33 = vmul.f32 0.5, %v2093_v32 }
  0xec   : > { %1882 = vpow2.f32 %v1134_v12  ;;  %v655_v26 = vadd.f32 1.0, %v623_v20  ;;  %v1071_v27 = vmul.f32 %v1039_v21, %v591_v14  ;;  %v639_v34 = vmul.f32 0.3275911, %v607_v25 }
  0xed   : > { %1884 = vrcp.f32 %v673_v23  ;;  %v1055_v37 = vsub.f32 0.0, %v607_v25  ;;  %v2140_v41 = vmul.f32 0.5, %v411_v51  ;;  %v1108_v42 = vmul.f32 1.442695, %v1073_v19 }
  0xee   : > { %1886 = vrcp.f32 %v655_v26  ;;  %v1140_v44 = vmul.f32 1.442695, %v1089_v24  ;;  %v671_v45 = vadd.f32 1.0, %v639_v34  ;;  %v1104_v32 = vmul.f32 1.442695, %v1071_v27 }
  0xef   : > { %v1087_v46 = vmul.f32 %v1055_v37, %v607_v25  ;;  %v2144_v48 = vmul.f32 0.70710677, %v2130_v28  ;;  %v2147_v49 = vadd.f32 %v1825_v38, %v2083_v22  ;;  %v2151_v51 = vmul.f32 0.5, %v475_v59 }
  0xf0   : > { %v2132_v31 = vpop.eup %1866  ;;  %v2153_v53 = vmul.f32 0.5, %v403_v60  ;;  %1888 = vrcp.f32 %v671_v45  ;;  %v2166_v12 = vadd.f32 %v2083_v22, %v415_v58  ;;  %vm1248_vm4 = vcmp.lt.f32.partialorder %v2089_v30, 0.0 }
  0xf1   : > { %v2137_v39 = vpop.eup %1868  ;;  %v752_v40 = vmul.f32 1.0614054, %v2132_v31  ;;  %1890 = vpow2.f32 %v1108_v42  ;;  %v596_v56 = vand.u32 2147483647, %v2144_v48  ;;  %v1136_v63 = vmul.f32 1.442695, %v1087_v46 }
  0xf2   : > { %v768_v43 = vmul.f32 1.0614054, %v2137_v39  ;;  %1892 = vpow2.f32 %v1140_v44  ;;  %v2162_v59 = vmul.f32 0.70710677, %v2147_v49  ;;  %vm1230_vm5 = vcmp.lt.f32.partialorder %v2097_v35, 0.0 }
  0xf3   : > { %v1653_v47 = vadd.f32 -1.4531521, %v752_v40  ;;  %v2149_v50 = vpop.eup %1870  ;;  %1894 = vpow2.f32 %v1104_v32  ;;  %v628_v9 = vmul.f32 0.3275911, %v596_v56  ;;  %v1044_v10 = vsub.f32 0.0, %v596_v56 }
  0xf4   : > { %v1669_v52 = vadd.f32 -1.4531521, %v768_v43  ;;  %v750_v55 = vmul.f32 1.0614054, %v2149_v50  ;;  %v2158_v61 = vpop.eup %1872  ;;  %v2171_v18 = vand.u32 2147483647, %v2162_v59  ;;  %1896 = vpow2.f32 %v1136_v63 }
  0xf5   : > { %v816_v54 = vmul.f32 %v2132_v31, %v1653_v47  ;;  %v766_v3 = vmul.f32 1.0614054, %v2158_v61  ;;  %v1875_v5 = vpop.eup %1874  ;;  %v660_v21 = vadd.f32 1.0, %v628_v9  ;;  %v1076_v23 = vmul.f32 %v1044_v10, %v596_v56 }
  0xf6   : > { %v832_v62 = vmul.f32 %v2137_v39, %v1669_v52  ;;  %v1651_v0 = vadd.f32 -1.4531521, %v750_v55  ;;  %v1877_v13 = vpop.eup %1876  ;;  %v644_v42 = vmul.f32 0.3275911, %v2171_v18  ;;  %vm1246_vm7 = vcmp.lt.f32.partialorder %v2100_v36, 0.0 }
  0xf7   : > { %v848_v60 = vadd.f32 1.4214138, %v816_v54  ;;  %v1667_v16 = vadd.f32 -1.4531521, %v766_v3  ;;  %v2173_v19 = vpop.eup %1878  ;;  %1898 = vrcp.f32 %v660_v21  ;;  %v1114_v40 = vmul.f32 1.442695, %v1076_v23 }
  0xf8   : > { %v864_v6 = vadd.f32 1.4214138, %v832_v62  ;;  %v814_v15 = vmul.f32 %v2149_v50, %v1651_v0  ;;  %v2176_v24 = vpop.eup %1880  ;;  %v753_v34 = vmul.f32 1.0614054, %v2173_v19  ;;  %v676_v55 = vadd.f32 1.0, %v644_v42 }
  0xf9   : > { %v880_v14 = vmul.f32 %v2132_v31, %v848_v60  ;;  %v830_v27 = vmul.f32 %v2158_v61, %v1667_v16  ;;  %v2180_v37 = vpop.eup %1882  ;;  %1900 = vpow2.f32 %v1114_v40  ;;  %vm1233_vm8 = vcmp.lt.f32.partialorder %v2105_v57, 0.0 }
  0xfa   : > { %v896_v20 = vmul.f32 %v2137_v39, %v864_v6  ;;  %v846_v26 = vadd.f32 1.4214138, %v814_v15  ;;  %v2183_v43 = vpop.eup %1884  ;;  %v1654_v47 = vadd.f32 -1.4531521, %v753_v34  ;;  %1902 = vrcp.f32 %v676_v55 }
  0xfb   : > { %v1685_v25 = vadd.f32 -0.28449672, %v880_v14  ;;  %v862_v46 = vadd.f32 1.4214138, %v830_v27  ;;  %v2187_v32 = vpop.eup %1886  ;;  %v769_v54 = vmul.f32 1.0614054, %v2183_v43 }
  0xfc   : > { %v1701_v38 = vadd.f32 -0.28449672, %v896_v20  ;;  %v878_v45 = vmul.f32 %v2149_v50, %v846_v26  ;;  %v817_v63 = vmul.f32 %v2173_v19, %v1654_v47  ;;  %v751_v3 = vmul.f32 1.0614054, %v2187_v32 }
  0xfd   : > { %v944_v44 = vmul.f32 %v2132_v31, %v1685_v25  ;;  %v894_v62 = vmul.f32 %v2158_v61, %v862_v46  ;;  %v1670_v0 = vadd.f32 -1.4531521, %v769_v54  ;;  %v2195_v6 = vpop.eup %1888  ;;  %vm1249_vm9 = vcmp.lt.f32.partialorder %v2114_v4, 0.0 }
  0xfe   : > { %v960_v52 = vmul.f32 %v2137_v39, %v1701_v38  ;;  %v1683_v58 = vadd.f32 -0.28449672, %v878_v45  ;;  %v849_v15 = vadd.f32 1.4214138, %v817_v63  ;;  %v1891_v16 = vpop.eup %1890  ;;  %v1652_v23 = vadd.f32 -1.4531521, %v751_v3 }
  0xff   : > { %v976_v56 = vadd.f32 0.2548296, %v944_v44  ;;  %v1699_v14 = vadd.f32 -0.28449672, %v894_v62  ;;  %v833_v21 = vmul.f32 %v2183_v43, %v1670_v0  ;;  %v767_v25 = vmul.f32 1.0614054, %v2195_v6  ;;  %v2203_v26 = vpop.eup %1892 }
 0x100   : > { %v992_v60 = vadd.f32 0.2548296, %v960_v52  ;;  %v942_v10 = vmul.f32 %v2149_v50, %v1683_v58  ;;  %v881_v38 = vmul.f32 %v2173_v19, %v849_v15  ;;  %v2207_v40 = vpop.eup %1894  ;;  %vm1231_vm10 = vcmp.lt.f32.partialorder %v2116_v7, 0.0 }
 0x101   : > { %v1008_v9 = vmul.f32 %v2132_v31, %v976_v56  ;;  %v958_v31 = vmul.f32 %v2158_v61, %v1699_v14  ;;  %v865_v44 = vadd.f32 1.4214138, %v833_v21  ;;  %v1668_v45 = vadd.f32 -1.4531521, %v767_v25  ;;  %v2215_v58 = vpop.eup %1896 }
 0x102   : > { %v1024_v20 = vmul.f32 %v2137_v39, %v992_v60  ;;  %v974_v34 = vadd.f32 0.2548296, %v942_v10  ;;  %v815_v39 = vmul.f32 %v2187_v32, %v1652_v23  ;;  %vm1247_vm11 = vcmp.lt.f32.partialorder %v2126_v17, 0.0 }
 0x103   : > { %v1168_v27 = vmul.f32 %v1875_v5, %v1008_v9  ;;  %v990_v52 = vadd.f32 0.2548296, %v958_v31  ;;  %v1686_v5 = vadd.f32 -0.28449672, %v881_v38  ;;  %v897_v55 = vmul.f32 %v2183_v43, %v865_v44 }
 0x104   : > { %v1184_v42 = vmul.f32 %v1877_v13, %v1024_v20  ;;  %v1006_v47 = vmul.f32 %v2149_v50, %v974_v34  ;;  %v847_v56 = vadd.f32 1.4214138, %v815_v39  ;;  %v831_v13 = vmul.f32 %v2195_v6, %v1668_v45  ;;  %v2221_v14 = vpop.eup %1898 }
 0x105   : > { %v1200_v46 = vsub.f32 1.0, %v1168_v27  ;;  %v1022_v60 = vmul.f32 %v2158_v61, %v990_v52  ;;  %v945_v0 = vmul.f32 %v2173_v19, %v1686_v5  ;;  %v1702_v3 = vadd.f32 -0.28449672, %v897_v55 }
 0x106   : > { %v1216_v54 = vsub.f32 1.0, %v1184_v42  ;;  %v1166_v63 = vmul.f32 %v2176_v24, %v1006_v47  ;;  %v879_v9 = vmul.f32 %v2187_v32, %v847_v56  ;;  %v863_v10 = vadd.f32 1.4214138, %v831_v13  ;;  %v2230_v34 = vpop.eup %1900 }
 0x107   : > { %v1264_v62 = vsub.f32 0.0, %v1200_v46  ;;  %v1182_v21 = vmul.f32 %v2180_v37, %v1022_v60  ;;  %v977_v23 = vadd.f32 0.2548296, %v945_v0  ;;  %v961_v25 = vmul.f32 %v2183_v43, %v1702_v3  ;;  %v2236_v45 = vpop.eup %1902 }
 0x108   : > { %v1280_v50 = vsub.f32 0.0, %v1216_v54  ;;  %v1198_v20 = vsub.f32 1.0, %v1166_v63  ;;  %v1684_v27 = vadd.f32 -0.28449672, %v879_v9  ;;  %v895_v30 = vmul.f32 %v2195_v6, %v863_v10 }
 0x109   : > { %v1296_v15 = vsel %vm1232_vm3, %v1264_v62, %v1200_v46  ;;  %v1214_v29 = vsub.f32 1.0, %v1182_v21  ;;  %v1009_v42 = vmul.f32 %v2173_v19, %v977_v23  ;;  %v993_v44 = vadd.f32 0.2548296, %v961_v25 }
 0x10a   : > { %v1328_v24 = vadd.f32 1.0, %v1296_v15  ;;  %v1312_v61 = vsel %vm1248_vm4, %v1280_v50, %v1216_v54  ;;  %v1262_v38 = vsub.f32 0.0, %v1198_v20  ;;  %v943_v39 = vmul.f32 %v2187_v32, %v1684_v27 }
 0x10b   : > { %v1344_v31 = vadd.f32 1.0, %v1312_v61  ;;  %v1169_v47 = vmul.f32 %v1891_v16, %v1009_v42  ;;  %v1025_v54 = vmul.f32 %v2183_v43, %v993_v44  ;;  %v756_v0 = vmul.f32 1.0614054, %v2221_v14 }
 0x10c   : > { %v1360_v37 = vmul.f32 %v1328_v24, %v2110_v1  ;;  %v1294_v19 = vsel %vm1230_vm5, %v1262_v38, %v1198_v20  ;;  %v1278_v1 = vsub.f32 0.0, %v1214_v29  ;;  %v975_v55 = vadd.f32 0.2548296, %v943_v39  ;;  %v479_v39 = vpop.f32.mrf.mxu1 }
 0x10d   : > { %v1376_v46 = vmul.f32 %v1344_v31, %v2112_v2  ;;  %v1326_v5 = vadd.f32 1.0, %v1294_v19  ;;  %v1201_v62 = vsub.f32 1.0, %v1169_v47  ;;  %v1700_v2 = vadd.f32 -0.28449672, %v895_v30 }
 0x10e   : > { %v1751_v52 = vpack.c.bf16 %v1360_v37, %v1360_v37  ;;  %v1310_v13 = vsel %vm1246_vm7, %v1278_v1, %v1214_v29  ;;  %v1185_v63 = vmul.f32 %v2203_v26, %v1025_v54  ;;  %v1007_v60 = vmul.f32 %v2187_v32, %v975_v55 }
 0x10f   : > { %v1767_v56 = vpack.c.bf16 %v1376_v46, %v1376_v46  ;;  %v1358_v35 = vmul.f32 %v1326_v5, %v2118_v8  ;;  %v1342_v16 = vadd.f32 1.0, %v1310_v13  ;;  %v1265_v43 = vsub.f32 0.0, %v1201_v62 }
 0x110   : > { %1521 = vst.msk [vmem:[%s2243_s27 + $0x8] sm:$0xf] %vm1518_vm6, %v1751_v52  ;;  %v959_v36 = vmul.f32 %v2195_v6, %v1700_v2  ;;  %v772_v50 = vmul.f32 1.0614054, %v2236_v45  ;;  %v1217_v8 = vsub.f32 1.0, %v1185_v63  ;;  %v1167_v10 = vmul.f32 %v2207_v40, %v1007_v60  ;;  %v1810_v2 = vpop.f32.mrf.mxu0 }
 0x111   : > { %1537 = vst.msk [vmem:[%s2243_s27 + $0x48] sm:$0xf] %vm1518_vm6, %v1767_v56  ;;  %v1749_v3 = vpack.c.bf16 %v1358_v35, %v1358_v35  ;;  %v1374_v9 = vmul.f32 %v1342_v16, %v2135_v33  ;;  %v1297_v26 = vsel %vm1233_vm8, %v1265_v43, %v1201_v62  ;;  %v1657_v15 = vadd.f32 -1.4531521, %v756_v0  ;;  %v1826_v43 = vpop.f32.mrf.mxu1 }
 0x112   : > { %v991_v32 = vadd.f32 0.2548296, %v959_v36  ;;  %v1673_v20 = vadd.f32 -1.4531521, %v772_v50  ;;  %v1329_v23 = vadd.f32 1.0, %v1297_v26  ;;  %v1281_v24 = vsub.f32 0.0, %v1217_v8 }
 0x113   : > { %1519 = vst.msk [vmem:[%s2243_s27] sm:$0xf] %vm1518_vm6, %v1749_v3  ;;  %v1765_v21 = vpack.c.bf16 %v1374_v9, %v1374_v9  ;;  %v1199_v61 = vsub.f32 1.0, %v1167_v10  ;;  %v820_v33 = vmul.f32 %v2221_v14, %v1657_v15  ;;  %v1060_v40 = vsub.f32 0.0, %v2171_v18 }
 0x114   : > { %v1023_v25 = vmul.f32 %v2195_v6, %v991_v32  ;;  %v836_v27 = vmul.f32 %v2236_v45, %v1673_v20  ;;  %v1361_v57 = vmul.f32 %v1329_v23, %v2140_v41  ;;  %v1313_v31 = vsel %vm1249_vm9, %v1281_v24, %v1217_v8  ;;  %v418_v32 = vpop.f32.mrf.mxu0 }
 0x115   : > { %1535 = vst.msk [vmem:[%s2243_s27 + $0x40] sm:$0xf] %vm1518_vm6, %v1765_v21  ;;  %v1263_v38 = vsub.f32 0.0, %v1199_v61  ;;  %v2279_v29 = vmul.f32 0.70710677, %v2166_v12  ;;  %v1345_v42 = vadd.f32 1.0, %v1313_v31  ;;  %v1092_v41 = vmul.f32 %v1060_v40, %v2171_v18 }
 0x116   : > { %v1183_v6 = vmul.f32 %v2215_v58, %v1023_v25  ;;  %v852_v37 = vadd.f32 1.4214138, %v820_v33  ;;  %v868_v44 = vadd.f32 1.4214138, %v836_v27  ;;  %v1752_v30 = vpack.c.bf16 %v1361_v57, %v1361_v57 }
 0x117   : > { %v1295_v46 = vsel %vm1231_vm10, %v1263_v38, %v1199_v61  ;;  %v594_v4 = vand.u32 2147483647, %v2279_v29  ;;  %v1377_v19 = vmul.f32 %v1345_v42, %v2151_v51  ;;  %v1146_v5 = vmul.f32 1.442695, %v1092_v41 }
 0x118   : > { %v1327_v1 = vadd.f32 1.0, %v1295_v46  ;;  %v1215_v47 = vsub.f32 1.0, %v1183_v6  ;;  %v884_v52 = vmul.f32 %v2221_v14, %v852_v37  ;;  %1522 = vst.msk [vmem:[%s2243_s27 + $0xc] sm:$0xf] %vm1518_vm6, %v1752_v30  ;;  %v900_v58 = vmul.f32 %v2236_v45, %v868_v44  ;;  %v482_v37 = vpop.f32.mrf.mxu1 }
 0x119   : > { %v626_v54 = vmul.f32 0.3275911, %v594_v4  ;;  %v480_v7 = vadd.f32 %v2083_v22, %v479_v39  ;;  %v1768_v55 = vpack.c.bf16 %v1377_v19, %v1377_v19  ;;  %1904 = vpow2.f32 %v1146_v5 }
 0x11a   : > { %v1359_v18 = vmul.f32 %v1327_v1, %v2153_v53  ;;  %v1279_v56 = vsub.f32 0.0, %v1215_v47  ;;  %v1689_v13 = vadd.f32 -0.28449672, %v884_v52  ;;  %v1705_v51 = vadd.f32 -0.28449672, %v900_v58 }
 0x11b   : > { %v658_v62 = vadd.f32 1.0, %v626_v54  ;;  %1538 = vst.msk [vmem:[%s2243_s27 + $0x4c] sm:$0xf] %vm1518_vm6, %v1768_v55  ;;  %v1042_v60 = vsub.f32 0.0, %v594_v4  ;;  %v543_v36 = vmul.f32 0.5, %v2122_v11  ;;  %v427_v3 = vadd.f32 %v1810_v2, %v2083_v22 }
 0x11c   : > { %v1750_v35 = vpack.c.bf16 %v1359_v18, %v1359_v18  ;;  %v1311_v16 = vsel %vm1247_vm11, %v1279_v56, %v1215_v47  ;;  %v948_v63 = vmul.f32 %v2221_v14, %v1689_v13  ;;  %v964_v0 = vmul.f32 %v2236_v45, %v1705_v51  ;;  %v1813_v47 = vpop.f32.mrf.mxu0 }
 0x11d   : > { %v1343_v53 = vadd.f32 1.0, %v1311_v16  ;;  %1906 = vrcp.f32 %v658_v62  ;;  %v2301_v50 = vmul.f32 0.70710677, %v480_v7  ;;  %v491_v8 = vadd.f32 %v1826_v43, %v2083_v22 }
 0x11e   : > { %1520 = vst.msk [vmem:[%s2243_s27 + $0x4] sm:$0xf] %vm1518_vm6, %v1750_v35  ;;  %v980_v17 = vadd.f32 0.2548296, %v948_v63  ;;  %v1074_v26 = vmul.f32 %v1042_v60, %v594_v4  ;;  %v996_v20 = vadd.f32 0.2548296, %v964_v0  ;;  %v2330_v1 = vadd.f32 %v2083_v22, %v482_v37  ;;  %v1829_v0 = vpop.f32.mrf.mxu1 }
 0x11f   : > { %v1375_v9 = vmul.f32 %v1343_v53, %v543_v36  ;;  %v610_v11 = vand.u32 2147483647, %v2301_v50  ;;  %v2307_v21 = vmul.f32 0.70710677, %v427_v3  ;;  %v2310_v61 = vmul.f32 0.70710677, %v491_v8 }
 0x120   : > { %v1012_v10 = vmul.f32 %v2221_v14, %v980_v17  ;;  %v532_v25 = vmul.f32 0.5, %v2130_v28  ;;  %v419_v14 = vadd.f32 %v2083_v22, %v418_v32  ;;  %v1110_v40 = vmul.f32 1.442695, %v1074_v26 }
 0x121   : > { %v1766_v15 = vpack.c.bf16 %v1375_v9, %v1375_v9  ;;  %v642_v24 = vmul.f32 0.3275911, %v610_v11  ;;  %v597_v33 = vand.u32 2147483647, %v2307_v21  ;;  %v613_v31 = vand.u32 2147483647, %v2310_v61 }
 0x122   : > { %v1172_v23 = vmul.f32 %v2230_v34, %v1012_v10  ;;  %vm1236_vm12 = vcmp.lt.f32.partialorder %v2144_v48, 0.0  ;;  %v548_v34 = vmul.f32 0.5, %v2147_v49  ;;  %v1028_v38 = vmul.f32 %v2236_v45, %v996_v20 }
 0x123   : > { %1536 = vst.msk [vmem:[%s2243_s27 + $0x44] sm:$0xf] %vm1518_vm6, %v1766_v15  ;;  %v674_v57 = vadd.f32 1.0, %v642_v24  ;;  %v629_v42 = vmul.f32 0.3275911, %v597_v33  ;;  %vm1252_vm13 = vcmp.lt.f32.partialorder %v2162_v59, 0.0  ;;  %v2341_v62 = vadd.f32 %v1813_v47, %v2083_v22 }
 0x124   : > { %v1204_v27 = vsub.f32 1.0, %v1172_v23  ;;  %v645_v28 = vmul.f32 0.3275911, %v613_v31  ;;  %v2323_v44 = vmul.f32 0.5, %v2166_v12  ;;  %v1058_v39 = vsub.f32 0.0, %v610_v11 }
 0x125   : > { %1908 = vrcp.f32 %v674_v57  ;;  %v661_v30 = vadd.f32 1.0, %v629_v42  ;;  %v2325_v46 = vmul.f32 0.70710677, %v419_v14  ;;  %v2327_v49 = vmul.f32 0.5, %v480_v7 }
 0x126   : > { %v1268_v6 = vsub.f32 0.0, %v1204_v27  ;;  %v1905_v41 = vpop.eup %1904  ;;  %1910 = vpow2.f32 %v1110_v40  ;;  %v677_v45 = vadd.f32 1.0, %v645_v28  ;;  %v2334_v12 = vmul.f32 0.5, %v427_v3 }
 0x127   : > { %v1188_v19 = vmul.f32 %v1905_v41, %v1028_v38  ;;  %1912 = vrcp.f32 %v661_v30  ;;  %v1045_v58 = vsub.f32 0.0, %v597_v33  ;;  %v595_v5 = vand.u32 2147483647, %v2325_v46 }
 0x128   : > { %v1300_v48 = vsel %vm1236_vm12, %v1268_v6, %v1204_v27  ;;  %1914 = vrcp.f32 %v677_v45  ;;  %v1090_v18 = vmul.f32 %v1058_v39, %v610_v11  ;;  %v2338_v56 = vmul.f32 0.5, %v491_v8 }
 0x129   : > { %v1332_v4 = vadd.f32 1.0, %v1300_v48  ;;  %v1220_v55 = vsub.f32 1.0, %v1188_v19  ;;  %v1061_v13 = vsub.f32 0.0, %v613_v31  ;;  %v627_v51 = vmul.f32 0.3275911, %v595_v5 }
 0x12a   : > { %v2332_v52 = vpop.eup %1906  ;;  %v2344_v63 = vmul.f32 0.70710677, %v2330_v1  ;;  %v1077_v60 = vmul.f32 %v1045_v58, %v597_v33  ;;  %v2346_v43 = vmul.f32 0.5, %v419_v14  ;;  %v1043_v53 = vsub.f32 0.0, %v595_v5 }
 0x12b   : > { %v1364_v54 = vmul.f32 %v1332_v4, %v532_v25  ;;  %v754_v7 = vmul.f32 1.0614054, %v2332_v52  ;;  %v1284_v35 = vsub.f32 0.0, %v1220_v55  ;;  %v659_v36 = vadd.f32 1.0, %v627_v51  ;;  %v431_v4 = vpop.f32.mrf.mxu0 }
 0x12c   : > { %v1142_v9 = vmul.f32 1.442695, %v1090_v18  ;;  %v611_v8 = vand.u32 2147483647, %v2344_v63  ;;  %v1093_v26 = vmul.f32 %v1061_v13, %v613_v31  ;;  %v2355_v11 = vmul.f32 0.70710677, %v2341_v62 }
 0x12d   : > { %v1755_v2 = vpack.c.bf16 %v1364_v54, %v1364_v54  ;;  %v1655_v16 = vadd.f32 -1.4531521, %v754_v7  ;;  %v1316_v17 = vsel %vm1252_vm13, %v1284_v35, %v1220_v55  ;;  %1916 = vrcp.f32 %v659_v36 }
 0x12e   : > { %v1348_v10 = vadd.f32 1.0, %v1316_v17  ;;  %v643_v15 = vmul.f32 0.3275911, %v611_v8  ;;  %v1059_v20 = vsub.f32 0.0, %v611_v8  ;;  %v2358_v23 = vadd.f32 %v1829_v0, %v2083_v22 }
 0x12f   : > { %1525 = vst.msk [vmem:[%s2243_s27 + $0x18] sm:$0xf] %vm1518_vm6, %v1755_v2  ;;  %v818_v3 = vmul.f32 %v2332_v52, %v1655_v16  ;;  %v1116_v59 = vmul.f32 1.442695, %v1077_v60  ;;  %v1075_v25 = vmul.f32 %v1043_v53, %v595_v5  ;;  %v600_v33 = vand.u32 2147483647, %v2355_v11 }
 0x130   : > { %v1380_v24 = vmul.f32 %v1348_v10, %v548_v34  ;;  %1918 = vpow2.f32 %v1142_v9  ;;  %v675_v40 = vadd.f32 1.0, %v643_v15  ;;  %v1091_v57 = vmul.f32 %v1059_v20, %v611_v8 }
 0x131   : > { %v850_v32 = vadd.f32 1.4214138, %v818_v3  ;;  %v632_v42 = vmul.f32 0.3275911, %v600_v33  ;;  %v1048_v6 = vsub.f32 0.0, %v600_v33  ;;  %v2380_v35 = vadd.f32 %v2083_v22, %v431_v4 }
 0x132   : > { %v2361_v14 = vpop.eup %1908  ;;  %v1771_v31 = vpack.c.bf16 %v1380_v24, %v1380_v24  ;;  %v1148_v34 = vmul.f32 1.442695, %v1093_v26  ;;  %1920 = vrcp.f32 %v675_v40  ;;  %v2366_v39 = vmul.f32 0.70710677, %v2358_v23  ;;  %v495_v26 = vpop.f32.mrf.mxu1 }
 0x133   : > { %v882_v27 = vmul.f32 %v2332_v52, %v850_v32  ;;  %v770_v38 = vmul.f32 1.0614054, %v2361_v14  ;;  %v1911_v28 = vpop.eup %1910  ;;  %1922 = vpow2.f32 %v1116_v59  ;;  %v1112_v48 = vmul.f32 1.442695, %v1075_v25 }
 0x134   : > { %v2368_v30 = vpop.eup %1912  ;;  %1541 = vst.msk [vmem:[%s2243_s27 + $0x58] sm:$0xf] %vm1518_vm6, %v1771_v31  ;;  %v664_v45 = vadd.f32 1.0, %v632_v42  ;;  %v1144_v5 = vmul.f32 1.442695, %v1091_v57  ;;  %v1080_v18 = vmul.f32 %v1048_v6, %v600_v33  ;;  %vm1234_vm14 = vcmp.lt.f32.partialorder %v2279_v29, 0.0 }
 0x135   : > { %v1687_v37 = vadd.f32 -0.28449672, %v882_v27  ;;  %v1671_v41 = vadd.f32 -1.4531521, %v770_v38  ;;  %v2372_v19 = vpop.eup %1914  ;;  %v757_v58 = vmul.f32 1.0614054, %v2368_v30  ;;  %v2396_v57 = vadd.f32 %v2083_v22, %v495_v26 }
 0x136   : > { %v616_v54 = vand.u32 2147483647, %v2366_v39  ;;  %v773_v7 = vmul.f32 1.0614054, %v2372_v19  ;;  %1924 = vrcp.f32 %v664_v45  ;;  %v1122_v8 = vmul.f32 1.442695, %v1080_v18 }
 0x137   : > { %v946_v47 = vmul.f32 %v2332_v52, %v1687_v37  ;;  %v834_v55 = vmul.f32 %v2361_v14, %v1671_v41  ;;  %v1658_v51 = vadd.f32 -1.4531521, %v757_v58  ;;  %1926 = vpow2.f32 %v1148_v34 }
 0x138   : > { %v648_v2 = vmul.f32 0.3275911, %v616_v54  ;;  %v1674_v60 = vadd.f32 -1.4531521, %v773_v7  ;;  %v1064_v36 = vsub.f32 0.0, %v616_v54  ;;  %1928 = vpow2.f32 %v1112_v48 }
 0x139   : > { %v978_v13 = vadd.f32 0.2548296, %v946_v47  ;;  %v866_v16 = vadd.f32 1.4214138, %v834_v55  ;;  %v821_v0 = vmul.f32 %v2368_v30, %v1658_v51  ;;  %v2390_v24 = vmul.f32 0.70710677, %v2380_v35 }
 0x13a   : > { %v680_v17 = vadd.f32 1.0, %v648_v2  ;;  %v837_v9 = vmul.f32 %v2372_v19, %v1674_v60  ;;  %v1096_v10 = vmul.f32 %v1064_v36, %v616_v54  ;;  %v2387_v32 = vpop.eup %1916  ;;  %vm1250_vm15 = vcmp.lt.f32.partialorder %v2301_v50, 0.0 }
 0x13b   : > { %v1010_v53 = vmul.f32 %v2332_v52, %v978_v13  ;;  %v898_v3 = vmul.f32 %v2361_v14, %v866_v16  ;;  %v853_v20 = vadd.f32 1.4214138, %v821_v0  ;;  %v755_v25 = vmul.f32 1.0614054, %v2387_v32 }
 0x13c   : > { %1930 = vrcp.f32 %v680_v17  ;;  %v869_v59 = vadd.f32 1.4214138, %v837_v9  ;;  %v598_v40 = vand.u32 2147483647, %v2390_v24  ;;  %vm1237_vm0 = vcmp.lt.f32.partialorder %v2307_v21, 0.0 }
 0x13d   : > { %v1170_v15 = vmul.f32 %v1911_v28, %v1010_v53  ;;  %v1703_v52 = vadd.f32 -0.28449672, %v898_v3  ;;  %1932 = vpow2.f32 %v1144_v5  ;;  %v885_v27 = vmul.f32 %v2368_v30, %v853_v20  ;;  %v1919_v31 = vpop.eup %1918 }
 0x13e   : > { %v901_v42 = vmul.f32 %v2372_v19, %v869_v59  ;;  %v1656_v6 = vadd.f32 -1.4531521, %v755_v25  ;;  %v1154_v28 = vmul.f32 1.442695, %v1096_v10  ;;  %1934 = vpow2.f32 %v1122_v8 }
 0x13f   : > { %v1202_v33 = vsub.f32 1.0, %v1170_v15  ;;  %v962_v38 = vmul.f32 %v2361_v14, %v1703_v52  ;;  %v1690_v34 = vadd.f32 -0.28449672, %v885_v27  ;;  %v630_v41 = vmul.f32 0.3275911, %v598_v40  ;;  %v2400_v48 = vpop.eup %1920 }
 0x140   : > { %v1706_v4 = vadd.f32 -0.28449672, %v901_v42  ;;  %v819_v47 = vmul.f32 %v2387_v32, %v1656_v6  ;;  %v1046_v58 = vsub.f32 0.0, %v598_v40  ;;  %v1923_v22 = vpop.eup %1922  ;;  %v771_v55 = vmul.f32 1.0614054, %v2400_v48 }
 0x141   : > { %v1266_v37 = vsub.f32 0.0, %v1202_v33  ;;  %v994_v45 = vadd.f32 0.2548296, %v962_v38  ;;  %v949_v54 = vmul.f32 %v2368_v30, %v1690_v34  ;;  %v662_v7 = vadd.f32 1.0, %v630_v41 }
 0x142   : > { %v965_v51 = vmul.f32 %v2372_v19, %v1706_v4  ;;  %v851_v2 = vadd.f32 1.4214138, %v819_v47  ;;  %v1672_v36 = vadd.f32 -1.4531521, %v771_v55  ;;  %v1078_v29 = vmul.f32 %v1046_v58, %v598_v40 }
 0x143   : > { %v1298_v5 = vsel %vm1234_vm14, %v1266_v37, %v1202_v33  ;;  %v1026_v13 = vmul.f32 %v2361_v14, %v994_v45  ;;  %v2410_v16 = vpop.eup %1924  ;;  %v981_v60 = vadd.f32 0.2548296, %v949_v54  ;;  %1936 = vrcp.f32 %v662_v7 }
 0x144   : > { %v1330_v18 = vadd.f32 1.0, %v1298_v5  ;;  %v997_v17 = vadd.f32 0.2548296, %v965_v51  ;;  %v883_v3 = vmul.f32 %v2387_v32, %v851_v2  ;;  %v1927_v9 = vpop.eup %1926  ;;  %vm1253_vm1 = vcmp.lt.f32.partialorder %v2310_v61, 0.0 }
 0x145   : > { %v1186_v0 = vmul.f32 %v1919_v31, %v1026_v13  ;;  %v1013_v14 = vmul.f32 %v2368_v30, %v981_v60  ;;  %v835_v8 = vmul.f32 %v2400_v48, %v1672_v36  ;;  %v760_v10 = vmul.f32 1.0614054, %v2410_v16  ;;  %v1929_v15 = vpop.eup %1928 }
 0x146   : > { %v1362_v53 = vmul.f32 %v1330_v18, %v2323_v44  ;;  %v1118_v26 = vmul.f32 1.442695, %v1078_v29  ;;  %v1029_v52 = vmul.f32 %v2372_v19, %v997_v17  ;;  %v1688_v59 = vadd.f32 -0.28449672, %v883_v3 }
 0x147   : > { %v1218_v44 = vsub.f32 1.0, %v1186_v0  ;;  %v1173_v25 = vmul.f32 %v1923_v22, %v1013_v14  ;;  %v867_v33 = vadd.f32 1.4214138, %v835_v8  ;;  %v1661_v27 = vadd.f32 -1.4531521, %v760_v10 }
 0x148   : > { %v1753_v20 = vpack.c.bf16 %v1362_v53, %v1362_v53  ;;  %1938 = vpow2.f32 %v1154_v28  ;;  %v1189_v31 = vmul.f32 %v1927_v9, %v1029_v52  ;;  %v947_v38 = vmul.f32 %v2387_v32, %v1688_v59 }
 0x149   : > { %v2420_v40 = vpop.eup %1930  ;;  %v1282_v30 = vsub.f32 0.0, %v1218_v44  ;;  %1940 = vpow2.f32 %v1118_v26  ;;  %v1205_v6 = vsub.f32 1.0, %v1173_v25  ;;  %v899_v37 = vmul.f32 %v2400_v48, %v867_v33 }
 0x14a   : > { %1523 = vst.msk [vmem:[%s2243_s27 + $0x10] sm:$0xf] %vm1518_vm6, %v1753_v20  ;;  %v1933_v42 = vpop.eup %1932  ;;  %v824_v19 = vmul.f32 %v2410_v16, %v1661_v27  ;;  %v776_v34 = vmul.f32 1.0614054, %v2420_v40  ;;  %v1221_v41 = vsub.f32 1.0, %v1189_v31  ;;  %vm1235_vm2 = vcmp.lt.f32.partialorder %v2325_v46, 0.0 }
 0x14b   : > { %v1314_v28 = vsel %vm1250_vm15, %v1282_v30, %v1218_v44  ;;  %v979_v45 = vadd.f32 0.2548296, %v947_v38  ;;  %v2431_v4 = vmul.f32 0.70710677, %v2396_v57  ;;  %v1269_v58 = vsub.f32 0.0, %v1205_v6  ;;  %v1935_v54 = vpop.eup %1934  ;;  %v1814_v44 = vpop.f32.mrf.mxu0 }
 0x14c   : > { %v1346_v47 = vadd.f32 1.0, %v1314_v28  ;;  %v1704_v22 = vadd.f32 -0.28449672, %v899_v37  ;;  %v856_v5 = vadd.f32 1.4214138, %v824_v19  ;;  %v1285_v55 = vsub.f32 0.0, %v1221_v41 }
 0x14d   : > { %v1011_v7 = vmul.f32 %v2387_v32, %v979_v45  ;;  %v1677_v18 = vadd.f32 -1.4531521, %v776_v34  ;;  %v2436_v13 = vand.u32 2147483647, %v2431_v4  ;;  %v1301_v51 = vsel %vm1237_vm0, %v1269_v58, %v1205_v6  ;;  %v2464_v6 = vld [vmem:[%s2742_s2] ss:$0 sm:$0xff] }
 0x14e   : > { %v1378_v50 = vmul.f32 %v1346_v47, %v2327_v49  ;;  %v963_v2 = vmul.f32 %v2400_v48, %v1704_v22  ;;  %v888_v60 = vmul.f32 %v2410_v16, %v856_v5  ;;  %v1333_v36 = vadd.f32 1.0, %v1301_v51 }
 0x14f   : > { %v1317_v29 = vsel %vm1253_vm1, %v1285_v55, %v1221_v41  ;;  %v1171_v53 = vmul.f32 %v1929_v15, %v1011_v7  ;;  %v840_v32 = vmul.f32 %v2420_v40, %v1677_v18  ;;  %v646_v10 = vmul.f32 0.3275911, %v2436_v13  ;;  %v1830_v41 = vpop.f32.mrf.mxu1 }
 0x150   : > { %v1769_v0 = vpack.c.bf16 %v1378_v50, %v1378_v50  ;;  %v1349_v17 = vadd.f32 1.0, %v1317_v29  ;;  %v995_v3 = vadd.f32 0.2548296, %v963_v2  ;;  %v1693_v9 = vadd.f32 -0.28449672, %v888_v60  ;;  %v2446_v49 = vpop.eup %1936  ;;  %v434_v29 = vpop.f32.mrf.mxu0 }
 0x151   : > { %v1365_v21 = vmul.f32 %v1333_v36, %v2334_v12  ;;  %v1203_v14 = vsub.f32 1.0, %v1171_v53  ;;  %v872_v8 = vadd.f32 1.4214138, %v840_v32  ;;  %v758_v20 = vmul.f32 1.0614054, %v2446_v49 }
 0x152   : > { %1539 = vst.msk [vmem:[%s2243_s27 + $0x50] sm:$0xf] %vm1518_vm6, %v1769_v0  ;;  %v1381_v61 = vmul.f32 %v1349_v17, %v2338_v56  ;;  %v1027_v26 = vmul.f32 %v2400_v48, %v995_v3  ;;  %v952_v15 = vmul.f32 %v2410_v16, %v1693_v9  ;;  %v678_v25 = vadd.f32 1.0, %v646_v10 }
 0x153   : > { %v1756_v52 = vpack.c.bf16 %v1365_v21, %v1365_v21  ;;  %v1267_v59 = vsub.f32 0.0, %v1203_v14  ;;  %v904_v12 = vmul.f32 %v2420_v40, %v872_v8  ;;  %v1659_v31 = vadd.f32 -1.4531521, %v758_v20 }
 0x154   : > { %v1772_v33 = vpack.c.bf16 %v1381_v61, %v1381_v61  ;;  %v1187_v27 = vmul.f32 %v1933_v42, %v1027_v26  ;;  %v984_v30 = vadd.f32 0.2548296, %v952_v15  ;;  %1942 = vrcp.f32 %v678_v25 }
 0x155   : > { %v1939_v38 = vpop.eup %1938  ;;  %1526 = vst.msk [vmem:[%s2243_s27 + $0x1c] sm:$0xf] %vm1518_vm6, %v1756_v52  ;;  %v1299_v56 = vsel %vm1235_vm2, %v1267_v59, %v1203_v14  ;;  %v1709_v48 = vadd.f32 -0.28449672, %v904_v12  ;;  %v2467_v37 = vadd.f32 %v2464_v6, %v1814_v44  ;;  %v822_v46 = vmul.f32 %v2446_v49, %v1659_v31  ;;  %v498_v31 = vpop.f32.mrf.mxu1 }
 0x156   : > { %v1941_v19 = vpop.eup %1940  ;;  %1542 = vst.msk [vmem:[%s2243_s27 + $0x5c] sm:$0xf] %vm1518_vm6, %v1772_v33  ;;  %v1331_v42 = vadd.f32 1.0, %v1299_v56  ;;  %v1219_v34 = vsub.f32 1.0, %v1187_v27  ;;  %v1016_v28 = vmul.f32 %v2410_v16, %v984_v30  ;;  %vm1251_vm3 = vcmp.lt.f32.partialorder %v2344_v63, 0.0 }
 0x157   : > { %v968_v45 = vmul.f32 %v2420_v40, %v1709_v48  ;;  %v854_v5 = vadd.f32 1.4214138, %v822_v46  ;;  %v1062_v7 = vsub.f32 0.0, %v2436_v13  ;;  %v2478_v18 = vmul.f32 0.70710677, %v2467_v37 }
 0x158   : > { %v1363_v47 = vmul.f32 %v1331_v42, %v2346_v43  ;;  %v1283_v58 = vsub.f32 0.0, %v1219_v34  ;;  %v1176_v22 = vmul.f32 %v1935_v54, %v1016_v28  ;;  %v2481_v16 = vadd.f32 %v2464_v6, %v1830_v41 }
 0x159   : > { %v1000_v55 = vadd.f32 0.2548296, %v968_v45  ;;  %v886_v2 = vmul.f32 %v2446_v49, %v854_v5  ;;  %v547_v43 = vmul.f32 0.5, %v2330_v1  ;;  %v2487_v36 = vand.u32 2147483647, %v2478_v18 }
 0x15a   : > { %v1754_v50 = vpack.c.bf16 %v1363_v47, %v1363_v47  ;;  %v1315_v51 = vsel %vm1251_vm3, %v1283_v58, %v1219_v34  ;;  %v1208_v63 = vsub.f32 1.0, %v1176_v22  ;;  %v536_v53 = vmul.f32 0.5, %v2341_v62  ;;  %v1817_v47 = vpop.f32.mrf.mxu0 }
 0x15b   : > { %v1347_v60 = vadd.f32 1.0, %v1315_v51  ;;  %v1032_v54 = vmul.f32 %v2420_v40, %v1000_v55  ;;  %vm1240_vm4 = vcmp.lt.f32.partialorder %v2355_v11, 0.0  ;;  %v1691_v0 = vadd.f32 -0.28449672, %v886_v2 }
 0x15c   : > { %1524 = vst.msk [vmem:[%s2243_s27 + $0x14] sm:$0xf] %vm1518_vm6, %v1754_v50  ;;  %v1272_v32 = vsub.f32 0.0, %v1208_v63  ;;  %v1094_v1 = vmul.f32 %v1062_v7, %v2436_v13  ;;  %v633_v9 = vmul.f32 0.3275911, %v2487_v36  ;;  %v2500_v8 = vadd.f32 %v2464_v6, %v434_v29 }
 0x15d   : > { %v1379_v17 = vmul.f32 %v1347_v60, %v547_v43  ;;  %v1192_v3 = vmul.f32 %v1939_v38, %v1032_v54  ;;  %v950_v21 = vmul.f32 %v2446_v49, %v1691_v0  ;;  %v2497_v14 = vmul.f32 0.70710677, %v2481_v16  ;;  %v1833_v60 = vpop.f32.mrf.mxu1 }
 0x15e   : > { %v1304_v40 = vsel %vm1240_vm4, %v1272_v32, %v1208_v63  ;;  %v665_v61 = vadd.f32 1.0, %v633_v9  ;;  %vm1256_vm5 = vcmp.lt.f32.partialorder %v2366_v39, 0.0  ;;  %v1150_v59 = vmul.f32 1.442695, %v1094_v1 }
 0x15f   : > { %v1770_v62 = vpack.c.bf16 %v1379_v17, %v1379_v17  ;;  %v1336_v11 = vadd.f32 1.0, %v1304_v40  ;;  %v1224_v10 = vsub.f32 1.0, %v1192_v3  ;;  %v982_v26 = vadd.f32 0.2548296, %v950_v21 }
 0x160   : > { %v617_v15 = vand.u32 2147483647, %v2497_v14  ;;  %1944 = vrcp.f32 %v665_v61  ;;  %v2511_v30 = vmul.f32 0.70710677, %v2500_v8  ;;  %v552_v38 = vmul.f32 0.5, %v2358_v23 }
 0x161   : > { %1540 = vst.msk [vmem:[%s2243_s27 + $0x54] sm:$0xf] %vm1518_vm6, %v1770_v62  ;;  %v1368_v13 = vmul.f32 %v1336_v11, %v536_v53  ;;  %v1288_v20 = vsub.f32 0.0, %v1224_v10  ;;  %v2505_v44 = vpop.eup %1942  ;;  %v1014_v52 = vmul.f32 %v2446_v49, %v982_v26  ;;  %v534_v39 = vmul.f32 0.5, %v2380_v35 }
 0x162   : > { %v649_v12 = vmul.f32 0.3275911, %v617_v15  ;;  %v774_v27 = vmul.f32 1.0614054, %v2505_v44  ;;  %v599_v34 = vand.u32 2147483647, %v2511_v30  ;;  %v2519_v41 = vadd.f32 %v2464_v6, %v498_v31 }
 0x163   : > { %v1759_v25 = vpack.c.bf16 %v1368_v13, %v1368_v13  ;;  %v1320_v33 = vsel %vm1256_vm5, %v1288_v20, %v1224_v10  ;;  %v1174_v48 = vmul.f32 %v1941_v19, %v1014_v52  ;;  %v1049_v23 = vsub.f32 0.0, %v2487_v36 }
 0x164   : > { %v1352_v56 = vadd.f32 1.0, %v1320_v33  ;;  %v681_v42 = vadd.f32 1.0, %v649_v12  ;;  %v1675_v49 = vadd.f32 -1.4531521, %v774_v27  ;;  %v631_v19 = vmul.f32 0.3275911, %v599_v34 }
 0x165   : > { %1529 = vst.msk [vmem:[%s2243_s27 + $0x28] sm:$0xf] %vm1518_vm6, %v1759_v25  ;;  %v1206_v46 = vsub.f32 1.0, %v1174_v48  ;;  %v1065_v35 = vsub.f32 0.0, %v617_v15  ;;  %v2524_v5 = vmul.f32 0.70710677, %v2519_v41  ;;  %v2534_v43 = vadd.f32 %v2464_v6, %v1817_v47  ;;  %v511_v25 = vpop.f32.mrf.mxu1 }
 0x166   : > { %v1384_v28 = vmul.f32 %v1352_v56, %v552_v38  ;;  %1946 = vrcp.f32 %v681_v42  ;;  %v838_v45 = vmul.f32 %v2505_v44, %v1675_v49  ;;  %vm1238_vm7 = vcmp.lt.f32.partialorder %v2390_v24, 0.0 }
 0x167   : > { %1948 = vpow2.f32 %v1150_v59  ;;  %v1270_v22 = vsub.f32 0.0, %v1206_v46  ;;  %v2528_v55 = vmul.f32 0.5, %v2396_v57  ;;  %v663_v50 = vadd.f32 1.0, %v631_v19 }
 0x168   : > { %v1775_v58 = vpack.c.bf16 %v1384_v28, %v1384_v28  ;;  %v870_v7 = vadd.f32 1.4214138, %v838_v45  ;;  %v1047_v63 = vsub.f32 0.0, %v599_v34  ;;  %v615_v2 = vand.u32 2147483647, %v2524_v5 }
 0x169   : > { %v1302_v51 = vsel %vm1238_vm7, %v1270_v22, %v1206_v46  ;;  %v1081_v24 = vmul.f32 %v1049_v23, %v2487_v36  ;;  %1950 = vrcp.f32 %v663_v50  ;;  %v2539_v57 = vmul.f32 0.5, %v2467_v37 }
 0x16a   : > { %1545 = vst.msk [vmem:[%s2243_s27 + $0x68] sm:$0xf] %vm1518_vm6, %v1775_v58  ;;  %v1334_v54 = vadd.f32 1.0, %v1302_v51  ;;  %v902_v29 = vmul.f32 %v2505_v44, %v870_v7  ;;  %v1097_v53 = vmul.f32 %v1065_v35, %v617_v15  ;;  %v647_v32 = vmul.f32 0.3275911, %v615_v2  ;;  %v447_v15 = vpop.f32.mrf.mxu0 }
 0x16b   : > { %v2542_v0 = vmul.f32 0.70710677, %v2534_v43  ;;  %v2545_v1 = vmul.f32 0.5, %v2481_v16  ;;  %v2548_v9 = vadd.f32 %v2464_v6, %v1833_v60  ;;  %v1079_v36 = vmul.f32 %v1047_v63, %v599_v34 }
 0x16c   : > { %v1366_v17 = vmul.f32 %v1334_v54, %v534_v39  ;;  %v1707_v3 = vadd.f32 -0.28449672, %v902_v29  ;;  %v679_v21 = vadd.f32 1.0, %v647_v32  ;;  %v1063_v37 = vsub.f32 0.0, %v615_v2 }
 0x16d   : > { %v2550_v40 = vpop.eup %1944  ;;  %v604_v62 = vand.u32 2147483647, %v2542_v0  ;;  %v1124_v26 = vmul.f32 1.442695, %v1081_v24  ;;  %v1156_v16 = vmul.f32 1.442695, %v1097_v53  ;;  %v2562_v38 = vadd.f32 %v2464_v6, %v447_v15 }
 0x16e   : > { %v1757_v11 = vpack.c.bf16 %v1366_v17, %v1366_v17  ;;  %v966_v10 = vmul.f32 %v2505_v44, %v1707_v3  ;;  %v761_v61 = vmul.f32 1.0614054, %v2550_v40  ;;  %1952 = vrcp.f32 %v679_v21 }
 0x16f   : > { %v636_v13 = vmul.f32 0.3275911, %v604_v62  ;;  %v1052_v20 = vsub.f32 0.0, %v604_v62  ;;  %v2558_v12 = vmul.f32 0.70710677, %v2548_v9  ;;  %vm1254_vm8 = vcmp.lt.f32.partialorder %v2431_v4, 0.0 }
 0x170   : > { %1527 = vst.msk [vmem:[%s2243_s27 + $0x20] sm:$0xf] %vm1518_vm6, %v1757_v11  ;;  %v998_v52 = vadd.f32 0.2548296, %v966_v10  ;;  %v1662_v59 = vadd.f32 -1.4531521, %v761_v61  ;;  %v1095_v27 = vmul.f32 %v1063_v37, %v615_v2  ;;  %1954 = vpow2.f32 %v1124_v26 }
 0x171   : > { %v1120_v33 = vmul.f32 1.442695, %v1079_v36  ;;  %v668_v31 = vadd.f32 1.0, %v636_v13  ;;  %v620_v39 = vand.u32 2147483647, %v2558_v12  ;;  %v1084_v28 = vmul.f32 %v1052_v20, %v604_v62  ;;  %v1818_v20 = vpop.f32.mrf.mxu0 }
 0x172   : > { %v1030_v48 = vmul.f32 %v2505_v44, %v998_v52  ;;  %v825_v42 = vmul.f32 %v2550_v40, %v1662_v59  ;;  %v2571_v46 = vadd.f32 %v2464_v6, %v511_v25  ;;  %v1152_v44 = vmul.f32 1.442695, %v1095_v27 }
 0x173   : > { %v2564_v56 = vpop.eup %1946  ;;  %1956 = vrcp.f32 %v668_v31  ;;  %v652_v19 = vmul.f32 0.3275911, %v620_v39  ;;  %v2574_v58 = vmul.f32 0.70710677, %v2562_v38  ;;  %v1068_v50 = vsub.f32 0.0, %v620_v39 }
 0x174   : > { %v1949_v49 = vpop.eup %1948  ;;  %v777_v34 = vmul.f32 1.0614054, %v2564_v56  ;;  %v857_v23 = vadd.f32 1.4214138, %v825_v42  ;;  %1958 = vpow2.f32 %v1156_v16  ;;  %v1130_v2 = vmul.f32 1.442695, %v1084_v28 }
 0x175   : > { %v1190_v45 = vmul.f32 %v1949_v49, %v1030_v48  ;;  %1960 = vpow2.f32 %v1120_v33  ;;  %v684_v7 = vadd.f32 1.0, %v652_v19  ;;  %v602_v60 = vand.u32 2147483647, %v2574_v58 }
 0x176   : > { %v1678_v47 = vadd.f32 -1.4531521, %v777_v34  ;;  %v889_v35 = vmul.f32 %v2550_v40, %v857_v23  ;;  %v2577_v51 = vpop.eup %1950  ;;  %v2582_v54 = vmul.f32 0.70710677, %v2571_v46  ;;  %v2586_v17 = vmul.f32 0.5, %v2500_v8 }
 0x177   : > { %v1222_v22 = vsub.f32 1.0, %v1190_v45  ;;  %v759_v53 = vmul.f32 1.0614054, %v2577_v51  ;;  %1962 = vrcp.f32 %v684_v7  ;;  %v634_v3 = vmul.f32 0.3275911, %v602_v60 }
 0x178   : > { %v841_v63 = vmul.f32 %v2564_v56, %v1678_v47  ;;  %v1694_v24 = vadd.f32 -0.28449672, %v889_v35  ;;  %1964 = vpow2.f32 %v1152_v44  ;;  %v1100_v62 = vmul.f32 %v1068_v50, %v620_v39 }
 0x179   : > { %v1286_v29 = vsub.f32 0.0, %v1222_v22  ;;  %v1660_v37 = vadd.f32 -1.4531521, %v759_v53  ;;  %1966 = vpow2.f32 %v1130_v2  ;;  %v666_v61 = vadd.f32 1.0, %v634_v3 }
 0x17a   : > { %v873_v32 = vadd.f32 1.4214138, %v841_v63  ;;  %v953_v21 = vmul.f32 %v2550_v40, %v1694_v24  ;;  %v1050_v16 = vsub.f32 0.0, %v602_v60  ;;  %v618_v13 = vand.u32 2147483647, %v2582_v54 }
 0x17b   : > { %v1318_v36 = vsel %vm1254_vm8, %v1286_v29, %v1222_v22  ;;  %v2592_v26 = vpop.eup %1952  ;;  %v823_v8 = vmul.f32 %v2577_v51, %v1660_v37  ;;  %vm1241_vm9 = vcmp.lt.f32.partialorder %v2478_v18, 0.0  ;;  %1968 = vrcp.f32 %v666_v61 }
 0x17c   : > { %v1350_v11 = vadd.f32 1.0, %v1318_v36  ;;  %v905_v10 = vmul.f32 %v2564_v56, %v873_v32  ;;  %v985_v15 = vadd.f32 0.2548296, %v953_v21  ;;  %v775_v59 = vmul.f32 1.0614054, %v2592_v26 }
 0x17d   : > { %v855_v33 = vadd.f32 1.4214138, %v823_v8  ;;  %v1162_v27 = vmul.f32 1.442695, %v1100_v62  ;;  %v650_v31 = vmul.f32 0.3275911, %v618_v13  ;;  %v1955_v48 = vpop.eup %1954  ;;  %v2602_v34 = vadd.f32 %v2464_v6, %v1818_v20 }
 0x17e   : > { %v1382_v4 = vmul.f32 %v1350_v11, %v2528_v55  ;;  %v1710_v52 = vadd.f32 -0.28449672, %v905_v10  ;;  %v1017_v25 = vmul.f32 %v2550_v40, %v985_v15  ;;  %v1676_v49 = vadd.f32 -1.4531521, %v775_v59 }
 0x17f   : > { %v887_v45 = vmul.f32 %v2577_v51, %v855_v33  ;;  %v1082_v23 = vmul.f32 %v1050_v16, %v602_v60  ;;  %v682_v19 = vadd.f32 1.0, %v650_v31  ;;  %v1066_v35 = vsub.f32 0.0, %v618_v13 }
 0x180   : > { %v1773_v42 = vpack.c.bf16 %v1382_v4, %v1382_v4  ;;  %v969_v39 = vmul.f32 %v2564_v56, %v1710_v52  ;;  %v2604_v55 = vpop.eup %1956  ;;  %v1177_v28 = vmul.f32 %v1955_v48, %v1017_v25  ;;  %v839_v44 = vmul.f32 %v2592_v26, %v1676_v49 }
 0x181   : > { %v1959_v47 = vpop.eup %1958  ;;  %v764_v22 = vmul.f32 1.0614054, %v2604_v55  ;;  %vm1257_vm10 = vcmp.lt.f32.partialorder %v2497_v14, 0.0  ;;  %v1692_v63 = vadd.f32 -0.28449672, %v887_v45  ;;  %v2613_v2 = vmul.f32 0.5, %v2519_v41 }
 0x182   : > { %1543 = vst.msk [vmem:[%s2243_s27 + $0x60] sm:$0xf] %vm1518_vm6, %v1773_v42  ;;  %v1001_v40 = vadd.f32 0.2548296, %v969_v39  ;;  %v1961_v7 = vpop.eup %1960  ;;  %v1209_v50 = vsub.f32 1.0, %v1177_v28  ;;  %1970 = vrcp.f32 %v682_v19  ;;  %v1098_v11 = vmul.f32 %v1066_v35, %v618_v13 }
 0x183   : > { %v871_v29 = vadd.f32 1.4214138, %v839_v44  ;;  %v1665_v24 = vadd.f32 -1.4531521, %v764_v22  ;;  %1972 = vpow2.f32 %v1162_v27  ;;  %v951_v32 = vmul.f32 %v2577_v51, %v1692_v63 }
 0x184   : > { %v1033_v60 = vmul.f32 %v2564_v56, %v1001_v40  ;;  %v1273_v53 = vsub.f32 0.0, %v1209_v50  ;;  %v1126_v3 = vmul.f32 1.442695, %v1082_v23  ;;  %v2618_v36 = vmul.f32 0.70710677, %v2602_v34  ;;  %v2620_v21 = vpop.eup %1962 }
 0x185   : > { %v903_v62 = vmul.f32 %v2592_v26, %v871_v29  ;;  %v828_v41 = vmul.f32 %v2604_v55, %v1665_v24  ;;  %v1965_v10 = vpop.eup %1964  ;;  %v983_v61 = vadd.f32 0.2548296, %v951_v32  ;;  %v780_v15 = vmul.f32 1.0614054, %v2620_v21 }
 0x186   : > { %v1193_v37 = vmul.f32 %v1959_v47, %v1033_v60  ;;  %v1305_v56 = vsel %vm1241_vm9, %v1273_v53, %v1209_v50  ;;  %v605_v8 = vand.u32 2147483647, %v2618_v36  ;;  %vm1239_vm11 = vcmp.lt.f32.partialorder %v2511_v30, 0.0  ;;  %v1967_v59 = vpop.eup %1966 }
 0x187   : > { %v1337_v16 = vadd.f32 1.0, %v1305_v56  ;;  %v1708_v4 = vadd.f32 -0.28449672, %v903_v62  ;;  %v860_v52 = vadd.f32 1.4214138, %v828_v41  ;;  %v1015_v25 = vmul.f32 %v2577_v51, %v983_v61 }
 0x188   : > { %v1225_v20 = vsub.f32 1.0, %v1193_v37  ;;  %v1681_v33 = vadd.f32 -1.4531521, %v780_v15  ;;  %1974 = vpow2.f32 %v1126_v3  ;;  %v637_v13 = vmul.f32 0.3275911, %v605_v8  ;;  %v2633_v42 = vpop.eup %1968  ;;  %v1834_v3 = vpop.f32.mrf.mxu1 }
 0x189   : > { %v1369_v18 = vmul.f32 %v1337_v16, %v2539_v57  ;;  %v967_v31 = vmul.f32 %v2592_v26, %v1708_v4  ;;  %v892_v48 = vmul.f32 %v2604_v55, %v860_v52  ;;  %v1175_v39 = vmul.f32 %v1961_v7, %v1015_v25 }
 0x18a   : > { %v1289_v27 = vsub.f32 0.0, %v1225_v20  ;;  %v844_v49 = vmul.f32 %v2620_v21, %v1681_v33  ;;  %v1158_v28 = vmul.f32 1.442695, %v1098_v11  ;;  %v669_v45 = vadd.f32 1.0, %v637_v13 }
 0x18b   : > { %v1760_v23 = vpack.c.bf16 %v1369_v18, %v1369_v18  ;;  %v999_v19 = vadd.f32 0.2548296, %v967_v31  ;;  %v1697_v47 = vadd.f32 -0.28449672, %v892_v48  ;;  %v1207_v40 = vsub.f32 1.0, %v1175_v39 }
 0x18c   : > { %v1321_v51 = vsel %vm1257_vm10, %v1289_v27, %v1225_v20  ;;  %v876_v44 = vadd.f32 1.4214138, %v844_v49  ;;  %v762_v22 = vmul.f32 1.0614054, %v2633_v42  ;;  %1976 = vrcp.f32 %v669_v45 }
 0x18d   : > { %v1353_v57 = vadd.f32 1.0, %v1321_v51  ;;  %1530 = vst.msk [vmem:[%s2243_s27 + $0x2c] sm:$0xf] %vm1518_vm6, %v1760_v23  ;;  %v1031_v35 = vmul.f32 %v2592_v26, %v999_v19  ;;  %v956_v7 = vmul.f32 %v2604_v55, %v1697_v47  ;;  %v1053_v50 = vsub.f32 0.0, %v605_v8 }
 0x18e   : > { %v1271_v60 = vsub.f32 0.0, %v1207_v40  ;;  %v908_v14 = vmul.f32 %v2620_v21, %v876_v44  ;;  %v1663_v29 = vadd.f32 -1.4531521, %v762_v22  ;;  %vm1255_vm12 = vcmp.lt.f32.partialorder %v2524_v5, 0.0 }
 0x18f   : > { %v1385_v63 = vmul.f32 %v1353_v57, %v2545_v1  ;;  %v2645_v24 = vpop.eup %1970  ;;  %v1191_v53 = vmul.f32 %v1965_v10, %v1031_v35  ;;  %v988_v32 = vadd.f32 0.2548296, %v956_v7  ;;  %1978 = vpow2.f32 %v1158_v28  ;;  %v450_v10 = vpop.f32.mrf.mxu0 }
 0x190   : > { %v1973_v26 = vpop.eup %1972  ;;  %v1303_v62 = vsel %vm1239_vm11, %v1271_v60, %v1207_v40  ;;  %v1713_v41 = vadd.f32 -0.28449672, %v908_v14  ;;  %v826_v1 = vmul.f32 %v2633_v42, %v1663_v29  ;;  %v778_v15 = vmul.f32 1.0614054, %v2645_v24 }
 0x191   : > { %v1776_v37 = vpack.c.bf16 %v1385_v63, %v1385_v63  ;;  %v1335_v11 = vadd.f32 1.0, %v1303_v62  ;;  %v1223_v56 = vsub.f32 1.0, %v1191_v53  ;;  %v1020_v61 = vmul.f32 %v2604_v55, %v988_v32 }
 0x192   : > { %v972_v16 = vmul.f32 %v2620_v21, %v1713_v41  ;;  %v858_v20 = vadd.f32 1.4214138, %v826_v1  ;;  %v1085_v4 = vmul.f32 %v1053_v50, %v605_v8  ;;  %v2657_v52 = vadd.f32 %v2464_v6, %v1834_v3 }
 0x193   : > { %1546 = vst.msk [vmem:[%s2243_s27 + $0x6c] sm:$0xf] %vm1518_vm6, %v1776_v37  ;;  %v1367_v30 = vmul.f32 %v1335_v11, %v2586_v17  ;;  %v1287_v25 = vsub.f32 0.0, %v1223_v56  ;;  %v1180_v33 = vmul.f32 %v1967_v59, %v1020_v61  ;;  %v1679_v13 = vadd.f32 -1.4531521, %v778_v15  ;;  %v514_v15 = vpop.f32.mrf.mxu1 }
 0x194   : > { %v1004_v18 = vadd.f32 0.2548296, %v972_v16  ;;  %v890_v55 = vmul.f32 %v2633_v42, %v858_v20  ;;  %v2662_v27 = vmul.f32 0.70710677, %v2657_v52  ;;  %v2665_v31 = vadd.f32 %v2464_v6, %v450_v10 }
 0x195   : > { %v1975_v48 = vpop.eup %1974  ;;  %v1758_v8 = vpack.c.bf16 %v1367_v30, %v1367_v30  ;;  %v1319_v39 = vsel %vm1255_vm12, %v1287_v25, %v1223_v56  ;;  %v1212_v49 = vsub.f32 1.0, %v1180_v33  ;;  %v842_v17 = vmul.f32 %v2645_v24, %v1679_v13 }
 0x196   : > { %v1351_v28 = vadd.f32 1.0, %v1319_v39  ;;  %v1036_v59 = vmul.f32 %v2620_v21, %v1004_v18  ;;  %v1695_v45 = vadd.f32 -0.28449672, %v890_v55  ;;  %v2672_v23 = vand.u32 2147483647, %v2662_v27 }
 0x197   : > { %1528 = vst.msk [vmem:[%s2243_s27 + $0x24] sm:$0xf] %vm1518_vm6, %v1758_v8  ;;  %v540_v51 = vmul.f32 0.5, %v2534_v43  ;;  %vm1244_vm13 = vcmp.lt.f32.partialorder %v2542_v0, 0.0  ;;  %v1276_v19 = vsub.f32 0.0, %v1212_v49  ;;  %vm1260_vm14 = vcmp.lt.f32.partialorder %v2558_v12, 0.0 }
 0x198   : > { %v874_v47 = vadd.f32 1.4214138, %v842_v17  ;;  %v1383_v5 = vmul.f32 %v1351_v28, %v2613_v2  ;;  %v1196_v57 = vmul.f32 %v1973_v26, %v1036_v59  ;;  %v954_v40 = vmul.f32 %v2633_v42, %v1695_v45 }
 0x199   : > { %v653_v21 = vmul.f32 0.3275911, %v2672_v23  ;;  %v1308_v44 = vsel %vm1244_vm13, %v1276_v19, %v1212_v49  ;;  %v1132_v35 = vmul.f32 1.442695, %v1085_v4  ;;  %v2683_v7 = vmul.f32 0.70710677, %v2665_v31  ;;  %v2685_v43 = vpop.eup %1976 }
 0x19a   : > { %v906_v22 = vmul.f32 %v2645_v24, %v874_v47  ;;  %v1774_v0 = vpack.c.bf16 %v1383_v5, %v1383_v5  ;;  %v1340_v50 = vadd.f32 1.0, %v1308_v44  ;;  %v1228_v63 = vsub.f32 1.0, %v1196_v57 }
 0x19b   : > { %v986_v60 = vadd.f32 0.2548296, %v954_v40  ;;  %v556_v2 = vmul.f32 0.5, %v2548_v9  ;;  %v765_v29 = vmul.f32 1.0614054, %v2685_v43  ;;  %v685_v53 = vadd.f32 1.0, %v653_v21 }
 0x19c   : > { %v1711_v14 = vadd.f32 -0.28449672, %v906_v22  ;;  %v1979_v32 = vpop.eup %1978  ;;  %1544 = vst.msk [vmem:[%s2243_s27 + $0x64] sm:$0xf] %vm1518_vm6, %v1774_v0  ;;  %v1372_v3 = vmul.f32 %v1340_v50, %v540_v51  ;;  %v1292_v26 = vsub.f32 0.0, %v1228_v63  ;;  %v2700_v33 = vadd.f32 %v2464_v6, %v514_v15 }
 0x19d   : > { %v1018_v37 = vmul.f32 %v2633_v42, %v986_v60  ;;  %v603_v62 = vand.u32 2147483647, %v2683_v7  ;;  %v1666_v1 = vadd.f32 -1.4531521, %v765_v29  ;;  %1980 = vrcp.f32 %v685_v53 }
 0x19e   : > { %v970_v41 = vmul.f32 %v2645_v24, %v1711_v14  ;;  %v1763_v9 = vpack.c.bf16 %v1372_v3, %v1372_v3  ;;  %v1324_v11 = vsel %vm1260_vm14, %v1292_v26, %v1228_v63  ;;  %1982 = vpow2.f32 %v1132_v35 }
 0x19f   : > { %v1178_v56 = vmul.f32 %v1975_v48, %v1018_v37  ;;  %v635_v61 = vmul.f32 0.3275911, %v603_v62  ;;  %v1356_v10 = vadd.f32 1.0, %v1324_v11  ;;  %v829_v20 = vmul.f32 %v2685_v43, %v1666_v1 }
 0x1a0   : > { %v1002_v16 = vadd.f32 0.2548296, %v970_v41  ;;  %1533 = vst.msk [vmem:[%s2243_s27 + $0x38] sm:$0xf] %vm1518_vm6, %v1763_v9  ;;  %vm1242_vm15 = vcmp.lt.f32.partialorder %v2574_v58, 0.0  ;;  %v1069_v8 = vsub.f32 0.0, %v2672_v23 }
 0x1a1   : > { %v1210_v42 = vsub.f32 1.0, %v1178_v56  ;;  %v667_v4 = vadd.f32 1.0, %v635_v61  ;;  %v1388_v12 = vmul.f32 %v1356_v10, %v556_v2  ;;  %v861_v25 = vadd.f32 1.4214138, %v829_v20 }
 0x1a2   : > { %v1034_v30 = vmul.f32 %v2645_v24, %v1002_v16  ;;  %v2706_v49 = vmul.f32 0.70710677, %v2700_v33  ;;  %v538_v24 = vmul.f32 0.5, %v2562_v38  ;;  %v1101_v19 = vmul.f32 %v1069_v8, %v2672_v23 }
 0x1a3   : > { %v1274_v13 = vsub.f32 0.0, %v1210_v42  ;;  %1984 = vrcp.f32 %v667_v4  ;;  %v1779_v18 = vpack.c.bf16 %v1388_v12, %v1388_v12  ;;  %v893_v48 = vmul.f32 %v2685_v43, %v861_v25 }
 0x1a4   : > { %v1194_v55 = vmul.f32 %v1979_v32, %v1034_v30  ;;  %v619_v58 = vand.u32 2147483647, %v2706_v49  ;;  %vm1258_vm0 = vcmp.lt.f32.partialorder %v2582_v54, 0.0  ;;  %v1051_v47 = vsub.f32 0.0, %v603_v62 }
 0x1a5   : > { %v1306_v39 = vsel %vm1242_vm15, %v1274_v13, %v1210_v42  ;;  %1549 = vst.msk [vmem:[%s2243_s27 + $0x78] sm:$0xf] %vm1518_vm6, %v1779_v18  ;;  %v1698_v28 = vadd.f32 -0.28449672, %v893_v48  ;;  %v554_v44 = vmul.f32 0.5, %v2571_v46  ;;  %vm1245_vm1 = vcmp.lt.f32.partialorder %v2618_v36, 0.0 }
 0x1a6   : > { %v1338_v6 = vadd.f32 1.0, %v1306_v39  ;;  %v1226_v17 = vsub.f32 1.0, %v1194_v55  ;;  %v651_v5 = vmul.f32 0.3275911, %v619_v58  ;;  %v1164_v63 = vmul.f32 1.442695, %v1101_v19 }
 0x1a7   : > { %v957_v51 = vmul.f32 %v2685_v43, %v1698_v28  ;;  %v1083_v54 = vmul.f32 %v1051_v47, %v603_v62  ;;  %v1067_v1 = vsub.f32 0.0, %v619_v58  ;;  %v541_v11 = vmul.f32 0.5, %v2602_v34 }
 0x1a8   : > { %v1370_v59 = vmul.f32 %v1338_v6, %v538_v24  ;;  %v1290_v45 = vsub.f32 0.0, %v1226_v17  ;;  %v683_v35 = vadd.f32 1.0, %v651_v5  ;;  %vm1261_vm2 = vcmp.lt.f32.partialorder %v2662_v27, 0.0 }
 0x1a9   : > { %v989_v21 = vadd.f32 0.2548296, %v957_v51  ;;  %v1128_v26 = vmul.f32 1.442695, %v1083_v54  ;;  %v1099_v20 = vmul.f32 %v1067_v1, %v619_v58  ;;  %v557_v5 = vmul.f32 0.5, %v2657_v52 }
 0x1aa   : > { %v1761_v57 = vpack.c.bf16 %v1370_v59, %v1370_v59  ;;  %v1322_v40 = vsel %vm1258_vm0, %v1290_v45, %v1226_v17  ;;  %v1981_v38 = vpop.eup %1980  ;;  %1986 = vrcp.f32 %v683_v35  ;;  %vm1243_vm3 = vcmp.lt.f32.partialorder %v2683_v7, 0.0 }
 0x1ab   : > { %v1354_v22 = vadd.f32 1.0, %v1322_v40  ;;  %v1021_v0 = vmul.f32 %v2685_v43, %v989_v21  ;;  %v781_v50 = vmul.f32 1.0614054, %v1981_v38  ;;  %v1983_v23 = vpop.eup %1982  ;;  %1988 = vpow2.f32 %v1164_v63 }
 0x1ac   : > { %1531 = vst.msk [vmem:[%s2243_s27 + $0x30] sm:$0xf] %vm1518_vm6, %v1761_v57  ;;  %1990 = vpow2.f32 %v1128_v26  ;;  %v1160_v18 = vmul.f32 1.442695, %v1099_v20  ;;  %v539_v27 = vmul.f32 0.5, %v2665_v31  ;;  %vm1259_vm4 = vcmp.lt.f32.partialorder %v2706_v49, 0.0 }
 0x1ad   : > { %v1386_v60 = vmul.f32 %v1354_v22, %v554_v44  ;;  %v1181_v2 = vmul.f32 %v1983_v23, %v1021_v0  ;;  %v1682_v14 = vadd.f32 -1.4531521, %v781_v50 }
 0x1ae   : > { %1992 = vpow2.f32 %v1160_v18 }
 0x1af   : > { %v1777_v29 = vpack.c.bf16 %v1386_v60, %v1386_v60  ;;  %v1213_v32 = vsub.f32 1.0, %v1181_v2  ;;  %v845_v3 = vmul.f32 %v1981_v38, %v1682_v14 }
 0x1b0   : > { %v1985_v53 = vpop.eup %1984 }
 0x1b1   : > { %1547 = vst.msk [vmem:[%s2243_s27 + $0x70] sm:$0xf] %vm1518_vm6, %v1777_v29  ;;  %v763_v46 = vmul.f32 1.0614054, %v1985_v53  ;;  %v1277_v37 = vsub.f32 0.0, %v1213_v32 }
 0x1b2   : > { %v877_v41 = vadd.f32 1.4214138, %v845_v3 }
 0x1b3   : > { %v1664_v43 = vadd.f32 -1.4531521, %v763_v46  ;;  %v1309_v62 = vsel %vm1245_vm1, %v1277_v37, %v1213_v32 }
 0x1b4   : > { %v909_v9 = vmul.f32 %v1981_v38, %v877_v41  ;;  %v1341_v56 = vadd.f32 1.0, %v1309_v62 }
 0x1b5   : > { %v827_v61 = vmul.f32 %v1985_v53, %v1664_v43 }
 0x1b6   : > { %v1714_v15 = vadd.f32 -0.28449672, %v909_v9  ;;  %v1373_v10 = vmul.f32 %v1341_v56, %v541_v11 }
 0x1b7   : > { %v859_v16 = vadd.f32 1.4214138, %v827_v61  ;;  %v1987_v30 = vpop.eup %1986 }
 0x1b8   : > { %v973_v42 = vmul.f32 %v1981_v38, %v1714_v15  ;;  %v1764_v4 = vpack.c.bf16 %v1373_v10, %v1373_v10  ;;  %v779_v13 = vmul.f32 1.0614054, %v1987_v30  ;;  %v1989_v48 = vpop.eup %1988 }
 0x1b9   : > { %v891_v12 = vmul.f32 %v1985_v53, %v859_v16  ;;  %v1991_v59 = vpop.eup %1990 }
 0x1ba   : > { %v1005_v25 = vadd.f32 0.2548296, %v973_v42  ;;  %1534 = vst.msk [vmem:[%s2243_s27 + $0x3c] sm:$0xf] %vm1518_vm6, %v1764_v4  ;;  %v1680_v8 = vadd.f32 -1.4531521, %v779_v13 }
 0x1bb   : > { %v1696_v36 = vadd.f32 -0.28449672, %v891_v12  ;;  %v1993_v52 = vpop.eup %1992 }
 0x1bc   : > { %v1037_v55 = vmul.f32 %v1981_v38, %v1005_v25  ;;  %v843_v6 = vmul.f32 %v1987_v30, %v1680_v8 }
 0x1bd   : > { %v955_v34 = vmul.f32 %v1985_v53, %v1696_v36 }
 0x1be   : > { %v1197_v39 = vmul.f32 %v1989_v48, %v1037_v55  ;;  %v875_v58 = vadd.f32 1.4214138, %v843_v6 }
 0x1bf   : > { %v987_v24 = vadd.f32 0.2548296, %v955_v34 }
 0x1c0   : > { %v1229_v17 = vsub.f32 1.0, %v1197_v39  ;;  %v907_v19 = vmul.f32 %v1987_v30, %v875_v58 }
 0x1c1   : > { %v1019_v28 = vmul.f32 %v1985_v53, %v987_v24  ;;  %v555_v53 = vmul.f32 0.5, %v2700_v33 }
 0x1c2   : > { %v1293_v45 = vsub.f32 0.0, %v1229_v17  ;;  %v1712_v21 = vadd.f32 -0.28449672, %v907_v19 }
 0x1c3   : > { %v1179_v51 = vmul.f32 %v1991_v59, %v1019_v28 }
 0x1c4   : > { %v1325_v47 = vsel %vm1261_vm2, %v1293_v45, %v1229_v17  ;;  %v971_v22 = vmul.f32 %v1987_v30, %v1712_v21 }
 0x1c5   : > { %v1357_v57 = vadd.f32 1.0, %v1325_v47  ;;  %v1211_v40 = vsub.f32 1.0, %v1179_v51 }
 0x1c6   : > { %v1003_v50 = vadd.f32 0.2548296, %v971_v22 }
 0x1c7   : > { %v1389_v38 = vmul.f32 %v1357_v57, %v557_v5  ;;  %v1275_v44 = vsub.f32 0.0, %v1211_v40 }
 0x1c8   : > { %v1035_v23 = vmul.f32 %v1987_v30, %v1003_v50 }
 0x1c9   : > { %v1780_v35 = vpack.c.bf16 %v1389_v38, %v1389_v38  ;;  %v1307_v0 = vsel %vm1243_vm3, %v1275_v44, %v1211_v40 }
 0x1ca   : > { %v1339_v63 = vadd.f32 1.0, %v1307_v0  ;;  %v1195_v54 = vmul.f32 %v1993_v52, %v1035_v23 }
 0x1cb   : > { %1550 = vst.msk [vmem:[%s2243_s27 + $0x7c] sm:$0xf] %vm1518_vm6, %v1780_v35 }
 0x1cc   : > { %v1371_v60 = vmul.f32 %v1339_v63, %v539_v27  ;;  %v1227_v14 = vsub.f32 1.0, %v1195_v54 }
 0x1ce   : > { %v1762_v2 = vpack.c.bf16 %v1371_v60, %v1371_v60  ;;  %v1291_v29 = vsub.f32 0.0, %v1227_v14 }
 0x1d0   : > { %1532 = vst.msk [vmem:[%s2243_s27 + $0x34] sm:$0xf] %vm1518_vm6, %v1762_v2  ;;  %v1323_v7 = vsel %vm1259_vm4, %v1291_v29, %v1227_v14 }
 0x1d1   : > { %v1355_v32 = vadd.f32 1.0, %v1323_v7 }
 0x1d3   : > { %v1387_v31 = vmul.f32 %v1355_v32, %v555_v53 }
 0x1d5   : > { %v1778_v3 = vpack.c.bf16 %v1387_v31, %v1387_v31 }
 0x1d7   : > { %1548 = vst.msk [vmem:[%s2243_s27 + $0x74] sm:$0xf] %vm1518_vm6, %v1778_v3 }
 0x1d8 PF: > { %s13_s12 = sadd.s32 1, %s2001_s12  }
 0x1d9   : > { %p10_p4 = scmp.ge.s32.totalorder %s13_s12, 4  }
 0x1db   :  { %12 = sbr.rel (!%p10_p4) target bundleno = 1 (0x1), region = 62 }

// kernel: backbone_forward.13
= control target key start
LH: loop header
LB: loop body
LE: loop exit
PB: predicated region body
PF: predicated region fallthrough
CT: control target
= control target key end

     0   :  { %s1249_s15 = smov 0   ;;  %s1492_s0 = inlined_call_operand.vmem [shape: bf16[512,72], index: 0, kind: input, shape index: {}]   ;;  %s1493_s1 = inlined_call_operand.vmem [shape: bf16[72,8], index: 1, kind: input, shape index: {}]   ;;  %s1494_s2 = inlined_call_operand.vmem [shape: f32[1,8], index: 2, kind: input, shape index: {}]   ;;  %s1495_s3 = inlined_call_operand.vmem [shape: bf16[512,8], index: 3, kind: input, shape index: {}]   ;;  %s1496_s4 = inlined_call_operand.vmem [shape: bf16[512,8], index: 4, kind: output, shape index: {}]  }
   0x1 LB: > { %s918_s16 = sadd.s32 4294967295, %s1222_s15   ;;  %p922_p0 = scmp.ge.s32.totalorder %s1222_s15, 1  ;;  %s1222_s15 = sphi %s1249_s15, %s14_s15  }
   0x2   : > { %p174_p1 = scmp.lt.s32.totalorder %s1222_s15, 3 }
   0x4   : > { %p175_p2 = pnand %p922_p0, %p174_p1 }
   0x5   : > { %s923_s21 = sshll.u32 (!%p175_p2), %s918_s16, 5 }
   0x6   : > { %178 = sbr.rel (%p175_p2) target bundleno = 262 (0x106), region = 36  ;;  %p206_p3 = scmp.lt.s32.totalorder (!%p175_p2), %s923_s21, 63 }
   0xb   : > { %v1195_v0 = vld [vmem:[%s1493_s1 + $0x20] ss:$0 sps:$4 sm:$0xff]   ;;  %vm428_vm0 = vcmask 1043456   ;;  %v1196_v1 = vld [vmem:[%s1493_s1 + $0x18] sm:$0xff]   ;;  %v1197_v3 = vld [vmem:[%s1493_s1 + $0x10] sm:$0xff]   ;;  %s1498_s21 = smov (!%p206_p3, %s923_s21), 63 }
   0xc   : > { %1185 = vmatprep.subr.msk.bf16.mxu0 %vm428_vm0, %v1195_v0  ;;  %1186 = vmatprep.subr.msk.bf16.mxu1 %vm428_vm0, %v1195_v0  ;;  %v430_v2 = vsel %vm428_vm0, %v1195_v0, 0  ;;  %v1198_v4 = vld [vmem:[%s1493_s1 + $0x8] sm:$0xff]   ;;  %s1269_s26 = sshll.u32 %s1498_s21, 2  ;;  %vm379_vm1 = vcmask 588800   ;;  %v1199_v7 = vld [vmem:[%s1493_s1] sm:$0xff]   ;;  %vm817_vm2 = vcmask 60416  }
   0xd   : > { %1134 = vmatpush3.bf16.msra.mxu0 %v430_v2  ;;  %1180 = vmatpush3.bf16.msra.mxu1 %v430_v2  ;;  %s1275_s29 = scalar_lea.vmem %s1492_s0, %s1269_s26  ;;  %s1316_s8 = scalar_lea.vmem %s1495_s3, %s1269_s26  ;;  %v1323_v24 = vld [vmem:[%s1494_s2] ss:$0 sm:$0xff] }
   0xe   : > { %1135 = vmatprep.subr.bf16.mxu0 %v1196_v1  ;;  %1176 = vmatprep.subr.bf16.mxu1 %v1196_v1  ;;  %v1200_v5 = vld [vmem:[%s1275_s29] sm:$0xff]   ;;  %v1202_v8 = vld [vmem:[%s1275_s29 + $0x8] sm:$0xff]   ;;  %v1204_v10 = vld [vmem:[%s1275_s29 + $0x10] sm:$0xff]   ;;  %s1341_s13 = scalar_lea.vmem %s1496_s4, %s1269_s26 }
   0xf   : > { %v1201_v6 = vld [vmem:[%s1275_s29 + $0x40] sm:$0xff]   ;;  %1143 = vmatprep.mubr.msk.bf16.mxu0 %vm379_vm1, %v1200_v5  ;;  %v1203_v9 = vld [vmem:[%s1275_s29 + $0x48] sm:$0xff]   ;;  %v1205_v11 = vld [vmem:[%s1275_s29 + $0x50] sm:$0xff]  }
  0x10   : > { %1159 = vmatprep.mubr.msk.bf16.mxu1 %vm379_vm1, %v1201_v6  ;;  %v1206_v12 = vld [vmem:[%s1275_s29 + $0x18] sm:$0xff]   ;;  %v1208_v14 = vld [vmem:[%s1275_s29 + $0x20] sm:$0xff]   ;;  %v1210_v16 = vld [vmem:[%s1275_s29 + $0x28] sm:$0xff]  }
  0x11   : > { %1136 = vmatpush3.bf16.msra.mxu0 %v1196_v1  ;;  %1181 = vmatpush3.bf16.msra.mxu1 %v1196_v1  ;;  %v1207_v13 = vld [vmem:[%s1275_s29 + $0x58] sm:$0xff]   ;;  %v1209_v15 = vld [vmem:[%s1275_s29 + $0x60] sm:$0xff]   ;;  %v1211_v17 = vld [vmem:[%s1275_s29 + $0x68] sm:$0xff]  }
  0x12   : > { %1137 = vmatprep.subr.bf16.mxu0 %v1197_v3  ;;  %1177 = vmatprep.subr.bf16.mxu1 %v1197_v3  ;;  %v1212_v18 = vld [vmem:[%s1275_s29 + $0x30] sm:$0xff]   ;;  %v1214_v20 = vld [vmem:[%s1275_s29 + $0x38] sm:$0xff]   ;;  %v1097_v22 = vld [vmem:[%s1316_s8 + $0x8] sm:$0xff]  }
  0x13   : > { %v1213_v19 = vld [vmem:[%s1275_s29 + $0x70] sm:$0xff]   ;;  %v1215_v21 = vld [vmem:[%s1275_s29 + $0x78] sm:$0xff]   ;;  %v1105_v23 = vld [vmem:[%s1316_s8 + $0x48] sm:$0xff]   ;;  %v1039_v27 = vunpack.c.l.bf16 %v1097_v22  ;;  %v1040_v44 = vunpack.c.h.bf16 %v1097_v22 }
  0x14   : > { %v1034_v25 = vld [vmem:[%s1316_s8] sm:$0xff]   ;;  %v1071_v28 = vunpack.c.l.bf16 %v1105_v23  ;;  %v1332_v41 = vld [vmem:[%s1316_s8 + $0x18] sm:$0xff]   ;;  %v1072_v46 = vunpack.c.h.bf16 %v1105_v23  ;;  %v1344_v53 = vld [vmem:[%s1316_s8 + $0x10] sm:$0xff]  }
  0x15   : > { %1138 = vmatpush3.bf16.msra.mxu0 %v1197_v3  ;;  %1182 = vmatpush3.bf16.msra.mxu1 %v1197_v3  ;;  %v1104_v26 = vld [vmem:[%s1316_s8 + $0x40] sm:$0xff]   ;;  %v1035_v33 = vunpack.c.l.bf16 %v1034_v25  ;;  %v1335_v42 = vld [vmem:[%s1316_s8 + $0x58] sm:$0xff]   ;;  %v1036_v47 = vunpack.c.h.bf16 %v1034_v25  ;;  %v1347_v54 = vld [vmem:[%s1316_s8 + $0x50] sm:$0xff]   ;;  %v1047_v59 = vunpack.c.l.bf16 %v1332_v41  ;;  %v1043_v5 = vunpack.c.l.bf16 %v1344_v53 }
  0x16   : > { %1139 = vmatprep.subr.bf16.mxu0 %v1198_v4  ;;  %1178 = vmatprep.subr.bf16.mxu1 %v1198_v4  ;;  %v1067_v34 = vunpack.c.l.bf16 %v1104_v26  ;;  %v1068_v48 = vunpack.c.h.bf16 %v1104_v26  ;;  %v1079_v60 = vunpack.c.l.bf16 %v1335_v42  ;;  %v1075_v6 = vunpack.c.l.bf16 %v1347_v54  ;;  %v1373_v22 = vld [vmem:[%s1316_s8 + $0x68] sm:$0xff]  }
  0x19   : > { %1140 = vmatpush3.bf16.msra.mxu0 %v1198_v4  ;;  %1183 = vmatpush3.bf16.msra.mxu1 %v1198_v4 }
  0x1a   : > { %1141 = vmatprep.subr.bf16.mxu0 %v1199_v7  ;;  %1179 = vmatprep.subr.bf16.mxu1 %v1199_v7 }
  0x1d   : > { %1142 = vmatpush3.bf16.msra.mxu0 %v1199_v7  ;;  %1184 = vmatpush3.bf16.msra.mxu1 %v1199_v7 }
  0x20   : > { %1144 = vmatmul.mubr.msk.bf16.vlgmr.msra.gmra.mxu0 %vm379_vm1, %v1202_v8  ;;  %1160 = vmatmul.mubr.msk.bf16.vlgmr.msra.gmra.mxu1 %vm379_vm1, %v1203_v9 }
  0x21   : > { %1147 = vmatprep.mubr.msk.bf16.mxu0 %vm379_vm1, %v1204_v10  ;;  %1163 = vmatprep.mubr.msk.bf16.mxu1 %vm379_vm1, %v1205_v11 }
  0x28   : > { %1148 = vmatmul.mubr.msk.bf16.gmra.mxu0 %vm379_vm1, %v1206_v12  ;;  %1164 = vmatmul.mubr.msk.bf16.gmra.mxu1 %vm379_vm1, %v1207_v13 }
  0x29   : > { %1151 = vmatprep.mubr.msk.bf16.mxu0 %vm379_vm1, %v1208_v14  ;;  %1167 = vmatprep.mubr.msk.bf16.mxu1 %vm379_vm1, %v1209_v15  ;;  %v1048_v15 = vunpack.c.h.bf16 %v1332_v41  ;;  %v1087_v41 = vunpack.c.l.bf16 %v1373_v22 }
  0x30   : > { %1152 = vmatmul.mubr.msk.bf16.gmra.mxu0 %vm379_vm1, %v1210_v16  ;;  %1168 = vmatmul.mubr.msk.bf16.gmra.mxu1 %vm379_vm1, %v1211_v17  ;;  %v1080_v16 = vunpack.c.h.bf16 %v1335_v42 }
  0x31   : > { %1155 = vmatprep.mubr.msk.bf16.mxu0 %vm379_vm1, %v1212_v18  ;;  %1171 = vmatprep.mubr.msk.bf16.mxu1 %vm379_vm1, %v1213_v19 }
  0x38   : > { %1156 = vmatmul.mubr.msk.bf16.gmra.mxu0 %vm379_vm1, %v1214_v20  ;;  %1172 = vmatmul.mubr.msk.bf16.gmra.mxu1 %vm379_vm1, %v1215_v21  ;;  %v1370_v21 = vld [vmem:[%s1316_s8 + $0x28] sm:$0xff]  }
  0xe0   : > { %v1145_v29 = vpop.f32.mrf.mxu0  ;;  %v1161_v30 = vpop.f32.mrf.mxu1 }
  0xe1   : > { %v475_v31 = vadd.f32 %v1145_v29, %v1323_v24  ;;  %v539_v32 = vadd.f32 %v1161_v30, %v1323_v24  ;;  %v1076_v29 = vunpack.c.h.bf16 %v1347_v54 }
  0xe2   : > { %v466_v35 = vpop.f32.mrf.mxu0  ;;  %v530_v36 = vpop.f32.mrf.mxu1 }
  0xe3   : > { %v659_v37 = vadd.f32 %v1039_v27, %v475_v31  ;;  %v675_v38 = vadd.f32 %v1071_v28, %v539_v32  ;;  %v467_v39 = vadd.f32 %v1323_v24, %v466_v35  ;;  %v531_v40 = vadd.f32 %v1323_v24, %v530_v36  ;;  %v1393_v35 = vld [vmem:[%s1316_s8 + $0x60] sm:$0xff]  }
  0xe4   : > { %v1146_v43 = vpop.f32.mrf.mxu0  ;;  %v1162_v45 = vpop.f32.mrf.mxu1  ;;  %v1044_v28 = vunpack.c.h.bf16 %v1344_v53 }
  0xe5   : > { %v1003_v49 = vpack.c.bf16 %v659_v37, %v659_v37  ;;  %v1019_v50 = vpack.c.bf16 %v675_v38, %v675_v38  ;;  %v657_v51 = vadd.f32 %v1035_v33, %v467_v39  ;;  %v673_v52 = vadd.f32 %v1067_v34, %v531_v40  ;;  %v1390_v34 = vld [vmem:[%s1316_s8 + $0x20] sm:$0xff]  }
  0xe6   : > { %v478_v55 = vadd.f32 %v1146_v43, %v1323_v24  ;;  %v542_v56 = vadd.f32 %v1162_v45, %v1323_v24  ;;  %v469_v57 = vpop.f32.mrf.mxu0  ;;  %v533_v58 = vpop.f32.mrf.mxu1  ;;  %v1055_v40 = vunpack.c.l.bf16 %v1370_v21 }
  0xe7   : > { %820 = vst.msk [vmem:[%s1341_s13 + $0x8] sm:$0xf] %vm817_vm2, %v1003_v49  ;;  %836 = vst.msk [vmem:[%s1341_s13 + $0x48] sm:$0xf] %vm817_vm2, %v1019_v50  ;;  %v1001_v61 = vpack.c.bf16 %v657_v51, %v657_v51  ;;  %v1017_v62 = vpack.c.bf16 %v673_v52, %v673_v52  ;;  %v470_v63 = vadd.f32 %v1323_v24, %v469_v57  ;;  %v1051_v50 = vunpack.c.l.bf16 %v1390_v34 }
  0xe8   : > { %v534_v0 = vadd.f32 %v1323_v24, %v533_v58  ;;  %v660_v1 = vadd.f32 %v1040_v44, %v478_v55  ;;  %v676_v2 = vadd.f32 %v1072_v46, %v542_v56  ;;  %v1149_v3 = vpop.f32.mrf.mxu0  ;;  %v1165_v4 = vpop.f32.mrf.mxu1  ;;  %v1083_v51 = vunpack.c.l.bf16 %v1393_v35 }
  0xe9   : > { %818 = vst.msk [vmem:[%s1341_s13] sm:$0xf] %vm817_vm2, %v1001_v61  ;;  %834 = vst.msk [vmem:[%s1341_s13 + $0x40] sm:$0xf] %vm817_vm2, %v1017_v62  ;;  %v658_v7 = vadd.f32 %v1036_v47, %v470_v63  ;;  %v491_v9 = vadd.f32 %v1149_v3, %v1323_v24  ;;  %v555_v10 = vadd.f32 %v1165_v4, %v1323_v24  ;;  %v1088_v61 = vunpack.c.h.bf16 %v1373_v22  ;;  %v1423_v3 = vld [vmem:[%s1316_s8 + $0x78] sm:$0xff]  }
  0xea   : > { %v674_v8 = vadd.f32 %v1068_v48, %v534_v0  ;;  %v1004_v11 = vpack.c.bf16 %v660_v1, %v660_v1  ;;  %v1020_v12 = vpack.c.bf16 %v676_v2, %v676_v2  ;;  %v482_v13 = vpop.f32.mrf.mxu0  ;;  %v546_v14 = vpop.f32.mrf.mxu1  ;;  %v1420_v2 = vld [vmem:[%s1316_s8 + $0x38] sm:$0xff]  }
  0xeb   : > { %v1002_v17 = vpack.c.bf16 %v658_v7, %v658_v7  ;;  %v663_v19 = vadd.f32 %v1047_v59, %v491_v9  ;;  %v679_v20 = vadd.f32 %v1079_v60, %v555_v10  ;;  %v483_v23 = vadd.f32 %v1323_v24, %v482_v13 }
  0xec   : > { %v1018_v18 = vpack.c.bf16 %v674_v8, %v674_v8  ;;  %821 = vst.msk [vmem:[%s1341_s13 + $0xc] sm:$0xf] %vm817_vm2, %v1004_v11  ;;  %837 = vst.msk [vmem:[%s1341_s13 + $0x4c] sm:$0xf] %vm817_vm2, %v1020_v12  ;;  %v547_v25 = vadd.f32 %v1323_v24, %v546_v14  ;;  %v1150_v26 = vpop.f32.mrf.mxu0  ;;  %v1166_v27 = vpop.f32.mrf.mxu1  ;;  %v1056_v60 = vunpack.c.h.bf16 %v1370_v21  ;;  %v1052_v8 = vunpack.c.h.bf16 %v1390_v34  ;;  %v1434_v14 = vld [vmem:[%s1316_s8 + $0x30] sm:$0xff]  }
  0xed   : > { %819 = vst.msk [vmem:[%s1341_s13 + $0x4] sm:$0xf] %vm817_vm2, %v1002_v17  ;;  %v1007_v30 = vpack.c.bf16 %v663_v19, %v663_v19  ;;  %v1023_v31 = vpack.c.bf16 %v679_v20, %v679_v20  ;;  %v494_v32 = vadd.f32 %v1150_v26, %v1323_v24  ;;  %v558_v33 = vadd.f32 %v1166_v27, %v1323_v24 }
  0xee   : > { %835 = vst.msk [vmem:[%s1341_s13 + $0x44] sm:$0xf] %vm817_vm2, %v1018_v18  ;;  %v661_v36 = vadd.f32 %v1043_v5, %v483_v23  ;;  %v677_v37 = vadd.f32 %v1075_v6, %v547_v25  ;;  %v485_v38 = vpop.f32.mrf.mxu0  ;;  %v549_v39 = vpop.f32.mrf.mxu1  ;;  %v1084_v9 = vunpack.c.h.bf16 %v1393_v35  ;;  %v1063_v20 = vunpack.c.l.bf16 %v1420_v2 }
  0xef   : > { %824 = vst.msk [vmem:[%s1341_s13 + $0x18] sm:$0xf] %vm817_vm2, %v1007_v30  ;;  %840 = vst.msk [vmem:[%s1341_s13 + $0x58] sm:$0xf] %vm817_vm2, %v1023_v31  ;;  %v664_v42 = vadd.f32 %v1048_v15, %v494_v32  ;;  %v680_v43 = vadd.f32 %v1080_v16, %v558_v33  ;;  %v486_v44 = vadd.f32 %v1323_v24, %v485_v38  ;;  %v1437_v15 = vld [vmem:[%s1316_s8 + $0x70] sm:$0xff]   ;;  %v1095_v21 = vunpack.c.l.bf16 %v1423_v3 }
  0xf0   : > { %v550_v45 = vadd.f32 %v1323_v24, %v549_v39  ;;  %v1005_v46 = vpack.c.bf16 %v661_v36, %v661_v36  ;;  %v1021_v47 = vpack.c.bf16 %v677_v37, %v677_v37  ;;  %v1153_v48 = vpop.f32.mrf.mxu0  ;;  %v1169_v49 = vpop.f32.mrf.mxu1  ;;  %v1059_v31 = vunpack.c.l.bf16 %v1434_v14 }
  0xf1   : > { %v1008_v52 = vpack.c.bf16 %v664_v42, %v664_v42  ;;  %v1024_v53 = vpack.c.bf16 %v680_v43, %v680_v43  ;;  %v662_v54 = vadd.f32 %v1044_v28, %v486_v44  ;;  %v507_v56 = vadd.f32 %v1153_v48, %v1323_v24 }
  0xf2   : > { %v678_v55 = vadd.f32 %v1076_v29, %v550_v45  ;;  %822 = vst.msk [vmem:[%s1341_s13 + $0x10] sm:$0xf] %vm817_vm2, %v1005_v46  ;;  %838 = vst.msk [vmem:[%s1341_s13 + $0x50] sm:$0xf] %vm817_vm2, %v1021_v47  ;;  %v571_v57 = vadd.f32 %v1169_v49, %v1323_v24  ;;  %v498_v58 = vpop.f32.mrf.mxu0  ;;  %v562_v59 = vpop.f32.mrf.mxu1  ;;  %v1091_v32 = vunpack.c.l.bf16 %v1437_v15  ;;  %v1096_v42 = vunpack.c.h.bf16 %v1423_v3 }
  0xf3   : > { %825 = vst.msk [vmem:[%s1341_s13 + $0x1c] sm:$0xf] %vm817_vm2, %v1008_v52  ;;  %841 = vst.msk [vmem:[%s1341_s13 + $0x5c] sm:$0xf] %vm817_vm2, %v1024_v53  ;;  %v1006_v62 = vpack.c.bf16 %v662_v54, %v662_v54  ;;  %v499_v0 = vadd.f32 %v1323_v24, %v498_v58  ;;  %v563_v1 = vadd.f32 %v1323_v24, %v562_v59  ;;  %v1092_v52 = vunpack.c.h.bf16 %v1437_v15 }
  0xf4   : > { %v1022_v63 = vpack.c.bf16 %v678_v55, %v678_v55  ;;  %v667_v4 = vadd.f32 %v1055_v40, %v507_v56  ;;  %v683_v5 = vadd.f32 %v1087_v41, %v571_v57  ;;  %v1154_v6 = vpop.f32.mrf.mxu0  ;;  %v1170_v7 = vpop.f32.mrf.mxu1  ;;  %v1064_v41 = vunpack.c.h.bf16 %v1420_v2 }
  0xf5   : > { %823 = vst.msk [vmem:[%s1341_s13 + $0x14] sm:$0xf] %vm817_vm2, %v1006_v62  ;;  %v665_v10 = vadd.f32 %v1051_v50, %v499_v0  ;;  %v681_v11 = vadd.f32 %v1083_v51, %v563_v1  ;;  %v510_v12 = vadd.f32 %v1154_v6, %v1323_v24  ;;  %v574_v13 = vadd.f32 %v1170_v7, %v1323_v24 }
  0xf6   : > { %839 = vst.msk [vmem:[%s1341_s13 + $0x54] sm:$0xf] %vm817_vm2, %v1022_v63  ;;  %v1011_v16 = vpack.c.bf16 %v667_v4, %v667_v4  ;;  %v1027_v17 = vpack.c.bf16 %v683_v5, %v683_v5  ;;  %v501_v18 = vpop.f32.mrf.mxu0  ;;  %v565_v19 = vpop.f32.mrf.mxu1  ;;  %v1060_v51 = vunpack.c.h.bf16 %v1434_v14 }
  0xf7   : > { %v1009_v22 = vpack.c.bf16 %v665_v10, %v665_v10  ;;  %v1025_v23 = vpack.c.bf16 %v681_v11, %v681_v11  ;;  %v668_v25 = vadd.f32 %v1056_v60, %v510_v12  ;;  %v684_v26 = vadd.f32 %v1088_v61, %v574_v13 }
  0xf8   : > { %828 = vst.msk [vmem:[%s1341_s13 + $0x28] sm:$0xf] %vm817_vm2, %v1011_v16  ;;  %844 = vst.msk [vmem:[%s1341_s13 + $0x68] sm:$0xf] %vm817_vm2, %v1027_v17  ;;  %v502_v27 = vadd.f32 %v1323_v24, %v501_v18  ;;  %v566_v28 = vadd.f32 %v1323_v24, %v565_v19  ;;  %v1157_v29 = vpop.f32.mrf.mxu0  ;;  %v1173_v30 = vpop.f32.mrf.mxu1 }
  0xf9   : > { %826 = vst.msk [vmem:[%s1341_s13 + $0x20] sm:$0xf] %vm817_vm2, %v1009_v22  ;;  %842 = vst.msk [vmem:[%s1341_s13 + $0x60] sm:$0xf] %vm817_vm2, %v1025_v23  ;;  %v1012_v33 = vpack.c.bf16 %v668_v25, %v668_v25  ;;  %v1028_v34 = vpack.c.bf16 %v684_v26, %v684_v26  ;;  %v523_v35 = vadd.f32 %v1157_v29, %v1323_v24 }
  0xfa   : > { %v587_v36 = vadd.f32 %v1173_v30, %v1323_v24  ;;  %v666_v37 = vadd.f32 %v1052_v8, %v502_v27  ;;  %v682_v38 = vadd.f32 %v1084_v9, %v566_v28  ;;  %v514_v39 = vpop.f32.mrf.mxu0  ;;  %v578_v40 = vpop.f32.mrf.mxu1 }
  0xfb   : > { %829 = vst.msk [vmem:[%s1341_s13 + $0x2c] sm:$0xf] %vm817_vm2, %v1012_v33  ;;  %845 = vst.msk [vmem:[%s1341_s13 + $0x6c] sm:$0xf] %vm817_vm2, %v1028_v34  ;;  %v671_v43 = vadd.f32 %v1063_v20, %v523_v35  ;;  %v515_v45 = vadd.f32 %v1323_v24, %v514_v39  ;;  %v579_v46 = vadd.f32 %v1323_v24, %v578_v40 }
  0xfc   : > { %v687_v44 = vadd.f32 %v1095_v21, %v587_v36  ;;  %v1010_v47 = vpack.c.bf16 %v666_v37, %v666_v37  ;;  %v1026_v48 = vpack.c.bf16 %v682_v38, %v682_v38  ;;  %v1158_v49 = vpop.f32.mrf.mxu0  ;;  %v1174_v50 = vpop.f32.mrf.mxu1 }
  0xfd   : > { %v1015_v53 = vpack.c.bf16 %v671_v43, %v671_v43  ;;  %v669_v55 = vadd.f32 %v1059_v31, %v515_v45  ;;  %v685_v56 = vadd.f32 %v1091_v32, %v579_v46  ;;  %v526_v57 = vadd.f32 %v1158_v49, %v1323_v24 }
  0xfe   : > { %v1031_v54 = vpack.c.bf16 %v687_v44, %v687_v44  ;;  %827 = vst.msk [vmem:[%s1341_s13 + $0x24] sm:$0xf] %vm817_vm2, %v1010_v47  ;;  %843 = vst.msk [vmem:[%s1341_s13 + $0x64] sm:$0xf] %vm817_vm2, %v1026_v48  ;;  %v590_v58 = vadd.f32 %v1174_v50, %v1323_v24  ;;  %v517_v59 = vpop.f32.mrf.mxu0  ;;  %v581_v60 = vpop.f32.mrf.mxu1 }
  0xff   : > { %832 = vst.msk [vmem:[%s1341_s13 + $0x38] sm:$0xf] %vm817_vm2, %v1015_v53  ;;  %v1013_v61 = vpack.c.bf16 %v669_v55, %v669_v55  ;;  %v1029_v62 = vpack.c.bf16 %v685_v56, %v685_v56  ;;  %v518_v63 = vadd.f32 %v1323_v24, %v517_v59  ;;  %v582_v0 = vadd.f32 %v1323_v24, %v581_v60 }
 0x100   : > { %848 = vst.msk [vmem:[%s1341_s13 + $0x78] sm:$0xf] %vm817_vm2, %v1031_v54  ;;  %v672_v1 = vadd.f32 %v1064_v41, %v526_v57  ;;  %v688_v2 = vadd.f32 %v1096_v42, %v590_v58 }
 0x101   : > { %830 = vst.msk [vmem:[%s1341_s13 + $0x30] sm:$0xf] %vm817_vm2, %v1013_v61  ;;  %846 = vst.msk [vmem:[%s1341_s13 + $0x70] sm:$0xf] %vm817_vm2, %v1029_v62  ;;  %v670_v3 = vadd.f32 %v1060_v51, %v518_v63  ;;  %v686_v4 = vadd.f32 %v1092_v52, %v582_v0 }
 0x102   : > { %v1016_v5 = vpack.c.bf16 %v672_v1, %v672_v1  ;;  %v1032_v6 = vpack.c.bf16 %v688_v2, %v688_v2 }
 0x103   : > { %v1014_v7 = vpack.c.bf16 %v670_v3, %v670_v3  ;;  %v1030_v8 = vpack.c.bf16 %v686_v4, %v686_v4 }
 0x104   : > { %833 = vst.msk [vmem:[%s1341_s13 + $0x3c] sm:$0xf] %vm817_vm2, %v1016_v5  ;;  %849 = vst.msk [vmem:[%s1341_s13 + $0x7c] sm:$0xf] %vm817_vm2, %v1032_v6 }
 0x105   : > { %831 = vst.msk [vmem:[%s1341_s13 + $0x34] sm:$0xf] %vm817_vm2, %v1014_v7  ;;  %847 = vst.msk [vmem:[%s1341_s13 + $0x74] sm:$0xf] %vm817_vm2, %v1030_v8 }
 0x106 PF: > { %s14_s15 = sadd.s32 1, %s1222_s15  }
 0x107   : > { %p11_p4 = scmp.ge.s32.totalorder %s14_s15, 4  }
 0x109   :  { %13 = sbr.rel (!%p11_p4) target bundleno = 1 (0x1), region = 69 }

// kernel: backbone_forward.12
= control target key start
LH: loop header
LB: loop body
LE: loop exit
PB: predicated region body
PF: predicated region fallthrough
CT: control target
= control target key end

     0   :  { %s2063_s12 = smov 0   ;;  %s2788_s0 = inlined_call_operand.vmem [shape: bf16[512,72], index: 0, kind: input, shape index: {}]   ;;  %s2789_s1 = inlined_call_operand.vmem [shape: bf16[72,8], index: 1, kind: input, shape index: {}]   ;;  %s2790_s2 = inlined_call_operand.vmem [shape: f32[1,8], index: 2, kind: input, shape index: {}]   ;;  %s2791_s3 = inlined_call_operand.vmem [shape: bf16[512,8], index: 3, kind: output, shape index: {}]  }
   0x1 LB: > { %s1625_s13 = sadd.s32 4294967295, %s2041_s12   ;;  %p1629_p0 = scmp.ge.s32.totalorder %s2041_s12, 1  ;;  %s2041_s12 = sphi %s2063_s12, %s13_s12  }
   0x2   : > { %p138_p1 = scmp.lt.s32.totalorder %s2041_s12, 3 }
   0x4   : > { %p139_p2 = pnand %p1629_p0, %p138_p1 }
   0x5   : > { %s1630_s18 = sshll.u32 (!%p139_p2), %s1625_s13, 5 }
   0x6   : > { %142 = sbr.rel (%p139_p2) target bundleno = 480 (0x1e0), region = 32  ;;  %p163_p3 = scmp.lt.s32.totalorder (!%p139_p2), %s1630_s18, 63 }
   0xb   : > { %v1885_v0 = vld [vmem:[%s2789_s1 + $0x20] ss:$0 sps:$4 sm:$0xff]   ;;  %vm379_vm0 = vcmask 1043456   ;;  %v1886_v1 = vld [vmem:[%s2789_s1 + $0x18] sm:$0xff]   ;;  %v1887_v3 = vld [vmem:[%s2789_s1 + $0x10] sm:$0xff]   ;;  %s2793_s18 = smov (!%p163_p3, %s1630_s18), 63 }
   0xc   : > { %1875 = vmatprep.subr.msk.bf16.mxu0 %vm379_vm0, %v1885_v0  ;;  %1876 = vmatprep.subr.msk.bf16.mxu1 %vm379_vm0, %v1885_v0  ;;  %v381_v2 = vsel %vm379_vm0, %v1885_v0, 0  ;;  %v1888_v4 = vld [vmem:[%s2789_s1 + $0x8] sm:$0xff]   ;;  %s1631_s23 = sshll.u32 %s2793_s18, 2  ;;  %vm330_vm1 = vcmask 588800   ;;  %v1889_v7 = vld [vmem:[%s2789_s1] sm:$0xff]   ;;  %vm1536_vm5 = vcmask 60416  }
   0xd   : > { %1824 = vmatpush3.bf16.msra.mxu0 %v381_v2  ;;  %1870 = vmatpush3.bf16.msra.mxu1 %v381_v2  ;;  %s2091_s26 = scalar_lea.vmem %s2788_s0, %s1631_s23  ;;  %v2131_v22 = vld [vmem:[%s2790_s2] ss:$0 sm:$0xff]  ;;  %s2291_s6 = scalar_lea.vmem %s2791_s3, %s1631_s23 }
   0xe   : > { %1825 = vmatprep.subr.bf16.mxu0 %v1886_v1  ;;  %1866 = vmatprep.subr.bf16.mxu1 %v1886_v1  ;;  %v1890_v5 = vld [vmem:[%s2091_s26] sm:$0xff]   ;;  %v1892_v8 = vld [vmem:[%s2091_s26 + $0x8] sm:$0xff]   ;;  %v1894_v10 = vld [vmem:[%s2091_s26 + $0x10] sm:$0xff]  }
   0xf   : > { %v1891_v6 = vld [vmem:[%s2091_s26 + $0x40] sm:$0xff]   ;;  %1833 = vmatprep.mubr.msk.bf16.mxu0 %vm330_vm1, %v1890_v5  ;;  %v1893_v9 = vld [vmem:[%s2091_s26 + $0x48] sm:$0xff]   ;;  %v1895_v11 = vld [vmem:[%s2091_s26 + $0x50] sm:$0xff]  }
  0x10   : > { %1849 = vmatprep.mubr.msk.bf16.mxu1 %vm330_vm1, %v1891_v6  ;;  %v1896_v12 = vld [vmem:[%s2091_s26 + $0x18] sm:$0xff]   ;;  %v1898_v14 = vld [vmem:[%s2091_s26 + $0x20] sm:$0xff]   ;;  %v1900_v16 = vld [vmem:[%s2091_s26 + $0x28] sm:$0xff]  }
  0x11   : > { %1826 = vmatpush3.bf16.msra.mxu0 %v1886_v1  ;;  %1871 = vmatpush3.bf16.msra.mxu1 %v1886_v1  ;;  %v1897_v13 = vld [vmem:[%s2091_s26 + $0x58] sm:$0xff]   ;;  %v1899_v15 = vld [vmem:[%s2091_s26 + $0x60] sm:$0xff]   ;;  %v1901_v17 = vld [vmem:[%s2091_s26 + $0x68] sm:$0xff]  }
  0x12   : > { %1827 = vmatprep.subr.bf16.mxu0 %v1887_v3  ;;  %1867 = vmatprep.subr.bf16.mxu1 %v1887_v3  ;;  %v1902_v18 = vld [vmem:[%s2091_s26 + $0x30] sm:$0xff]   ;;  %v1904_v20 = vld [vmem:[%s2091_s26 + $0x38] sm:$0xff]  }
  0x13   : > { %v1903_v19 = vld [vmem:[%s2091_s26 + $0x70] sm:$0xff]   ;;  %v1905_v21 = vld [vmem:[%s2091_s26 + $0x78] sm:$0xff]  }
  0x15   : > { %1828 = vmatpush3.bf16.msra.mxu0 %v1887_v3  ;;  %1872 = vmatpush3.bf16.msra.mxu1 %v1887_v3 }
  0x16   : > { %1829 = vmatprep.subr.bf16.mxu0 %v1888_v4  ;;  %1868 = vmatprep.subr.bf16.mxu1 %v1888_v4 }
  0x19   : > { %1830 = vmatpush3.bf16.msra.mxu0 %v1888_v4  ;;  %1873 = vmatpush3.bf16.msra.mxu1 %v1888_v4 }
  0x1a   : > { %1831 = vmatprep.subr.bf16.mxu0 %v1889_v7  ;;  %1869 = vmatprep.subr.bf16.mxu1 %v1889_v7 }
  0x1d   : > { %1832 = vmatpush3.bf16.msra.mxu0 %v1889_v7  ;;  %1874 = vmatpush3.bf16.msra.mxu1 %v1889_v7 }
  0x20   : > { %1834 = vmatmul.mubr.msk.bf16.vlgmr.msra.gmra.mxu0 %vm330_vm1, %v1892_v8  ;;  %1850 = vmatmul.mubr.msk.bf16.vlgmr.msra.gmra.mxu1 %vm330_vm1, %v1893_v9 }
  0x21   : > { %1837 = vmatprep.mubr.msk.bf16.mxu0 %vm330_vm1, %v1894_v10  ;;  %1853 = vmatprep.mubr.msk.bf16.mxu1 %vm330_vm1, %v1895_v11 }
  0x28   : > { %1838 = vmatmul.mubr.msk.bf16.gmra.mxu0 %vm330_vm1, %v1896_v12  ;;  %1854 = vmatmul.mubr.msk.bf16.gmra.mxu1 %vm330_vm1, %v1897_v13 }
  0x29   : > { %1841 = vmatprep.mubr.msk.bf16.mxu0 %vm330_vm1, %v1898_v14  ;;  %1857 = vmatprep.mubr.msk.bf16.mxu1 %vm330_vm1, %v1899_v15 }
  0x30   : > { %1842 = vmatmul.mubr.msk.bf16.gmra.mxu0 %vm330_vm1, %v1900_v16  ;;  %1858 = vmatmul.mubr.msk.bf16.gmra.mxu1 %vm330_vm1, %v1901_v17 }
  0x31   : > { %1845 = vmatprep.mubr.msk.bf16.mxu0 %vm330_vm1, %v1902_v18  ;;  %1861 = vmatprep.mubr.msk.bf16.mxu1 %vm330_vm1, %v1903_v19 }
  0x38   : > { %1846 = vmatmul.mubr.msk.bf16.gmra.mxu0 %vm330_vm1, %v1904_v20  ;;  %1862 = vmatmul.mubr.msk.bf16.gmra.mxu1 %vm330_vm1, %v1905_v21 }
  0xe0   : > { %v1835_v23 = vpop.f32.mrf.mxu0  ;;  %v1851_v24 = vpop.f32.mrf.mxu1 }
  0xe1   : > { %v426_v25 = vadd.f32 %v1835_v23, %v2131_v22  ;;  %v490_v26 = vadd.f32 %v1851_v24, %v2131_v22 }
  0xe2   : > { %v417_v27 = vpop.f32.mrf.mxu0  ;;  %v481_v28 = vpop.f32.mrf.mxu1 }
  0xe3   : > { %v2135_v29 = vmul.f32 0.70710677, %v426_v25  ;;  %v2137_v30 = vmul.f32 0.70710677, %v490_v26  ;;  %v418_v31 = vadd.f32 %v2131_v22, %v417_v27  ;;  %v2141_v32 = vadd.f32 %v2131_v22, %v481_v28 }
  0xe4   : > { %v1836_v40 = vpop.f32.mrf.mxu0  ;;  %v1852_v52 = vpop.f32.mrf.mxu1  ;;  %v2158_v1 = vmul.f32 0.5, %v426_v25  ;;  %v2160_v2 = vmul.f32 0.5, %v490_v26 }
  0xe5   : > { %v610_v33 = vand.u32 2147483647, %v2135_v29  ;;  %v626_v34 = vand.u32 2147483647, %v2137_v30  ;;  %v2145_v35 = vmul.f32 0.70710677, %v418_v31  ;;  %v429_v51 = vadd.f32 %v1836_v40, %v2131_v22 }
  0xe6   : > { %v2148_v36 = vmul.f32 0.70710677, %v2141_v32  ;;  %v420_v53 = vpop.f32.mrf.mxu0  ;;  %v493_v59 = vadd.f32 %v1852_v52, %v2131_v22  ;;  %v484_v0 = vpop.f32.mrf.mxu1  ;;  %v2166_v8 = vmul.f32 0.5, %v418_v31  ;;  %vm1250_vm2 = vcmp.lt.f32.partialorder %v2135_v29, 0.0 }
  0xe7   : > { %v642_v37 = vmul.f32 0.3275911, %v610_v33  ;;  %v1058_v38 = vsub.f32 0.0, %v610_v33  ;;  %v658_v39 = vmul.f32 0.3275911, %v626_v34  ;;  %v1074_v41 = vsub.f32 0.0, %v626_v34 }
  0xe8   : > { %v608_v42 = vand.u32 2147483647, %v2145_v35  ;;  %v624_v43 = vand.u32 2147483647, %v2148_v36  ;;  %v2153_v57 = vmul.f32 0.70710677, %v429_v51  ;;  %v421_v60 = vadd.f32 %v2131_v22, %v420_v53  ;;  %v1839_v18 = vpop.f32.mrf.mxu0 }
  0xe9   : > { %v674_v44 = vadd.f32 1.0, %v642_v37  ;;  %v690_v45 = vadd.f32 1.0, %v658_v39  ;;  %v1090_v49 = vmul.f32 %v1058_v38, %v610_v33  ;;  %v1106_v54 = vmul.f32 %v1074_v41, %v626_v34  ;;  %v1855_v38 = vpop.f32.mrf.mxu1 }
  0xea   : > { %v640_v46 = vmul.f32 0.3275911, %v608_v42  ;;  %v1056_v47 = vsub.f32 0.0, %v608_v42  ;;  %v656_v48 = vmul.f32 0.3275911, %v624_v43  ;;  %v1072_v50 = vsub.f32 0.0, %v624_v43 }
  0xeb   : > { %1906 = vrcp.f32 %v674_v44  ;;  %v1124_v61 = vmul.f32 1.442695, %v1090_v49  ;;  %v611_v63 = vand.u32 2147483647, %v2153_v57  ;;  %v1156_v3 = vmul.f32 1.442695, %v1106_v54 }
  0xec   : > { %1908 = vrcp.f32 %v690_v45  ;;  %v672_v55 = vadd.f32 1.0, %v640_v46  ;;  %v688_v56 = vadd.f32 1.0, %v656_v48  ;;  %v1088_v58 = vmul.f32 %v1056_v47, %v608_v42 }
  0xed   : > { %v1104_v62 = vmul.f32 %v1072_v50, %v624_v43  ;;  %v2162_v4 = vmul.f32 0.70710677, %v493_v59  ;;  %v643_v5 = vmul.f32 0.3275911, %v611_v63  ;;  %v1059_v6 = vsub.f32 0.0, %v611_v63 }
  0xee   : > { %1910 = vrcp.f32 %v672_v55  ;;  %v2164_v7 = vmul.f32 0.70710677, %v421_v60  ;;  %v1120_v9 = vmul.f32 1.442695, %v1088_v58  ;;  %v2170_v11 = vadd.f32 %v2131_v22, %v484_v0  ;;  %v433_v58 = vpop.f32.mrf.mxu0 }
  0xef   : > { %1912 = vrcp.f32 %v688_v56  ;;  %v627_v10 = vand.u32 2147483647, %v2162_v4  ;;  %v1152_v12 = vmul.f32 1.442695, %v1104_v62  ;;  %v675_v13 = vadd.f32 1.0, %v643_v5 }
  0xf0   : > { %1914 = vpow2.f32 %v1124_v61  ;;  %v609_v14 = vand.u32 2147483647, %v2164_v7  ;;  %v2174_v17 = vmul.f32 0.70710677, %v2170_v11  ;;  %v1091_v19 = vmul.f32 %v1059_v6, %v611_v63 }
  0xf1   : > { %1916 = vpow2.f32 %v1156_v3  ;;  %v659_v15 = vmul.f32 0.3275911, %v627_v10  ;;  %v1075_v16 = vsub.f32 0.0, %v627_v10  ;;  %v2178_v28 = vadd.f32 %v1839_v18, %v2131_v22 }
  0xf2   : > { %1918 = vrcp.f32 %v675_v13  ;;  %v641_v20 = vmul.f32 0.3275911, %v609_v14  ;;  %v1057_v21 = vsub.f32 0.0, %v609_v14  ;;  %v625_v25 = vand.u32 2147483647, %v2174_v17 }
  0xf3   : > { %1920 = vpow2.f32 %v1120_v9  ;;  %v691_v23 = vadd.f32 1.0, %v659_v15  ;;  %v1107_v24 = vmul.f32 %v1075_v16, %v627_v10  ;;  %v2183_v33 = vmul.f32 0.5, %v2141_v32 }
  0xf4   : > { %1922 = vpow2.f32 %v1152_v12  ;;  %v673_v26 = vadd.f32 1.0, %v641_v20  ;;  %v1089_v27 = vmul.f32 %v1057_v21, %v609_v14  ;;  %v657_v34 = vmul.f32 0.3275911, %v625_v25 }
  0xf5   : > { %1924 = vrcp.f32 %v691_v23  ;;  %v1073_v37 = vsub.f32 0.0, %v625_v25  ;;  %v2188_v41 = vmul.f32 0.5, %v429_v51  ;;  %v1126_v42 = vmul.f32 1.442695, %v1091_v19 }
  0xf6   : > { %1926 = vrcp.f32 %v673_v26  ;;  %v1158_v44 = vmul.f32 1.442695, %v1107_v24  ;;  %v689_v45 = vadd.f32 1.0, %v657_v34  ;;  %v1122_v32 = vmul.f32 1.442695, %v1089_v27 }
  0xf7   : > { %v1105_v46 = vmul.f32 %v1073_v37, %v625_v25  ;;  %v2192_v48 = vmul.f32 0.70710677, %v2178_v28  ;;  %v2195_v49 = vadd.f32 %v1855_v38, %v2131_v22  ;;  %v2199_v51 = vmul.f32 0.5, %v493_v59 }
  0xf8   : > { %v2180_v31 = vpop.eup %1906  ;;  %v2201_v53 = vmul.f32 0.5, %v421_v60  ;;  %1928 = vrcp.f32 %v689_v45  ;;  %v2214_v12 = vadd.f32 %v2131_v22, %v433_v58  ;;  %vm1266_vm3 = vcmp.lt.f32.partialorder %v2137_v30, 0.0 }
  0xf9   : > { %v2185_v39 = vpop.eup %1908  ;;  %v770_v40 = vmul.f32 1.0614054, %v2180_v31  ;;  %1930 = vpow2.f32 %v1126_v42  ;;  %v614_v56 = vand.u32 2147483647, %v2192_v48  ;;  %v1154_v63 = vmul.f32 1.442695, %v1105_v46 }
  0xfa   : > { %v786_v43 = vmul.f32 1.0614054, %v2185_v39  ;;  %1932 = vpow2.f32 %v1158_v44  ;;  %v2210_v59 = vmul.f32 0.70710677, %v2195_v49  ;;  %vm1248_vm4 = vcmp.lt.f32.partialorder %v2145_v35, 0.0 }
  0xfb   : > { %v1674_v47 = vadd.f32 -1.4531521, %v770_v40  ;;  %v2197_v50 = vpop.eup %1910  ;;  %1934 = vpow2.f32 %v1122_v32  ;;  %v646_v9 = vmul.f32 0.3275911, %v614_v56  ;;  %v1062_v10 = vsub.f32 0.0, %v614_v56 }
  0xfc   : > { %v1690_v52 = vadd.f32 -1.4531521, %v786_v43  ;;  %v768_v55 = vmul.f32 1.0614054, %v2197_v50  ;;  %v2206_v61 = vpop.eup %1912  ;;  %v2219_v18 = vand.u32 2147483647, %v2210_v59  ;;  %1936 = vpow2.f32 %v1154_v63 }
  0xfd   : > { %v834_v54 = vmul.f32 %v2180_v31, %v1674_v47  ;;  %v784_v3 = vmul.f32 1.0614054, %v2206_v61  ;;  %v1915_v5 = vpop.eup %1914  ;;  %v678_v21 = vadd.f32 1.0, %v646_v9  ;;  %v1094_v23 = vmul.f32 %v1062_v10, %v614_v56 }
  0xfe   : > { %v850_v62 = vmul.f32 %v2185_v39, %v1690_v52  ;;  %v1672_v0 = vadd.f32 -1.4531521, %v768_v55  ;;  %v1917_v13 = vpop.eup %1916  ;;  %v662_v42 = vmul.f32 0.3275911, %v2219_v18  ;;  %vm1264_vm6 = vcmp.lt.f32.partialorder %v2148_v36, 0.0 }
  0xff   : > { %v866_v60 = vadd.f32 1.4214138, %v834_v54  ;;  %v1688_v16 = vadd.f32 -1.4531521, %v784_v3  ;;  %v2221_v19 = vpop.eup %1918  ;;  %1938 = vrcp.f32 %v678_v21  ;;  %v1132_v40 = vmul.f32 1.442695, %v1094_v23 }
 0x100   : > { %v882_v6 = vadd.f32 1.4214138, %v850_v62  ;;  %v832_v15 = vmul.f32 %v2197_v50, %v1672_v0  ;;  %v2224_v24 = vpop.eup %1920  ;;  %v771_v34 = vmul.f32 1.0614054, %v2221_v19  ;;  %v694_v55 = vadd.f32 1.0, %v662_v42 }
 0x101   : > { %v898_v14 = vmul.f32 %v2180_v31, %v866_v60  ;;  %v848_v27 = vmul.f32 %v2206_v61, %v1688_v16  ;;  %v2228_v37 = vpop.eup %1922  ;;  %1940 = vpow2.f32 %v1132_v40  ;;  %vm1251_vm7 = vcmp.lt.f32.partialorder %v2153_v57, 0.0 }
 0x102   : > { %v914_v20 = vmul.f32 %v2185_v39, %v882_v6  ;;  %v864_v26 = vadd.f32 1.4214138, %v832_v15  ;;  %v2231_v43 = vpop.eup %1924  ;;  %v1675_v47 = vadd.f32 -1.4531521, %v771_v34  ;;  %1942 = vrcp.f32 %v694_v55 }
 0x103   : > { %v1706_v25 = vadd.f32 -0.28449672, %v898_v14  ;;  %v880_v46 = vadd.f32 1.4214138, %v848_v27  ;;  %v2235_v32 = vpop.eup %1926  ;;  %v787_v54 = vmul.f32 1.0614054, %v2231_v43 }
 0x104   : > { %v1722_v38 = vadd.f32 -0.28449672, %v914_v20  ;;  %v896_v45 = vmul.f32 %v2197_v50, %v864_v26  ;;  %v835_v63 = vmul.f32 %v2221_v19, %v1675_v47  ;;  %v769_v3 = vmul.f32 1.0614054, %v2235_v32 }
 0x105   : > { %v962_v44 = vmul.f32 %v2180_v31, %v1706_v25  ;;  %v912_v62 = vmul.f32 %v2206_v61, %v880_v46  ;;  %v1691_v0 = vadd.f32 -1.4531521, %v787_v54  ;;  %v2243_v6 = vpop.eup %1928  ;;  %vm1267_vm8 = vcmp.lt.f32.partialorder %v2162_v4, 0.0 }
 0x106   : > { %v978_v52 = vmul.f32 %v2185_v39, %v1722_v38  ;;  %v1704_v58 = vadd.f32 -0.28449672, %v896_v45  ;;  %v867_v15 = vadd.f32 1.4214138, %v835_v63  ;;  %v1931_v16 = vpop.eup %1930  ;;  %v1673_v23 = vadd.f32 -1.4531521, %v769_v3 }
 0x107   : > { %v994_v56 = vadd.f32 0.2548296, %v962_v44  ;;  %v1720_v14 = vadd.f32 -0.28449672, %v912_v62  ;;  %v851_v21 = vmul.f32 %v2231_v43, %v1691_v0  ;;  %v785_v25 = vmul.f32 1.0614054, %v2243_v6  ;;  %v2251_v26 = vpop.eup %1932 }
 0x108   : > { %v1010_v60 = vadd.f32 0.2548296, %v978_v52  ;;  %v960_v10 = vmul.f32 %v2197_v50, %v1704_v58  ;;  %v899_v38 = vmul.f32 %v2221_v19, %v867_v15  ;;  %v2255_v40 = vpop.eup %1934  ;;  %vm1249_vm9 = vcmp.lt.f32.partialorder %v2164_v7, 0.0 }
 0x109   : > { %v1026_v9 = vmul.f32 %v2180_v31, %v994_v56  ;;  %v976_v31 = vmul.f32 %v2206_v61, %v1720_v14  ;;  %v883_v44 = vadd.f32 1.4214138, %v851_v21  ;;  %v1689_v45 = vadd.f32 -1.4531521, %v785_v25  ;;  %v2263_v58 = vpop.eup %1936 }
 0x10a   : > { %v1042_v20 = vmul.f32 %v2185_v39, %v1010_v60  ;;  %v992_v34 = vadd.f32 0.2548296, %v960_v10  ;;  %v833_v39 = vmul.f32 %v2235_v32, %v1673_v23  ;;  %vm1265_vm10 = vcmp.lt.f32.partialorder %v2174_v17, 0.0 }
 0x10b   : > { %v1186_v27 = vmul.f32 %v1915_v5, %v1026_v9  ;;  %v1008_v52 = vadd.f32 0.2548296, %v976_v31  ;;  %v1707_v5 = vadd.f32 -0.28449672, %v899_v38  ;;  %v915_v55 = vmul.f32 %v2231_v43, %v883_v44 }
 0x10c   : > { %v1202_v42 = vmul.f32 %v1917_v13, %v1042_v20  ;;  %v1024_v47 = vmul.f32 %v2197_v50, %v992_v34  ;;  %v865_v56 = vadd.f32 1.4214138, %v833_v39  ;;  %v849_v13 = vmul.f32 %v2243_v6, %v1689_v45  ;;  %v2269_v14 = vpop.eup %1938 }
 0x10d   : > { %v1218_v46 = vsub.f32 1.0, %v1186_v27  ;;  %v1040_v60 = vmul.f32 %v2206_v61, %v1008_v52  ;;  %v963_v0 = vmul.f32 %v2221_v19, %v1707_v5  ;;  %v1723_v3 = vadd.f32 -0.28449672, %v915_v55 }
 0x10e   : > { %v1234_v54 = vsub.f32 1.0, %v1202_v42  ;;  %v1184_v63 = vmul.f32 %v2224_v24, %v1024_v47  ;;  %v897_v9 = vmul.f32 %v2235_v32, %v865_v56  ;;  %v881_v10 = vadd.f32 1.4214138, %v849_v13  ;;  %v2278_v34 = vpop.eup %1940 }
 0x10f   : > { %v1282_v62 = vsub.f32 0.0, %v1218_v46  ;;  %v1200_v21 = vmul.f32 %v2228_v37, %v1040_v60  ;;  %v995_v23 = vadd.f32 0.2548296, %v963_v0  ;;  %v979_v25 = vmul.f32 %v2231_v43, %v1723_v3  ;;  %v2284_v45 = vpop.eup %1942 }
 0x110   : > { %v1298_v50 = vsub.f32 0.0, %v1234_v54  ;;  %v1216_v20 = vsub.f32 1.0, %v1184_v63  ;;  %v1705_v27 = vadd.f32 -0.28449672, %v897_v9  ;;  %v913_v30 = vmul.f32 %v2243_v6, %v881_v10 }
 0x111   : > { %v1314_v15 = vsel %vm1250_vm2, %v1282_v62, %v1218_v46  ;;  %v1232_v29 = vsub.f32 1.0, %v1200_v21  ;;  %v1027_v42 = vmul.f32 %v2221_v19, %v995_v23  ;;  %v1011_v44 = vadd.f32 0.2548296, %v979_v25 }
 0x112   : > { %v1346_v24 = vadd.f32 1.0, %v1314_v15  ;;  %v1330_v61 = vsel %vm1266_vm3, %v1298_v50, %v1234_v54  ;;  %v1280_v38 = vsub.f32 0.0, %v1216_v20  ;;  %v961_v39 = vmul.f32 %v2235_v32, %v1705_v27 }
 0x113   : > { %v1362_v31 = vadd.f32 1.0, %v1330_v61  ;;  %v1187_v47 = vmul.f32 %v1931_v16, %v1027_v42  ;;  %v1043_v54 = vmul.f32 %v2231_v43, %v1011_v44  ;;  %v774_v0 = vmul.f32 1.0614054, %v2269_v14 }
 0x114   : > { %v1378_v37 = vmul.f32 %v1346_v24, %v2158_v1  ;;  %v1312_v19 = vsel %vm1248_vm4, %v1280_v38, %v1216_v20  ;;  %v1296_v1 = vsub.f32 0.0, %v1232_v29  ;;  %v993_v55 = vadd.f32 0.2548296, %v961_v39  ;;  %v497_v39 = vpop.f32.mrf.mxu1 }
 0x115   : > { %v1394_v46 = vmul.f32 %v1362_v31, %v2160_v2  ;;  %v1344_v5 = vadd.f32 1.0, %v1312_v19  ;;  %v1219_v62 = vsub.f32 1.0, %v1187_v47  ;;  %v1721_v2 = vadd.f32 -0.28449672, %v913_v30 }
 0x116   : > { %v1772_v52 = vpack.c.bf16 %v1378_v37, %v1378_v37  ;;  %v1328_v13 = vsel %vm1264_vm6, %v1296_v1, %v1232_v29  ;;  %v1203_v63 = vmul.f32 %v2251_v26, %v1043_v54  ;;  %v1025_v60 = vmul.f32 %v2235_v32, %v993_v55 }
 0x117   : > { %v1788_v56 = vpack.c.bf16 %v1394_v46, %v1394_v46  ;;  %v1376_v35 = vmul.f32 %v1344_v5, %v2166_v8  ;;  %v1360_v16 = vadd.f32 1.0, %v1328_v13  ;;  %v1283_v43 = vsub.f32 0.0, %v1219_v62 }
 0x118   : > { %1539 = vst.msk [vmem:[%s2291_s6 + $0x8] sm:$0xf] %vm1536_vm5, %v1772_v52  ;;  %v977_v36 = vmul.f32 %v2243_v6, %v1721_v2  ;;  %v790_v50 = vmul.f32 1.0614054, %v2284_v45  ;;  %v1235_v8 = vsub.f32 1.0, %v1203_v63  ;;  %v1185_v10 = vmul.f32 %v2255_v40, %v1025_v60  ;;  %v1840_v2 = vpop.f32.mrf.mxu0 }
 0x119   : > { %1555 = vst.msk [vmem:[%s2291_s6 + $0x48] sm:$0xf] %vm1536_vm5, %v1788_v56  ;;  %v1770_v3 = vpack.c.bf16 %v1376_v35, %v1376_v35  ;;  %v1392_v9 = vmul.f32 %v1360_v16, %v2183_v33  ;;  %v1315_v26 = vsel %vm1251_vm7, %v1283_v43, %v1219_v62  ;;  %v1678_v15 = vadd.f32 -1.4531521, %v774_v0  ;;  %v1856_v43 = vpop.f32.mrf.mxu1 }
 0x11a   : > { %v1009_v32 = vadd.f32 0.2548296, %v977_v36  ;;  %v1694_v20 = vadd.f32 -1.4531521, %v790_v50  ;;  %v1347_v23 = vadd.f32 1.0, %v1315_v26  ;;  %v1299_v24 = vsub.f32 0.0, %v1235_v8 }
 0x11b   : > { %1537 = vst.msk [vmem:[%s2291_s6] sm:$0xf] %vm1536_vm5, %v1770_v3  ;;  %v1786_v21 = vpack.c.bf16 %v1392_v9, %v1392_v9  ;;  %v1217_v61 = vsub.f32 1.0, %v1185_v10  ;;  %v838_v33 = vmul.f32 %v2269_v14, %v1678_v15  ;;  %v1078_v40 = vsub.f32 0.0, %v2219_v18 }
 0x11c   : > { %v1041_v25 = vmul.f32 %v2243_v6, %v1009_v32  ;;  %v854_v27 = vmul.f32 %v2284_v45, %v1694_v20  ;;  %v1379_v57 = vmul.f32 %v1347_v23, %v2188_v41  ;;  %v1331_v31 = vsel %vm1267_vm8, %v1299_v24, %v1235_v8  ;;  %v436_v32 = vpop.f32.mrf.mxu0 }
 0x11d   : > { %1553 = vst.msk [vmem:[%s2291_s6 + $0x40] sm:$0xf] %vm1536_vm5, %v1786_v21  ;;  %v1281_v38 = vsub.f32 0.0, %v1217_v61  ;;  %v2327_v29 = vmul.f32 0.70710677, %v2214_v12  ;;  %v1363_v42 = vadd.f32 1.0, %v1331_v31  ;;  %v1110_v41 = vmul.f32 %v1078_v40, %v2219_v18 }
 0x11e   : > { %v1201_v6 = vmul.f32 %v2263_v58, %v1041_v25  ;;  %v870_v37 = vadd.f32 1.4214138, %v838_v33  ;;  %v886_v44 = vadd.f32 1.4214138, %v854_v27  ;;  %v1773_v30 = vpack.c.bf16 %v1379_v57, %v1379_v57 }
 0x11f   : > { %v1313_v46 = vsel %vm1249_vm9, %v1281_v38, %v1217_v61  ;;  %v612_v4 = vand.u32 2147483647, %v2327_v29  ;;  %v1395_v19 = vmul.f32 %v1363_v42, %v2199_v51  ;;  %v1164_v5 = vmul.f32 1.442695, %v1110_v41 }
 0x120   : > { %v1345_v1 = vadd.f32 1.0, %v1313_v46  ;;  %v1233_v47 = vsub.f32 1.0, %v1201_v6  ;;  %v902_v52 = vmul.f32 %v2269_v14, %v870_v37  ;;  %1540 = vst.msk [vmem:[%s2291_s6 + $0xc] sm:$0xf] %vm1536_vm5, %v1773_v30  ;;  %v918_v58 = vmul.f32 %v2284_v45, %v886_v44  ;;  %v500_v37 = vpop.f32.mrf.mxu1 }
 0x121   : > { %v644_v54 = vmul.f32 0.3275911, %v612_v4  ;;  %v498_v7 = vadd.f32 %v2131_v22, %v497_v39  ;;  %v1789_v55 = vpack.c.bf16 %v1395_v19, %v1395_v19  ;;  %1944 = vpow2.f32 %v1164_v5 }
 0x122   : > { %v1377_v18 = vmul.f32 %v1345_v1, %v2201_v53  ;;  %v1297_v56 = vsub.f32 0.0, %v1233_v47  ;;  %v1710_v13 = vadd.f32 -0.28449672, %v902_v52  ;;  %v1726_v51 = vadd.f32 -0.28449672, %v918_v58 }
 0x123   : > { %v676_v62 = vadd.f32 1.0, %v644_v54  ;;  %1556 = vst.msk [vmem:[%s2291_s6 + $0x4c] sm:$0xf] %vm1536_vm5, %v1789_v55  ;;  %v1060_v60 = vsub.f32 0.0, %v612_v4  ;;  %v561_v36 = vmul.f32 0.5, %v2170_v11  ;;  %v445_v3 = vadd.f32 %v1840_v2, %v2131_v22 }
 0x124   : > { %v1771_v35 = vpack.c.bf16 %v1377_v18, %v1377_v18  ;;  %v1329_v16 = vsel %vm1265_vm10, %v1297_v56, %v1233_v47  ;;  %v966_v63 = vmul.f32 %v2269_v14, %v1710_v13  ;;  %v982_v0 = vmul.f32 %v2284_v45, %v1726_v51  ;;  %v1843_v47 = vpop.f32.mrf.mxu0 }
 0x125   : > { %v1361_v53 = vadd.f32 1.0, %v1329_v16  ;;  %1946 = vrcp.f32 %v676_v62  ;;  %v2349_v50 = vmul.f32 0.70710677, %v498_v7  ;;  %v509_v8 = vadd.f32 %v1856_v43, %v2131_v22 }
 0x126   : > { %1538 = vst.msk [vmem:[%s2291_s6 + $0x4] sm:$0xf] %vm1536_vm5, %v1771_v35  ;;  %v998_v17 = vadd.f32 0.2548296, %v966_v63  ;;  %v1092_v26 = vmul.f32 %v1060_v60, %v612_v4  ;;  %v1014_v20 = vadd.f32 0.2548296, %v982_v0  ;;  %v2378_v1 = vadd.f32 %v2131_v22, %v500_v37  ;;  %v1859_v0 = vpop.f32.mrf.mxu1 }
 0x127   : > { %v1393_v9 = vmul.f32 %v1361_v53, %v561_v36  ;;  %v628_v11 = vand.u32 2147483647, %v2349_v50  ;;  %v2355_v21 = vmul.f32 0.70710677, %v445_v3  ;;  %v2358_v61 = vmul.f32 0.70710677, %v509_v8 }
 0x128   : > { %v1030_v10 = vmul.f32 %v2269_v14, %v998_v17  ;;  %v550_v25 = vmul.f32 0.5, %v2178_v28  ;;  %v437_v14 = vadd.f32 %v2131_v22, %v436_v32  ;;  %v1128_v40 = vmul.f32 1.442695, %v1092_v26 }
 0x129   : > { %v1787_v15 = vpack.c.bf16 %v1393_v9, %v1393_v9  ;;  %v660_v24 = vmul.f32 0.3275911, %v628_v11  ;;  %v615_v33 = vand.u32 2147483647, %v2355_v21  ;;  %v631_v31 = vand.u32 2147483647, %v2358_v61 }
 0x12a   : > { %v1190_v23 = vmul.f32 %v2278_v34, %v1030_v10  ;;  %vm1254_vm11 = vcmp.lt.f32.partialorder %v2192_v48, 0.0  ;;  %v566_v34 = vmul.f32 0.5, %v2195_v49  ;;  %v1046_v38 = vmul.f32 %v2284_v45, %v1014_v20 }
 0x12b   : > { %1554 = vst.msk [vmem:[%s2291_s6 + $0x44] sm:$0xf] %vm1536_vm5, %v1787_v15  ;;  %v692_v57 = vadd.f32 1.0, %v660_v24  ;;  %v647_v42 = vmul.f32 0.3275911, %v615_v33  ;;  %vm1270_vm12 = vcmp.lt.f32.partialorder %v2210_v59, 0.0  ;;  %v2389_v62 = vadd.f32 %v1843_v47, %v2131_v22 }
 0x12c   : > { %v1222_v27 = vsub.f32 1.0, %v1190_v23  ;;  %v663_v28 = vmul.f32 0.3275911, %v631_v31  ;;  %v2371_v44 = vmul.f32 0.5, %v2214_v12  ;;  %v1076_v39 = vsub.f32 0.0, %v628_v11 }
 0x12d   : > { %1948 = vrcp.f32 %v692_v57  ;;  %v679_v30 = vadd.f32 1.0, %v647_v42  ;;  %v2373_v46 = vmul.f32 0.70710677, %v437_v14  ;;  %v2375_v49 = vmul.f32 0.5, %v498_v7 }
 0x12e   : > { %v1286_v6 = vsub.f32 0.0, %v1222_v27  ;;  %v1945_v41 = vpop.eup %1944  ;;  %1950 = vpow2.f32 %v1128_v40  ;;  %v695_v45 = vadd.f32 1.0, %v663_v28  ;;  %v2382_v12 = vmul.f32 0.5, %v445_v3 }
 0x12f   : > { %v1206_v19 = vmul.f32 %v1945_v41, %v1046_v38  ;;  %1952 = vrcp.f32 %v679_v30  ;;  %v1063_v58 = vsub.f32 0.0, %v615_v33  ;;  %v613_v5 = vand.u32 2147483647, %v2373_v46 }
 0x130   : > { %v1318_v48 = vsel %vm1254_vm11, %v1286_v6, %v1222_v27  ;;  %1954 = vrcp.f32 %v695_v45  ;;  %v1108_v18 = vmul.f32 %v1076_v39, %v628_v11  ;;  %v2386_v56 = vmul.f32 0.5, %v509_v8 }
 0x131   : > { %v1350_v4 = vadd.f32 1.0, %v1318_v48  ;;  %v1238_v55 = vsub.f32 1.0, %v1206_v19  ;;  %v1079_v13 = vsub.f32 0.0, %v631_v31  ;;  %v645_v51 = vmul.f32 0.3275911, %v613_v5 }
 0x132   : > { %v2380_v52 = vpop.eup %1946  ;;  %v2392_v63 = vmul.f32 0.70710677, %v2378_v1  ;;  %v1095_v60 = vmul.f32 %v1063_v58, %v615_v33  ;;  %v2394_v43 = vmul.f32 0.5, %v437_v14  ;;  %v1061_v53 = vsub.f32 0.0, %v613_v5 }
 0x133   : > { %v1382_v54 = vmul.f32 %v1350_v4, %v550_v25  ;;  %v772_v7 = vmul.f32 1.0614054, %v2380_v52  ;;  %v1302_v35 = vsub.f32 0.0, %v1238_v55  ;;  %v677_v36 = vadd.f32 1.0, %v645_v51  ;;  %v449_v4 = vpop.f32.mrf.mxu0 }
 0x134   : > { %v1160_v9 = vmul.f32 1.442695, %v1108_v18  ;;  %v629_v8 = vand.u32 2147483647, %v2392_v63  ;;  %v1111_v26 = vmul.f32 %v1079_v13, %v631_v31  ;;  %v2403_v11 = vmul.f32 0.70710677, %v2389_v62 }
 0x135   : > { %v1776_v2 = vpack.c.bf16 %v1382_v54, %v1382_v54  ;;  %v1676_v16 = vadd.f32 -1.4531521, %v772_v7  ;;  %v1334_v17 = vsel %vm1270_vm12, %v1302_v35, %v1238_v55  ;;  %1956 = vrcp.f32 %v677_v36 }
 0x136   : > { %v1366_v10 = vadd.f32 1.0, %v1334_v17  ;;  %v661_v15 = vmul.f32 0.3275911, %v629_v8  ;;  %v1077_v20 = vsub.f32 0.0, %v629_v8  ;;  %v2406_v23 = vadd.f32 %v1859_v0, %v2131_v22 }
 0x137   : > { %1543 = vst.msk [vmem:[%s2291_s6 + $0x18] sm:$0xf] %vm1536_vm5, %v1776_v2  ;;  %v836_v3 = vmul.f32 %v2380_v52, %v1676_v16  ;;  %v1134_v59 = vmul.f32 1.442695, %v1095_v60  ;;  %v1093_v25 = vmul.f32 %v1061_v53, %v613_v5  ;;  %v618_v33 = vand.u32 2147483647, %v2403_v11 }
 0x138   : > { %v1398_v24 = vmul.f32 %v1366_v10, %v566_v34  ;;  %1958 = vpow2.f32 %v1160_v9  ;;  %v693_v40 = vadd.f32 1.0, %v661_v15  ;;  %v1109_v57 = vmul.f32 %v1077_v20, %v629_v8 }
 0x139   : > { %v868_v32 = vadd.f32 1.4214138, %v836_v3  ;;  %v650_v42 = vmul.f32 0.3275911, %v618_v33  ;;  %v1066_v6 = vsub.f32 0.0, %v618_v33  ;;  %v2428_v35 = vadd.f32 %v2131_v22, %v449_v4 }
 0x13a   : > { %v2409_v14 = vpop.eup %1948  ;;  %v1792_v31 = vpack.c.bf16 %v1398_v24, %v1398_v24  ;;  %v1166_v34 = vmul.f32 1.442695, %v1111_v26  ;;  %1960 = vrcp.f32 %v693_v40  ;;  %v2414_v39 = vmul.f32 0.70710677, %v2406_v23  ;;  %v513_v26 = vpop.f32.mrf.mxu1 }
 0x13b   : > { %v900_v27 = vmul.f32 %v2380_v52, %v868_v32  ;;  %v788_v38 = vmul.f32 1.0614054, %v2409_v14  ;;  %v1951_v28 = vpop.eup %1950  ;;  %1962 = vpow2.f32 %v1134_v59  ;;  %v1130_v48 = vmul.f32 1.442695, %v1093_v25 }
 0x13c   : > { %v2416_v30 = vpop.eup %1952  ;;  %1559 = vst.msk [vmem:[%s2291_s6 + $0x58] sm:$0xf] %vm1536_vm5, %v1792_v31  ;;  %v682_v45 = vadd.f32 1.0, %v650_v42  ;;  %v1162_v5 = vmul.f32 1.442695, %v1109_v57  ;;  %v1098_v18 = vmul.f32 %v1066_v6, %v618_v33  ;;  %vm1252_vm13 = vcmp.lt.f32.partialorder %v2327_v29, 0.0 }
 0x13d   : > { %v1708_v37 = vadd.f32 -0.28449672, %v900_v27  ;;  %v1692_v41 = vadd.f32 -1.4531521, %v788_v38  ;;  %v2420_v19 = vpop.eup %1954  ;;  %v775_v58 = vmul.f32 1.0614054, %v2416_v30  ;;  %v2444_v57 = vadd.f32 %v2131_v22, %v513_v26 }
 0x13e   : > { %v634_v54 = vand.u32 2147483647, %v2414_v39  ;;  %v791_v7 = vmul.f32 1.0614054, %v2420_v19  ;;  %1964 = vrcp.f32 %v682_v45  ;;  %v1140_v8 = vmul.f32 1.442695, %v1098_v18 }
 0x13f   : > { %v964_v47 = vmul.f32 %v2380_v52, %v1708_v37  ;;  %v852_v55 = vmul.f32 %v2409_v14, %v1692_v41  ;;  %v1679_v51 = vadd.f32 -1.4531521, %v775_v58  ;;  %1966 = vpow2.f32 %v1166_v34 }
 0x140   : > { %v666_v2 = vmul.f32 0.3275911, %v634_v54  ;;  %v1695_v60 = vadd.f32 -1.4531521, %v791_v7  ;;  %v1082_v36 = vsub.f32 0.0, %v634_v54  ;;  %1968 = vpow2.f32 %v1130_v48 }
 0x141   : > { %v996_v13 = vadd.f32 0.2548296, %v964_v47  ;;  %v884_v16 = vadd.f32 1.4214138, %v852_v55  ;;  %v839_v0 = vmul.f32 %v2416_v30, %v1679_v51  ;;  %v2438_v24 = vmul.f32 0.70710677, %v2428_v35 }
 0x142   : > { %v698_v17 = vadd.f32 1.0, %v666_v2  ;;  %v855_v9 = vmul.f32 %v2420_v19, %v1695_v60  ;;  %v1114_v10 = vmul.f32 %v1082_v36, %v634_v54  ;;  %v2435_v32 = vpop.eup %1956  ;;  %vm1268_vm14 = vcmp.lt.f32.partialorder %v2349_v50, 0.0 }
 0x143   : > { %v1028_v53 = vmul.f32 %v2380_v52, %v996_v13  ;;  %v916_v3 = vmul.f32 %v2409_v14, %v884_v16  ;;  %v871_v20 = vadd.f32 1.4214138, %v839_v0  ;;  %v773_v25 = vmul.f32 1.0614054, %v2435_v32 }
 0x144   : > { %1970 = vrcp.f32 %v698_v17  ;;  %v887_v59 = vadd.f32 1.4214138, %v855_v9  ;;  %v616_v40 = vand.u32 2147483647, %v2438_v24  ;;  %vm1255_vm15 = vcmp.lt.f32.partialorder %v2355_v21, 0.0 }
 0x145   : > { %v1188_v15 = vmul.f32 %v1951_v28, %v1028_v53  ;;  %v1724_v52 = vadd.f32 -0.28449672, %v916_v3  ;;  %1972 = vpow2.f32 %v1162_v5  ;;  %v903_v27 = vmul.f32 %v2416_v30, %v871_v20  ;;  %v1959_v31 = vpop.eup %1958 }
 0x146   : > { %v919_v42 = vmul.f32 %v2420_v19, %v887_v59  ;;  %v1677_v6 = vadd.f32 -1.4531521, %v773_v25  ;;  %v1172_v28 = vmul.f32 1.442695, %v1114_v10  ;;  %1974 = vpow2.f32 %v1140_v8 }
 0x147   : > { %v1220_v33 = vsub.f32 1.0, %v1188_v15  ;;  %v980_v38 = vmul.f32 %v2409_v14, %v1724_v52  ;;  %v1711_v34 = vadd.f32 -0.28449672, %v903_v27  ;;  %v648_v41 = vmul.f32 0.3275911, %v616_v40  ;;  %v2448_v48 = vpop.eup %1960 }
 0x148   : > { %v1727_v4 = vadd.f32 -0.28449672, %v919_v42  ;;  %v837_v47 = vmul.f32 %v2435_v32, %v1677_v6  ;;  %v1064_v58 = vsub.f32 0.0, %v616_v40  ;;  %v1963_v22 = vpop.eup %1962  ;;  %v789_v55 = vmul.f32 1.0614054, %v2448_v48 }
 0x149   : > { %v1284_v37 = vsub.f32 0.0, %v1220_v33  ;;  %v1012_v45 = vadd.f32 0.2548296, %v980_v38  ;;  %v967_v54 = vmul.f32 %v2416_v30, %v1711_v34  ;;  %v680_v7 = vadd.f32 1.0, %v648_v41 }
 0x14a   : > { %v983_v51 = vmul.f32 %v2420_v19, %v1727_v4  ;;  %v869_v2 = vadd.f32 1.4214138, %v837_v47  ;;  %v1693_v36 = vadd.f32 -1.4531521, %v789_v55  ;;  %v1096_v29 = vmul.f32 %v1064_v58, %v616_v40 }
 0x14b   : > { %v1316_v5 = vsel %vm1252_vm13, %v1284_v37, %v1220_v33  ;;  %v1044_v13 = vmul.f32 %v2409_v14, %v1012_v45  ;;  %v2458_v16 = vpop.eup %1964  ;;  %v999_v60 = vadd.f32 0.2548296, %v967_v54  ;;  %1976 = vrcp.f32 %v680_v7 }
 0x14c   : > { %v1348_v18 = vadd.f32 1.0, %v1316_v5  ;;  %v1015_v17 = vadd.f32 0.2548296, %v983_v51  ;;  %v901_v3 = vmul.f32 %v2435_v32, %v869_v2  ;;  %v1967_v9 = vpop.eup %1966  ;;  %vm1271_vm0 = vcmp.lt.f32.partialorder %v2358_v61, 0.0 }
 0x14d   : > { %v1204_v0 = vmul.f32 %v1959_v31, %v1044_v13  ;;  %v1031_v14 = vmul.f32 %v2416_v30, %v999_v60  ;;  %v853_v8 = vmul.f32 %v2448_v48, %v1693_v36  ;;  %v778_v10 = vmul.f32 1.0614054, %v2458_v16  ;;  %v1969_v15 = vpop.eup %1968 }
 0x14e   : > { %v1380_v53 = vmul.f32 %v1348_v18, %v2371_v44  ;;  %v1136_v26 = vmul.f32 1.442695, %v1096_v29  ;;  %v1047_v52 = vmul.f32 %v2420_v19, %v1015_v17  ;;  %v1709_v59 = vadd.f32 -0.28449672, %v901_v3 }
 0x14f   : > { %v1236_v44 = vsub.f32 1.0, %v1204_v0  ;;  %v1191_v25 = vmul.f32 %v1963_v22, %v1031_v14  ;;  %v885_v33 = vadd.f32 1.4214138, %v853_v8  ;;  %v1682_v27 = vadd.f32 -1.4531521, %v778_v10 }
 0x150   : > { %v1774_v20 = vpack.c.bf16 %v1380_v53, %v1380_v53  ;;  %1978 = vpow2.f32 %v1172_v28  ;;  %v1207_v31 = vmul.f32 %v1967_v9, %v1047_v52  ;;  %v965_v38 = vmul.f32 %v2435_v32, %v1709_v59 }
 0x151   : > { %v2468_v40 = vpop.eup %1970  ;;  %v1300_v30 = vsub.f32 0.0, %v1236_v44  ;;  %1980 = vpow2.f32 %v1136_v26  ;;  %v1223_v6 = vsub.f32 1.0, %v1191_v25  ;;  %v917_v37 = vmul.f32 %v2448_v48, %v885_v33 }
 0x152   : > { %1541 = vst.msk [vmem:[%s2291_s6 + $0x10] sm:$0xf] %vm1536_vm5, %v1774_v20  ;;  %v1973_v42 = vpop.eup %1972  ;;  %v842_v19 = vmul.f32 %v2458_v16, %v1682_v27  ;;  %v794_v34 = vmul.f32 1.0614054, %v2468_v40  ;;  %v1239_v41 = vsub.f32 1.0, %v1207_v31  ;;  %vm1253_vm1 = vcmp.lt.f32.partialorder %v2373_v46, 0.0 }
 0x153   : > { %v1332_v28 = vsel %vm1268_vm14, %v1300_v30, %v1236_v44  ;;  %v997_v45 = vadd.f32 0.2548296, %v965_v38  ;;  %v2479_v4 = vmul.f32 0.70710677, %v2444_v57  ;;  %v1287_v58 = vsub.f32 0.0, %v1223_v6  ;;  %v1975_v54 = vpop.eup %1974  ;;  %v1844_v44 = vpop.f32.mrf.mxu0 }
 0x154   : > { %v1364_v47 = vadd.f32 1.0, %v1332_v28  ;;  %v1725_v22 = vadd.f32 -0.28449672, %v917_v37  ;;  %v874_v5 = vadd.f32 1.4214138, %v842_v19  ;;  %v1303_v55 = vsub.f32 0.0, %v1239_v41 }
 0x155   : > { %v1029_v7 = vmul.f32 %v2435_v32, %v997_v45  ;;  %v1698_v18 = vadd.f32 -1.4531521, %v794_v34  ;;  %v2484_v13 = vand.u32 2147483647, %v2479_v4  ;;  %v1319_v51 = vsel %vm1255_vm15, %v1287_v58, %v1223_v6  ;;  %v2512_v6 = vld [vmem:[%s2790_s2] ss:$0 sm:$0xff] }
 0x156   : > { %v1396_v50 = vmul.f32 %v1364_v47, %v2375_v49  ;;  %v981_v2 = vmul.f32 %v2448_v48, %v1725_v22  ;;  %v906_v60 = vmul.f32 %v2458_v16, %v874_v5  ;;  %v1351_v36 = vadd.f32 1.0, %v1319_v51 }
 0x157   : > { %v1335_v29 = vsel %vm1271_vm0, %v1303_v55, %v1239_v41  ;;  %v1189_v53 = vmul.f32 %v1969_v15, %v1029_v7  ;;  %v858_v32 = vmul.f32 %v2468_v40, %v1698_v18  ;;  %v664_v10 = vmul.f32 0.3275911, %v2484_v13  ;;  %v1860_v41 = vpop.f32.mrf.mxu1 }
 0x158   : > { %v1790_v0 = vpack.c.bf16 %v1396_v50, %v1396_v50  ;;  %v1367_v17 = vadd.f32 1.0, %v1335_v29  ;;  %v1013_v3 = vadd.f32 0.2548296, %v981_v2  ;;  %v1714_v9 = vadd.f32 -0.28449672, %v906_v60  ;;  %v2494_v49 = vpop.eup %1976  ;;  %v452_v29 = vpop.f32.mrf.mxu0 }
 0x159   : > { %v1383_v21 = vmul.f32 %v1351_v36, %v2382_v12  ;;  %v1221_v14 = vsub.f32 1.0, %v1189_v53  ;;  %v890_v8 = vadd.f32 1.4214138, %v858_v32  ;;  %v776_v20 = vmul.f32 1.0614054, %v2494_v49 }
 0x15a   : > { %1557 = vst.msk [vmem:[%s2291_s6 + $0x50] sm:$0xf] %vm1536_vm5, %v1790_v0  ;;  %v1399_v61 = vmul.f32 %v1367_v17, %v2386_v56  ;;  %v1045_v26 = vmul.f32 %v2448_v48, %v1013_v3  ;;  %v970_v15 = vmul.f32 %v2458_v16, %v1714_v9  ;;  %v696_v25 = vadd.f32 1.0, %v664_v10 }
 0x15b   : > { %v1777_v52 = vpack.c.bf16 %v1383_v21, %v1383_v21  ;;  %v1285_v59 = vsub.f32 0.0, %v1221_v14  ;;  %v922_v12 = vmul.f32 %v2468_v40, %v890_v8  ;;  %v1680_v31 = vadd.f32 -1.4531521, %v776_v20 }
 0x15c   : > { %v1793_v33 = vpack.c.bf16 %v1399_v61, %v1399_v61  ;;  %v1205_v27 = vmul.f32 %v1973_v42, %v1045_v26  ;;  %v1002_v30 = vadd.f32 0.2548296, %v970_v15  ;;  %1982 = vrcp.f32 %v696_v25 }
 0x15d   : > { %v1979_v38 = vpop.eup %1978  ;;  %1544 = vst.msk [vmem:[%s2291_s6 + $0x1c] sm:$0xf] %vm1536_vm5, %v1777_v52  ;;  %v1317_v56 = vsel %vm1253_vm1, %v1285_v59, %v1221_v14  ;;  %v1730_v48 = vadd.f32 -0.28449672, %v922_v12  ;;  %v2515_v37 = vadd.f32 %v2512_v6, %v1844_v44  ;;  %v840_v46 = vmul.f32 %v2494_v49, %v1680_v31  ;;  %v516_v31 = vpop.f32.mrf.mxu1 }
 0x15e   : > { %v1981_v19 = vpop.eup %1980  ;;  %1560 = vst.msk [vmem:[%s2291_s6 + $0x5c] sm:$0xf] %vm1536_vm5, %v1793_v33  ;;  %v1349_v42 = vadd.f32 1.0, %v1317_v56  ;;  %v1237_v34 = vsub.f32 1.0, %v1205_v27  ;;  %v1034_v28 = vmul.f32 %v2458_v16, %v1002_v30  ;;  %vm1269_vm2 = vcmp.lt.f32.partialorder %v2392_v63, 0.0 }
 0x15f   : > { %v986_v45 = vmul.f32 %v2468_v40, %v1730_v48  ;;  %v872_v5 = vadd.f32 1.4214138, %v840_v46  ;;  %v1080_v7 = vsub.f32 0.0, %v2484_v13  ;;  %v2526_v18 = vmul.f32 0.70710677, %v2515_v37 }
 0x160   : > { %v1381_v47 = vmul.f32 %v1349_v42, %v2394_v43  ;;  %v1301_v58 = vsub.f32 0.0, %v1237_v34  ;;  %v1194_v22 = vmul.f32 %v1975_v54, %v1034_v28  ;;  %v2529_v16 = vadd.f32 %v2512_v6, %v1860_v41 }
 0x161   : > { %v1018_v55 = vadd.f32 0.2548296, %v986_v45  ;;  %v904_v2 = vmul.f32 %v2494_v49, %v872_v5  ;;  %v565_v43 = vmul.f32 0.5, %v2378_v1  ;;  %v2535_v36 = vand.u32 2147483647, %v2526_v18 }
 0x162   : > { %v1775_v50 = vpack.c.bf16 %v1381_v47, %v1381_v47  ;;  %v1333_v51 = vsel %vm1269_vm2, %v1301_v58, %v1237_v34  ;;  %v1226_v63 = vsub.f32 1.0, %v1194_v22  ;;  %v554_v53 = vmul.f32 0.5, %v2389_v62  ;;  %v1847_v47 = vpop.f32.mrf.mxu0 }
 0x163   : > { %v1365_v60 = vadd.f32 1.0, %v1333_v51  ;;  %v1050_v54 = vmul.f32 %v2468_v40, %v1018_v55  ;;  %vm1258_vm3 = vcmp.lt.f32.partialorder %v2403_v11, 0.0  ;;  %v1712_v0 = vadd.f32 -0.28449672, %v904_v2 }
 0x164   : > { %1542 = vst.msk [vmem:[%s2291_s6 + $0x14] sm:$0xf] %vm1536_vm5, %v1775_v50  ;;  %v1290_v32 = vsub.f32 0.0, %v1226_v63  ;;  %v1112_v1 = vmul.f32 %v1080_v7, %v2484_v13  ;;  %v651_v9 = vmul.f32 0.3275911, %v2535_v36  ;;  %v2548_v8 = vadd.f32 %v2512_v6, %v452_v29 }
 0x165   : > { %v1397_v17 = vmul.f32 %v1365_v60, %v565_v43  ;;  %v1210_v3 = vmul.f32 %v1979_v38, %v1050_v54  ;;  %v968_v21 = vmul.f32 %v2494_v49, %v1712_v0  ;;  %v2545_v14 = vmul.f32 0.70710677, %v2529_v16  ;;  %v1863_v60 = vpop.f32.mrf.mxu1 }
 0x166   : > { %v1322_v40 = vsel %vm1258_vm3, %v1290_v32, %v1226_v63  ;;  %v683_v61 = vadd.f32 1.0, %v651_v9  ;;  %vm1274_vm4 = vcmp.lt.f32.partialorder %v2414_v39, 0.0  ;;  %v1168_v59 = vmul.f32 1.442695, %v1112_v1 }
 0x167   : > { %v1791_v62 = vpack.c.bf16 %v1397_v17, %v1397_v17  ;;  %v1354_v11 = vadd.f32 1.0, %v1322_v40  ;;  %v1242_v10 = vsub.f32 1.0, %v1210_v3  ;;  %v1000_v26 = vadd.f32 0.2548296, %v968_v21 }
 0x168   : > { %v635_v15 = vand.u32 2147483647, %v2545_v14  ;;  %1984 = vrcp.f32 %v683_v61  ;;  %v2559_v30 = vmul.f32 0.70710677, %v2548_v8  ;;  %v570_v38 = vmul.f32 0.5, %v2406_v23 }
 0x169   : > { %1558 = vst.msk [vmem:[%s2291_s6 + $0x54] sm:$0xf] %vm1536_vm5, %v1791_v62  ;;  %v1386_v13 = vmul.f32 %v1354_v11, %v554_v53  ;;  %v1306_v20 = vsub.f32 0.0, %v1242_v10  ;;  %v2553_v44 = vpop.eup %1982  ;;  %v1032_v52 = vmul.f32 %v2494_v49, %v1000_v26  ;;  %v552_v39 = vmul.f32 0.5, %v2428_v35 }
 0x16a   : > { %v667_v12 = vmul.f32 0.3275911, %v635_v15  ;;  %v792_v27 = vmul.f32 1.0614054, %v2553_v44  ;;  %v617_v34 = vand.u32 2147483647, %v2559_v30  ;;  %v2567_v41 = vadd.f32 %v2512_v6, %v516_v31 }
 0x16b   : > { %v1780_v25 = vpack.c.bf16 %v1386_v13, %v1386_v13  ;;  %v1338_v33 = vsel %vm1274_vm4, %v1306_v20, %v1242_v10  ;;  %v1192_v48 = vmul.f32 %v1981_v19, %v1032_v52  ;;  %v1067_v23 = vsub.f32 0.0, %v2535_v36 }
 0x16c   : > { %v1370_v56 = vadd.f32 1.0, %v1338_v33  ;;  %v699_v42 = vadd.f32 1.0, %v667_v12  ;;  %v1696_v49 = vadd.f32 -1.4531521, %v792_v27  ;;  %v649_v19 = vmul.f32 0.3275911, %v617_v34 }
 0x16d   : > { %1547 = vst.msk [vmem:[%s2291_s6 + $0x28] sm:$0xf] %vm1536_vm5, %v1780_v25  ;;  %v1224_v46 = vsub.f32 1.0, %v1192_v48  ;;  %v1083_v35 = vsub.f32 0.0, %v635_v15  ;;  %v2572_v5 = vmul.f32 0.70710677, %v2567_v41  ;;  %v2582_v43 = vadd.f32 %v2512_v6, %v1847_v47  ;;  %v529_v25 = vpop.f32.mrf.mxu1 }
 0x16e   : > { %v1402_v28 = vmul.f32 %v1370_v56, %v570_v38  ;;  %1986 = vrcp.f32 %v699_v42  ;;  %v856_v45 = vmul.f32 %v2553_v44, %v1696_v49  ;;  %vm1256_vm6 = vcmp.lt.f32.partialorder %v2438_v24, 0.0 }
 0x16f   : > { %1988 = vpow2.f32 %v1168_v59  ;;  %v1288_v22 = vsub.f32 0.0, %v1224_v46  ;;  %v2576_v55 = vmul.f32 0.5, %v2444_v57  ;;  %v681_v50 = vadd.f32 1.0, %v649_v19 }
 0x170   : > { %v1796_v58 = vpack.c.bf16 %v1402_v28, %v1402_v28  ;;  %v888_v7 = vadd.f32 1.4214138, %v856_v45  ;;  %v1065_v63 = vsub.f32 0.0, %v617_v34  ;;  %v633_v2 = vand.u32 2147483647, %v2572_v5 }
 0x171   : > { %v1320_v51 = vsel %vm1256_vm6, %v1288_v22, %v1224_v46  ;;  %v1099_v24 = vmul.f32 %v1067_v23, %v2535_v36  ;;  %1990 = vrcp.f32 %v681_v50  ;;  %v2587_v57 = vmul.f32 0.5, %v2515_v37 }
 0x172   : > { %1563 = vst.msk [vmem:[%s2291_s6 + $0x68] sm:$0xf] %vm1536_vm5, %v1796_v58  ;;  %v1352_v54 = vadd.f32 1.0, %v1320_v51  ;;  %v920_v29 = vmul.f32 %v2553_v44, %v888_v7  ;;  %v1115_v53 = vmul.f32 %v1083_v35, %v635_v15  ;;  %v665_v32 = vmul.f32 0.3275911, %v633_v2  ;;  %v465_v15 = vpop.f32.mrf.mxu0 }
 0x173   : > { %v2590_v0 = vmul.f32 0.70710677, %v2582_v43  ;;  %v2593_v1 = vmul.f32 0.5, %v2529_v16  ;;  %v2596_v9 = vadd.f32 %v2512_v6, %v1863_v60  ;;  %v1097_v36 = vmul.f32 %v1065_v63, %v617_v34 }
 0x174   : > { %v1384_v17 = vmul.f32 %v1352_v54, %v552_v39  ;;  %v1728_v3 = vadd.f32 -0.28449672, %v920_v29  ;;  %v697_v21 = vadd.f32 1.0, %v665_v32  ;;  %v1081_v37 = vsub.f32 0.0, %v633_v2 }
 0x175   : > { %v2598_v40 = vpop.eup %1984  ;;  %v622_v62 = vand.u32 2147483647, %v2590_v0  ;;  %v1142_v26 = vmul.f32 1.442695, %v1099_v24  ;;  %v1174_v16 = vmul.f32 1.442695, %v1115_v53  ;;  %v2610_v38 = vadd.f32 %v2512_v6, %v465_v15 }
 0x176   : > { %v1778_v11 = vpack.c.bf16 %v1384_v17, %v1384_v17  ;;  %v984_v10 = vmul.f32 %v2553_v44, %v1728_v3  ;;  %v779_v61 = vmul.f32 1.0614054, %v2598_v40  ;;  %1992 = vrcp.f32 %v697_v21 }
 0x177   : > { %v654_v13 = vmul.f32 0.3275911, %v622_v62  ;;  %v1070_v20 = vsub.f32 0.0, %v622_v62  ;;  %v2606_v12 = vmul.f32 0.70710677, %v2596_v9  ;;  %vm1272_vm7 = vcmp.lt.f32.partialorder %v2479_v4, 0.0 }
 0x178   : > { %1545 = vst.msk [vmem:[%s2291_s6 + $0x20] sm:$0xf] %vm1536_vm5, %v1778_v11  ;;  %v1016_v52 = vadd.f32 0.2548296, %v984_v10  ;;  %v1683_v59 = vadd.f32 -1.4531521, %v779_v61  ;;  %v1113_v27 = vmul.f32 %v1081_v37, %v633_v2  ;;  %1994 = vpow2.f32 %v1142_v26 }
 0x179   : > { %v1138_v33 = vmul.f32 1.442695, %v1097_v36  ;;  %v686_v31 = vadd.f32 1.0, %v654_v13  ;;  %v638_v39 = vand.u32 2147483647, %v2606_v12  ;;  %v1102_v28 = vmul.f32 %v1070_v20, %v622_v62  ;;  %v1848_v20 = vpop.f32.mrf.mxu0 }
 0x17a   : > { %v1048_v48 = vmul.f32 %v2553_v44, %v1016_v52  ;;  %v843_v42 = vmul.f32 %v2598_v40, %v1683_v59  ;;  %v2619_v46 = vadd.f32 %v2512_v6, %v529_v25  ;;  %v1170_v44 = vmul.f32 1.442695, %v1113_v27 }
 0x17b   : > { %v2612_v56 = vpop.eup %1986  ;;  %1996 = vrcp.f32 %v686_v31  ;;  %v670_v19 = vmul.f32 0.3275911, %v638_v39  ;;  %v2622_v58 = vmul.f32 0.70710677, %v2610_v38  ;;  %v1086_v50 = vsub.f32 0.0, %v638_v39 }
 0x17c   : > { %v1989_v49 = vpop.eup %1988  ;;  %v795_v34 = vmul.f32 1.0614054, %v2612_v56  ;;  %v875_v23 = vadd.f32 1.4214138, %v843_v42  ;;  %1998 = vpow2.f32 %v1174_v16  ;;  %v1148_v2 = vmul.f32 1.442695, %v1102_v28 }
 0x17d   : > { %v1208_v45 = vmul.f32 %v1989_v49, %v1048_v48  ;;  %2000 = vpow2.f32 %v1138_v33  ;;  %v702_v7 = vadd.f32 1.0, %v670_v19  ;;  %v620_v60 = vand.u32 2147483647, %v2622_v58 }
 0x17e   : > { %v1699_v47 = vadd.f32 -1.4531521, %v795_v34  ;;  %v907_v35 = vmul.f32 %v2598_v40, %v875_v23  ;;  %v2625_v51 = vpop.eup %1990  ;;  %v2630_v54 = vmul.f32 0.70710677, %v2619_v46  ;;  %v2634_v17 = vmul.f32 0.5, %v2548_v8 }
 0x17f   : > { %v1240_v22 = vsub.f32 1.0, %v1208_v45  ;;  %v777_v53 = vmul.f32 1.0614054, %v2625_v51  ;;  %2002 = vrcp.f32 %v702_v7  ;;  %v652_v3 = vmul.f32 0.3275911, %v620_v60 }
 0x180   : > { %v859_v63 = vmul.f32 %v2612_v56, %v1699_v47  ;;  %v1715_v24 = vadd.f32 -0.28449672, %v907_v35  ;;  %2004 = vpow2.f32 %v1170_v44  ;;  %v1118_v62 = vmul.f32 %v1086_v50, %v638_v39 }
 0x181   : > { %v1304_v29 = vsub.f32 0.0, %v1240_v22  ;;  %v1681_v37 = vadd.f32 -1.4531521, %v777_v53  ;;  %2006 = vpow2.f32 %v1148_v2  ;;  %v684_v61 = vadd.f32 1.0, %v652_v3 }
 0x182   : > { %v891_v32 = vadd.f32 1.4214138, %v859_v63  ;;  %v971_v21 = vmul.f32 %v2598_v40, %v1715_v24  ;;  %v1068_v16 = vsub.f32 0.0, %v620_v60  ;;  %v636_v13 = vand.u32 2147483647, %v2630_v54 }
 0x183   : > { %v1336_v36 = vsel %vm1272_vm7, %v1304_v29, %v1240_v22  ;;  %v2640_v26 = vpop.eup %1992  ;;  %v841_v8 = vmul.f32 %v2625_v51, %v1681_v37  ;;  %vm1259_vm8 = vcmp.lt.f32.partialorder %v2526_v18, 0.0  ;;  %2008 = vrcp.f32 %v684_v61 }
 0x184   : > { %v1368_v11 = vadd.f32 1.0, %v1336_v36  ;;  %v923_v10 = vmul.f32 %v2612_v56, %v891_v32  ;;  %v1003_v15 = vadd.f32 0.2548296, %v971_v21  ;;  %v793_v59 = vmul.f32 1.0614054, %v2640_v26 }
 0x185   : > { %v873_v33 = vadd.f32 1.4214138, %v841_v8  ;;  %v1180_v27 = vmul.f32 1.442695, %v1118_v62  ;;  %v668_v31 = vmul.f32 0.3275911, %v636_v13  ;;  %v1995_v48 = vpop.eup %1994  ;;  %v2650_v34 = vadd.f32 %v2512_v6, %v1848_v20 }
 0x186   : > { %v1400_v4 = vmul.f32 %v1368_v11, %v2576_v55  ;;  %v1731_v52 = vadd.f32 -0.28449672, %v923_v10  ;;  %v1035_v25 = vmul.f32 %v2598_v40, %v1003_v15  ;;  %v1697_v49 = vadd.f32 -1.4531521, %v793_v59 }
 0x187   : > { %v905_v45 = vmul.f32 %v2625_v51, %v873_v33  ;;  %v1100_v23 = vmul.f32 %v1068_v16, %v620_v60  ;;  %v700_v19 = vadd.f32 1.0, %v668_v31  ;;  %v1084_v35 = vsub.f32 0.0, %v636_v13 }
 0x188   : > { %v1794_v42 = vpack.c.bf16 %v1400_v4, %v1400_v4  ;;  %v987_v39 = vmul.f32 %v2612_v56, %v1731_v52  ;;  %v2652_v55 = vpop.eup %1996  ;;  %v1195_v28 = vmul.f32 %v1995_v48, %v1035_v25  ;;  %v857_v44 = vmul.f32 %v2640_v26, %v1697_v49 }
 0x189   : > { %v1999_v47 = vpop.eup %1998  ;;  %v782_v22 = vmul.f32 1.0614054, %v2652_v55  ;;  %vm1275_vm9 = vcmp.lt.f32.partialorder %v2545_v14, 0.0  ;;  %v1713_v63 = vadd.f32 -0.28449672, %v905_v45  ;;  %v2661_v2 = vmul.f32 0.5, %v2567_v41 }
 0x18a   : > { %1561 = vst.msk [vmem:[%s2291_s6 + $0x60] sm:$0xf] %vm1536_vm5, %v1794_v42  ;;  %v1019_v40 = vadd.f32 0.2548296, %v987_v39  ;;  %v2001_v7 = vpop.eup %2000  ;;  %v1227_v50 = vsub.f32 1.0, %v1195_v28  ;;  %2010 = vrcp.f32 %v700_v19  ;;  %v1116_v11 = vmul.f32 %v1084_v35, %v636_v13 }
 0x18b   : > { %v889_v29 = vadd.f32 1.4214138, %v857_v44  ;;  %v1686_v24 = vadd.f32 -1.4531521, %v782_v22  ;;  %2012 = vpow2.f32 %v1180_v27  ;;  %v969_v32 = vmul.f32 %v2625_v51, %v1713_v63 }
 0x18c   : > { %v1051_v60 = vmul.f32 %v2612_v56, %v1019_v40  ;;  %v1291_v53 = vsub.f32 0.0, %v1227_v50  ;;  %v1144_v3 = vmul.f32 1.442695, %v1100_v23  ;;  %v2666_v36 = vmul.f32 0.70710677, %v2650_v34  ;;  %v2668_v21 = vpop.eup %2002 }
 0x18d   : > { %v921_v62 = vmul.f32 %v2640_v26, %v889_v29  ;;  %v846_v41 = vmul.f32 %v2652_v55, %v1686_v24  ;;  %v2005_v10 = vpop.eup %2004  ;;  %v1001_v61 = vadd.f32 0.2548296, %v969_v32  ;;  %v798_v15 = vmul.f32 1.0614054, %v2668_v21 }
 0x18e   : > { %v1211_v37 = vmul.f32 %v1999_v47, %v1051_v60  ;;  %v1323_v56 = vsel %vm1259_vm8, %v1291_v53, %v1227_v50  ;;  %v623_v8 = vand.u32 2147483647, %v2666_v36  ;;  %vm1257_vm10 = vcmp.lt.f32.partialorder %v2559_v30, 0.0  ;;  %v2007_v59 = vpop.eup %2006 }
 0x18f   : > { %v1355_v16 = vadd.f32 1.0, %v1323_v56  ;;  %v1729_v4 = vadd.f32 -0.28449672, %v921_v62  ;;  %v878_v52 = vadd.f32 1.4214138, %v846_v41  ;;  %v1033_v25 = vmul.f32 %v2625_v51, %v1001_v61 }
 0x190   : > { %v1243_v20 = vsub.f32 1.0, %v1211_v37  ;;  %v1702_v33 = vadd.f32 -1.4531521, %v798_v15  ;;  %2014 = vpow2.f32 %v1144_v3  ;;  %v655_v13 = vmul.f32 0.3275911, %v623_v8  ;;  %v2681_v42 = vpop.eup %2008  ;;  %v1864_v3 = vpop.f32.mrf.mxu1 }
 0x191   : > { %v1387_v18 = vmul.f32 %v1355_v16, %v2587_v57  ;;  %v985_v31 = vmul.f32 %v2640_v26, %v1729_v4  ;;  %v910_v48 = vmul.f32 %v2652_v55, %v878_v52  ;;  %v1193_v39 = vmul.f32 %v2001_v7, %v1033_v25 }
 0x192   : > { %v1307_v27 = vsub.f32 0.0, %v1243_v20  ;;  %v862_v49 = vmul.f32 %v2668_v21, %v1702_v33  ;;  %v1176_v28 = vmul.f32 1.442695, %v1116_v11  ;;  %v687_v45 = vadd.f32 1.0, %v655_v13 }
 0x193   : > { %v1781_v23 = vpack.c.bf16 %v1387_v18, %v1387_v18  ;;  %v1017_v19 = vadd.f32 0.2548296, %v985_v31  ;;  %v1718_v47 = vadd.f32 -0.28449672, %v910_v48  ;;  %v1225_v40 = vsub.f32 1.0, %v1193_v39 }
 0x194   : > { %v1339_v51 = vsel %vm1275_vm9, %v1307_v27, %v1243_v20  ;;  %v894_v44 = vadd.f32 1.4214138, %v862_v49  ;;  %v780_v22 = vmul.f32 1.0614054, %v2681_v42  ;;  %2016 = vrcp.f32 %v687_v45 }
 0x195   : > { %v1371_v57 = vadd.f32 1.0, %v1339_v51  ;;  %1548 = vst.msk [vmem:[%s2291_s6 + $0x2c] sm:$0xf] %vm1536_vm5, %v1781_v23  ;;  %v1049_v35 = vmul.f32 %v2640_v26, %v1017_v19  ;;  %v974_v7 = vmul.f32 %v2652_v55, %v1718_v47  ;;  %v1071_v50 = vsub.f32 0.0, %v623_v8 }
 0x196   : > { %v1289_v60 = vsub.f32 0.0, %v1225_v40  ;;  %v926_v14 = vmul.f32 %v2668_v21, %v894_v44  ;;  %v1684_v29 = vadd.f32 -1.4531521, %v780_v22  ;;  %vm1273_vm11 = vcmp.lt.f32.partialorder %v2572_v5, 0.0 }
 0x197   : > { %v1403_v63 = vmul.f32 %v1371_v57, %v2593_v1  ;;  %v2693_v24 = vpop.eup %2010  ;;  %v1209_v53 = vmul.f32 %v2005_v10, %v1049_v35  ;;  %v1006_v32 = vadd.f32 0.2548296, %v974_v7  ;;  %2018 = vpow2.f32 %v1176_v28  ;;  %v468_v10 = vpop.f32.mrf.mxu0 }
 0x198   : > { %v2013_v26 = vpop.eup %2012  ;;  %v1321_v62 = vsel %vm1257_vm10, %v1289_v60, %v1225_v40  ;;  %v1734_v41 = vadd.f32 -0.28449672, %v926_v14  ;;  %v844_v1 = vmul.f32 %v2681_v42, %v1684_v29  ;;  %v796_v15 = vmul.f32 1.0614054, %v2693_v24 }
 0x199   : > { %v1797_v37 = vpack.c.bf16 %v1403_v63, %v1403_v63  ;;  %v1353_v11 = vadd.f32 1.0, %v1321_v62  ;;  %v1241_v56 = vsub.f32 1.0, %v1209_v53  ;;  %v1038_v61 = vmul.f32 %v2652_v55, %v1006_v32 }
 0x19a   : > { %v990_v16 = vmul.f32 %v2668_v21, %v1734_v41  ;;  %v876_v20 = vadd.f32 1.4214138, %v844_v1  ;;  %v1103_v4 = vmul.f32 %v1071_v50, %v623_v8  ;;  %v2705_v52 = vadd.f32 %v2512_v6, %v1864_v3 }
 0x19b   : > { %1564 = vst.msk [vmem:[%s2291_s6 + $0x6c] sm:$0xf] %vm1536_vm5, %v1797_v37  ;;  %v1385_v30 = vmul.f32 %v1353_v11, %v2634_v17  ;;  %v1305_v25 = vsub.f32 0.0, %v1241_v56  ;;  %v1198_v33 = vmul.f32 %v2007_v59, %v1038_v61  ;;  %v1700_v13 = vadd.f32 -1.4531521, %v796_v15  ;;  %v532_v15 = vpop.f32.mrf.mxu1 }
 0x19c   : > { %v1022_v18 = vadd.f32 0.2548296, %v990_v16  ;;  %v908_v55 = vmul.f32 %v2681_v42, %v876_v20  ;;  %v2710_v27 = vmul.f32 0.70710677, %v2705_v52  ;;  %v2713_v31 = vadd.f32 %v2512_v6, %v468_v10 }
 0x19d   : > { %v2015_v48 = vpop.eup %2014  ;;  %v1779_v8 = vpack.c.bf16 %v1385_v30, %v1385_v30  ;;  %v1337_v39 = vsel %vm1273_vm11, %v1305_v25, %v1241_v56  ;;  %v1230_v49 = vsub.f32 1.0, %v1198_v33  ;;  %v860_v17 = vmul.f32 %v2693_v24, %v1700_v13 }
 0x19e   : > { %v1369_v28 = vadd.f32 1.0, %v1337_v39  ;;  %v1054_v59 = vmul.f32 %v2668_v21, %v1022_v18  ;;  %v1716_v45 = vadd.f32 -0.28449672, %v908_v55  ;;  %v2720_v23 = vand.u32 2147483647, %v2710_v27 }
 0x19f   : > { %1546 = vst.msk [vmem:[%s2291_s6 + $0x24] sm:$0xf] %vm1536_vm5, %v1779_v8  ;;  %v558_v51 = vmul.f32 0.5, %v2582_v43  ;;  %vm1262_vm12 = vcmp.lt.f32.partialorder %v2590_v0, 0.0  ;;  %v1294_v19 = vsub.f32 0.0, %v1230_v49  ;;  %vm1278_vm13 = vcmp.lt.f32.partialorder %v2606_v12, 0.0 }
 0x1a0   : > { %v892_v47 = vadd.f32 1.4214138, %v860_v17  ;;  %v1401_v5 = vmul.f32 %v1369_v28, %v2661_v2  ;;  %v1214_v57 = vmul.f32 %v2013_v26, %v1054_v59  ;;  %v972_v40 = vmul.f32 %v2681_v42, %v1716_v45 }
 0x1a1   : > { %v671_v21 = vmul.f32 0.3275911, %v2720_v23  ;;  %v1326_v44 = vsel %vm1262_vm12, %v1294_v19, %v1230_v49  ;;  %v1150_v35 = vmul.f32 1.442695, %v1103_v4  ;;  %v2731_v7 = vmul.f32 0.70710677, %v2713_v31  ;;  %v2733_v43 = vpop.eup %2016 }
 0x1a2   : > { %v924_v22 = vmul.f32 %v2693_v24, %v892_v47  ;;  %v1795_v0 = vpack.c.bf16 %v1401_v5, %v1401_v5  ;;  %v1358_v50 = vadd.f32 1.0, %v1326_v44  ;;  %v1246_v63 = vsub.f32 1.0, %v1214_v57 }
 0x1a3   : > { %v1004_v60 = vadd.f32 0.2548296, %v972_v40  ;;  %v574_v2 = vmul.f32 0.5, %v2596_v9  ;;  %v783_v29 = vmul.f32 1.0614054, %v2733_v43  ;;  %v703_v53 = vadd.f32 1.0, %v671_v21 }
 0x1a4   : > { %v1732_v14 = vadd.f32 -0.28449672, %v924_v22  ;;  %v2019_v32 = vpop.eup %2018  ;;  %1562 = vst.msk [vmem:[%s2291_s6 + $0x64] sm:$0xf] %vm1536_vm5, %v1795_v0  ;;  %v1390_v3 = vmul.f32 %v1358_v50, %v558_v51  ;;  %v1310_v26 = vsub.f32 0.0, %v1246_v63  ;;  %v2748_v33 = vadd.f32 %v2512_v6, %v532_v15 }
 0x1a5   : > { %v1036_v37 = vmul.f32 %v2681_v42, %v1004_v60  ;;  %v621_v62 = vand.u32 2147483647, %v2731_v7  ;;  %v1687_v1 = vadd.f32 -1.4531521, %v783_v29  ;;  %2020 = vrcp.f32 %v703_v53 }
 0x1a6   : > { %v988_v41 = vmul.f32 %v2693_v24, %v1732_v14  ;;  %v1784_v9 = vpack.c.bf16 %v1390_v3, %v1390_v3  ;;  %v1342_v11 = vsel %vm1278_vm13, %v1310_v26, %v1246_v63  ;;  %2022 = vpow2.f32 %v1150_v35 }
 0x1a7   : > { %v1196_v56 = vmul.f32 %v2015_v48, %v1036_v37  ;;  %v653_v61 = vmul.f32 0.3275911, %v621_v62  ;;  %v1374_v10 = vadd.f32 1.0, %v1342_v11  ;;  %v847_v20 = vmul.f32 %v2733_v43, %v1687_v1 }
 0x1a8   : > { %v1020_v16 = vadd.f32 0.2548296, %v988_v41  ;;  %1551 = vst.msk [vmem:[%s2291_s6 + $0x38] sm:$0xf] %vm1536_vm5, %v1784_v9  ;;  %vm1260_vm14 = vcmp.lt.f32.partialorder %v2622_v58, 0.0  ;;  %v1087_v8 = vsub.f32 0.0, %v2720_v23 }
 0x1a9   : > { %v1228_v42 = vsub.f32 1.0, %v1196_v56  ;;  %v685_v4 = vadd.f32 1.0, %v653_v61  ;;  %v1406_v12 = vmul.f32 %v1374_v10, %v574_v2  ;;  %v879_v25 = vadd.f32 1.4214138, %v847_v20 }
 0x1aa   : > { %v1052_v30 = vmul.f32 %v2693_v24, %v1020_v16  ;;  %v2754_v49 = vmul.f32 0.70710677, %v2748_v33  ;;  %v556_v24 = vmul.f32 0.5, %v2610_v38  ;;  %v1119_v19 = vmul.f32 %v1087_v8, %v2720_v23 }
 0x1ab   : > { %v1292_v13 = vsub.f32 0.0, %v1228_v42  ;;  %2024 = vrcp.f32 %v685_v4  ;;  %v1800_v18 = vpack.c.bf16 %v1406_v12, %v1406_v12  ;;  %v911_v48 = vmul.f32 %v2733_v43, %v879_v25 }
 0x1ac   : > { %v1212_v55 = vmul.f32 %v2019_v32, %v1052_v30  ;;  %v637_v58 = vand.u32 2147483647, %v2754_v49  ;;  %vm1276_vm15 = vcmp.lt.f32.partialorder %v2630_v54, 0.0  ;;  %v1069_v47 = vsub.f32 0.0, %v621_v62 }
 0x1ad   : > { %v1324_v39 = vsel %vm1260_vm14, %v1292_v13, %v1228_v42  ;;  %1567 = vst.msk [vmem:[%s2291_s6 + $0x78] sm:$0xf] %vm1536_vm5, %v1800_v18  ;;  %v1719_v28 = vadd.f32 -0.28449672, %v911_v48  ;;  %v572_v44 = vmul.f32 0.5, %v2619_v46  ;;  %vm1263_vm0 = vcmp.lt.f32.partialorder %v2666_v36, 0.0 }
 0x1ae   : > { %v1356_v6 = vadd.f32 1.0, %v1324_v39  ;;  %v1244_v17 = vsub.f32 1.0, %v1212_v55  ;;  %v669_v5 = vmul.f32 0.3275911, %v637_v58  ;;  %v1182_v63 = vmul.f32 1.442695, %v1119_v19 }
 0x1af   : > { %v975_v51 = vmul.f32 %v2733_v43, %v1719_v28  ;;  %v1101_v54 = vmul.f32 %v1069_v47, %v621_v62  ;;  %v1085_v1 = vsub.f32 0.0, %v637_v58  ;;  %v559_v11 = vmul.f32 0.5, %v2650_v34 }
 0x1b0   : > { %v1388_v59 = vmul.f32 %v1356_v6, %v556_v24  ;;  %v1308_v45 = vsub.f32 0.0, %v1244_v17  ;;  %v701_v35 = vadd.f32 1.0, %v669_v5  ;;  %vm1279_vm1 = vcmp.lt.f32.partialorder %v2710_v27, 0.0 }
 0x1b1   : > { %v1007_v21 = vadd.f32 0.2548296, %v975_v51  ;;  %v1146_v26 = vmul.f32 1.442695, %v1101_v54  ;;  %v1117_v20 = vmul.f32 %v1085_v1, %v637_v58  ;;  %v575_v5 = vmul.f32 0.5, %v2705_v52 }
 0x1b2   : > { %v1782_v57 = vpack.c.bf16 %v1388_v59, %v1388_v59  ;;  %v1340_v40 = vsel %vm1276_vm15, %v1308_v45, %v1244_v17  ;;  %v2021_v38 = vpop.eup %2020  ;;  %2026 = vrcp.f32 %v701_v35  ;;  %vm1261_vm2 = vcmp.lt.f32.partialorder %v2731_v7, 0.0 }
 0x1b3   : > { %v1372_v22 = vadd.f32 1.0, %v1340_v40  ;;  %v1039_v0 = vmul.f32 %v2733_v43, %v1007_v21  ;;  %v799_v50 = vmul.f32 1.0614054, %v2021_v38  ;;  %v2023_v23 = vpop.eup %2022  ;;  %2028 = vpow2.f32 %v1182_v63 }
 0x1b4   : > { %1549 = vst.msk [vmem:[%s2291_s6 + $0x30] sm:$0xf] %vm1536_vm5, %v1782_v57  ;;  %2030 = vpow2.f32 %v1146_v26  ;;  %v1178_v18 = vmul.f32 1.442695, %v1117_v20  ;;  %v557_v27 = vmul.f32 0.5, %v2713_v31  ;;  %vm1277_vm3 = vcmp.lt.f32.partialorder %v2754_v49, 0.0 }
 0x1b5   : > { %v1404_v60 = vmul.f32 %v1372_v22, %v572_v44  ;;  %v1199_v2 = vmul.f32 %v2023_v23, %v1039_v0  ;;  %v1703_v14 = vadd.f32 -1.4531521, %v799_v50 }
 0x1b6   : > { %2032 = vpow2.f32 %v1178_v18 }
 0x1b7   : > { %v1798_v29 = vpack.c.bf16 %v1404_v60, %v1404_v60  ;;  %v1231_v32 = vsub.f32 1.0, %v1199_v2  ;;  %v863_v3 = vmul.f32 %v2021_v38, %v1703_v14 }
 0x1b8   : > { %v2025_v53 = vpop.eup %2024 }
 0x1b9   : > { %1565 = vst.msk [vmem:[%s2291_s6 + $0x70] sm:$0xf] %vm1536_vm5, %v1798_v29  ;;  %v781_v46 = vmul.f32 1.0614054, %v2025_v53  ;;  %v1295_v37 = vsub.f32 0.0, %v1231_v32 }
 0x1ba   : > { %v895_v41 = vadd.f32 1.4214138, %v863_v3 }
 0x1bb   : > { %v1685_v43 = vadd.f32 -1.4531521, %v781_v46  ;;  %v1327_v62 = vsel %vm1263_vm0, %v1295_v37, %v1231_v32 }
 0x1bc   : > { %v927_v9 = vmul.f32 %v2021_v38, %v895_v41  ;;  %v1359_v56 = vadd.f32 1.0, %v1327_v62 }
 0x1bd   : > { %v845_v61 = vmul.f32 %v2025_v53, %v1685_v43 }
 0x1be   : > { %v1735_v15 = vadd.f32 -0.28449672, %v927_v9  ;;  %v1391_v10 = vmul.f32 %v1359_v56, %v559_v11 }
 0x1bf   : > { %v877_v16 = vadd.f32 1.4214138, %v845_v61  ;;  %v2027_v30 = vpop.eup %2026 }
 0x1c0   : > { %v991_v42 = vmul.f32 %v2021_v38, %v1735_v15  ;;  %v1785_v4 = vpack.c.bf16 %v1391_v10, %v1391_v10  ;;  %v797_v13 = vmul.f32 1.0614054, %v2027_v30  ;;  %v2029_v48 = vpop.eup %2028 }
 0x1c1   : > { %v909_v12 = vmul.f32 %v2025_v53, %v877_v16  ;;  %v2031_v59 = vpop.eup %2030 }
 0x1c2   : > { %v1023_v25 = vadd.f32 0.2548296, %v991_v42  ;;  %1552 = vst.msk [vmem:[%s2291_s6 + $0x3c] sm:$0xf] %vm1536_vm5, %v1785_v4  ;;  %v1701_v8 = vadd.f32 -1.4531521, %v797_v13 }
 0x1c3   : > { %v1717_v36 = vadd.f32 -0.28449672, %v909_v12  ;;  %v2033_v52 = vpop.eup %2032 }
 0x1c4   : > { %v1055_v55 = vmul.f32 %v2021_v38, %v1023_v25  ;;  %v861_v6 = vmul.f32 %v2027_v30, %v1701_v8 }
 0x1c5   : > { %v973_v34 = vmul.f32 %v2025_v53, %v1717_v36 }
 0x1c6   : > { %v1215_v39 = vmul.f32 %v2029_v48, %v1055_v55  ;;  %v893_v58 = vadd.f32 1.4214138, %v861_v6 }
 0x1c7   : > { %v1005_v24 = vadd.f32 0.2548296, %v973_v34 }
 0x1c8   : > { %v1247_v17 = vsub.f32 1.0, %v1215_v39  ;;  %v925_v19 = vmul.f32 %v2027_v30, %v893_v58 }
 0x1c9   : > { %v1037_v28 = vmul.f32 %v2025_v53, %v1005_v24  ;;  %v573_v53 = vmul.f32 0.5, %v2748_v33 }
 0x1ca   : > { %v1311_v45 = vsub.f32 0.0, %v1247_v17  ;;  %v1733_v21 = vadd.f32 -0.28449672, %v925_v19 }
 0x1cb   : > { %v1197_v51 = vmul.f32 %v2031_v59, %v1037_v28 }
 0x1cc   : > { %v1343_v47 = vsel %vm1279_vm1, %v1311_v45, %v1247_v17  ;;  %v989_v22 = vmul.f32 %v2027_v30, %v1733_v21 }
 0x1cd   : > { %v1375_v57 = vadd.f32 1.0, %v1343_v47  ;;  %v1229_v40 = vsub.f32 1.0, %v1197_v51 }
 0x1ce   : > { %v1021_v50 = vadd.f32 0.2548296, %v989_v22 }
 0x1cf   : > { %v1407_v38 = vmul.f32 %v1375_v57, %v575_v5  ;;  %v1293_v44 = vsub.f32 0.0, %v1229_v40 }
 0x1d0   : > { %v1053_v23 = vmul.f32 %v2027_v30, %v1021_v50 }
 0x1d1   : > { %v1801_v35 = vpack.c.bf16 %v1407_v38, %v1407_v38  ;;  %v1325_v0 = vsel %vm1261_vm2, %v1293_v44, %v1229_v40 }
 0x1d2   : > { %v1357_v63 = vadd.f32 1.0, %v1325_v0  ;;  %v1213_v54 = vmul.f32 %v2033_v52, %v1053_v23 }
 0x1d3   : > { %1568 = vst.msk [vmem:[%s2291_s6 + $0x7c] sm:$0xf] %vm1536_vm5, %v1801_v35 }
 0x1d4   : > { %v1389_v60 = vmul.f32 %v1357_v63, %v557_v27  ;;  %v1245_v14 = vsub.f32 1.0, %v1213_v54 }
 0x1d6   : > { %v1783_v2 = vpack.c.bf16 %v1389_v60, %v1389_v60  ;;  %v1309_v29 = vsub.f32 0.0, %v1245_v14 }
 0x1d8   : > { %1550 = vst.msk [vmem:[%s2291_s6 + $0x34] sm:$0xf] %vm1536_vm5, %v1783_v2  ;;  %v1341_v7 = vsel %vm1277_vm3, %v1309_v29, %v1245_v14 }
 0x1d9   : > { %v1373_v32 = vadd.f32 1.0, %v1341_v7 }
 0x1db   : > { %v1405_v31 = vmul.f32 %v1373_v32, %v573_v53 }
 0x1dd   : > { %v1799_v3 = vpack.c.bf16 %v1405_v31, %v1405_v31 }
 0x1df   : > { %1566 = vst.msk [vmem:[%s2291_s6 + $0x74] sm:$0xf] %vm1536_vm5, %v1799_v3 }
 0x1e0 PF: > { %s13_s12 = sadd.s32 1, %s2041_s12  }
 0x1e1   : > { %p10_p4 = scmp.ge.s32.totalorder %s13_s12, 4  }
 0x1e3   :  { %12 = sbr.rel (!%p10_p4) target bundleno = 1 (0x1), region = 62 }

// kernel: backbone_forward.14
= control target key start
LH: loop header
LB: loop body
LE: loop exit
PB: predicated region body
PF: predicated region fallthrough
CT: control target
= control target key end

     0   :  { %s999_s18 = smov 0   ;;  %s1194_s0 = inlined_call_operand.vmem [shape: bf16[128,72], index: 0, kind: input, shape index: {}]   ;;  %s1195_s1 = inlined_call_operand.vmem [shape: bf16[72,32], index: 1, kind: input, shape index: {}]   ;;  %s1196_s2 = inlined_call_operand.vmem [shape: f32[1,32], index: 2, kind: input, shape index: {}]   ;;  %s1197_s3 = inlined_call_operand.vmem [shape: bf16[32,16], index: 3, kind: input, shape index: {}]   ;;  %s1198_s4 = inlined_call_operand.vmem [shape: f32[1,16], index: 4, kind: input, shape index: {}]   ;;  %s1199_s5 = inlined_call_operand.vmem [shape: bf16[128,16], index: 5, kind: output, shape index: {}]  }
   0x1 LB: > { %s800_s19 = sadd.s32 4294967295, %s967_s18   ;;  %p804_p0 = scmp.ge.s32.totalorder %s967_s18, 1  ;;  %s967_s18 = sphi %s999_s18, %s15_s18  }
   0x2   : > { %p188_p1 = scmp.lt.s32.totalorder %s967_s18, 3 }
   0x4   : > { %p189_p2 = pnand %p804_p0, %p188_p1 }
   0x5   : > { %s805_s24 = sshll.u32 (!%p189_p2), %s800_s19, 3 }
   0x6   : > { %192 = sbr.rel (%p189_p2) target bundleno = 501 (0x1f5), region = 40  ;;  %p217_p3 = scmp.lt.s32.totalorder (!%p189_p2), %s805_s24, 15 }
   0xb   : > { %v918_v0 = vld [vmem:[%s1195_s1 + $0x20] ss:$0 sps:$4 sm:$0xff]   ;;  %vm313_vm0 = vcmask 1043456   ;;  %v919_v1 = vld [vmem:[%s1195_s1 + $0x18] sm:$0xff]   ;;  %v920_v3 = vld [vmem:[%s1195_s1 + $0x10] sm:$0xff]   ;;  %s1201_s24 = smov (!%p217_p3, %s805_s24), 15 }
   0xc   : > { %909 = vmatprep.subr.msk.bf16.mxu0 %vm313_vm0, %v918_v0  ;;  %v315_v2 = vsel %vm313_vm0, %v918_v0, 0  ;;  %v921_v4 = vld [vmem:[%s1195_s1 + $0x8] sm:$0xff]   ;;  %s806_s29 = sshll.u32 %s1201_s24, 2  ;;  %vm300_vm1 = vcmask 588800   ;;  %v922_v6 = vld [vmem:[%s1195_s1] sm:$0xff]   ;;  %vm625_vm6 = vcmask 261120  }
   0xd   : > { %880 = vmatpush3.bf16.msra.mxu0 %v315_v2  ;;  %s220_s7 = scalar_lea.vmem %s1194_s0, %s806_s29  ;;  %v927_v10 = vld [vmem:[%s1197_s3 + $0x8] sm:$0xff]   ;;  %v928_v11 = vld [vmem:[%s1197_s3] sm:$0xff]   ;;  %s1173_s21 = scalar_lea.vmem %s1199_s5, %s806_s29  ;;  %vm735_vm11 = vcmask 125952  }
   0xe   : > { %881 = vmatprep.subr.bf16.mxu0 %v919_v1  ;;  %v923_v5 = vld [vmem:[%s220_s7] sm:$0xff]   ;;  %v924_v7 = vld [vmem:[%s220_s7 + $0x8] sm:$0xff]   ;;  %v925_v8 = vld [vmem:[%s220_s7 + $0x10] sm:$0xff]   ;;  %897 = vmatprep.subr.bf16.mxu1 %v927_v10 }
   0xf   : > { %889 = vmatprep.mubr.msk.bf16.mxu0 %vm300_vm1, %v923_v5  ;;  %v926_v9 = vld [vmem:[%s220_s7 + $0x18] sm:$0xff]   ;;  %898 = vmatpush3.bf16.msra.mxu1 %v927_v10  ;;  %v809_v12 = vld [vmem:[%s1196_s2] ss:$0 sm:$0xff] }
  0x10   : > { %899 = vmatprep.subr.bf16.mxu1 %v928_v11 }
  0x11   : > { %882 = vmatpush3.bf16.msra.mxu0 %v919_v1 }
  0x12   : > { %883 = vmatprep.subr.bf16.mxu0 %v920_v3 }
  0x13   : > { %900 = vmatpush3.bf16.msra.mxu1 %v928_v11 }
  0x15   : > { %884 = vmatpush3.bf16.msra.mxu0 %v920_v3 }
  0x16   : > { %885 = vmatprep.subr.bf16.mxu0 %v921_v4 }
  0x19   : > { %886 = vmatpush3.bf16.msra.mxu0 %v921_v4 }
  0x1a   : > { %887 = vmatprep.subr.bf16.mxu0 %v922_v6 }
  0x1d   : > { %888 = vmatpush3.bf16.msra.mxu0 %v922_v6 }
  0x20   : > { %890 = vmatmul.mubr.msk.bf16.vlgmr.msra.gmra.mxu0 %vm300_vm1, %v924_v7 }
  0x21   : > { %893 = vmatprep.mubr.msk.bf16.mxu0 %vm300_vm1, %v925_v8 }
  0x28   : > { %894 = vmatmul.mubr.msk.bf16.gmra.mxu0 %vm300_vm1, %v926_v9 }
  0xe0   : > { %v891_v13 = vpop.f32.mrf.mxu0 }
  0xe1   : > { %v1039_v14 = vadd.f32 %v891_v13, %v809_v12 }
  0xe2   : > { %v351_v15 = vpop.f32.mrf.mxu0 }
  0xe3   : > { %v1042_v16 = vmul.f32 0.70710677, %v1039_v14  ;;  %v1044_v17 = vadd.f32 %v809_v12, %v351_v15 }
  0xe4   : > { %v892_v18 = vpop.f32.mrf.mxu0 }
  0xe5   : > { %v400_v19 = vand.u32 2147483647, %v1042_v16  ;;  %v1048_v20 = vmul.f32 0.70710677, %v1044_v17  ;;  %v1050_v21 = vadd.f32 %v892_v18, %v809_v12  ;;  %vm560_vm2 = vcmp.lt.f32.partialorder %v1042_v16, 0.0 }
  0xe6   : > { %v354_v22 = vpop.f32.mrf.mxu0 }
  0xe7   : > { %v408_v23 = vmul.f32 0.3275911, %v400_v19  ;;  %v398_v24 = vand.u32 2147483647, %v1048_v20  ;;  %v1054_v25 = vmul.f32 0.70710677, %v1050_v21  ;;  %v1056_v26 = vadd.f32 %v809_v12, %v354_v22 }
  0xe8   : > { %v895_v27 = vpop.f32.mrf.mxu0  ;;  %v512_v42 = vsub.f32 0.0, %v400_v19  ;;  %vm558_vm4 = vcmp.lt.f32.partialorder %v1048_v20, 0.0 }
  0xe9   : > { %v416_v28 = vadd.f32 1.0, %v408_v23  ;;  %v406_v29 = vmul.f32 0.3275911, %v398_v24  ;;  %v401_v30 = vand.u32 2147483647, %v1054_v25  ;;  %v1063_v37 = vadd.f32 %v895_v27, %v809_v12 }
  0xea   : > { %v1060_v31 = vmul.f32 0.70710677, %v1056_v26  ;;  %v367_v32 = vpop.f32.mrf.mxu0  ;;  %v520_v50 = vmul.f32 %v512_v42, %v400_v19  ;;  %v510_v51 = vsub.f32 0.0, %v398_v24  ;;  %vm561_vm3 = vcmp.lt.f32.partialorder %v1054_v25, 0.0 }
  0xeb   : > { %929 = vrcp.f32 %v416_v28  ;;  %v414_v33 = vadd.f32 1.0, %v406_v29  ;;  %v409_v34 = vmul.f32 0.3275911, %v401_v30  ;;  %v1065_v38 = vadd.f32 %v809_v12, %v367_v32 }
  0xec   : > { %v399_v35 = vand.u32 2147483647, %v1060_v31  ;;  %v896_v36 = vpop.f32.mrf.mxu0  ;;  %v1068_v41 = vmul.f32 0.70710677, %v1063_v37  ;;  %v513_v54 = vsub.f32 0.0, %v401_v30  ;;  %v518_v61 = vmul.f32 %v510_v51, %v398_v24 }
  0xed   : > { %931 = vrcp.f32 %v414_v33  ;;  %v417_v39 = vadd.f32 1.0, %v409_v34  ;;  %v1072_v46 = vmul.f32 0.70710677, %v1065_v38  ;;  %v1074_v47 = vadd.f32 %v896_v36, %v809_v12 }
  0xee   : > { %v407_v40 = vmul.f32 0.3275911, %v399_v35  ;;  %v370_v44 = vpop.f32.mrf.mxu0  ;;  %v404_v45 = vand.u32 2147483647, %v1068_v41  ;;  %v530_v60 = vmul.f32 1.442695, %v520_v50  ;;  %v521_v1 = vmul.f32 %v513_v54, %v401_v30 }
  0xef   : > { %933 = vrcp.f32 %v417_v39  ;;  %v1076_v49 = vadd.f32 %v809_v12, %v370_v44  ;;  %v402_v52 = vand.u32 2147483647, %v1072_v46  ;;  %v1080_v53 = vmul.f32 0.70710677, %v1074_v47 }
  0xf0   : > { %v415_v43 = vadd.f32 1.0, %v407_v40  ;;  %v412_v48 = vmul.f32 0.3275911, %v404_v45  ;;  %v511_v3 = vsub.f32 0.0, %v399_v35  ;;  %v516_v7 = vsub.f32 0.0, %v404_v45 }
  0xf1   : > { %v410_v56 = vmul.f32 0.3275911, %v402_v52  ;;  %v405_v57 = vand.u32 2147483647, %v1080_v53  ;;  %v1084_v58 = vmul.f32 0.70710677, %v1076_v49 }
  0xf2   : > { %935 = vrcp.f32 %v415_v43  ;;  %v420_v55 = vadd.f32 1.0, %v412_v48  ;;  %v526_v9 = vmul.f32 1.442695, %v518_v61  ;;  %v532_v13 = vmul.f32 1.442695, %v521_v1 }
  0xf3   : > { %v418_v62 = vadd.f32 1.0, %v410_v56  ;;  %v413_v63 = vmul.f32 0.3275911, %v405_v57  ;;  %v403_v2 = vand.u32 2147483647, %v1084_v58  ;;  %v519_v19 = vmul.f32 %v511_v3, %v399_v35 }
  0xf4   : > { %937 = vrcp.f32 %v420_v55  ;;  %v514_v22 = vsub.f32 0.0, %v402_v52  ;;  %v524_v27 = vmul.f32 %v516_v7, %v404_v45  ;;  %v517_v30 = vsub.f32 0.0, %v405_v57 }
  0xf5   : > { %939 = vrcp.f32 %v418_v62  ;;  %v421_v4 = vadd.f32 1.0, %v413_v63  ;;  %v411_v8 = vmul.f32 0.3275911, %v403_v2  ;;  %v528_v35 = vmul.f32 1.442695, %v519_v19 }
  0xf6   : > { %941 = vpow2.f32 %v530_v60  ;;  %v522_v39 = vmul.f32 %v514_v22, %v402_v52  ;;  %v538_v43 = vmul.f32 1.442695, %v524_v27  ;;  %v525_v50 = vmul.f32 %v517_v30, %v405_v57 }
  0xf7   : > { %943 = vrcp.f32 %v421_v4  ;;  %v419_v15 = vadd.f32 1.0, %v411_v8  ;;  %v515_v56 = vsub.f32 0.0, %v403_v2  ;;  %vm559_vm5 = vcmp.lt.f32.partialorder %v1060_v31, 0.0 }
  0xf8   : > { %v1086_v59 = vpop.eup %929  ;;  %v534_v52 = vmul.f32 1.442695, %v522_v39  ;;  %v384_v31 = vmul.f32 0.5, %v1039_v14  ;;  %vm564_vm7 = vcmp.lt.f32.partialorder %v1068_v41, 0.0  ;;  %vm562_vm8 = vcmp.lt.f32.partialorder %v1072_v46, 0.0 }
  0xf9   : > { %v440_v0 = vmul.f32 1.0614054, %v1086_v59  ;;  %945 = vrcp.f32 %v419_v15  ;;  %vm565_vm9 = vcmp.lt.f32.partialorder %v1080_v53, 0.0  ;;  %vm563_vm10 = vcmp.lt.f32.partialorder %v1084_v58, 0.0 }
  0xfa   : > { %v1090_v5 = vpop.eup %931  ;;  %947 = vpow2.f32 %v526_v9  ;;  %v389_v46 = vmul.f32 0.5, %v1074_v47  ;;  %v839_v47 = vld [vmem:[%s1198_s4] ss:$0 sm:$0xff] }
  0xfb   : > { %v825_v6 = vadd.f32 -1.4531521, %v440_v0  ;;  %v438_v10 = vmul.f32 1.0614054, %v1090_v5  ;;  %949 = vpow2.f32 %v532_v13 }
  0xfc   : > { %v1093_v11 = vpop.eup %933  ;;  %951 = vpow2.f32 %v528_v35 }
  0xfd   : > { %v456_v12 = vmul.f32 %v1086_v59, %v825_v6  ;;  %v441_v18 = vmul.f32 1.0614054, %v1093_v11  ;;  %v823_v23 = vadd.f32 -1.4531521, %v438_v10  ;;  %953 = vpow2.f32 %v538_v43 }
  0xfe   : > { %v540_v6 = vmul.f32 1.442695, %v525_v50  ;;  %955 = vpow2.f32 %v534_v52 }
  0xff   : > { %v464_v24 = vadd.f32 1.4214138, %v456_v12  ;;  %v1097_v28 = vpop.eup %935  ;;  %v826_v29 = vadd.f32 -1.4531521, %v441_v18  ;;  %v454_v32 = vmul.f32 %v1090_v5, %v823_v23  ;;  %v523_v12 = vmul.f32 %v515_v56, %v403_v2 }
 0x100   : > { %v439_v34 = vmul.f32 1.0614054, %v1097_v28  ;;  %957 = vpow2.f32 %v540_v6 }
 0x101   : > { %v472_v33 = vmul.f32 %v1086_v59, %v464_v24  ;;  %v457_v36 = vmul.f32 %v1093_v11, %v826_v29  ;;  %v462_v40 = vadd.f32 1.4214138, %v454_v32  ;;  %v1103_v45 = vpop.eup %937  ;;  %v536_v39 = vmul.f32 1.442695, %v523_v12 }
 0x102   : > { %v824_v44 = vadd.f32 -1.4531521, %v439_v34  ;;  %v444_v55 = vmul.f32 1.0614054, %v1103_v45  ;;  %v1110_v63 = vpop.eup %939 }
 0x103   : > { %v833_v42 = vadd.f32 -0.28449672, %v472_v33  ;;  %v465_v48 = vadd.f32 1.4214138, %v457_v36  ;;  %v470_v51 = vmul.f32 %v1090_v5, %v462_v40  ;;  %v442_v4 = vmul.f32 1.0614054, %v1110_v63  ;;  %v942_v8 = vpop.eup %941 }
 0x104   : > { %v455_v60 = vmul.f32 %v1097_v28, %v824_v44  ;;  %v829_v1 = vadd.f32 -1.4531521, %v444_v55  ;;  %v1117_v15 = vpop.eup %943  ;;  %959 = vpow2.f32 %v536_v39 }
 0x105   : > { %v488_v54 = vmul.f32 %v1086_v59, %v833_v42  ;;  %v473_v61 = vmul.f32 %v1093_v11, %v465_v48  ;;  %v831_v62 = vadd.f32 -0.28449672, %v470_v51  ;;  %v827_v19 = vadd.f32 -1.4531521, %v442_v4 }
 0x106   : > { %v463_v57 = vadd.f32 1.4214138, %v455_v60  ;;  %v460_v10 = vmul.f32 %v1103_v45, %v829_v1  ;;  %v445_v27 = vmul.f32 1.0614054, %v1117_v15  ;;  %v1121_v30 = vpop.eup %945 }
 0x107   : > { %v496_v0 = vadd.f32 0.2548296, %v488_v54  ;;  %v834_v3 = vadd.f32 -0.28449672, %v473_v61  ;;  %v486_v7 = vmul.f32 %v1090_v5, %v831_v62  ;;  %v458_v32 = vmul.f32 %v1110_v63, %v827_v19  ;;  %v948_v33 = vpop.eup %947 }
 0x108   : > { %v471_v13 = vmul.f32 %v1097_v28, %v463_v57  ;;  %v468_v24 = vadd.f32 1.4214138, %v460_v10  ;;  %v830_v36 = vadd.f32 -1.4531521, %v445_v27  ;;  %v443_v35 = vmul.f32 1.0614054, %v1121_v30  ;;  %v950_v40 = vpop.eup %949 }
 0x109   : > { %v504_v9 = vmul.f32 %v1086_v59, %v496_v0  ;;  %v489_v18 = vmul.f32 %v1093_v11, %v834_v3  ;;  %v494_v22 = vadd.f32 0.2548296, %v486_v7  ;;  %v466_v43 = vadd.f32 1.4214138, %v458_v32  ;;  %v952_v3 = vpop.eup %951 }
 0x10a   : > { %v832_v29 = vadd.f32 -0.28449672, %v471_v13  ;;  %v476_v34 = vmul.f32 %v1103_v45, %v468_v24  ;;  %v461_v54 = vmul.f32 %v1117_v15, %v830_v36  ;;  %v828_v55 = vadd.f32 -1.4531521, %v443_v35 }
 0x10b   : > { %v544_v23 = vmul.f32 %v942_v8, %v504_v9  ;;  %v497_v59 = vadd.f32 0.2548296, %v489_v18  ;;  %v502_v2 = vmul.f32 %v1090_v5, %v494_v22  ;;  %v474_v56 = vmul.f32 %v1110_v63, %v466_v43  ;;  %v954_v9 = vpop.eup %953 }
 0x10c   : > { %v487_v44 = vmul.f32 %v1097_v28, %v832_v29  ;;  %v837_v51 = vadd.f32 -0.28449672, %v476_v34  ;;  %v469_v62 = vadd.f32 1.4214138, %v461_v54  ;;  %v459_v0 = vmul.f32 %v1121_v30, %v828_v55  ;;  %v956_v29 = vpop.eup %955 }
 0x10d   : > { %v505_v42 = vmul.f32 %v1093_v11, %v497_v59  ;;  %v542_v48 = vmul.f32 %v948_v33, %v502_v2  ;;  %v552_v50 = vsub.f32 1.0, %v544_v23  ;;  %v835_v1 = vadd.f32 -0.28449672, %v474_v56  ;;  %v958_v36 = vpop.eup %957 }
 0x10e   : > { %v495_v60 = vadd.f32 0.2548296, %v487_v44  ;;  %v492_v52 = vmul.f32 %v1103_v45, %v837_v51  ;;  %v477_v6 = vmul.f32 %v1117_v15, %v469_v62  ;;  %v467_v7 = vadd.f32 1.4214138, %v459_v0 }
 0x10f   : > { %v545_v5 = vmul.f32 %v950_v40, %v505_v42  ;;  %v550_v61 = vsub.f32 1.0, %v542_v48  ;;  %v568_v10 = vsub.f32 0.0, %v552_v50  ;;  %v490_v13 = vmul.f32 %v1110_v63, %v835_v1 }
 0x110   : > { %v503_v57 = vmul.f32 %v1097_v28, %v495_v60  ;;  %v500_v4 = vadd.f32 0.2548296, %v492_v52  ;;  %v838_v22 = vadd.f32 -0.28449672, %v477_v6  ;;  %v475_v23 = vmul.f32 %v1121_v30, %v467_v7 }
 0x111   : > { %v553_v11 = vsub.f32 1.0, %v545_v5  ;;  %v566_v8 = vsub.f32 0.0, %v550_v61  ;;  %v498_v24 = vadd.f32 0.2548296, %v490_v13  ;;  %v576_v34 = vsel %vm560_vm2, %v568_v10, %v552_v50  ;;  %v960_v52 = vpop.eup %959 }
 0x112   : > { %v543_v18 = vmul.f32 %v952_v3, %v503_v57  ;;  %v508_v19 = vmul.f32 %v1103_v45, %v500_v4  ;;  %v493_v32 = vmul.f32 %v1117_v15, %v838_v22  ;;  %v836_v2 = vadd.f32 -0.28449672, %v475_v23 }
 0x113   : > { %v569_v12 = vsub.f32 0.0, %v553_v11  ;;  %v574_v33 = vsel %vm558_vm4, %v566_v8, %v550_v61  ;;  %v506_v25 = vmul.f32 %v1110_v63, %v498_v24  ;;  %v584_v48 = vadd.f32 1.0, %v576_v34 }
 0x114   : > { %v551_v27 = vsub.f32 1.0, %v543_v18  ;;  %v548_v59 = vmul.f32 %v954_v9, %v508_v19  ;;  %v501_v20 = vadd.f32 0.2548296, %v493_v32  ;;  %v491_v39 = vmul.f32 %v1121_v30, %v836_v2 }
 0x115   : > { %v577_v28 = vsel %vm561_vm3, %v569_v12, %v553_v11  ;;  %v546_v42 = vmul.f32 %v956_v29, %v506_v25  ;;  %v582_v44 = vadd.f32 1.0, %v574_v33  ;;  %v385_v51 = vmul.f32 0.5, %v1050_v21 }
 0x116   : > { %v567_v45 = vsub.f32 0.0, %v551_v27  ;;  %v585_v35 = vadd.f32 1.0, %v577_v28  ;;  %v556_v40 = vsub.f32 1.0, %v548_v59  ;;  %v509_v16 = vmul.f32 %v1117_v15, %v501_v20 }
 0x117   : > { %v499_v50 = vadd.f32 0.2548296, %v491_v39  ;;  %v382_v63 = vmul.f32 0.5, %v1044_v17  ;;  %v383_v54 = vmul.f32 0.5, %v1056_v26  ;;  %v554_v55 = vsub.f32 1.0, %v546_v42 }
 0x118   : > { %v575_v43 = vsel %vm559_vm5, %v567_v45, %v551_v27  ;;  %v593_v56 = vmul.f32 %v585_v35, %v385_v51  ;;  %v549_v60 = vmul.f32 %v958_v36, %v509_v16  ;;  %v572_v62 = vsub.f32 0.0, %v556_v40 }
 0x119   : > { %v583_v5 = vadd.f32 1.0, %v575_v43  ;;  %v507_v61 = vmul.f32 %v1121_v30, %v499_v50  ;;  %v570_v0 = vsub.f32 0.0, %v554_v55  ;;  %v590_v11 = vmul.f32 %v582_v44, %v382_v63 }
 0x11a   : > { %v592_v1 = vmul.f32 %v584_v48, %v384_v31  ;;  %v557_v15 = vsub.f32 1.0, %v549_v60  ;;  %v580_v6 = vsel %vm564_vm7, %v572_v62, %v556_v40  ;;  %v386_v12 = vmul.f32 0.5, %v1065_v38 }
 0x11b   : > { %v591_v21 = vmul.f32 %v583_v5, %v383_v54  ;;  %v547_v57 = vmul.f32 %v960_v52, %v507_v61  ;;  %v578_v14 = vsel %vm562_vm8, %v570_v0, %v554_v55  ;;  %v588_v41 = vadd.f32 1.0, %v580_v6 }
 0x11c   : > { %v599_v26 = vpack.c.bf16 %v593_v56, %v592_v1  ;;  %v573_v3 = vsub.f32 0.0, %v557_v15  ;;  %v586_v8 = vadd.f32 1.0, %v578_v14  ;;  %v387_v13 = vmul.f32 0.5, %v1076_v49 }
 0x11d   : > { %v598_v17 = vpack.c.bf16 %v591_v21, %v590_v11  ;;  %v555_v4 = vsub.f32 1.0, %v547_v57  ;;  %v388_v18 = vmul.f32 0.5, %v1063_v37 }
 0x11e   : > { %v581_v30 = vsel %vm565_vm9, %v573_v3, %v557_v15  ;;  %v594_v22 = vmul.f32 %v586_v8, %v386_v12 }
 0x11f   : > { %901 = vmatprep.mubr.msk.bf16.mxu1 %vm625_vm6, %v598_v17  ;;  %v571_v7 = vsub.f32 0.0, %v555_v4  ;;  %v589_v9 = vadd.f32 1.0, %v581_v30  ;;  %v596_v28 = vmul.f32 %v588_v41, %v388_v18 }
 0x120   : > { %902 = vmatmul.mubr.msk.bf16.vlgmr.msra.gmra.mxu1 %vm625_vm6, %v599_v26 }
 0x121   : > { %v579_v10 = vsel %vm563_vm10, %v571_v7, %v555_v4  ;;  %v597_v19 = vmul.f32 %v589_v9, %v389_v46 }
 0x122   : > { %v587_v53 = vadd.f32 1.0, %v579_v10 }
 0x123   : > { %v601_v27 = vpack.c.bf16 %v597_v19, %v596_v28 }
 0x124   : > { %v595_v23 = vmul.f32 %v587_v53, %v387_v13 }
 0x126   : > { %v600_v24 = vpack.c.bf16 %v595_v23, %v594_v22 }
 0x128   : > { %905 = vmatprep.mubr.msk.bf16.mxu1 %vm625_vm6, %v600_v24 }
 0x129   : > { %906 = vmatmul.mubr.msk.bf16.gmra.mxu1 %vm625_vm6, %v601_v27 }
 0x1e0   : > { %v903_v38 = vpop.f32.mrf.mxu1 }
 0x1e1   : > { %v681_v58 = vadd.f32 %v903_v38, %v839_v47 }
 0x1e2   : > { %v672_v37 = vpop.f32.mrf.mxu1 }
 0x1e3   : > { %v858_v49 = vpack.c.bf16 %v681_v58, %v681_v58  ;;  %v673_v29 = vadd.f32 %v839_v47, %v672_v37 }
 0x1e4   : > { %v904_v59 = vpop.f32.mrf.mxu1 }
 0x1e5   : > { %738 = vst.msk [vmem:[%s1173_s21 + $0x8] sm:$0xf] %vm735_vm11, %v858_v49  ;;  %v856_v32 = vpack.c.bf16 %v673_v29, %v673_v29  ;;  %v684_v2 = vadd.f32 %v904_v59, %v839_v47 }
 0x1e6   : > { %v675_v33 = vpop.f32.mrf.mxu1 }
 0x1e7   : > { %736 = vst.msk [vmem:[%s1173_s21] sm:$0xf] %vm735_vm11, %v856_v32  ;;  %v859_v34 = vpack.c.bf16 %v684_v2, %v684_v2  ;;  %v676_v25 = vadd.f32 %v839_v47, %v675_v33 }
 0x1e9   : > { %739 = vst.msk [vmem:[%s1173_s21 + $0xc] sm:$0xf] %vm735_vm11, %v859_v34  ;;  %v857_v45 = vpack.c.bf16 %v676_v25, %v676_v25  ;;  %v907_v36 = vpop.f32.mrf.mxu1 }
 0x1ea   : > { %v697_v35 = vadd.f32 %v907_v36, %v839_v47 }
 0x1eb   : > { %737 = vst.msk [vmem:[%s1173_s21 + $0x4] sm:$0xf] %vm735_vm11, %v857_v45  ;;  %v688_v20 = vpop.f32.mrf.mxu1 }
 0x1ec   : > { %v862_v39 = vpack.c.bf16 %v697_v35, %v697_v35  ;;  %v689_v40 = vadd.f32 %v839_v47, %v688_v20 }
 0x1ed   : > { %v908_v42 = vpop.f32.mrf.mxu1 }
 0x1ee   : > { %742 = vst.msk [vmem:[%s1173_s21 + $0x18] sm:$0xf] %vm735_vm11, %v862_v39  ;;  %v860_v43 = vpack.c.bf16 %v689_v40, %v689_v40  ;;  %v700_v44 = vadd.f32 %v908_v42, %v839_v47 }
 0x1ef   : > { %v691_v48 = vpop.f32.mrf.mxu1 }
 0x1f0   : > { %740 = vst.msk [vmem:[%s1173_s21 + $0x10] sm:$0xf] %vm735_vm11, %v860_v43  ;;  %v863_v51 = vpack.c.bf16 %v700_v44, %v700_v44  ;;  %v692_v16 = vadd.f32 %v839_v47, %v691_v48 }
 0x1f2   : > { %743 = vst.msk [vmem:[%s1173_s21 + $0x1c] sm:$0xf] %vm735_vm11, %v863_v51  ;;  %v861_v50 = vpack.c.bf16 %v692_v16, %v692_v16 }
 0x1f4   : > { %741 = vst.msk [vmem:[%s1173_s21 + $0x14] sm:$0xf] %vm735_vm11, %v861_v50 }
 0x1f5 PF: > { %s15_s18 = sadd.s32 1, %s967_s18  }
 0x1f6   : > { %p12_p4 = scmp.ge.s32.totalorder %s15_s18, 4  }
 0x1f8   :  { %14 = sbr.rel (!%p12_p4) target bundleno = 1 (0x1), region = 70 }

// kernel: backbone_forward.15
= control target key start
LH: loop header
LB: loop body
LE: loop exit
PB: predicated region body
PF: predicated region fallthrough
CT: control target
= control target key end

     0   :  { %s1175_s21 = smov 0   ;;  %s1409_s0 = inlined_call_operand.vmem [shape: bf16[128,144], index: 0, kind: input, shape index: {}]   ;;  %s1410_s1 = inlined_call_operand.vmem [shape: bf16[144,32], index: 1, kind: input, shape index: {}]   ;;  %s1411_s2 = inlined_call_operand.vmem [shape: f32[1,32], index: 2, kind: input, shape index: {}]   ;;  %s1412_s3 = inlined_call_operand.vmem [shape: bf16[32,16], index: 3, kind: input, shape index: {}]   ;;  %s1413_s4 = inlined_call_operand.vmem [shape: f32[1,16], index: 4, kind: input, shape index: {}]   ;;  %s1414_s5 = inlined_call_operand.vmem [shape: bf16[128,16], index: 5, kind: input, shape index: {}]   ;;  %s1415_s6 = inlined_call_operand.vmem [shape: bf16[128,16], index: 6, kind: output, shape index: {}]  }
   0x1 LB: > { %s936_s22 = sadd.s32 4294967295, %s1137_s21   ;;  %p940_p0 = scmp.ge.s32.totalorder %s1137_s21, 1  ;;  %s1137_s21 = sphi %s1175_s21, %s16_s21  }
   0x2   : > { %p225_p1 = scmp.lt.s32.totalorder %s1137_s21, 3 }
   0x4   : > { %p226_p2 = pnand %p940_p0, %p225_p1 }
   0x5   : > { %s941_s25 = sshll.u32 (!%p226_p2), %s936_s22, 3 }
   0x6   : > { %229 = sbr.rel (%p226_p2) target bundleno = 523 (0x20b), region = 44  ;;  %p262_p3 = scmp.lt.s32.totalorder (!%p226_p2), %s941_s25, 15 }
   0xb   : > { %v1076_v0 = vld [vmem:[%s1410_s1 + $0x38] sm:$0xff]   ;;  %v1139_v1 = vmov 0   ;;  %v1077_v2 = vld [vmem:[%s1410_s1 + $0x30] sm:$0xff]   ;;  %s1417_s25 = smov (!%p262_p3, %s941_s25), 15  ;;  %v1078_v3 = vld [vmem:[%s1410_s1 + $0x28] sm:$0xff]   ;;  %vm404_vm0 = vcmask 130048  }
   0xc   : > { %417 = vmatprep.subr.bf16.mxu0 %v1139_v1  ;;  %1049 = vmatprep.subr.bf16.mxu1 %v1139_v1  ;;  %s1003_s30 = sshll.u32 %s1417_s25, 3  ;;  %v1079_v4 = vld [vmem:[%s1410_s1 + $0x20] sm:$0xff]   ;;  %v1080_v7 = vld [vmem:[%s1410_s1 + $0x18] sm:$0xff]   ;;  %v1081_v8 = vld [vmem:[%s1410_s1 + $0x10] sm:$0xff]   ;;  %vm725_vm3 = vcmask 261120   ;;  %vm859_vm10 = vcmask 125952  }
   0xd   : > { %418 = vmatpush1.bf16.msra.mxu0 %v1076_v0  ;;  %1058 = vmatpush1.bf16.msra.mxu1 %v1076_v0  ;;  %s1198_s9 = scalar_lea.vmem %s1409_s0, %s1003_s30  ;;  %v1082_v9 = vld [vmem:[%s1410_s1 + $0x8] sm:$0xff]   ;;  %v1083_v10 = vld [vmem:[%s1410_s1] sm:$0xff]   ;;  %s945_s30 = sshll.u32 %s1417_s25, 2 }
   0xe   : > { %419 = vmatprep.subr.bf16.mxu0 %v1139_v1  ;;  %1050 = vmatprep.subr.bf16.mxu1 %v1139_v1  ;;  %v1087_v5 = vld [vmem:[%s1198_s9 + $0x4] ss:$8 sps:$4 sm:$0xff]   ;;  %v1090_v6 = vld [vmem:[%s1198_s9 + $0x34] ss:$8 sps:$4 sm:$0xff]   ;;  %v1085_v12 = vld [vmem:[%s1198_s9] ss:$8 sps:$4 sm:$0xff]   ;;  %s1388_s13 = scalar_lea.vmem %s1415_s6, %s945_s30 }
   0xf   : > { %966 = vmatprep.mubr.msk.bf16.mxu0 %vm404_vm0, %v1087_v5  ;;  %969 = vmatprep.mubr.msk.bf16.mxu1 %vm404_vm0, %v1090_v6  ;;  %v1084_v11 = vld [vmem:[%s1410_s1 + $0x40] sm:$0xff]   ;;  %v1088_v13 = vld [vmem:[%s1198_s9 + $0x30] ss:$8 sps:$4 sm:$0xff]   ;;  %v1091_v14 = vld [vmem:[%s1198_s9 + $0x14] ss:$8 sps:$4 sm:$0xff]  }
  0x10   : > { %v1093_v15 = vld [vmem:[%s1198_s9 + $0x10] ss:$8 sps:$4 sm:$0xff]   ;;  %v1094_v16 = vld [vmem:[%s1198_s9 + $0x24] ss:$8 sps:$4 sm:$0xff]   ;;  %v1096_v17 = vld [vmem:[%s1198_s9 + $0x20] ss:$8 sps:$4 sm:$0xff]   ;;  %s272_s9 = scalar_lea.vmem %s1414_s5, %s945_s30 }
  0x11   : > { %420 = vmatpush1.bf16.msra.mxu0 %v1077_v2  ;;  %1059 = vmatpush1.bf16.msra.mxu1 %v1077_v2  ;;  %v1097_v18 = vld [vmem:[%s1412_s3 + $0x8] sm:$0xff]   ;;  %v1098_v19 = vld [vmem:[%s1412_s3] sm:$0xff]  }
  0x12   : > { %421 = vmatprep.subr.bf16.mxu0 %v1139_v1  ;;  %1051 = vmatprep.subr.bf16.mxu1 %v1139_v1  ;;  %v948_v20 = vld [vmem:[%s1411_s2] ss:$0 sm:$0xff] }
  0x15   : > { %422 = vmatpush1.bf16.msra.mxu0 %v1078_v3  ;;  %1060 = vmatpush1.bf16.msra.mxu1 %v1078_v3 }
  0x16   : > { %423 = vmatprep.subr.bf16.mxu0 %v1139_v1  ;;  %1052 = vmatprep.subr.bf16.mxu1 %v1139_v1 }
  0x19   : > { %424 = vmatpush1.bf16.msra.mxu0 %v1079_v4  ;;  %1061 = vmatpush1.bf16.msra.mxu1 %v1079_v4 }
  0x1a   : > { %425 = vmatprep.subr.bf16.mxu0 %v1139_v1  ;;  %1053 = vmatprep.subr.bf16.mxu1 %v1139_v1 }
  0x1d   : > { %426 = vmatpush1.bf16.msra.mxu0 %v1080_v7  ;;  %1062 = vmatpush1.bf16.msra.mxu1 %v1080_v7 }
  0x1e   : > { %427 = vmatprep.subr.bf16.mxu0 %v1139_v1  ;;  %1054 = vmatprep.subr.bf16.mxu1 %v1139_v1 }
  0x21   : > { %428 = vmatpush1.bf16.msra.mxu0 %v1081_v8  ;;  %1063 = vmatpush1.bf16.msra.mxu1 %v1081_v8 }
  0x22   : > { %429 = vmatprep.subr.bf16.mxu0 %v1139_v1  ;;  %1055 = vmatprep.subr.bf16.mxu1 %v1139_v1 }
  0x25   : > { %430 = vmatpush1.bf16.msra.mxu0 %v1082_v9  ;;  %1064 = vmatpush1.bf16.msra.mxu1 %v1082_v9 }
  0x26   : > { %431 = vmatprep.subr.bf16.mxu0 %v1139_v1  ;;  %1056 = vmatprep.subr.bf16.mxu1 %v1139_v1 }
  0x29   : > { %432 = vmatpush1.bf16.msra.mxu0 %v1083_v10  ;;  %1065 = vmatpush1.bf16.msra.mxu1 %v1083_v10 }
  0x2a   : > { %447 = vmatprep.subr.bf16.mxu0 %v1139_v1  ;;  %1057 = vmatprep.subr.bf16.mxu1 %v1139_v1 }
  0x2d   : > { %448 = vmatpush2.bf16.msra.mxu0 %v1084_v11  ;;  %1066 = vmatpush2.bf16.msra.mxu1 %v1084_v11 }
  0x2e   : > { %1037 = vmatprep.subr.bf16.mxu1 %v1097_v18 }
  0x30   : > { %450 = vmatmul.mubr.bf16.vlgmr.msra.gmra.mxu0 %v1085_v12  ;;  %474 = vmatmul.mubr.bf16.vlgmr.msra.gmra.mxu1 %v1088_v13 }
  0x31   : > { %967 = vmatprep.mubr.msk.bf16.mxu0 %vm404_vm0, %v1091_v14  ;;  %1038 = vmatpush3.bf16.msra.mxu1 %v1097_v18 }
  0x32   : > { %1039 = vmatprep.subr.bf16.mxu1 %v1098_v19 }
  0x35   : > { %1040 = vmatpush3.bf16.msra.mxu1 %v1098_v19 }
  0x38   : > { %458 = vmatmul.mubr.bf16.gmra.mxu0 %v1093_v15 }
  0x39   : > { %968 = vmatprep.mubr.msk.bf16.mxu0 %vm404_vm0, %v1094_v16 }
  0x40   : > { %466 = vmatmul.mubr.bf16.gmra.mxu0 %v1096_v17 }
  0xf0   : > { %v451_v21 = vpop.f32.mrf.mxu0  ;;  %v475_v22 = vpop.f32.mrf.mxu1 }
  0xf1   : > { %v1239_v23 = vadd.f32 %v948_v20, %v451_v21  ;;  %v1241_v24 = vadd.f32 %v948_v20, %v475_v22 }
  0xf2   : > { %v453_v25 = vpop.f32.mrf.mxu0  ;;  %v477_v26 = vpop.f32.mrf.mxu1 }
  0xf3   : > { %v1244_v27 = vmul.f32 0.70710677, %v1239_v23  ;;  %v1247_v28 = vmul.f32 0.70710677, %v1241_v24 }
  0xf4   : > { %v454_v29 = vpop.f32.mrf.mxu0  ;;  %v478_v30 = vpop.f32.mrf.mxu1 }
  0xf5   : > { %v498_v31 = vand.u32 2147483647, %v1244_v27  ;;  %v504_v32 = vand.u32 2147483647, %v1247_v28  ;;  %v1251_v33 = vadd.f32 %v948_v20, %v454_v29  ;;  %v1253_v34 = vadd.f32 %v948_v20, %v478_v30 }
  0xf6   : > { %v456_v35 = vpop.f32.mrf.mxu0  ;;  %v480_v36 = vpop.f32.mrf.mxu1  ;;  %vm658_vm1 = vcmp.lt.f32.partialorder %v1244_v27, 0.0  ;;  %vm664_vm7 = vcmp.lt.f32.partialorder %v1247_v28, 0.0 }
  0xf7   : > { %v506_v37 = vmul.f32 0.3275911, %v498_v31  ;;  %v512_v38 = vmul.f32 0.3275911, %v504_v32  ;;  %v1256_v39 = vmul.f32 0.70710677, %v1251_v33 }
  0xf8   : > { %v1259_v40 = vmul.f32 0.70710677, %v1253_v34  ;;  %v459_v41 = vpop.f32.mrf.mxu0  ;;  %v610_v57 = vsub.f32 0.0, %v498_v31  ;;  %v616_v4 = vsub.f32 0.0, %v504_v32 }
  0xf9   : > { %v514_v42 = vadd.f32 1.0, %v506_v37  ;;  %v520_v43 = vadd.f32 1.0, %v512_v38  ;;  %v499_v44 = vand.u32 2147483647, %v1256_v39  ;;  %v1265_v47 = vadd.f32 %v948_v20, %v459_v41 }
  0xfa   : > { %v1263_v45 = vand.u32 2147483647, %v1259_v40  ;;  %v461_v46 = vpop.f32.mrf.mxu0  ;;  %v618_v0 = vmul.f32 %v610_v57, %v498_v31  ;;  %v624_v17 = vmul.f32 %v616_v4, %v504_v32  ;;  %vm659_vm2 = vcmp.lt.f32.partialorder %v1256_v39, 0.0 }
  0xfb   : > { %1099 = vrcp.f32 %v514_v42  ;;  %v507_v48 = vmul.f32 0.3275911, %v499_v44  ;;  %v1269_v51 = vmul.f32 0.70710677, %v1265_v47  ;;  %v611_v5 = vsub.f32 0.0, %v499_v44 }
  0xfc   : > { %1101 = vrcp.f32 %v520_v43  ;;  %v513_v49 = vmul.f32 0.3275911, %v1263_v45  ;;  %v462_v50 = vpop.f32.mrf.mxu0  ;;  %v626_v12 = vmul.f32 1.442695, %v618_v0  ;;  %v617_v30 = vsub.f32 0.0, %v1263_v45 }
  0xfd   : > { %v515_v52 = vadd.f32 1.0, %v507_v48  ;;  %v500_v55 = vand.u32 2147483647, %v1269_v51  ;;  %v1272_v56 = vadd.f32 %v948_v20, %v462_v50  ;;  %v619_v18 = vmul.f32 %v611_v5, %v499_v44 }
  0xfe   : > { %v521_v53 = vadd.f32 1.0, %v513_v49  ;;  %v464_v54 = vpop.f32.mrf.mxu0  ;;  %v638_v35 = vmul.f32 1.442695, %v624_v17  ;;  %vm660_vm4 = vcmp.lt.f32.partialorder %v1269_v51, 0.0  ;;  %v484_v51 = vmul.f32 0.5, %v1265_v47 }
  0xff   : > { %1103 = vrcp.f32 %v515_v52  ;;  %v508_v59 = vmul.f32 0.3275911, %v500_v55  ;;  %v1275_v60 = vmul.f32 0.70710677, %v1272_v56  ;;  %v612_v21 = vsub.f32 0.0, %v500_v55 }
 0x100   : > { %v467_v58 = vpop.f32.mrf.mxu0  ;;  %1105 = vrcp.f32 %v521_v53  ;;  %v628_v42 = vmul.f32 1.442695, %v619_v18  ;;  %v625_v52 = vmul.f32 %v617_v30, %v1263_v45  ;;  %vm665_vm6 = vcmp.lt.f32.partialorder %v1259_v40, 0.0 }
 0x101   : > { %v1277_v61 = vadd.f32 %v948_v20, %v467_v58  ;;  %v516_v63 = vadd.f32 1.0, %v508_v59  ;;  %v501_v1 = vand.u32 2147483647, %v1275_v60  ;;  %v620_v43 = vmul.f32 %v612_v21, %v500_v55 }
 0x102   : > { %v469_v62 = vpop.f32.mrf.mxu0  ;;  %v640_v4 = vmul.f32 1.442695, %v625_v52  ;;  %vm661_vm5 = vcmp.lt.f32.partialorder %v1275_v60, 0.0 }
 0x103   : > { %v1281_v2 = vmul.f32 0.70710677, %v1277_v61  ;;  %1107 = vrcp.f32 %v516_v63  ;;  %v509_v7 = vmul.f32 0.3275911, %v501_v1  ;;  %v613_v48 = vsub.f32 0.0, %v501_v1 }
 0x104   : > { %v470_v3 = vpop.f32.mrf.mxu0  ;;  %v630_v59 = vmul.f32 1.442695, %v620_v43  ;;  %v486_v28 = vmul.f32 0.5, %v1277_v61  ;;  %v1013_v61 = vld [vmem:[%s272_s9] sm:$0xff]  }
 0x105   : > { %v1283_v6 = vadd.f32 %v948_v20, %v470_v3  ;;  %v1286_v8 = vand.u32 2147483647, %v1281_v2  ;;  %v517_v13 = vadd.f32 1.0, %v509_v7  ;;  %v621_v0 = vmul.f32 %v613_v48, %v501_v1 }
 0x106   : > { %v472_v9 = vpop.f32.mrf.mxu0  ;;  %vm662_vm8 = vcmp.lt.f32.partialorder %v1281_v2, 0.0 }
 0x107   : > { %v1289_v10 = vmul.f32 0.70710677, %v1283_v6  ;;  %v510_v14 = vmul.f32 0.3275911, %v1286_v8  ;;  %1109 = vrcp.f32 %v517_v13  ;;  %v487_v2 = vmul.f32 0.5, %v1283_v6 }
 0x108   : > { %v1291_v11 = vpop.eup %1099  ;;  %1111 = vpow2.f32 %v626_v12  ;;  %v614_v12 = vsub.f32 0.0, %v1286_v8 }
 0x109   : > { %v1294_v15 = vpop.eup %1101  ;;  %v538_v16 = vmul.f32 1.0614054, %v1291_v11  ;;  %v1298_v19 = vand.u32 2147483647, %v1289_v10  ;;  %v518_v22 = vadd.f32 1.0, %v510_v14  ;;  %vm663_vm9 = vcmp.lt.f32.partialorder %v1289_v10, 0.0 }
 0x10a   : > { %v544_v20 = vmul.f32 1.0614054, %v1294_v15 }
 0x10b   : > { %v970_v25 = vadd.f32 -1.4531521, %v538_v16  ;;  %v511_v26 = vmul.f32 0.3275911, %v1298_v19  ;;  %1113 = vrcp.f32 %v518_v22  ;;  %v615_v14 = vsub.f32 0.0, %v1298_v19 }
 0x10c   : > { %v976_v29 = vadd.f32 -1.4531521, %v544_v20  ;;  %v1303_v31 = vpop.eup %1103  ;;  %v632_v20 = vmul.f32 1.442695, %v621_v0 }
 0x10d   : > { %v554_v32 = vmul.f32 %v1291_v11, %v970_v25  ;;  %v519_v36 = vadd.f32 1.0, %v511_v26  ;;  %v1306_v37 = vpop.eup %1105  ;;  %v539_v41 = vmul.f32 1.0614054, %v1303_v31 }
 0x10e   : > { %v560_v38 = vmul.f32 %v1294_v15, %v976_v29  ;;  %v545_v46 = vmul.f32 1.0614054, %v1306_v37 }
 0x10f   : > { %v562_v44 = vadd.f32 1.4214138, %v554_v32  ;;  %v971_v50 = vadd.f32 -1.4531521, %v539_v41  ;;  %1115 = vrcp.f32 %v519_v36 }
 0x110   : > { %v568_v49 = vadd.f32 1.4214138, %v560_v38  ;;  %v977_v54 = vadd.f32 -1.4531521, %v545_v46  ;;  %v1313_v57 = vpop.eup %1107  ;;  %1117 = vpow2.f32 %v628_v42  ;;  %v623_v42 = vmul.f32 %v615_v14, %v1298_v19 }
 0x111   : > { %v570_v53 = vmul.f32 %v1291_v11, %v562_v44  ;;  %v555_v58 = vmul.f32 %v1303_v31, %v971_v50  ;;  %v540_v63 = vmul.f32 1.0614054, %v1313_v57  ;;  %1119 = vpow2.f32 %v638_v35 }
 0x112   : > { %v561_v55 = vmul.f32 %v1306_v37, %v977_v54  ;;  %v576_v3 = vmul.f32 %v1294_v15, %v568_v49  ;;  %1121 = vpow2.f32 %v630_v59  ;;  %v622_v35 = vmul.f32 %v614_v12, %v1286_v8 }
 0x113   : > { %v978_v62 = vadd.f32 -0.28449672, %v570_v53  ;;  %v563_v45 = vadd.f32 1.4214138, %v555_v58  ;;  %v972_v9 = vadd.f32 -1.4531521, %v540_v63  ;;  %1123 = vpow2.f32 %v640_v4 }
 0x114   : > { %v569_v7 = vadd.f32 1.4214138, %v561_v55  ;;  %v1323_v16 = vpop.eup %1109  ;;  %v984_v21 = vadd.f32 -0.28449672, %v576_v3  ;;  %1125 = vpow2.f32 %v632_v20  ;;  %v634_v54 = vmul.f32 1.442695, %v622_v35 }
 0x115   : > { %v586_v5 = vmul.f32 %v1291_v11, %v978_v62  ;;  %v571_v13 = vmul.f32 %v1303_v31, %v563_v45  ;;  %v556_v18 = vmul.f32 %v1313_v57, %v972_v9  ;;  %v541_v25 = vmul.f32 1.0614054, %v1323_v16  ;;  %v1112_v26 = vpop.eup %1111 }
 0x116   : > { %v577_v1 = vmul.f32 %v1306_v37, %v569_v7  ;;  %v636_v62 = vmul.f32 1.442695, %v623_v42  ;;  %1127 = vpow2.f32 %v634_v54  ;;  %v482_v14 = vmul.f32 0.5, %v1239_v23 }
 0x117   : > { %v594_v17 = vadd.f32 0.2548296, %v586_v5  ;;  %v979_v22 = vadd.f32 -0.28449672, %v571_v13  ;;  %v564_v32 = vadd.f32 1.4214138, %v556_v18 }
 0x118   : > { %v985_v30 = vadd.f32 -0.28449672, %v577_v1  ;;  %v1330_v36 = vpop.eup %1113  ;;  %v973_v41 = vadd.f32 -1.4531521, %v541_v25  ;;  %1129 = vpow2.f32 %v636_v62 }
 0x119   : > { %v602_v29 = vmul.f32 %v1291_v11, %v594_v17  ;;  %v587_v38 = vmul.f32 %v1303_v31, %v979_v22  ;;  %v572_v46 = vmul.f32 %v1313_v57, %v564_v32  ;;  %v542_v48 = vmul.f32 1.0614054, %v1330_v36 }
 0x11a   : > { %v593_v44 = vmul.f32 %v1306_v37, %v985_v30  ;;  %v592_v11 = vmul.f32 %v1294_v15, %v984_v21  ;;  %v557_v50 = vmul.f32 %v1323_v16, %v973_v41 }
 0x11b   : > { %v642_v43 = vmul.f32 %v1112_v26, %v602_v29  ;;  %v595_v49 = vadd.f32 0.2548296, %v587_v38  ;;  %v980_v53 = vadd.f32 -0.28449672, %v572_v46  ;;  %v974_v59 = vadd.f32 -1.4531521, %v542_v48 }
 0x11c   : > { %v1339_v8 = vpop.eup %1115  ;;  %v565_v58 = vadd.f32 1.4214138, %v557_v50  ;;  %v601_v0 = vadd.f32 0.2548296, %v593_v44  ;;  %v600_v4 = vadd.f32 0.2548296, %v592_v11 }
 0x11d   : > { %v650_v52 = vsub.f32 1.0, %v642_v43  ;;  %v603_v19 = vmul.f32 %v1303_v31, %v595_v49  ;;  %v1118_v55 = vpop.eup %1117  ;;  %v588_v3 = vmul.f32 %v1313_v57, %v980_v53  ;;  %v543_v45 = vmul.f32 1.0614054, %v1339_v8 }
 0x11e   : > { %v573_v7 = vmul.f32 %v1323_v16, %v565_v58  ;;  %v558_v9 = vmul.f32 %v1330_v36, %v974_v59  ;;  %v1120_v12 = vpop.eup %1119  ;;  %v609_v21 = vmul.f32 %v1306_v37, %v601_v0  ;;  %v608_v26 = vmul.f32 %v1294_v15, %v600_v4 }
 0x11f   : > { %v666_v63 = vsub.f32 0.0, %v650_v52  ;;  %v643_v5 = vmul.f32 %v1118_v55, %v603_v19  ;;  %v596_v31 = vadd.f32 0.2548296, %v588_v3  ;;  %v975_v13 = vadd.f32 -1.4531521, %v543_v45  ;;  %v1122_v20 = vpop.eup %1121 }
 0x120   : > { %v981_v18 = vadd.f32 -0.28449672, %v573_v7  ;;  %v566_v25 = vadd.f32 1.4214138, %v558_v9  ;;  %v1124_v32 = vpop.eup %1123  ;;  %v483_v37 = vmul.f32 0.5, %v1251_v33  ;;  %v648_v48 = vmul.f32 %v1120_v12, %v608_v26 }
 0x121   : > { %v674_v17 = vsel %vm658_vm1, %v666_v63, %v650_v52  ;;  %v651_v1 = vsub.f32 1.0, %v643_v5  ;;  %v604_v22 = vmul.f32 %v1313_v57, %v596_v31  ;;  %v559_v30 = vmul.f32 %v1339_v8, %v975_v13  ;;  %v1126_v50 = vpop.eup %1125 }
 0x122   : > { %v589_v27 = vmul.f32 %v1323_v16, %v981_v18  ;;  %v682_v35 = vadd.f32 1.0, %v674_v17  ;;  %v574_v38 = vmul.f32 %v1330_v36, %v566_v25  ;;  %v649_v44 = vmul.f32 %v1124_v32, %v609_v21 }
 0x123   : > { %v667_v29 = vsub.f32 0.0, %v651_v1  ;;  %v644_v23 = vmul.f32 %v1122_v20, %v604_v22  ;;  %v567_v42 = vadd.f32 1.4214138, %v559_v30  ;;  %v656_v0 = vsub.f32 1.0, %v648_v48  ;;  %v1128_v45 = vpop.eup %1127 }
 0x124   : > { %v597_v57 = vadd.f32 0.2548296, %v589_v27  ;;  %v982_v46 = vadd.f32 -0.28449672, %v574_v38  ;;  %v690_v52 = vmul.f32 %v682_v35, %v482_v14  ;;  %v657_v59 = vsub.f32 1.0, %v649_v44 }
 0x125   : > { %v675_v41 = vsel %vm659_vm2, %v667_v29, %v651_v1  ;;  %v652_v15 = vsub.f32 1.0, %v644_v23  ;;  %v575_v49 = vmul.f32 %v1339_v8, %v567_v42  ;;  %v1130_v31 = vpop.eup %1129  ;;  %v672_v17 = vsub.f32 0.0, %v656_v0 }
 0x126   : > { %v683_v43 = vadd.f32 1.0, %v675_v41  ;;  %v605_v11 = vmul.f32 %v1323_v16, %v597_v57  ;;  %v590_v54 = vmul.f32 %v1330_v36, %v982_v46  ;;  %v673_v7 = vsub.f32 0.0, %v657_v59 }
 0x127   : > { %v668_v53 = vsub.f32 0.0, %v652_v15  ;;  %v983_v33 = vadd.f32 -0.28449672, %v575_v49  ;;  %v485_v1 = vmul.f32 0.5, %v1272_v56  ;;  %v680_v60 = vsel %vm664_vm7, %v672_v17, %v656_v0 }
 0x128   : > { %v691_v39 = vmul.f32 %v683_v43, %v483_v37  ;;  %v645_v19 = vmul.f32 %v1126_v50, %v605_v11  ;;  %v598_v62 = vadd.f32 0.2548296, %v590_v54  ;;  %v681_v21 = vsel %vm665_vm6, %v673_v7, %v657_v59 }
 0x129   : > { %v676_v55 = vsel %vm660_vm4, %v668_v53, %v652_v15  ;;  %v591_v16 = vmul.f32 %v1339_v8, %v983_v33  ;;  %v689_v27 = vadd.f32 1.0, %v681_v21  ;;  %v688_v40 = vadd.f32 1.0, %v680_v60  ;;  %v1030_v33 = vld [vmem:[%s272_s9 + $0x18] sm:$0xff]  }
 0x12a   : > { %v698_v58 = vpack.c.bf16 %v691_v39, %v690_v52  ;;  %v653_v63 = vsub.f32 1.0, %v645_v19  ;;  %v606_v3 = vmul.f32 %v1330_v36, %v598_v62  ;;  %v684_v9 = vadd.f32 1.0, %v676_v55 }
 0x12b   : > { %v599_v5 = vadd.f32 0.2548296, %v591_v16  ;;  %v489_v32 = vmul.f32 0.5, %v1253_v34  ;;  %v488_v38 = vmul.f32 0.5, %v1241_v24  ;;  %v1028_v34 = vld [vmem:[%s272_s9 + $0x8] sm:$0xff]   ;;  %v1014_v46 = vunpack.c.l.bf16 %v1013_v61 }
 0x12c   : > { %1041 = vmatprep.mubr.msk.bf16.mxu1 %vm725_vm3, %v698_v58  ;;  %v669_v4 = vsub.f32 0.0, %v653_v63  ;;  %v646_v12 = vmul.f32 %v1128_v45, %v606_v3  ;;  %v692_v22 = vmul.f32 %v684_v9, %v484_v51  ;;  %v986_v24 = vld [vmem:[%s1413_s4] ss:$0 sm:$0xff]  ;;  %v1018_v6 = vunpack.c.l.bf16 %v1028_v34 }
 0x12d   : > { %v607_v14 = vmul.f32 %v1339_v8, %v599_v5  ;;  %v697_v37 = vmul.f32 %v689_v27, %v489_v32  ;;  %v696_v42 = vmul.f32 %v688_v40, %v488_v38  ;;  %v1019_v50 = vunpack.c.h.bf16 %v1028_v34 }
 0x12e   : > { %v677_v13 = vsel %vm661_vm5, %v669_v4, %v653_v63  ;;  %v654_v18 = vsub.f32 1.0, %v646_v12  ;;  %v1015_v19 = vunpack.c.h.bf16 %v1013_v61  ;;  %v1029_v63 = vld [vmem:[%s272_s9 + $0x10] sm:$0xff]   ;;  %v1026_v16 = vunpack.c.l.bf16 %v1030_v33 }
 0x12f   : > { %v685_v36 = vadd.f32 1.0, %v677_v13  ;;  %v647_v20 = vmul.f32 %v1130_v31, %v607_v14  ;;  %v701_v10 = vpack.c.bf16 %v697_v37, %v696_v42  ;;  %v1022_v5 = vunpack.c.l.bf16 %v1029_v63 }
 0x130   : > { %v670_v26 = vsub.f32 0.0, %v654_v18  ;;  %v1027_v51 = vunpack.c.h.bf16 %v1030_v33 }
 0x131   : > { %v693_v25 = vmul.f32 %v685_v36, %v485_v1  ;;  %v655_v47 = vsub.f32 1.0, %v647_v20  ;;  %v1023_v36 = vunpack.c.h.bf16 %v1029_v63 }
 0x132   : > { %v678_v8 = vsel %vm662_vm8, %v670_v26, %v654_v18 }
 0x133   : > { %v699_v29 = vpack.c.bf16 %v693_v25, %v692_v22  ;;  %v671_v30 = vsub.f32 0.0, %v655_v47  ;;  %v686_v56 = vadd.f32 1.0, %v678_v8 }
 0x135   : > { %1042 = vmatmul.mubr.msk.bf16.vlgmr.msra.gmra.mxu1 %vm725_vm3, %v699_v29  ;;  %v679_v35 = vsel %vm663_vm9, %v671_v30, %v655_v47  ;;  %v694_v41 = vmul.f32 %v686_v56, %v486_v28 }
 0x136   : > { %v687_v23 = vadd.f32 1.0, %v679_v35 }
 0x138   : > { %v695_v57 = vmul.f32 %v687_v23, %v487_v2 }
 0x13a   : > { %v700_v43 = vpack.c.bf16 %v695_v57, %v694_v41 }
 0x13c   : > { %1045 = vmatprep.mubr.msk.bf16.mxu1 %vm725_vm3, %v700_v43 }
 0x13d   : > { %1046 = vmatmul.mubr.msk.bf16.gmra.mxu1 %vm725_vm3, %v701_v10 }
 0x1f5   : > { %v1043_v44 = vpop.f32.mrf.mxu1 }
 0x1f6   : > { %v781_v15 = vadd.f32 %v1043_v44, %v986_v24 }
 0x1f7   : > { %v772_v48 = vpop.f32.mrf.mxu1 }
 0x1f8   : > { %v821_v11 = vadd.f32 %v1018_v6, %v781_v15  ;;  %v773_v49 = vadd.f32 %v986_v24, %v772_v48 }
 0x1f9   : > { %v1044_v52 = vpop.f32.mrf.mxu1 }
 0x1fa   : > { %v1006_v39 = vpack.c.bf16 %v821_v11, %v821_v11  ;;  %v819_v53 = vadd.f32 %v1014_v46, %v773_v49  ;;  %v784_v54 = vadd.f32 %v1044_v52, %v986_v24 }
 0x1fb   : > { %v775_v58 = vpop.f32.mrf.mxu1 }
 0x1fc   : > { %862 = vst.msk [vmem:[%s1388_s13 + $0x8] sm:$0xf] %vm859_vm10, %v1006_v39  ;;  %v1004_v59 = vpack.c.bf16 %v819_v53, %v819_v53  ;;  %v822_v62 = vadd.f32 %v1019_v50, %v784_v54  ;;  %v776_v55 = vadd.f32 %v986_v24, %v775_v58 }
 0x1fd   : > { %v1047_v45 = vpop.f32.mrf.mxu1 }
 0x1fe   : > { %860 = vst.msk [vmem:[%s1388_s13] sm:$0xf] %vm859_vm10, %v1004_v59  ;;  %v1007_v0 = vpack.c.bf16 %v822_v62, %v822_v62  ;;  %v820_v3 = vadd.f32 %v1015_v19, %v776_v55  ;;  %v797_v4 = vadd.f32 %v1047_v45, %v986_v24 }
 0x1ff   : > { %v788_v9 = vpop.f32.mrf.mxu1 }
 0x200   : > { %863 = vst.msk [vmem:[%s1388_s13 + $0xc] sm:$0xf] %vm859_vm10, %v1007_v0  ;;  %v1005_v7 = vpack.c.bf16 %v820_v3, %v820_v3  ;;  %v825_v12 = vadd.f32 %v1026_v16, %v797_v4  ;;  %v789_v31 = vadd.f32 %v986_v24, %v788_v9 }
 0x201   : > { %v1048_v13 = vpop.f32.mrf.mxu1 }
 0x202   : > { %861 = vst.msk [vmem:[%s1388_s13 + $0x4] sm:$0xf] %vm859_vm10, %v1005_v7  ;;  %v1010_v14 = vpack.c.bf16 %v825_v12, %v825_v12  ;;  %v823_v17 = vadd.f32 %v1022_v5, %v789_v31  ;;  %v800_v1 = vadd.f32 %v1048_v13, %v986_v24 }
 0x203   : > { %v791_v18 = vpop.f32.mrf.mxu1 }
 0x204   : > { %866 = vst.msk [vmem:[%s1388_s13 + $0x18] sm:$0xf] %vm859_vm10, %v1010_v14  ;;  %v1008_v20 = vpack.c.bf16 %v823_v17, %v823_v17  ;;  %v826_v21 = vadd.f32 %v1027_v51, %v800_v1  ;;  %v792_v22 = vadd.f32 %v986_v24, %v791_v18 }
 0x206   : > { %864 = vst.msk [vmem:[%s1388_s13 + $0x10] sm:$0xf] %vm859_vm10, %v1008_v20  ;;  %v1011_v25 = vpack.c.bf16 %v826_v21, %v826_v21  ;;  %v824_v26 = vadd.f32 %v1023_v36, %v792_v22 }
 0x208   : > { %867 = vst.msk [vmem:[%s1388_s13 + $0x1c] sm:$0xf] %vm859_vm10, %v1011_v25  ;;  %v1009_v47 = vpack.c.bf16 %v824_v26, %v824_v26 }
 0x20a   : > { %865 = vst.msk [vmem:[%s1388_s13 + $0x14] sm:$0xf] %vm859_vm10, %v1009_v47 }
 0x20b PF: > { %s16_s21 = sadd.s32 1, %s1137_s21  }
 0x20c   : > { %p13_p4 = scmp.ge.s32.totalorder %s16_s21, 4  }
 0x20e   :  { %15 = sbr.rel (!%p13_p4) target bundleno = 1 (0x1), region = 77 }

// kernel: backbone_forward.16
= control target key start
LH: loop header
LB: loop body
LE: loop exit
PB: predicated region body
PF: predicated region fallthrough
CT: control target
= control target key end

     0   :  { %s706_s18 = smov 0   ;;  %s772_s0 = inlined_call_operand.vmem [shape: bf16[32,144], index: 0, kind: input, shape index: {}]   ;;  %s773_s1 = inlined_call_operand.vmem [shape: bf16[144,64], index: 1, kind: input, shape index: {}]   ;;  %s774_s2 = inlined_call_operand.vmem [shape: f32[1,64], index: 2, kind: input, shape index: {}]   ;;  %s775_s3 = inlined_call_operand.vmem [shape: bf16[64,24], index: 3, kind: input, shape index: {}]   ;;  %s776_s4 = inlined_call_operand.vmem [shape: f32[1,24], index: 4, kind: input, shape index: {}]   ;;  %s777_s5 = inlined_call_operand.vmem [shape: bf16[32,24], index: 5, kind: output, shape index: {}]  }
   0x1 LB: > { %s573_s19 = sadd.s32 4294967295, %s671_s18   ;;  %p577_p0 = scmp.ge.s32.totalorder %s671_s18, 1  ;;  %s671_s18 = sphi %s706_s18, %s15_s18  }
   0x2   : > { %p189_p1 = scmp.lt.s32.totalorder %s671_s18, 3 }
   0x4   : > { %p190_p2 = pnand %p577_p0, %p189_p1 }
   0x5   : > { %s578_s22 = sshll.u32 (!%p190_p2), %s573_s19, 1 }
   0x6   : > { %193 = sbr.rel (%p190_p2) target bundleno = 502 (0x1f6), region = 40  ;;  %p219_p3 = scmp.lt.s32.totalorder (!%p190_p2), %s578_s22, 3 }
   0xb   : > { %v641_v0 = vld [vmem:[%s773_s1 + $0x38] sm:$0xff]   ;;  %v673_v1 = vmov 0   ;;  %v642_v2 = vld [vmem:[%s773_s1 + $0x30] sm:$0xff]   ;;  %s779_s22 = smov (!%p219_p3, %s578_s22), 3  ;;  %v643_v3 = vld [vmem:[%s773_s1 + $0x28] sm:$0xff]   ;;  %vm322_vm0 = vcmask 130048  }
   0xc   : > { %326 = vmatprep.subr.bf16.mxu0 %v673_v1  ;;  %s610_s27 = sshll.u32 %s779_s22, 3  ;;  %v644_v4 = vld [vmem:[%s773_s1 + $0x20] sm:$0xff]   ;;  %v645_v6 = vld [vmem:[%s773_s1 + $0x18] sm:$0xff]   ;;  %v646_v7 = vld [vmem:[%s773_s1 + $0x10] sm:$0xff]   ;;  %v674_v13 = vmov 0.0   ;;  %vm675_vm1 = vmmov 0  }
   0xd   : > { %327 = vmatpush1.bf16.msra.mxu0 %v641_v0  ;;  %s223_s30 = scalar_lea.vmem %s772_s0, %s610_s27  ;;  %v647_v8 = vld [vmem:[%s773_s1 + $0x8] sm:$0xff]   ;;  %v648_v9 = vld [vmem:[%s773_s1] sm:$0xff]   ;;  %v653_v12 = vld [vmem:[%s775_s3 + $0x18] sm:$0xff]   ;;  %618 = vmatprep.subr.bf16.mxu1 %v674_v13  ;;  %vm461_vm4 = vcmask 523264   ;;  %s582_s7 = sshll.u32 %s779_s22, 2  ;;  %vm514_vm5 = vcmask 191488  }
   0xe   : > { %328 = vmatprep.subr.bf16.mxu0 %v673_v1  ;;  %v652_v5 = vld [vmem:[%s223_s30 + $0x4] ss:$8 sps:$4 sm:$0xff]   ;;  %v650_v11 = vld [vmem:[%s223_s30] ss:$8 sps:$4 sm:$0xff]   ;;  %619 = vmatpush3.bf16.msra.mxu1 %v653_v12  ;;  %v654_v14 = vld [vmem:[%s775_s3 + $0x10] sm:$0xff]   ;;  %s229_s10 = scalar_lea.vmem %s777_s5, %s582_s7 }
   0xf   : > { %595 = vmatprep.mubr.msk.bf16.mxu0 %vm322_vm0, %v652_v5  ;;  %v649_v10 = vld [vmem:[%s773_s1 + $0x40] sm:$0xff]   ;;  %620 = vmatprep.subr.bf16.mxu1 %v674_v13  ;;  %v655_v15 = vld [vmem:[%s775_s3 + $0x8] sm:$0xff]  }
  0x10   : > { %v656_v16 = vld [vmem:[%s775_s3] sm:$0xff]   ;;  %626 = vmatprep.mubr.msk.bf16.mxu1 %vm675_vm1, %v674_v13 }
  0x11   : > { %329 = vmatpush1.bf16.msra.mxu0 %v642_v2  ;;  %v583_v17 = vld [vmem:[%s774_s2] ss:$0 sm:$0xff] }
  0x12   : > { %330 = vmatprep.subr.bf16.mxu0 %v673_v1  ;;  %621 = vmatpush3.bf16.msra.mxu1 %v654_v14 }
  0x13   : > { %622 = vmatprep.subr.bf16.mxu1 %v674_v13 }
  0x15   : > { %331 = vmatpush1.bf16.msra.mxu0 %v643_v3 }
  0x16   : > { %332 = vmatprep.subr.bf16.mxu0 %v673_v1  ;;  %623 = vmatpush3.bf16.msra.mxu1 %v655_v15 }
  0x17   : > { %624 = vmatprep.subr.bf16.mxu1 %v674_v13 }
  0x19   : > { %333 = vmatpush1.bf16.msra.mxu0 %v644_v4 }
  0x1a   : > { %334 = vmatprep.subr.bf16.mxu0 %v673_v1  ;;  %625 = vmatpush3.bf16.msra.mxu1 %v656_v16 }
  0x1d   : > { %335 = vmatpush1.bf16.msra.mxu0 %v645_v6 }
  0x1e   : > { %336 = vmatprep.subr.bf16.mxu0 %v673_v1 }
  0x21   : > { %337 = vmatpush1.bf16.msra.mxu0 %v646_v7 }
  0x22   : > { %338 = vmatprep.subr.bf16.mxu0 %v673_v1 }
  0x25   : > { %339 = vmatpush1.bf16.msra.mxu0 %v647_v8 }
  0x26   : > { %340 = vmatprep.subr.bf16.mxu0 %v673_v1 }
  0x29   : > { %341 = vmatpush1.bf16.msra.mxu0 %v648_v9 }
  0x2a   : > { %356 = vmatprep.subr.bf16.mxu0 %v673_v1 }
  0x2d   : > { %357 = vmatpush2.bf16.msra.mxu0 %v649_v10 }
  0x30   : > { %359 = vmatmul.mubr.bf16.vlgmr.msra.gmra.mxu0 %v650_v11  ;;  %v600_v11 = vld [vmem:[%s776_s4] ss:$0 sm:$0xff] }
  0xf0   : > { %v360_v18 = vpop.f32.mrf.mxu0 }
  0xf1   : > { %v361_v19 = vadd.f32 %v583_v17, %v360_v18 }
  0xf2   : > { %v362_v20 = vpop.f32.mrf.mxu0 }
  0xf3   : > { %v369_v21 = vmul.f32 0.70710677, %v361_v19  ;;  %v367_v5 = vmul.f32 0.5, %v361_v19 }
  0xf4   : > { %v363_v22 = vpop.f32.mrf.mxu0 }
  0xf5   : > { %v371_v23 = vand.u32 2147483647, %v369_v21  ;;  %v364_v24 = vadd.f32 %v583_v17, %v363_v22  ;;  %vm411_vm2 = vcmp.lt.f32.partialorder %v369_v21, 0.0 }
  0xf6   : > { %v365_v25 = vpop.f32.mrf.mxu0 }
  0xf7   : > { %v373_v26 = vmul.f32 0.3275911, %v371_v23  ;;  %v370_v27 = vmul.f32 0.70710677, %v364_v24  ;;  %v399_v32 = vsub.f32 0.0, %v371_v23  ;;  %v368_v6 = vmul.f32 0.5, %v364_v24 }
  0xf9   : > { %v375_v28 = vadd.f32 1.0, %v373_v26  ;;  %v372_v29 = vand.u32 2147483647, %v370_v27  ;;  %v401_v33 = vmul.f32 %v399_v32, %v371_v23  ;;  %vm412_vm3 = vcmp.lt.f32.partialorder %v370_v27, 0.0 }
  0xfb   : > { %657 = vrcp.f32 %v375_v28  ;;  %v374_v30 = vmul.f32 0.3275911, %v372_v29  ;;  %v400_v34 = vsub.f32 0.0, %v372_v29  ;;  %v403_v37 = vmul.f32 1.442695, %v401_v33 }
  0xfd   : > { %v376_v31 = vadd.f32 1.0, %v374_v30  ;;  %v402_v38 = vmul.f32 %v400_v34, %v372_v29 }
  0xff   : > { %659 = vrcp.f32 %v376_v31  ;;  %v405_v43 = vmul.f32 1.442695, %v402_v38 }
 0x100   : > { %661 = vpow2.f32 %v403_v37 }
 0x101   : > { %663 = vpow2.f32 %v405_v43 }
 0x108   : > { %v658_v35 = vpop.eup %657 }
 0x109   : > { %v381_v36 = vmul.f32 1.0614054, %v658_v35 }
 0x10b   : > { %v596_v39 = vadd.f32 -1.4531521, %v381_v36 }
 0x10c   : > { %v660_v40 = vpop.eup %659 }
 0x10d   : > { %v385_v41 = vmul.f32 %v658_v35, %v596_v39  ;;  %v382_v42 = vmul.f32 1.0614054, %v660_v40  ;;  %v662_v56 = vpop.eup %661 }
 0x10e   : > { %v664_v61 = vpop.eup %663 }
 0x10f   : > { %v387_v44 = vadd.f32 1.4214138, %v385_v41  ;;  %v597_v45 = vadd.f32 -1.4531521, %v382_v42 }
 0x111   : > { %v389_v46 = vmul.f32 %v658_v35, %v387_v44  ;;  %v386_v47 = vmul.f32 %v660_v40, %v597_v45 }
 0x113   : > { %v598_v48 = vadd.f32 -0.28449672, %v389_v46  ;;  %v388_v49 = vadd.f32 1.4214138, %v386_v47 }
 0x115   : > { %v393_v50 = vmul.f32 %v658_v35, %v598_v48  ;;  %v390_v51 = vmul.f32 %v660_v40, %v388_v49 }
 0x117   : > { %v395_v52 = vadd.f32 0.2548296, %v393_v50  ;;  %v599_v53 = vadd.f32 -0.28449672, %v390_v51 }
 0x119   : > { %v397_v54 = vmul.f32 %v658_v35, %v395_v52  ;;  %v394_v55 = vmul.f32 %v660_v40, %v599_v53 }
 0x11b   : > { %v407_v57 = vmul.f32 %v662_v56, %v397_v54  ;;  %v396_v58 = vadd.f32 0.2548296, %v394_v55 }
 0x11d   : > { %v409_v59 = vsub.f32 1.0, %v407_v57  ;;  %v398_v60 = vmul.f32 %v660_v40, %v396_v58 }
 0x11f   : > { %v413_v62 = vsub.f32 0.0, %v409_v59  ;;  %v408_v63 = vmul.f32 %v664_v61, %v398_v60 }
 0x121   : > { %v415_v0 = vsel %vm411_vm2, %v413_v62, %v409_v59  ;;  %v410_v1 = vsub.f32 1.0, %v408_v63 }
 0x122   : > { %v417_v3 = vadd.f32 1.0, %v415_v0 }
 0x123   : > { %v414_v2 = vsub.f32 0.0, %v410_v1 }
 0x124   : > { %v419_v8 = vmul.f32 %v417_v3, %v367_v5 }
 0x125   : > { %v416_v4 = vsel %vm412_vm3, %v414_v2, %v410_v1 }
 0x126   : > { %v418_v7 = vadd.f32 1.0, %v416_v4 }
 0x128   : > { %v420_v9 = vmul.f32 %v418_v7, %v368_v6 }
 0x12a   : > { %v421_v10 = vpack.c.bf16 %v420_v9, %v419_v8 }
 0x12c   : > { %627 = vmatmul.mubr.msk.bf16.vlgmr.msra.gmra.mxu1 %vm461_vm4, %v421_v10 }
 0x1ec   : > { %v499_v12 = vpop.f32.mrf.mxu1 }
 0x1ed   : > { %v500_v13 = vadd.f32 %v600_v11, %v499_v12 }
 0x1ee   : > { %v628_v14 = vpop.f32.mrf.mxu1 }
 0x1ef   : > { %v611_v15 = vpack.c.bf16 %v500_v13, %v500_v13 }
 0x1f0   : > { %v502_v16 = vpop.f32.mrf.mxu1 }
 0x1f1   : > { %515 = vst.msk [vmem:[%s229_s10] sm:$0xf] %vm514_vm5, %v611_v15  ;;  %v503_v17 = vadd.f32 %v600_v11, %v502_v16 }
 0x1f2   : > { %v629_v18 = vpop.f32.mrf.mxu1 }
 0x1f3   : > { %v612_v19 = vpack.c.bf16 %v503_v17, %v503_v17 }
 0x1f5   : > { %516 = vst.msk [vmem:[%s229_s10 + $0x4] sm:$0xf] %vm514_vm5, %v612_v19 }
 0x1f6 PF: > { %s15_s18 = sadd.s32 1, %s671_s18  }
 0x1f7   : > { %p12_p4 = scmp.ge.s32.totalorder %s15_s18, 4  }
 0x1f9   :  { %14 = sbr.rel (!%p12_p4) target bundleno = 1 (0x1), region = 70 }

// kernel: backbone_forward.18
= control target key start
LH: loop header
LB: loop body
LE: loop exit
PB: predicated region body
PF: predicated region fallthrough
CT: control target
= control target key end

     0   :  { %s542_s12 = smov 0   ;;  %s610_s0 = inlined_call_operand.vmem [shape: bf16[32,24], index: 0, kind: input, shape index: {}]   ;;  %s611_s1 = inlined_call_operand.vmem [shape: bf16[24,192], index: 1, kind: input, shape index: {}]   ;;  %s612_s2 = inlined_call_operand.vmem [shape: f32[1,192], index: 2, kind: input, shape index: {}]   ;;  %s613_s3 = inlined_call_operand.vmem [shape: bf16[32,192], index: 3, kind: output, shape index: {}]  }
   0x1 LB: > { %s450_s13 = sadd.s32 4294967295, %s519_s12   ;;  %p454_p0 = scmp.ge.s32.totalorder %s519_s12, 1  ;;  %s519_s12 = sphi %s542_s12, %s13_s12  }
   0x2   : > { %p138_p1 = scmp.lt.s32.totalorder %s519_s12, 3 }
   0x4   : > { %p139_p2 = pnand %p454_p0, %p138_p1 }
   0x5   : > { %s455_s18 = sshll.u32 (!%p139_p2), %s450_s13, 1 }
   0x6   : > { %142 = sbr.rel (%p139_p2) target bundleno = 278 (0x116), region = 32  ;;  %p164_p3 = scmp.lt.s32.totalorder (!%p139_p2), %s455_s18, 3 }
   0xb   : > { %v181_v0 = vld [vmem:[%s611_s1 + $0x10] sm:$0xff]  ;;  %vm218_vm0 = vcmask 1043456   ;;  %v493_v3 = vld [vmem:[%s611_s1 + $0x4] ss:$8 sps:$4 sm:$0xff]   ;;  %v521_v4 = vmov 0   ;;  %s615_s18 = smov (!%p164_p3, %s455_s18), 3  ;;  %v184_v8 = vlaneseq }
   0xc   : > { %v464_v1 = vcombine.high %v181_v0, %v181_v0  ;;  %v463_v2 = vcombine.low %v181_v0, %v181_v0  ;;  %257 = vmatprep.mubr.bf16.mxu0 %v521_v4  ;;  %v495_v6 = vld [vmem:[%s611_s1] ss:$8 sps:$4 sm:$0xff]   ;;  %s456_s21 = sshll.u32 %s615_s18, 2  ;;  %vm214_vm1 = vcmask 195584   ;;  %vm388_vm4 = vcmask 523268   ;;  %s479_s27 = sshll.u32 %s615_s18, 3 }
   0xd   : > { %s167_s24 = scalar_lea.vmem %s610_s0, %s456_s21  ;;  %v185_v9 = vshrl.u32 %v184_v8, 7  ;;  %v182_v11 = vld [vmem:[%s612_s2] sm:$0x3]  ;;  %vm389_vm6 = vmor %vm388_vm4, %vm218_vm0  ;;  %s174_s30 = scalar_lea.vmem %s613_s3, %s479_s27 }
   0xe   : > { %465 = vmatprep.subr.msk.bf16.mxu0 %vm218_vm0, %v464_v1  ;;  %v220_v5 = vsel %vm218_vm0, %v463_v2, 0  ;;  %v496_v7 = vld [vmem:[%s167_s24] sm:$0xff]  }
   0xf   : > { %238 = vmatpush1.bf16.msra.mxu0 %v220_v5  ;;  %v186_v10 = vsub.s32 0, %v185_v9  ;;  %v190_v12 = vsub.s32 1, %v185_v9 }
  0x10   : > { %239 = vmatprep.subr.bf16.mxu0 %v493_v3 }
  0x11   : > { %v187_v13 = vrot.slane %v182_v11, %v186_v10  ;;  %v191_v14 = vrot.slane %v182_v11, %v190_v12 }
  0x13   : > { %240 = vmatpush1.bf16.msra.mxu0 %v495_v6 }
  0x16   : > { %466 = vmatmul.mubr.msk.bf16.vlgmr.msra.gmra.mxu0 %vm214_vm1, %v496_v7 }
  0xd6   : > { %v259_v15 = vpop.f32.mrf.mxu0 }
  0xd7   : > { %v570_v16 = vadd.f32 %v259_v15, %v187_v13 }
  0xd8   : > { %v261_v17 = vpop.f32.mrf.mxu0 }
  0xd9   : > { %v573_v18 = vmul.f32 0.70710677, %v570_v16  ;;  %v575_v19 = vadd.f32 %v261_v17, %v191_v14 }
  0xda   : > { %v263_v20 = vpop.f32.mrf.mxu0 }
  0xdb   : > { %v276_v21 = vand.u32 2147483647, %v573_v18  ;;  %v579_v22 = vmul.f32 0.70710677, %v575_v19  ;;  %v581_v23 = vadd.f32 %v263_v20, %v187_v13  ;;  %vm356_vm2 = vcmp.lt.f32.partialorder %v573_v18, 0.0 }
  0xdc   : > { %v265_v24 = vpop.f32.mrf.mxu0 }
  0xdd   : > { %v280_v25 = vmul.f32 0.3275911, %v276_v21  ;;  %v277_v26 = vand.u32 2147483647, %v579_v22  ;;  %v585_v27 = vmul.f32 0.70710677, %v581_v23  ;;  %v587_v28 = vadd.f32 %v265_v24, %v191_v14 }
  0xde   : > { %v332_v39 = vsub.f32 0.0, %v276_v21  ;;  %vm357_vm3 = vcmp.lt.f32.partialorder %v579_v22, 0.0 }
  0xdf   : > { %v284_v29 = vadd.f32 1.0, %v280_v25  ;;  %v281_v30 = vmul.f32 0.3275911, %v277_v26  ;;  %v278_v31 = vand.u32 2147483647, %v585_v27  ;;  %v333_v40 = vsub.f32 0.0, %v277_v26 }
  0xe0   : > { %v591_v32 = vmul.f32 0.70710677, %v587_v28  ;;  %v336_v41 = vmul.f32 %v332_v39, %v276_v21  ;;  %vm358_vm5 = vcmp.lt.f32.partialorder %v585_v27, 0.0  ;;  %v271_v27 = vmul.f32 0.5, %v587_v28 }
  0xe1   : > { %497 = vrcp.f32 %v284_v29  ;;  %v285_v33 = vadd.f32 1.0, %v281_v30  ;;  %v282_v34 = vmul.f32 0.3275911, %v278_v31  ;;  %v334_v42 = vsub.f32 0.0, %v278_v31 }
  0xe2   : > { %v279_v35 = vand.u32 2147483647, %v591_v32  ;;  %v337_v44 = vmul.f32 %v333_v40, %v277_v26  ;;  %v340_v46 = vmul.f32 1.442695, %v336_v41  ;;  %vm359_vm7 = vcmp.lt.f32.partialorder %v591_v32, 0.0 }
  0xe3   : > { %499 = vrcp.f32 %v285_v33  ;;  %v286_v36 = vadd.f32 1.0, %v282_v34  ;;  %v338_v48 = vmul.f32 %v334_v42, %v278_v31 }
  0xe4   : > { %v283_v37 = vmul.f32 0.3275911, %v279_v35  ;;  %v335_v47 = vsub.f32 0.0, %v279_v35  ;;  %v342_v52 = vmul.f32 1.442695, %v337_v44 }
  0xe5   : > { %501 = vrcp.f32 %v286_v36  ;;  %v344_v58 = vmul.f32 1.442695, %v338_v48 }
  0xe6   : > { %v287_v38 = vadd.f32 1.0, %v283_v37  ;;  %v339_v55 = vmul.f32 %v335_v47, %v279_v35 }
  0xe8   : > { %503 = vrcp.f32 %v287_v38  ;;  %v346_v1 = vmul.f32 1.442695, %v339_v55 }
  0xe9   : > { %505 = vpow2.f32 %v340_v46 }
  0xea   : > { %507 = vpow2.f32 %v342_v52 }
  0xeb   : > { %509 = vpow2.f32 %v344_v58 }
  0xec   : > { %511 = vpow2.f32 %v346_v1 }
  0xee   : > { %v498_v43 = vpop.eup %497 }
  0xef   : > { %v296_v45 = vmul.f32 1.0614054, %v498_v43 }
  0xf0   : > { %v500_v49 = vpop.eup %499 }
  0xf1   : > { %v467_v50 = vadd.f32 -1.4531521, %v296_v45  ;;  %v297_v51 = vmul.f32 1.0614054, %v500_v49 }
  0xf2   : > { %v502_v53 = vpop.eup %501 }
  0xf3   : > { %v304_v54 = vmul.f32 %v498_v43, %v467_v50  ;;  %v468_v56 = vadd.f32 -1.4531521, %v297_v51  ;;  %v298_v57 = vmul.f32 1.0614054, %v502_v53  ;;  %v268_v50 = vmul.f32 0.5, %v570_v16 }
  0xf5   : > { %v308_v59 = vadd.f32 1.4214138, %v304_v54  ;;  %v504_v60 = vpop.eup %503  ;;  %v305_v61 = vmul.f32 %v500_v49, %v468_v56  ;;  %v469_v62 = vadd.f32 -1.4531521, %v298_v57 }
  0xf6   : > { %v299_v0 = vmul.f32 1.0614054, %v504_v60  ;;  %v506_v21 = vpop.eup %505 }
  0xf7   : > { %v312_v63 = vmul.f32 %v498_v43, %v308_v59  ;;  %v309_v2 = vadd.f32 1.4214138, %v305_v61  ;;  %v306_v3 = vmul.f32 %v502_v53, %v469_v62  ;;  %v508_v33 = vpop.eup %507 }
  0xf8   : > { %v470_v5 = vadd.f32 -1.4531521, %v299_v0  ;;  %v510_v38 = vpop.eup %509 }
  0xf9   : > { %v471_v4 = vadd.f32 -0.28449672, %v312_v63  ;;  %v313_v6 = vmul.f32 %v500_v49, %v309_v2  ;;  %v310_v7 = vadd.f32 1.4214138, %v306_v3  ;;  %v512_v45 = vpop.eup %511 }
  0xfa   : > { %v307_v9 = vmul.f32 %v504_v60, %v470_v5 }
  0xfb   : > { %v320_v8 = vmul.f32 %v498_v43, %v471_v4  ;;  %v472_v10 = vadd.f32 -0.28449672, %v313_v6  ;;  %v314_v11 = vmul.f32 %v502_v53, %v310_v7 }
  0xfc   : > { %v311_v13 = vadd.f32 1.4214138, %v307_v9 }
  0xfd   : > { %v324_v12 = vadd.f32 0.2548296, %v320_v8  ;;  %v321_v14 = vmul.f32 %v500_v49, %v472_v10  ;;  %v473_v15 = vadd.f32 -0.28449672, %v314_v11 }
  0xfe   : > { %v315_v20 = vmul.f32 %v504_v60, %v311_v13 }
  0xff   : > { %v328_v17 = vmul.f32 %v498_v43, %v324_v12  ;;  %v325_v24 = vadd.f32 0.2548296, %v321_v14  ;;  %v322_v25 = vmul.f32 %v502_v53, %v473_v15 }
 0x100   : > { %v474_v29 = vadd.f32 -0.28449672, %v315_v20 }
 0x101   : > { %v348_v26 = vmul.f32 %v506_v21, %v328_v17  ;;  %v329_v30 = vmul.f32 %v500_v49, %v325_v24  ;;  %v326_v31 = vadd.f32 0.2548296, %v322_v25 }
 0x102   : > { %v323_v35 = vmul.f32 %v504_v60, %v474_v29 }
 0x103   : > { %v352_v34 = vsub.f32 1.0, %v348_v26  ;;  %v349_v36 = vmul.f32 %v508_v33, %v329_v30  ;;  %v330_v37 = vmul.f32 %v502_v53, %v326_v31  ;;  %v269_v53 = vmul.f32 0.5, %v575_v19 }
 0x104   : > { %v327_v40 = vadd.f32 0.2548296, %v323_v35  ;;  %v270_v19 = vmul.f32 0.5, %v581_v23 }
 0x105   : > { %v360_v39 = vsub.f32 0.0, %v352_v34  ;;  %v353_v41 = vsub.f32 1.0, %v349_v36  ;;  %v350_v42 = vmul.f32 %v510_v38, %v330_v37 }
 0x106   : > { %v331_v44 = vmul.f32 %v504_v60, %v327_v40 }
 0x107   : > { %v364_v43 = vsel %vm356_vm2, %v360_v39, %v352_v34  ;;  %v361_v46 = vsub.f32 0.0, %v353_v41  ;;  %v354_v47 = vsub.f32 1.0, %v350_v42 }
 0x108   : > { %v368_v48 = vadd.f32 1.0, %v364_v43  ;;  %v351_v49 = vmul.f32 %v512_v45, %v331_v44 }
 0x109   : > { %v365_v51 = vsel %vm357_vm3, %v361_v46, %v353_v41  ;;  %v362_v52 = vsub.f32 0.0, %v354_v47 }
 0x10a   : > { %v369_v18 = vadd.f32 1.0, %v365_v51  ;;  %v355_v54 = vsub.f32 1.0, %v351_v49  ;;  %v372_v56 = vmul.f32 %v368_v48, %v268_v50 }
 0x10b   : > { %v366_v55 = vsel %vm358_vm5, %v362_v52, %v354_v47 }
 0x10c   : > { %v373_v57 = vmul.f32 %v369_v18, %v269_v53  ;;  %v363_v58 = vsub.f32 0.0, %v355_v54  ;;  %v370_v16 = vadd.f32 1.0, %v366_v55 }
 0x10e   : > { %v480_v22 = vpack.c.bf16 %v373_v57, %v372_v56  ;;  %v367_v59 = vsel %vm359_vm7, %v363_v58, %v355_v54  ;;  %v374_v61 = vmul.f32 %v370_v16, %v270_v19 }
 0x10f   : > { %v371_v60 = vadd.f32 1.0, %v367_v59 }
 0x110   : > { %390 = vst.msk [vmem:[%s174_s30] sm:$0xff] %vm389_vm6, %v480_v22 }
 0x111   : > { %v375_v62 = vmul.f32 %v371_v60, %v271_v27 }
 0x113   : > { %v481_v63 = vpack.c.bf16 %v375_v62, %v374_v61 }
 0x115   : > { %391 = vst.msk [vmem:[%s174_s30 + $0x8] sm:$0xff] %vm389_vm6, %v481_v63 }
 0x116 PF: > { %s13_s12 = sadd.s32 1, %s519_s12  }
 0x117   : > { %p10_p4 = scmp.ge.s32.totalorder %s13_s12, 4  }
 0x119   :  { %12 = sbr.rel (!%p10_p4) target bundleno = 1 (0x1), region = 62 }

// kernel: backbone_forward.17
= control target key start
LH: loop header
LB: loop body
LE: loop exit
PB: predicated region body
PF: predicated region fallthrough
CT: control target
= control target key end

     0   :  { %s821_s21 = smov 0   ;;  %s906_s0 = inlined_call_operand.vmem [shape: bf16[32,216], index: 0, kind: input, shape index: {}]   ;;  %s907_s1 = inlined_call_operand.vmem [shape: bf16[216,48], index: 1, kind: input, shape index: {}]   ;;  %s908_s2 = inlined_call_operand.vmem [shape: f32[1,48], index: 2, kind: input, shape index: {}]   ;;  %s909_s3 = inlined_call_operand.vmem [shape: bf16[48,24], index: 3, kind: input, shape index: {}]   ;;  %s910_s4 = inlined_call_operand.vmem [shape: f32[1,24], index: 4, kind: input, shape index: {}]   ;;  %s911_s5 = inlined_call_operand.vmem [shape: bf16[32,24], index: 5, kind: input, shape index: {}]   ;;  %s912_s6 = inlined_call_operand.vmem [shape: bf16[32,24], index: 6, kind: output, shape index: {}]  }
   0x1 LB: > { %s672_s22 = sadd.s32 4294967295, %s781_s21   ;;  %p676_p0 = scmp.ge.s32.totalorder %s781_s21, 1  ;;  %s781_s21 = sphi %s821_s21, %s16_s21  }
   0x2   : > { %p225_p1 = scmp.lt.s32.totalorder %s781_s21, 3 }
   0x4   : > { %p226_p2 = pnand %p676_p0, %p225_p1 }
   0x5   : > { %s677_s27 = sshll.u32 (!%p226_p2), %s672_s22, 1 }
   0x6   : > { %229 = sbr.rel (%p226_p2) target bundleno = 524 (0x20c), region = 44  ;;  %p262_p3 = scmp.lt.s32.totalorder (!%p226_p2), %s677_s27, 3 }
   0xb   : > { %v747_v0 = vld [vmem:[%s907_s1 + $0x38] sm:$0xff]   ;;  %v783_v1 = vmov 0   ;;  %v748_v2 = vld [vmem:[%s907_s1 + $0x30] sm:$0xff]   ;;  %s914_s27 = smov (!%p262_p3, %s677_s27), 3  ;;  %v749_v3 = vld [vmem:[%s907_s1 + $0x28] sm:$0xff]   ;;  %vm407_vm0 = vcmask 719872  }
   0xc   : > { %415 = vmatprep.subr.bf16.mxu0 %v783_v1  ;;  %s715_s30 = sshll.u32 %s914_s27, 3  ;;  %v750_v4 = vld [vmem:[%s907_s1 + $0x20] sm:$0xff]   ;;  %v751_v5 = vld [vmem:[%s907_s1 + $0x18] sm:$0xff]   ;;  %v752_v7 = vld [vmem:[%s907_s1 + $0x10] sm:$0xff]   ;;  %vm411_vm1 = vcmask 1043456   ;;  %v784_v19 = vmov 0.0  }
   0xd   : > { %416 = vmatpush1.bf16.msra.mxu0 %v747_v0  ;;  %s847_s11 = scalar_lea.vmem %s906_s0, %s715_s30  ;;  %v753_v8 = vld [vmem:[%s907_s1 + $0x8] sm:$0xff]   ;;  %v754_v9 = vld [vmem:[%s907_s1] sm:$0xff]   ;;  %v757_v13 = vld [vmem:[%s907_s1 + $0x58] sm:$0xff]   ;;  %726 = vmatprep.subr.bf16.mxu1 %v784_v19  ;;  %vm785_vm2 = vmmov 0   ;;  %vm542_vm5 = vcmask 392192   ;;  %s681_s18 = sshll.u32 %s914_s27, 2 }
   0xe   : > { %417 = vmatprep.subr.bf16.mxu0 %v783_v1  ;;  %v763_v6 = vld [vmem:[%s847_s11 + $0x4] ss:$8 sps:$4 sm:$0xff]   ;;  %v755_v10 = vld [vmem:[%s907_s1 + $0x68] ss:$0 sps:$4 sm:$0xff]   ;;  %v758_v14 = vld [vmem:[%s907_s1 + $0x50] sm:$0xff]   ;;  %732 = vmatprep.mubr.msk.bf16.mxu1 %vm785_vm2, %v784_v19  ;;  %s272_s22 = scalar_lea.vmem %s911_s5, %s681_s18  ;;  %s278_s28 = scalar_lea.vmem %s912_s6, %s681_s18  ;;  %vm601_vm6 = vcmask 191488  }
   0xf   : > { %701 = vmatprep.mubr.msk.bf16.mxu0 %vm407_vm0, %v763_v6  ;;  %v413_v11 = vsel %vm411_vm1, %v755_v10, 0  ;;  %v756_v12 = vld [vmem:[%s907_s1 + $0x60] sm:$0xff]   ;;  %v759_v15 = vld [vmem:[%s907_s1 + $0x48] sm:$0xff]   ;;  %v764_v18 = vld [vmem:[%s909_s3 + $0x10] sm:$0xff]  }
  0x10   : > { %v760_v16 = vld [vmem:[%s907_s1 + $0x40] sm:$0xff]   ;;  %727 = vmatpush3.bf16.msra.mxu1 %v764_v18  ;;  %v765_v20 = vld [vmem:[%s909_s3 + $0x8] sm:$0xff]  }
  0x11   : > { %418 = vmatpush1.bf16.msra.mxu0 %v748_v2  ;;  %v761_v17 = vld [vmem:[%s847_s11] ss:$8 sps:$4 sm:$0xff]   ;;  %728 = vmatprep.subr.bf16.mxu1 %v784_v19 }
  0x12   : > { %419 = vmatprep.subr.bf16.mxu0 %v783_v1  ;;  %v766_v21 = vld [vmem:[%s909_s3] sm:$0xff]  }
  0x13   : > { %v684_v22 = vld [vmem:[%s908_s2] ss:$0 sm:$0xff] }
  0x14   : > { %729 = vmatpush3.bf16.msra.mxu1 %v765_v20 }
  0x15   : > { %420 = vmatpush1.bf16.msra.mxu0 %v749_v3  ;;  %730 = vmatprep.subr.bf16.mxu1 %v784_v19 }
  0x16   : > { %421 = vmatprep.subr.bf16.mxu0 %v783_v1 }
  0x18   : > { %731 = vmatpush3.bf16.msra.mxu1 %v766_v21 }
  0x19   : > { %422 = vmatpush1.bf16.msra.mxu0 %v750_v4 }
  0x1a   : > { %423 = vmatprep.subr.bf16.mxu0 %v783_v1 }
  0x1d   : > { %424 = vmatpush1.bf16.msra.mxu0 %v751_v5 }
  0x1e   : > { %425 = vmatprep.subr.bf16.mxu0 %v783_v1 }
  0x21   : > { %426 = vmatpush1.bf16.msra.mxu0 %v752_v7 }
  0x22   : > { %427 = vmatprep.subr.bf16.mxu0 %v783_v1 }
  0x25   : > { %428 = vmatpush1.bf16.msra.mxu0 %v753_v8 }
  0x26   : > { %429 = vmatprep.subr.bf16.mxu0 %v783_v1 }
  0x29   : > { %430 = vmatpush1.bf16.msra.mxu0 %v754_v9 }
  0x2a   : > { %435 = vmatprep.subr.bf16.mxu0 %v783_v1 }
  0x2d   : > { %436 = vmatpush2.bf16.msra.mxu0 %v413_v11 }
  0x2e   : > { %437 = vmatprep.subr.bf16.mxu0 %v783_v1 }
  0x31   : > { %438 = vmatpush2.bf16.msra.mxu0 %v756_v12 }
  0x32   : > { %439 = vmatprep.subr.bf16.mxu0 %v783_v1 }
  0x35   : > { %440 = vmatpush2.bf16.msra.mxu0 %v757_v13 }
  0x36   : > { %441 = vmatprep.subr.bf16.mxu0 %v783_v1 }
  0x39   : > { %442 = vmatpush2.bf16.msra.mxu0 %v758_v14 }
  0x3a   : > { %443 = vmatprep.subr.bf16.mxu0 %v783_v1 }
  0x3d   : > { %444 = vmatpush2.bf16.msra.mxu0 %v759_v15 }
  0x3e   : > { %445 = vmatprep.subr.bf16.mxu0 %v783_v1 }
  0x41   : > { %446 = vmatpush2.bf16.msra.mxu0 %v760_v16  ;;  %v719_v16 = vld [vmem:[%s272_s22] sm:$0xff]  }
  0x42   : > { %v720_v18 = vunpack.c.l.bf16 %v719_v16 }
  0x44   : > { %448 = vmatmul.mubr.bf16.vlgmr.msra.gmra.mxu0 %v761_v17  ;;  %v706_v17 = vld [vmem:[%s910_s4] ss:$0 sm:$0xff] }
 0x104   : > { %v449_v23 = vpop.f32.mrf.mxu0 }
 0x105   : > { %v450_v24 = vadd.f32 %v684_v22, %v449_v23  ;;  %v721_v23 = vunpack.c.h.bf16 %v719_v16 }
 0x106   : > { %v451_v25 = vpop.f32.mrf.mxu0 }
 0x107   : > { %v458_v26 = vmul.f32 0.70710677, %v450_v24  ;;  %v456_v10 = vmul.f32 0.5, %v450_v24 }
 0x108   : > { %v452_v27 = vpop.f32.mrf.mxu0 }
 0x109   : > { %v460_v28 = vand.u32 2147483647, %v458_v26  ;;  %v453_v29 = vadd.f32 %v684_v22, %v452_v27  ;;  %vm500_vm3 = vcmp.lt.f32.partialorder %v458_v26, 0.0 }
 0x10a   : > { %v454_v30 = vpop.f32.mrf.mxu0 }
 0x10b   : > { %v462_v31 = vmul.f32 0.3275911, %v460_v28  ;;  %v459_v32 = vmul.f32 0.70710677, %v453_v29  ;;  %v488_v37 = vsub.f32 0.0, %v460_v28  ;;  %v457_v11 = vmul.f32 0.5, %v453_v29 }
 0x10d   : > { %v464_v33 = vadd.f32 1.0, %v462_v31  ;;  %v461_v34 = vand.u32 2147483647, %v459_v32  ;;  %v490_v38 = vmul.f32 %v488_v37, %v460_v28  ;;  %vm501_vm4 = vcmp.lt.f32.partialorder %v459_v32, 0.0 }
 0x10f   : > { %767 = vrcp.f32 %v464_v33  ;;  %v463_v35 = vmul.f32 0.3275911, %v461_v34  ;;  %v489_v39 = vsub.f32 0.0, %v461_v34  ;;  %v492_v42 = vmul.f32 1.442695, %v490_v38 }
 0x111   : > { %v465_v36 = vadd.f32 1.0, %v463_v35  ;;  %v491_v43 = vmul.f32 %v489_v39, %v461_v34 }
 0x113   : > { %769 = vrcp.f32 %v465_v36  ;;  %v494_v48 = vmul.f32 1.442695, %v491_v43 }
 0x114   : > { %771 = vpow2.f32 %v492_v42 }
 0x115   : > { %773 = vpow2.f32 %v494_v48 }
 0x11c   : > { %v768_v40 = vpop.eup %767 }
 0x11d   : > { %v470_v41 = vmul.f32 1.0614054, %v768_v40 }
 0x11f   : > { %v702_v44 = vadd.f32 -1.4531521, %v470_v41 }
 0x120   : > { %v770_v45 = vpop.eup %769 }
 0x121   : > { %v474_v46 = vmul.f32 %v768_v40, %v702_v44  ;;  %v471_v47 = vmul.f32 1.0614054, %v770_v45  ;;  %v772_v61 = vpop.eup %771 }
 0x122   : > { %v774_v2 = vpop.eup %773 }
 0x123   : > { %v476_v49 = vadd.f32 1.4214138, %v474_v46  ;;  %v703_v50 = vadd.f32 -1.4531521, %v471_v47 }
 0x125   : > { %v478_v51 = vmul.f32 %v768_v40, %v476_v49  ;;  %v475_v52 = vmul.f32 %v770_v45, %v703_v50 }
 0x127   : > { %v704_v53 = vadd.f32 -0.28449672, %v478_v51  ;;  %v477_v54 = vadd.f32 1.4214138, %v475_v52 }
 0x129   : > { %v482_v55 = vmul.f32 %v768_v40, %v704_v53  ;;  %v479_v56 = vmul.f32 %v770_v45, %v477_v54 }
 0x12b   : > { %v484_v57 = vadd.f32 0.2548296, %v482_v55  ;;  %v705_v58 = vadd.f32 -0.28449672, %v479_v56 }
 0x12d   : > { %v486_v59 = vmul.f32 %v768_v40, %v484_v57  ;;  %v483_v60 = vmul.f32 %v770_v45, %v705_v58 }
 0x12f   : > { %v496_v62 = vmul.f32 %v772_v61, %v486_v59  ;;  %v485_v63 = vadd.f32 0.2548296, %v483_v60 }
 0x131   : > { %v498_v0 = vsub.f32 1.0, %v496_v62  ;;  %v487_v1 = vmul.f32 %v770_v45, %v485_v63 }
 0x133   : > { %v502_v3 = vsub.f32 0.0, %v498_v0  ;;  %v497_v4 = vmul.f32 %v774_v2, %v487_v1 }
 0x135   : > { %v504_v5 = vsel %vm500_vm3, %v502_v3, %v498_v0  ;;  %v499_v6 = vsub.f32 1.0, %v497_v4 }
 0x136   : > { %v506_v8 = vadd.f32 1.0, %v504_v5 }
 0x137   : > { %v503_v7 = vsub.f32 0.0, %v499_v6 }
 0x138   : > { %v508_v13 = vmul.f32 %v506_v8, %v456_v10 }
 0x139   : > { %v505_v9 = vsel %vm501_vm4, %v503_v7, %v499_v6 }
 0x13a   : > { %v507_v12 = vadd.f32 1.0, %v505_v9 }
 0x13c   : > { %v509_v14 = vmul.f32 %v507_v12, %v457_v11 }
 0x13e   : > { %v510_v15 = vpack.c.bf16 %v509_v14, %v508_v13 }
 0x140   : > { %733 = vmatmul.mubr.msk.bf16.vlgmr.msra.gmra.mxu1 %vm542_vm5, %v510_v15 }
 0x200   : > { %v580_v19 = vpop.f32.mrf.mxu1 }
 0x201   : > { %v581_v20 = vadd.f32 %v706_v17, %v580_v19 }
 0x202   : > { %v734_v21 = vpop.f32.mrf.mxu1 }
 0x203   : > { %v591_v22 = vadd.f32 %v720_v18, %v581_v20 }
 0x204   : > { %v583_v24 = vpop.f32.mrf.mxu1 }
 0x205   : > { %v716_v25 = vpack.c.bf16 %v591_v22, %v591_v22  ;;  %v584_v26 = vadd.f32 %v706_v17, %v583_v24 }
 0x206   : > { %v735_v27 = vpop.f32.mrf.mxu1 }
 0x207   : > { %602 = vst.msk [vmem:[%s278_s28] sm:$0xf] %vm601_vm6, %v716_v25  ;;  %v592_v28 = vadd.f32 %v721_v23, %v584_v26 }
 0x209   : > { %v717_v29 = vpack.c.bf16 %v592_v28, %v592_v28 }
 0x20b   : > { %603 = vst.msk [vmem:[%s278_s28 + $0x4] sm:$0xf] %vm601_vm6, %v717_v29 }
 0x20c PF: > { %s16_s21 = sadd.s32 1, %s781_s21  }
 0x20d   : > { %p13_p4 = scmp.ge.s32.totalorder %s16_s21, 4  }
 0x20f   :  { %15 = sbr.rel (!%p13_p4) target bundleno = 1 (0x1), region = 77 }

// kernel: backbone_forward.20
= control target key start
LH: loop header
LB: loop body
LE: loop exit
PB: predicated region body
PF: predicated region fallthrough
CT: control target
= control target key end

     0   :  { %v200_v0 = vmov 0.0   ;;  %vm201_vm0 = vmmov 0   ;;  %vm45_vm1 = vcmask 261120   ;;  %s237_s1 = inlined_call_operand.vmem [shape: bf16[32,128], index: 1, kind: input, shape index: {}]   ;;  %s238_s0 = inlined_call_operand.vmem [shape: bf16[16,32], index: 0, kind: input, shape index: {}]   ;;  %s239_s2 = inlined_call_operand.vmem [shape: f32[1,128], index: 2, kind: input, shape index: {}]   ;;  %s240_s3 = inlined_call_operand.vmem [shape: bf16[16,128], index: 3, kind: output, shape index: {}]  }
   0x1   :  { %179 = vmatprep.subr.bf16.mxu0 %v200_v0  ;;  %v189_v1 = vld [vmem:[%s237_s1 + $0x8] sm:$0xff]   ;;  %183 = vmatprep.mubr.msk.bf16.mxu0 %vm201_vm0, %v200_v0  ;;  %v190_v2 = vld [vmem:[%s237_s1] sm:$0xff]  }
   0x2   :  { %180 = vmatpush3.bf16.msra.mxu0 %v189_v1  ;;  %v191_v3 = vld [vmem:[%s238_s0] sm:$0xff]  }
   0x3   :  { %181 = vmatprep.subr.bf16.mxu0 %v200_v0  ;;  %v158_v4 = vld [vmem:[%s239_s2] ss:$0 sm:$0xff] }
   0x6   :  { %182 = vmatpush3.bf16.msra.mxu0 %v190_v2 }
   0x9   :  { %184 = vmatmul.mubr.msk.bf16.vlgmr.msra.gmra.mxu0 %vm45_vm1, %v191_v3 }
  0xc9   :  { %v83_v5 = vpop.f32.mrf.mxu0 }
  0xca   :  { %v84_v6 = vadd.f32 %v158_v4, %v83_v5 }
  0xcb   :  { %v185_v7 = vpop.f32.mrf.mxu0 }
  0xcc   :  { %v92_v8 = vmul.f32 0.70710677, %v84_v6  ;;  %v90_v56 = vmul.f32 0.5, %v84_v6 }
  0xcd   :  { %v86_v9 = vpop.f32.mrf.mxu0 }
  0xce   :  { %v94_v10 = vand.u32 2147483647, %v92_v8  ;;  %v87_v11 = vadd.f32 %v158_v4, %v86_v9  ;;  %vm134_vm2 = vcmp.lt.f32.partialorder %v92_v8, 0.0 }
  0xcf   :  { %v186_v12 = vpop.f32.mrf.mxu0 }
  0xd0   :  { %v96_v13 = vmul.f32 0.3275911, %v94_v10  ;;  %v93_v14 = vmul.f32 0.70710677, %v87_v11  ;;  %v122_v19 = vsub.f32 0.0, %v94_v10  ;;  %v91_v57 = vmul.f32 0.5, %v87_v11 }
  0xd2   :  { %v98_v15 = vadd.f32 1.0, %v96_v13  ;;  %v95_v16 = vand.u32 2147483647, %v93_v14  ;;  %v124_v20 = vmul.f32 %v122_v19, %v94_v10  ;;  %vm135_vm3 = vcmp.lt.f32.partialorder %v93_v14, 0.0 }
  0xd4   :  { %192 = vrcp.f32 %v98_v15  ;;  %v97_v17 = vmul.f32 0.3275911, %v95_v16  ;;  %v123_v21 = vsub.f32 0.0, %v95_v16  ;;  %v126_v24 = vmul.f32 1.442695, %v124_v20 }
  0xd6   :  { %v99_v18 = vadd.f32 1.0, %v97_v17  ;;  %v125_v25 = vmul.f32 %v123_v21, %v95_v16 }
  0xd8   :  { %194 = vrcp.f32 %v99_v18  ;;  %v128_v30 = vmul.f32 1.442695, %v125_v25 }
  0xd9   :  { %196 = vpow2.f32 %v126_v24 }
  0xda   :  { %198 = vpow2.f32 %v128_v30 }
  0xe1   :  { %v193_v22 = vpop.eup %192 }
  0xe2   :  { %v104_v23 = vmul.f32 1.0614054, %v193_v22 }
  0xe4   :  { %v163_v26 = vadd.f32 -1.4531521, %v104_v23 }
  0xe5   :  { %v195_v27 = vpop.eup %194 }
  0xe6   :  { %v108_v28 = vmul.f32 %v193_v22, %v163_v26  ;;  %v105_v29 = vmul.f32 1.0614054, %v195_v27  ;;  %v197_v43 = vpop.eup %196 }
  0xe7   :  { %v199_v48 = vpop.eup %198 }
  0xe8   :  { %v110_v31 = vadd.f32 1.4214138, %v108_v28  ;;  %v164_v32 = vadd.f32 -1.4531521, %v105_v29 }
  0xea   :  { %v112_v33 = vmul.f32 %v193_v22, %v110_v31  ;;  %v109_v34 = vmul.f32 %v195_v27, %v164_v32 }
  0xec   :  { %v165_v35 = vadd.f32 -0.28449672, %v112_v33  ;;  %v111_v36 = vadd.f32 1.4214138, %v109_v34 }
  0xee   :  { %v116_v37 = vmul.f32 %v193_v22, %v165_v35  ;;  %v113_v38 = vmul.f32 %v195_v27, %v111_v36 }
  0xf0   :  { %v118_v39 = vadd.f32 0.2548296, %v116_v37  ;;  %v166_v40 = vadd.f32 -0.28449672, %v113_v38 }
  0xf2   :  { %v120_v41 = vmul.f32 %v193_v22, %v118_v39  ;;  %v117_v42 = vmul.f32 %v195_v27, %v166_v40 }
  0xf4   :  { %v130_v44 = vmul.f32 %v197_v43, %v120_v41  ;;  %v119_v45 = vadd.f32 0.2548296, %v117_v42 }
  0xf6   :  { %v132_v46 = vsub.f32 1.0, %v130_v44  ;;  %v121_v47 = vmul.f32 %v195_v27, %v119_v45 }
  0xf8   :  { %v136_v49 = vsub.f32 0.0, %v132_v46  ;;  %v131_v50 = vmul.f32 %v199_v48, %v121_v47 }
  0xfa   :  { %v138_v51 = vsel %vm134_vm2, %v136_v49, %v132_v46  ;;  %v133_v52 = vsub.f32 1.0, %v131_v50 }
  0xfb   :  { %v140_v54 = vadd.f32 1.0, %v138_v51 }
  0xfc   :  { %v137_v53 = vsub.f32 0.0, %v133_v52 }
  0xfd   :  { %v142_v59 = vmul.f32 %v140_v54, %v90_v56 }
  0xfe   :  { %v139_v55 = vsel %vm135_vm3, %v137_v53, %v133_v52 }
  0xff   :  { %v141_v58 = vadd.f32 1.0, %v139_v55 }
 0x101   :  { %v143_v60 = vmul.f32 %v141_v58, %v91_v57 }
 0x103   :  { %v174_v61 = vpack.c.bf16 %v143_v60, %v142_v59 }
 0x105   :  { %175 = vst [vmem:[%s240_s3] sm:$0xff] %v174_v61  }

// kernel: backbone_forward.19
= control target key start
LH: loop header
LB: loop body
LE: loop exit
PB: predicated region body
PF: predicated region fallthrough
CT: control target
= control target key end

     0   :  { %v716_v0 = vmov 0   ;;  %v30_v3 = vlaneseq  ;;  %vm577_vm2 = vcmask 523264   ;;  %vm630_vm5 = vcmask 257024   ;;  %s1129_s3 = inlined_call_operand.vmem [shape: bf16[192,32], index: 3, kind: input, shape index: {}]   ;;  %s1130_s0 = inlined_call_operand.vmem [shape: bf16[9,16,192], index: 0, kind: input, shape index: {}]   ;;  %s1131_s1 = inlined_call_operand.vmem [shape: bf16[9,1,192], index: 1, kind: input, shape index: {}]   ;;  %s1132_s2 = inlined_call_operand.vmem [shape: f32[1,192], index: 2, kind: input, shape index: {}]   ;;  %s1133_s4 = inlined_call_operand.vmem [shape: f32[1,32], index: 4, kind: input, shape index: {}]   ;;  %s1134_s5 = inlined_call_operand.vmem [shape: bf16[16,32], index: 5, kind: output, shape index: {}]  }
   0x1   :  { %581 = vmatprep.subr.bf16.mxu0 %v716_v0  ;;  %v688_v1 = vld [vmem:[%s1129_s3 + $0x38] sm:$0xff]   ;;  %v689_v2 = vld [vmem:[%s1129_s3 + $0x30] sm:$0xff]   ;;  %v690_v4 = vld [vmem:[%s1129_s3 + $0x28] sm:$0xff]  }
   0x2   :  { %582 = vmatpush1.bf16.msra.mxu0 %v688_v1  ;;  %v759_v5 = vshrl.u32 %v30_v3, 7  ;;  %v691_v6 = vld [vmem:[%s1129_s3 + $0x20] sm:$0xff]   ;;  %v692_v7 = vld [vmem:[%s1129_s3 + $0x18] sm:$0xff]   ;;  %v784_v11 = vld [vmem:[%s1130_s0 + $0x8] sm:$0xff] }
   0x3   :  { %583 = vmatprep.subr.bf16.mxu0 %v716_v0  ;;  %v771_v8 = vld [vmem:[%s1130_s0] sm:$0xff]  ;;  %v789_v12 = vld [vmem:[%s1130_s0 + $0x10] sm:$0xff]  ;;  %v803_v16 = vld [vmem:[%s1130_s0 + $0x18] sm:$0xff]  ;;  %v25_v25 = vunpack.c.l.bf16 %v784_v11  ;;  %v26_v26 = vunpack.c.h.bf16 %v784_v11 }
   0x4   :  { %v776_v9 = vld [vmem:[%s1131_s1] sm:$0x3]  ;;  %v779_v10 = vsub.s32 2, %v759_v5  ;;  %v794_v13 = vld [vmem:[%s1131_s1 + $0x2] sm:$0x3]  ;;  %v798_v15 = vsub.s32 0, %v759_v5  ;;  %v23_v19 = vunpack.c.l.bf16 %v771_v8  ;;  %v24_v20 = vunpack.c.h.bf16 %v771_v8 }
   0x5   :  { %v28_v14 = vunpack.c.l.bf16 %v776_v9  ;;  %v808_v17 = vld [vmem:[%s1130_s0 + $0x20] sm:$0xff]  ;;  %v61_v21 = vunpack.c.l.bf16 %v794_v13  ;;  %v822_v22 = vld [vmem:[%s1130_s0 + $0x28] sm:$0xff]  ;;  %v356_v24 = vsub.s32 1, %v759_v5  ;;  %v839_v29 = vld [vmem:[%s1130_s0 + $0x30] sm:$0xff]  ;;  %v56_v31 = vunpack.c.h.bf16 %v789_v12 }
   0x6   :  { %584 = vmatpush1.bf16.msra.mxu0 %v689_v2  ;;  %v813_v18 = vld [vmem:[%s1131_s1 + $0x4] sm:$0x3]  ;;  %v827_v23 = vld [vmem:[%s1131_s1 + $0x6] sm:$0x3]  ;;  %v844_v30 = vld [vmem:[%s1130_s0 + $0x38] sm:$0xff]  ;;  %v58_v32 = vunpack.c.h.bf16 %v803_v16  ;;  %v93_v34 = vunpack.c.h.bf16 %v808_v17  ;;  %v95_v37 = vunpack.c.h.bf16 %v822_v22  ;;  %v55_v41 = vunpack.c.l.bf16 %v789_v12 }
   0x7   :  { %585 = vmatprep.subr.bf16.mxu0 %v716_v0  ;;  %v37_v27 = vrot.slane %v28_v14, %v779_v10  ;;  %v98_v28 = vunpack.c.l.bf16 %v813_v18  ;;  %v70_v33 = vrot.slane %v61_v21, %v779_v10  ;;  %v693_v35 = vld [vmem:[%s1129_s3 + $0x10] sm:$0xff]   ;;  %v135_v39 = vunpack.c.l.bf16 %v827_v23  ;;  %v864_v40 = vld [vmem:[%s1131_s1 + $0x8] sm:$0x3]  ;;  %v874_v45 = vld [vmem:[%s1130_s0 + $0x40] sm:$0xff] }
   0x8   :  { %v130_v43 = vunpack.c.h.bf16 %v839_v29  ;;  %v132_v44 = vunpack.c.h.bf16 %v844_v30  ;;  %v883_v50 = vld [vmem:[%s1130_s0 + $0x48] sm:$0xff]  ;;  %v57_v51 = vunpack.c.l.bf16 %v803_v16  ;;  %v172_v54 = vunpack.c.l.bf16 %v864_v40  ;;  %v699_v12 = vld [vmem:[%s1129_s3 + $0x40] sm:$0xff]  }
   0x9   :  { %v47_v36 = vrot.slane %v37_v27, %v798_v15  ;;  %v107_v38 = vrot.slane %v98_v28, %v779_v10  ;;  %v80_v42 = vrot.slane %v70_v33, %v798_v15  ;;  %v144_v49 = vrot.slane %v135_v39, %v779_v10  ;;  %v694_v55 = vld [vmem:[%s1129_s3 + $0x8] sm:$0xff]   ;;  %v908_v27 = vld [vmem:[%s1130_s0 + $0x50] sm:$0xff] }
   0xa   :  { %586 = vmatpush1.bf16.msra.mxu0 %v690_v4  ;;  %v167_v59 = vunpack.c.h.bf16 %v874_v45  ;;  %v895_v60 = vld [vmem:[%s1131_s1 + $0xa] sm:$0x3]  ;;  %v169_v63 = vunpack.c.h.bf16 %v883_v50  ;;  %v181_v1 = vrot.slane %v172_v54, %v779_v10  ;;  %v919_v33 = vld [vmem:[%s1131_s1 + $0xc] sm:$0x3]  ;;  %v66_v9 = vrot.slane %v61_v21, %v798_v15 }
   0xb   :  { %587 = vmatprep.subr.bf16.mxu0 %v716_v0  ;;  %v49_v46 = vmul.f32 %v47_v36, %v24_v20  ;;  %v51_v47 = vmul.f32 %v47_v36, %v26_v26  ;;  %v117_v48 = vrot.slane %v107_v38, %v798_v15  ;;  %v82_v52 = vmul.f32 %v80_v42, %v56_v31  ;;  %v913_v31 = vld [vmem:[%s1130_s0 + $0x58] sm:$0xff]  ;;  %v698_v13 = vld [vmem:[%s1129_s3 + $0x48] sm:$0xff]  }
   0xc   :  { %v84_v53 = vmul.f32 %v80_v42, %v58_v32  ;;  %v154_v58 = vrot.slane %v144_v49, %v798_v15  ;;  %v191_v26 = vrot.slane %v181_v1, %v798_v15  ;;  %v1136_v32 = vunpack.c.l.bf16 %v895_v60  ;;  %v931_v42 = vld [vmem:[%s1130_s0 + $0x60] sm:$0xff]  ;;  %v942_v49 = vld [vmem:[%s1130_s0 + $0x70] sm:$0xff] }
   0xd   :  { %v119_v56 = vmul.f32 %v117_v48, %v93_v34  ;;  %v121_v57 = vmul.f32 %v117_v48, %v95_v37  ;;  %v86_v61 = vadd.f32 %v82_v52, %v49_v46  ;;  %v695_v34 = vld [vmem:[%s1129_s3] sm:$0xff]   ;;  %v947_v52 = vld [vmem:[%s1131_s1 + $0xe] sm:$0x3]  ;;  %v241_v1 = vunpack.c.h.bf16 %v931_v42 }
   0xe   :  { %588 = vmatpush1.bf16.msra.mxu0 %v691_v6  ;;  %v88_v62 = vadd.f32 %v84_v53, %v51_v47  ;;  %v156_v4 = vmul.f32 %v154_v58, %v130_v43  ;;  %v158_v6 = vmul.f32 %v154_v58, %v132_v44  ;;  %v936_v43 = vld [vmem:[%s1130_s0 + $0x68] sm:$0xff]  ;;  %v193_v47 = vmul.f32 %v191_v26, %v167_v59  ;;  %v958_v58 = vld [vmem:[%s1130_s0 + $0x78] sm:$0xff]  ;;  %v963_v59 = vld [vmem:[%s1130_s0 + $0x80] sm:$0xff] }
   0xf   :  { %589 = vmatprep.subr.bf16.mxu0 %v716_v0  ;;  %v195_v48 = vmul.f32 %v191_v26, %v169_v63  ;;  %v204_v53 = vunpack.c.h.bf16 %v908_v27  ;;  %v1141_v40 = vunpack.c.l.bf16 %v844_v30 }
  0x10   :  { %v125_v20 = vadd.f32 %v121_v57, %v88_v62  ;;  %v1135_v57 = vunpack.c.l.bf16 %v919_v33 }
  0x12   :  { %590 = vmatpush1.bf16.msra.mxu0 %v692_v7  ;;  %v123_v7 = vadd.f32 %v119_v56, %v86_v61  ;;  %v162_v46 = vadd.f32 %v158_v6, %v125_v20  ;;  %v218_v56 = vrot.slane %v1136_v32, %v779_v10  ;;  %v968_v61 = vld [vmem:[%s1131_s1 + $0x10] sm:$0x3]  ;;  %v696_v6 = vld [vmem:[%s1129_s3 + $0x58] sm:$0xff]   ;;  %v255_v26 = vrot.slane %v1135_v57, %v779_v10 }
  0x13   :  { %591 = vmatprep.subr.bf16.mxu0 %v716_v0  ;;  %v320_v63 = vunpack.c.l.bf16 %v968_v61 }
  0x14   :  { %v160_v44 = vadd.f32 %v156_v4, %v123_v7  ;;  %v243_v4 = vunpack.c.h.bf16 %v936_v43  ;;  %v199_v7 = vadd.f32 %v195_v48, %v162_v46  ;;  %v228_v20 = vrot.slane %v218_v56, %v798_v15 }
  0x15   :  { %v278_v46 = vunpack.c.h.bf16 %v942_v49  ;;  %v280_v48 = vunpack.c.h.bf16 %v958_v58  ;;  %v315_v56 = vunpack.c.h.bf16 %v963_v59  ;;  %v265_v57 = vrot.slane %v255_v26, %v798_v15 }
  0x16   :  { %592 = vmatpush1.bf16.msra.mxu0 %v693_v35  ;;  %v197_v62 = vadd.f32 %v193_v47, %v160_v44  ;;  %v1137_v44 = vunpack.c.l.bf16 %v947_v52  ;;  %v984_v47 = vld [vmem:[%s1130_s0 + $0x88] sm:$0xff]  ;;  %v230_v38 = vmul.f32 %v228_v20, %v204_v53  ;;  %v329_v35 = vrot.slane %v320_v63, %v779_v10 }
  0x17   :  { %593 = vmatprep.subr.bf16.mxu0 %v716_v0  ;;  %v317_v36 = vunpack.c.h.bf16 %v984_v47  ;;  %v33_v53 = vrot.slane %v28_v14, %v798_v15  ;;  %v269_v2 = vmul.f32 %v265_v57, %v243_v4  ;;  %v1139_v4 = vunpack.c.l.bf16 %v822_v22 }
  0x18   :  { %v292_v32 = vrot.slane %v1137_v44, %v779_v10  ;;  %v267_v44 = vmul.f32 %v265_v57, %v241_v1  ;;  %v339_v5 = vrot.slane %v329_v35, %v798_v15  ;;  %v177_v1 = vrot.slane %v172_v54, %v798_v15 }
  0x19   :  { %v1142_v22 = vunpack.c.l.bf16 %v895_v60  ;;  %v1145_v60 = vunpack.c.l.bf16 %v883_v50 }
  0x1a   :  { %594 = vmatpush1.bf16.msra.mxu0 %v694_v55  ;;  %v206_v55 = vunpack.c.h.bf16 %v913_v31  ;;  %v302_v10 = vrot.slane %v292_v32, %v798_v15  ;;  %v343_v35 = vmul.f32 %v339_v5, %v317_v36 }
  0x1b   :  { %595 = vmatprep.subr.bf16.mxu0 %v716_v0 }
  0x1c   :  { %v232_v37 = vmul.f32 %v228_v20, %v206_v55  ;;  %v697_v55 = vld [vmem:[%s1129_s3 + $0x50] sm:$0xff]   ;;  %v234_v20 = vadd.f32 %v230_v38, %v197_v62  ;;  %v140_v38 = vrot.slane %v135_v39, %v798_v15  ;;  %v304_v57 = vmul.f32 %v302_v10, %v278_v46 }
  0x1d   :  { %v306_v32 = vmul.f32 %v302_v10, %v280_v48  ;;  %v341_v62 = vmul.f32 %v339_v5, %v315_v56  ;;  %v1140_v48 = vunpack.c.l.bf16 %v839_v29  ;;  %v205_v29 = vunpack.c.l.bf16 %v913_v31 }
  0x1e   :  { %596 = vmatpush1.bf16.msra.mxu0 %v695_v34  ;;  %v989_v34 = vld [vmem:[%s1132_s2] sm:$0x3]  ;;  %v236_v26 = vadd.f32 %v232_v37, %v199_v7  ;;  %v271_v14 = vadd.f32 %v267_v44, %v234_v20  ;;  %v103_v37 = vrot.slane %v98_v28, %v798_v15  ;;  %v76_v28 = vrot.slane %v66_v9, %v798_v15 }
  0x1f   :  { %605 = vmatprep.subr.bf16.mxu0 %v716_v0  ;;  %v357_v3 = vrot.slane %v989_v34, %v356_v24  ;;  %v43_v24 = vrot.slane %v33_v53, %v798_v15  ;;  %v150_v36 = vrot.slane %v140_v38, %v798_v15  ;;  %v1144_v5 = vunpack.c.l.bf16 %v874_v45 }
  0x20   :  { %v113_v23 = vrot.slane %v103_v37, %v798_v15  ;;  %v308_v39 = vadd.f32 %v304_v57, %v271_v14  ;;  %v81_v8 = vmul.f32 %v76_v28, %v55_v41  ;;  %v83_v11 = vmul.f32 %v76_v28, %v57_v51 }
  0x21   :  { %v48_v21 = vmul.f32 %v43_v24, %v23_v19  ;;  %v50_v18 = vmul.f32 %v43_v24, %v25_v25  ;;  %v1138_v19 = vunpack.c.l.bf16 %v808_v17  ;;  %v155_v56 = vmul.f32 %v150_v36, %v1140_v48 }
  0x22   :  { %606 = vmatpush2.bf16.msra.mxu0 %v696_v6  ;;  %v273_v6 = vadd.f32 %v269_v2, %v236_v26  ;;  %v120_v7 = vmul.f32 %v113_v23, %v1139_v4  ;;  %v345_v44 = vadd.f32 %v341_v62, %v308_v39  ;;  %v157_v54 = vmul.f32 %v150_v36, %v1141_v40 }
  0x23   :  { %607 = vmatprep.subr.bf16.mxu0 %v716_v0  ;;  %v118_v25 = vmul.f32 %v113_v23, %v1138_v19  ;;  %v85_v16 = vadd.f32 %v81_v8, %v48_v21  ;;  %v87_v41 = vadd.f32 %v83_v11, %v50_v18  ;;  %v187_v17 = vrot.slane %v177_v1, %v798_v15 }
  0x24   :  { %v310_v2 = vadd.f32 %v306_v32, %v273_v6  ;;  %v214_v51 = vrot.slane %v1142_v22, %v798_v15  ;;  %v1061_v53 = vadd.f32 %v357_v3, %v345_v44  ;;  %v242_v31 = vunpack.c.l.bf16 %v936_v43 }
  0x25   :  { %v122_v26 = vadd.f32 %v118_v25, %v85_v16  ;;  %v124_v10 = vadd.f32 %v120_v7, %v87_v41  ;;  %v192_v24 = vmul.f32 %v187_v17, %v1144_v5  ;;  %v194_v9 = vmul.f32 %v187_v17, %v1145_v60 }
  0x26   :  { %608 = vmatpush2.bf16.msra.mxu0 %v697_v55  ;;  %v347_v46 = vadd.f32 %v343_v35, %v310_v2  ;;  %v1143_v55 = vunpack.c.l.bf16 %v919_v33  ;;  %v1075_v14 = vmul.f32 0.70710677, %v1061_v53  ;;  %v224_v37 = vrot.slane %v214_v51, %v798_v15 }
  0x27   :  { %609 = vmatprep.subr.bf16.mxu0 %v716_v0  ;;  %v159_v33 = vadd.f32 %v155_v56, %v122_v26  ;;  %v161_v6 = vadd.f32 %v157_v54, %v124_v10  ;;  %v1147_v62 = vunpack.c.l.bf16 %v908_v27  ;;  %v277_v21 = vunpack.c.l.bf16 %v942_v49 }
  0x28   :  { %v1063_v30 = vadd.f32 %v357_v3, %v347_v46  ;;  %v251_v20 = vrot.slane %v1143_v55, %v798_v15  ;;  %v373_v50 = vand.u32 2147483647, %v1075_v14  ;;  %v279_v18 = vunpack.c.l.bf16 %v958_v58 }
  0x29   :  { %v196_v57 = vadd.f32 %v192_v24, %v159_v33  ;;  %v198_v32 = vadd.f32 %v194_v9, %v161_v6  ;;  %v229_v35 = vmul.f32 %v224_v37, %v1147_v62  ;;  %v314_v8 = vunpack.c.l.bf16 %v963_v59 }
  0x2a   :  { %610 = vmatpush2.bf16.msra.mxu0 %v698_v13  ;;  %v1078_v3 = vmul.f32 0.70710677, %v1063_v30  ;;  %v261_v45 = vrot.slane %v251_v20, %v798_v15  ;;  %v231_v13 = vmul.f32 %v224_v37, %v205_v29  ;;  %v377_v28 = vmul.f32 0.3275911, %v373_v50 }
  0x2b   :  { %611 = vmatprep.subr.bf16.mxu0 %v716_v0  ;;  %v240_v0 = vunpack.c.l.bf16 %v931_v42  ;;  %v1146_v42 = vunpack.c.l.bf16 %v947_v52  ;;  %v233_v39 = vadd.f32 %v229_v35, %v196_v57  ;;  %v325_v49 = vrot.slane %v320_v63, %v798_v15 }
  0x2c   :  { %v375_v38 = vand.u32 2147483647, %v1078_v3  ;;  %v235_v2 = vadd.f32 %v231_v13, %v198_v32  ;;  %v268_v1 = vmul.f32 %v261_v45, %v242_v31  ;;  %v381_v52 = vadd.f32 1.0, %v377_v28 }
  0x2d   :  { %v288_v43 = vrot.slane %v1146_v42, %v798_v15  ;;  %v266_v36 = vmul.f32 %v261_v45, %v240_v0  ;;  %v316_v58 = vunpack.c.l.bf16 %v984_v47  ;;  %v335_v44 = vrot.slane %v325_v49, %v798_v15 }
  0x2e   :  { %612 = vmatpush2.bf16.msra.mxu0 %v699_v12  ;;  %v379_v23 = vmul.f32 0.3275911, %v375_v38  ;;  %v272_v25 = vadd.f32 %v268_v1, %v235_v2  ;;  %700 = vrcp.f32 %v381_v52  ;;  %v353_v59 = vrot.slane %v989_v34, %v798_v15 }
  0x2f   :  { %v270_v19 = vadd.f32 %v266_v36, %v233_v39  ;;  %v298_v27 = vrot.slane %v288_v43, %v798_v15  ;;  %v429_v46 = vsub.f32 0.0, %v373_v50  ;;  %v340_v40 = vmul.f32 %v335_v44, %v314_v8 }
  0x30   :  { %v383_v11 = vadd.f32 1.0, %v379_v23  ;;  %v431_v54 = vsub.f32 0.0, %v375_v38  ;;  %v342_v12 = vmul.f32 %v335_v44, %v316_v58  ;;  %vm453_vm0 = vcmp.lt.f32.partialorder %v1075_v14, 0.0 }
  0x31   :  { %v303_v4 = vmul.f32 %v298_v27, %v277_v21  ;;  %v305_v7 = vmul.f32 %v298_v27, %v279_v18  ;;  %v433_v63 = vmul.f32 %v429_v46, %v373_v50  ;;  %vm455_vm1 = vcmp.lt.f32.partialorder %v1078_v3, 0.0 }
  0x32   :  { %702 = vrcp.f32 %v383_v11  ;;  %v435_v47 = vmul.f32 %v431_v54, %v375_v38 }
  0x33   :  { %v307_v48 = vadd.f32 %v303_v4, %v270_v19  ;;  %v309_v56 = vadd.f32 %v305_v7, %v272_v25  ;;  %v438_v15 = vmul.f32 1.442695, %v433_v63 }
  0x34   :  { %v442_v29 = vmul.f32 1.442695, %v435_v47 }
  0x35   :  { %v344_v16 = vadd.f32 %v340_v40, %v307_v48  ;;  %v346_v61 = vadd.f32 %v342_v12, %v309_v56  ;;  %704 = vpow2.f32 %v438_v15  ;;  %v365_v40 = vmul.f32 0.5, %v1061_v53 }
  0x36   :  { %706 = vpow2.f32 %v442_v29 }
  0x37   :  { %v1100_v41 = vadd.f32 %v353_v59, %v344_v16  ;;  %v1102_v17 = vadd.f32 %v353_v59, %v346_v61  ;;  %v367_v16 = vmul.f32 0.5, %v1063_v30 }
  0x39   :  { %v1105_v22 = vmul.f32 0.70710677, %v1100_v41  ;;  %v1108_v51 = vmul.f32 0.70710677, %v1102_v17 }
  0x3b   :  { %v372_v34 = vand.u32 2147483647, %v1105_v22  ;;  %v374_v55 = vand.u32 2147483647, %v1108_v51  ;;  %v701_v20 = vpop.eup %700  ;;  %vm452_vm3 = vcmp.lt.f32.partialorder %v1105_v22, 0.0  ;;  %vm454_vm4 = vcmp.lt.f32.partialorder %v1108_v51, 0.0 }
  0x3c   :  { %v393_v5 = vmul.f32 1.0614054, %v701_v20  ;;  %v669_v22 = vld [vmem:[%s1133_s4] ss:$0 sm:$0xff] }
  0x3d   :  { %v376_v26 = vmul.f32 0.3275911, %v372_v34  ;;  %v378_v24 = vmul.f32 0.3275911, %v374_v55  ;;  %v428_v38 = vsub.f32 0.0, %v372_v34  ;;  %v430_v43 = vsub.f32 0.0, %v374_v55 }
  0x3e   :  { %v662_v0 = vadd.f32 -1.4531521, %v393_v5 }
  0x3f   :  { %v703_v10 = vpop.eup %702  ;;  %v380_v9 = vadd.f32 1.0, %v376_v26  ;;  %v382_v31 = vadd.f32 1.0, %v378_v24  ;;  %v432_v35 = vmul.f32 %v428_v38, %v372_v34  ;;  %v434_v21 = vmul.f32 %v430_v43, %v374_v55 }
  0x40   :  { %v395_v60 = vmul.f32 1.0614054, %v703_v10  ;;  %v401_v6 = vmul.f32 %v701_v20, %v662_v0  ;;  %v364_v38 = vmul.f32 0.5, %v1100_v41  ;;  %v366_v43 = vmul.f32 0.5, %v1102_v17 }
  0x41   :  { %708 = vrcp.f32 %v380_v9  ;;  %v436_v36 = vmul.f32 1.442695, %v432_v35  ;;  %v440_v52 = vmul.f32 1.442695, %v434_v21 }
  0x42   :  { %v664_v33 = vadd.f32 -1.4531521, %v395_v60  ;;  %710 = vrcp.f32 %v382_v31  ;;  %v405_v45 = vadd.f32 1.4214138, %v401_v6  ;;  %v705_v28 = vpop.eup %704 }
  0x43   :  { %v707_v39 = vpop.eup %706  ;;  %712 = vpow2.f32 %v436_v36 }
  0x44   :  { %v403_v37 = vmul.f32 %v703_v10, %v664_v33  ;;  %v409_v42 = vmul.f32 %v701_v20, %v405_v45  ;;  %714 = vpow2.f32 %v440_v52 }
  0x46   :  { %v407_v50 = vadd.f32 1.4214138, %v403_v37  ;;  %v666_v32 = vadd.f32 -0.28449672, %v409_v42 }
  0x48   :  { %v411_v57 = vmul.f32 %v703_v10, %v407_v50  ;;  %v417_v13 = vmul.f32 %v701_v20, %v666_v32 }
  0x4a   :  { %v668_v62 = vadd.f32 -0.28449672, %v411_v57  ;;  %v421_v23 = vadd.f32 0.2548296, %v417_v13 }
  0x4c   :  { %v419_v18 = vmul.f32 %v703_v10, %v668_v62  ;;  %v425_v8 = vmul.f32 %v701_v20, %v421_v23 }
  0x4e   :  { %v423_v2 = vadd.f32 0.2548296, %v419_v18  ;;  %v709_v1 = vpop.eup %708  ;;  %v445_v27 = vmul.f32 %v705_v28, %v425_v8 }
  0x4f   :  { %v711_v11 = vpop.eup %710  ;;  %v392_v25 = vmul.f32 1.0614054, %v709_v1 }
  0x50   :  { %v427_v19 = vmul.f32 %v703_v10, %v423_v2  ;;  %v394_v49 = vmul.f32 1.0614054, %v711_v11  ;;  %v449_v7 = vsub.f32 1.0, %v445_v27  ;;  %v713_v60 = vpop.eup %712 }
  0x51   :  { %v661_v4 = vadd.f32 -1.4531521, %v392_v25  ;;  %v715_v30 = vpop.eup %714 }
  0x52   :  { %v447_v58 = vmul.f32 %v707_v39, %v427_v19  ;;  %v663_v44 = vadd.f32 -1.4531521, %v394_v49  ;;  %v457_v48 = vsub.f32 0.0, %v449_v7 }
  0x53   :  { %v400_v46 = vmul.f32 %v709_v1, %v661_v4 }
  0x54   :  { %v451_v59 = vsub.f32 1.0, %v447_v58  ;;  %v402_v56 = vmul.f32 %v711_v11, %v663_v44  ;;  %v461_v61 = vsel %vm453_vm0, %v457_v48, %v449_v7 }
  0x55   :  { %v404_v12 = vadd.f32 1.4214138, %v400_v46  ;;  %v465_v15 = vadd.f32 1.0, %v461_v61 }
  0x56   :  { %v459_v54 = vsub.f32 0.0, %v451_v59  ;;  %v406_v63 = vadd.f32 1.4214138, %v402_v56 }
  0x57   :  { %v408_v34 = vmul.f32 %v709_v1, %v404_v12  ;;  %v469_v20 = vmul.f32 %v465_v15, %v365_v40 }
  0x58   :  { %v463_v47 = vsel %vm455_vm1, %v459_v54, %v451_v59  ;;  %v410_v55 = vmul.f32 %v711_v11, %v406_v63 }
  0x59   :  { %v467_v29 = vadd.f32 1.0, %v463_v47  ;;  %v665_v14 = vadd.f32 -0.28449672, %v408_v34 }
  0x5a   :  { %v667_v10 = vadd.f32 -0.28449672, %v410_v55 }
  0x5b   :  { %v471_v26 = vmul.f32 %v467_v29, %v367_v16  ;;  %v416_v3 = vmul.f32 %v709_v1, %v665_v14 }
  0x5c   :  { %v418_v24 = vmul.f32 %v711_v11, %v667_v10 }
  0x5d   :  { %v473_v5 = vpack.c.bf16 %v471_v26, %v469_v20  ;;  %v420_v53 = vadd.f32 0.2548296, %v416_v3 }
  0x5e   :  { %v422_v9 = vadd.f32 0.2548296, %v418_v24 }
  0x5f   :  { %682 = vmatprep.mubr.msk.bf16.mxu0 %vm577_vm2, %v473_v5  ;;  %v424_v0 = vmul.f32 %v709_v1, %v420_v53 }
  0x60   :  { %v426_v31 = vmul.f32 %v711_v11, %v422_v9 }
  0x61   :  { %v444_v33 = vmul.f32 %v713_v60, %v424_v0 }
  0x62   :  { %v446_v6 = vmul.f32 %v715_v30, %v426_v31 }
  0x63   :  { %v448_v37 = vsub.f32 1.0, %v444_v33 }
  0x64   :  { %v450_v45 = vsub.f32 1.0, %v446_v6 }
  0x65   :  { %v456_v50 = vsub.f32 0.0, %v448_v37 }
  0x66   :  { %v458_v42 = vsub.f32 0.0, %v450_v45 }
  0x67   :  { %v460_v57 = vsel %vm452_vm3, %v456_v50, %v448_v37 }
  0x68   :  { %v462_v32 = vsel %vm454_vm4, %v458_v42, %v450_v45  ;;  %v464_v62 = vadd.f32 1.0, %v460_v57 }
  0x69   :  { %v466_v35 = vadd.f32 1.0, %v462_v32 }
  0x6a   :  { %v468_v13 = vmul.f32 %v464_v62, %v364_v38 }
  0x6b   :  { %v470_v21 = vmul.f32 %v466_v35, %v366_v43 }
  0x6d   :  { %v472_v18 = vpack.c.bf16 %v470_v21, %v468_v13 }
  0x6f   :  { %614 = vmatmul.mubr.bf16.vlgmr.msra.gmra.mxu0 %v472_v18 }
 0x12f   :  { %v615_v28 = vpop.f32.mrf.mxu0 }
 0x130   :  { %v616_v51 = vadd.f32 %v669_v22, %v615_v28 }
 0x131   :  { %v617_v23 = vpop.f32.mrf.mxu0 }
 0x132   :  { %v685_v41 = vpack.c.bf16 %v616_v51, %v616_v51 }
 0x133   :  { %v618_v39 = vpop.f32.mrf.mxu0 }
 0x134   :  { %631 = vst.msk [vmem:[%s1134_s5] sm:$0xf] %vm630_vm5, %v685_v41  ;;  %v619_v17 = vadd.f32 %v669_v22, %v618_v39 }
 0x135   :  { %v620_v2 = vpop.f32.mrf.mxu0 }
 0x136   :  { %v686_v36 = vpack.c.bf16 %v619_v17, %v619_v17 }
 0x138   :  { %632 = vst.msk [vmem:[%s1134_s5 + $0x4] sm:$0xf] %vm630_vm5, %v686_v36 }

// kernel: backbone_forward.21
= control target key start
LH: loop header
LB: loop body
LE: loop exit
PB: predicated region body
PF: predicated region fallthrough
CT: control target
= control target key end

     0   :  { %v30_v0 = vlaneseq  ;;  %v498_v1 = vmov 0.0   ;;  %vm499_vm0 = vmmov 0   ;;  %vm354_vm3 = vcmask 257024   ;;  %s648_s3 = inlined_call_operand.vmem [shape: bf16[128,32], index: 3, kind: input, shape index: {}]   ;;  %s649_s0 = inlined_call_operand.vmem [shape: bf16[9,16,128], index: 0, kind: input, shape index: {}]   ;;  %s650_s1 = inlined_call_operand.vmem [shape: bf16[9,1,128], index: 1, kind: input, shape index: {}]   ;;  %s651_s2 = inlined_call_operand.vmem [shape: f32[1,128], index: 2, kind: input, shape index: {}]   ;;  %s652_s5 = inlined_call_operand.vmem [shape: bf16[16,32], index: 5, kind: input, shape index: {}]   ;;  %s653_s4 = inlined_call_operand.vmem [shape: f32[1,32], index: 4, kind: input, shape index: {}]   ;;  %s654_s6 = inlined_call_operand.vmem [shape: bf16[16,32], index: 6, kind: output, shape index: {}]  }
   0x1   :  { %460 = vmatprep.subr.bf16.mxu0 %v498_v1  ;;  %v482_v2 = vld [vmem:[%s648_s3 + $0x38] sm:$0xff]   ;;  %476 = vmatprep.mubr.msk.bf16.mxu0 %vm499_vm0, %v498_v1  ;;  %v483_v3 = vld [vmem:[%s648_s3 + $0x30] sm:$0xff]   ;;  %v484_v5 = vld [vmem:[%s648_s3 + $0x28] sm:$0xff]  }
   0x2   :  { %461 = vmatpush3.bf16.msra.mxu0 %v482_v2  ;;  %v31_v4 = vshrl.u32 %v30_v0, 7  ;;  %v485_v7 = vld [vmem:[%s648_s3 + $0x20] sm:$0xff]   ;;  %v443_v10 = vld [vmem:[%s649_s0 + $0x8] sm:$0xff]   ;;  %v444_v16 = vld [vmem:[%s649_s0 + $0x10] sm:$0xff]  }
   0x3   :  { %462 = vmatprep.subr.bf16.mxu0 %v498_v1  ;;  %v404_v8 = vld [vmem:[%s649_s0] sm:$0xff]   ;;  %v409_v14 = vunpack.c.l.bf16 %v443_v10  ;;  %v410_v18 = vunpack.c.h.bf16 %v443_v10  ;;  %v413_v20 = vunpack.c.l.bf16 %v444_v16  ;;  %v414_v21 = vunpack.c.h.bf16 %v444_v16  ;;  %v445_v22 = vld [vmem:[%s649_s0 + $0x18] sm:$0xff]   ;;  %v447_v30 = vld [vmem:[%s649_s0 + $0x28] sm:$0xff]  }
   0x4   :  { %v548_v6 = vsub.s32 0, %v31_v4  ;;  %v28_v9 = vld [vmem:[%s650_s1] sm:$0x1]  ;;  %v405_v11 = vunpack.c.l.bf16 %v404_v8  ;;  %v406_v12 = vunpack.c.h.bf16 %v404_v8  ;;  %v363_v15 = vld [vmem:[%s650_s1 + $0x1] sm:$0x1]  ;;  %v417_v27 = vunpack.c.l.bf16 %v445_v22  ;;  %v486_v39 = vld [vmem:[%s648_s3 + $0x18] sm:$0xff]  }
   0x5   :  { %v29_v13 = vunpack.c.l.bf16 %v28_v9  ;;  %v366_v17 = vld [vmem:[%s650_s1 + $0x2] sm:$0x1]  ;;  %v43_v19 = vunpack.c.l.bf16 %v363_v15  ;;  %v369_v23 = vld [vmem:[%s650_s1 + $0x3] sm:$0x1]  ;;  %v418_v28 = vunpack.c.h.bf16 %v445_v22  ;;  %v372_v29 = vld [vmem:[%s650_s1 + $0x4] sm:$0x1]  ;;  %v425_v43 = vunpack.c.l.bf16 %v447_v30 }
   0x6   :  { %463 = vmatpush3.bf16.msra.mxu0 %v483_v3  ;;  %v446_v24 = vld [vmem:[%s649_s0 + $0x20] sm:$0xff]   ;;  %v59_v26 = vunpack.c.l.bf16 %v366_v17  ;;  %v75_v32 = vunpack.c.l.bf16 %v369_v23  ;;  %v91_v38 = vunpack.c.l.bf16 %v372_v29  ;;  %v448_v45 = vld [vmem:[%s649_s0 + $0x30] sm:$0xff]   ;;  %v426_v49 = vunpack.c.h.bf16 %v447_v30  ;;  %v449_v55 = vld [vmem:[%s649_s0 + $0x38] sm:$0xff]  }
   0x7   :  { %464 = vmatprep.subr.bf16.mxu0 %v498_v1  ;;  %v33_v25 = vrot.slane %v29_v13, %v548_v6  ;;  %v47_v31 = vrot.slane %v43_v19, %v548_v6  ;;  %v421_v33 = vunpack.c.l.bf16 %v446_v24  ;;  %v422_v34 = vunpack.c.h.bf16 %v446_v24  ;;  %v375_v44 = vld [vmem:[%s650_s1 + $0x5] sm:$0x1]  ;;  %v378_v50 = vld [vmem:[%s650_s1 + $0x6] sm:$0x1]  ;;  %v381_v56 = vld [vmem:[%s650_s1 + $0x7] sm:$0x1] }
   0x8   :  { %v63_v37 = vrot.slane %v59_v26, %v548_v6  ;;  %v79_v42 = vrot.slane %v75_v32, %v548_v6  ;;  %v95_v48 = vrot.slane %v91_v38, %v548_v6  ;;  %v107_v59 = vunpack.c.l.bf16 %v375_v44  ;;  %v487_v61 = vld [vmem:[%s648_s3 + $0x10] sm:$0xff]   ;;  %v488_v16 = vld [vmem:[%s648_s3 + $0x8] sm:$0xff]   ;;  %v489_v29 = vld [vmem:[%s648_s3] sm:$0xff]  }
   0x9   :  { %v34_v35 = vmul.f32 %v405_v11, %v33_v25  ;;  %v35_v36 = vmul.f32 %v406_v12, %v33_v25  ;;  %v48_v40 = vmul.f32 %v409_v14, %v47_v31  ;;  %v49_v41 = vmul.f32 %v410_v18, %v47_v31  ;;  %v450_v11 = vld [vmem:[%s649_s0 + $0x40] sm:$0xff]   ;;  %v384_v12 = vld [vmem:[%s650_s1 + $0x8] sm:$0x1] }
   0xa   :  { %465 = vmatpush3.bf16.msra.mxu0 %v484_v5  ;;  %v64_v46 = vmul.f32 %v413_v20, %v63_v37  ;;  %v65_v47 = vmul.f32 %v414_v21, %v63_v37  ;;  %v80_v53 = vmul.f32 %v417_v27, %v79_v42  ;;  %v81_v54 = vmul.f32 %v418_v28, %v79_v42 }
   0xb   :  { %466 = vmatprep.subr.bf16.mxu0 %v498_v1  ;;  %v50_v51 = vadd.f32 %v48_v40, %v34_v35  ;;  %v51_v52 = vadd.f32 %v49_v41, %v35_v36  ;;  %v96_v57 = vmul.f32 %v421_v33, %v95_v48  ;;  %v97_v58 = vmul.f32 %v422_v34, %v95_v48  ;;  %v385_v36 = vld [vmem:[%s651_s2] ss:$0 sm:$0xff] }
   0xc   :  { %v429_v60 = vunpack.c.l.bf16 %v448_v45  ;;  %v430_v0 = vunpack.c.h.bf16 %v448_v45  ;;  %v123_v2 = vunpack.c.l.bf16 %v378_v50  ;;  %v111_v3 = vrot.slane %v107_v59, %v548_v6 }
   0xd   :  { %v66_v62 = vadd.f32 %v64_v46, %v50_v51  ;;  %v67_v63 = vadd.f32 %v65_v47, %v51_v52  ;;  %v433_v4 = vunpack.c.l.bf16 %v449_v55  ;;  %v139_v5 = vunpack.c.l.bf16 %v381_v56 }
   0xe   :  { %467 = vmatpush3.bf16.msra.mxu0 %v485_v7  ;;  %v127_v9 = vrot.slane %v123_v2, %v548_v6  ;;  %v434_v10 = vunpack.c.h.bf16 %v449_v55  ;;  %v112_v13 = vmul.f32 %v425_v43, %v111_v3  ;;  %v113_v14 = vmul.f32 %v426_v49, %v111_v3 }
   0xf   :  { %468 = vmatprep.subr.bf16.mxu0 %v498_v1  ;;  %v82_v7 = vadd.f32 %v80_v53, %v66_v62  ;;  %v83_v8 = vadd.f32 %v81_v54, %v67_v63  ;;  %v143_v15 = vrot.slane %v139_v5, %v548_v6  ;;  %v437_v21 = vunpack.c.l.bf16 %v450_v11 }
  0x10   :  { %v128_v19 = vmul.f32 %v429_v60, %v127_v9  ;;  %v129_v20 = vmul.f32 %v430_v0, %v127_v9  ;;  %v438_v22 = vunpack.c.h.bf16 %v450_v11  ;;  %v155_v23 = vunpack.c.l.bf16 %v384_v12 }
  0x11   :  { %v98_v17 = vadd.f32 %v96_v57, %v82_v7  ;;  %v99_v18 = vadd.f32 %v97_v58, %v83_v8  ;;  %v144_v26 = vmul.f32 %v433_v4, %v143_v15  ;;  %v145_v27 = vmul.f32 %v434_v10, %v143_v15 }
  0x12   :  { %469 = vmatpush3.bf16.msra.mxu0 %v486_v39  ;;  %v159_v28 = vrot.slane %v155_v23, %v548_v6 }
  0x13   :  { %470 = vmatprep.subr.bf16.mxu0 %v498_v1  ;;  %v114_v24 = vadd.f32 %v112_v13, %v98_v17  ;;  %v115_v25 = vadd.f32 %v113_v14, %v99_v18 }
  0x14   :  { %v160_v32 = vmul.f32 %v437_v21, %v159_v28  ;;  %v161_v33 = vmul.f32 %v438_v22, %v159_v28  ;;  %v440_v28 = vld [vmem:[%s652_s5] sm:$0xff]  }
  0x15   :  { %v130_v30 = vadd.f32 %v128_v19, %v114_v24  ;;  %v131_v31 = vadd.f32 %v129_v20, %v115_v25 }
  0x16   :  { %471 = vmatpush3.bf16.msra.mxu0 %v487_v61 }
  0x17   :  { %472 = vmatprep.subr.bf16.mxu0 %v498_v1  ;;  %v146_v34 = vadd.f32 %v144_v26, %v130_v30  ;;  %v147_v35 = vadd.f32 %v145_v27, %v131_v31  ;;  %v441_v30 = vunpack.c.l.bf16 %v440_v28 }
  0x19   :  { %v162_v37 = vadd.f32 %v160_v32, %v146_v34  ;;  %v163_v6 = vadd.f32 %v161_v33, %v147_v35  ;;  %v442_v35 = vunpack.c.h.bf16 %v440_v28 }
  0x1a   :  { %473 = vmatpush3.bf16.msra.mxu0 %v488_v16 }
  0x1b   :  { %474 = vmatprep.subr.bf16.mxu0 %v498_v1  ;;  %v171_v38 = vadd.f32 %v385_v36, %v162_v37  ;;  %v172_v39 = vadd.f32 %v385_v36, %v163_v6 }
  0x1d   :  { %v175_v40 = vmul.f32 0.70710677, %v171_v38  ;;  %v176_v41 = vmul.f32 0.70710677, %v172_v39  ;;  %v173_v18 = vmul.f32 0.5, %v171_v38  ;;  %v174_v20 = vmul.f32 0.5, %v172_v39 }
  0x1e   :  { %475 = vmatpush3.bf16.msra.mxu0 %v489_v29  ;;  %v390_v29 = vld [vmem:[%s653_s4] ss:$0 sm:$0xff] }
  0x1f   :  { %v177_v42 = vand.u32 2147483647, %v175_v40  ;;  %v178_v43 = vand.u32 2147483647, %v176_v41  ;;  %vm217_vm1 = vcmp.lt.f32.partialorder %v175_v40, 0.0  ;;  %vm218_vm2 = vcmp.lt.f32.partialorder %v176_v41, 0.0 }
  0x21   :  { %v179_v44 = vmul.f32 0.3275911, %v177_v42  ;;  %v180_v45 = vmul.f32 0.3275911, %v178_v43  ;;  %v205_v47 = vsub.f32 0.0, %v177_v42  ;;  %v206_v48 = vsub.f32 0.0, %v178_v43 }
  0x23   :  { %v181_v1 = vadd.f32 1.0, %v179_v44  ;;  %v182_v46 = vadd.f32 1.0, %v180_v45  ;;  %v207_v49 = vmul.f32 %v205_v47, %v177_v42  ;;  %v208_v50 = vmul.f32 %v206_v48, %v178_v43 }
  0x25   :  { %490 = vrcp.f32 %v181_v1  ;;  %v209_v51 = vmul.f32 1.442695, %v207_v49  ;;  %v211_v53 = vmul.f32 1.442695, %v208_v50 }
  0x26   :  { %492 = vrcp.f32 %v182_v46 }
  0x27   :  { %494 = vpow2.f32 %v209_v51 }
  0x28   :  { %496 = vpow2.f32 %v211_v53 }
  0x32   :  { %v491_v52 = vpop.eup %490 }
  0x33   :  { %v493_v54 = vpop.eup %492  ;;  %v187_v55 = vmul.f32 1.0614054, %v491_v52 }
  0x34   :  { %v188_v56 = vmul.f32 1.0614054, %v493_v54  ;;  %v495_v8 = vpop.eup %494 }
  0x35   :  { %v386_v57 = vadd.f32 -1.4531521, %v187_v55  ;;  %v497_v10 = vpop.eup %496 }
  0x36   :  { %v387_v58 = vadd.f32 -1.4531521, %v188_v56 }
  0x37   :  { %v191_v59 = vmul.f32 %v491_v52, %v386_v57 }
  0x38   :  { %v192_v60 = vmul.f32 %v493_v54, %v387_v58 }
  0x39   :  { %v193_v61 = vadd.f32 1.4214138, %v191_v59 }
  0x3a   :  { %v194_v62 = vadd.f32 1.4214138, %v192_v60 }
  0x3b   :  { %v195_v63 = vmul.f32 %v491_v52, %v193_v61 }
  0x3c   :  { %v196_v0 = vmul.f32 %v493_v54, %v194_v62 }
  0x3d   :  { %v388_v2 = vadd.f32 -0.28449672, %v195_v63 }
  0x3e   :  { %v389_v3 = vadd.f32 -0.28449672, %v196_v0 }
  0x3f   :  { %v199_v4 = vmul.f32 %v491_v52, %v388_v2 }
  0x40   :  { %v200_v5 = vmul.f32 %v493_v54, %v389_v3 }
  0x41   :  { %v201_v7 = vadd.f32 0.2548296, %v199_v4 }
  0x42   :  { %v202_v9 = vadd.f32 0.2548296, %v200_v5 }
  0x43   :  { %v203_v11 = vmul.f32 %v491_v52, %v201_v7 }
  0x44   :  { %v204_v12 = vmul.f32 %v493_v54, %v202_v9 }
  0x45   :  { %v213_v13 = vmul.f32 %v495_v8, %v203_v11 }
  0x46   :  { %v214_v14 = vmul.f32 %v497_v10, %v204_v12 }
  0x47   :  { %v215_v15 = vsub.f32 1.0, %v213_v13 }
  0x48   :  { %v216_v16 = vsub.f32 1.0, %v214_v14 }
  0x49   :  { %v219_v17 = vsub.f32 0.0, %v215_v15 }
  0x4a   :  { %v220_v19 = vsub.f32 0.0, %v216_v16 }
  0x4b   :  { %v221_v21 = vsel %vm217_vm1, %v219_v17, %v215_v15 }
  0x4c   :  { %v222_v22 = vsel %vm218_vm2, %v220_v19, %v216_v16  ;;  %v223_v23 = vadd.f32 1.0, %v221_v21 }
  0x4d   :  { %v224_v24 = vadd.f32 1.0, %v222_v22 }
  0x4e   :  { %v225_v25 = vmul.f32 %v223_v23, %v173_v18 }
  0x4f   :  { %v226_v26 = vmul.f32 %v224_v24, %v174_v20 }
  0x51   :  { %v227_v27 = vpack.c.bf16 %v226_v26, %v225_v25 }
  0x53   :  { %477 = vmatmul.mubr.bf16.vlgmr.msra.gmra.mxu0 %v227_v27 }
 0x113   :  { %v333_v31 = vpop.f32.mrf.mxu0 }
 0x114   :  { %v334_v32 = vadd.f32 %v390_v29, %v333_v31 }
 0x115   :  { %v478_v33 = vpop.f32.mrf.mxu0 }
 0x116   :  { %v344_v34 = vadd.f32 %v441_v30, %v334_v32 }
 0x117   :  { %v336_v36 = vpop.f32.mrf.mxu0 }
 0x118   :  { %v401_v37 = vpack.c.bf16 %v344_v34, %v344_v34  ;;  %v337_v6 = vadd.f32 %v390_v29, %v336_v36 }
 0x119   :  { %v479_v38 = vpop.f32.mrf.mxu0 }
 0x11a   :  { %355 = vst.msk [vmem:[%s654_s6] sm:$0xf] %vm354_vm3, %v401_v37  ;;  %v345_v39 = vadd.f32 %v442_v35, %v337_v6 }
 0x11c   :  { %v402_v40 = vpack.c.bf16 %v345_v39, %v345_v39 }
 0x11e   :  { %356 = vst.msk [vmem:[%s654_s6 + $0x4] sm:$0xf] %vm354_vm3, %v402_v40 }

</bundles_post_ra>
